<compile_context>
chip_gen: v5e
topology: v5e:2x2
jax: 0.10.0
libtpu: 0.0.40
codegen_flags: <defaults>
</compile_context>

<pallas_src>
import numpy as np

import jax
import jax.numpy as jnp
from jax.experimental import pallas as pl
from jax.experimental.pallas import tpu as pltpu

# LeNet geometry for a 32x32x3 input (implied by the 16*5*5 flatten).
KSZ = 5                 # conv kernel size
C1_HW = 28 * 28         # conv1 output spatial (784)
P1_W = 14               # pooled1 width
P1_HW = 14 * 14         # pooled1 spatial (196) == conv2 embedded frame
P2_HW = 5 * 5           # pooled2 spatial (25)
OC_PAD = 128            # padded channel width (lane dim)
FC_PAD = 128            # padded FC feature width (lane dim)
PBUF_ROWS = 256         # 196 + max shift (4*14+4 = 60)
K1_PAD = 128            # conv1 im2col K (3*5*5 = 75 -> 128)


# ----------------------------------------------------------------------------
# The fused kernel: one batch element per grid step.
# ----------------------------------------------------------------------------
def _lenet_kernel(cols1_ref, w1_ref, b1_ref, p1_ref,
                  w2_ref, b2_ref, p2_ref,
                  f1_ref, fb1_ref, f2_ref, fb2_ref, f3_ref, fb3_ref,
                  o_ref, pbuf):
    # ---- conv1 (im2col matmul) + bias + ReLU (f32 epilogue on the VPU) ----
    a1 = jnp.dot(cols1_ref[0], w1_ref[...], preferred_element_type=jnp.float32)
    a1 = jnp.maximum(a1 + b1_ref[...], 0.0)                      # (784, 128)

    # ---- AvgPool2d(2,2) as a bf16 matmul (0.25 folded into p1) ----
    pooled1 = jnp.dot(p1_ref[...], a1.astype(jnp.bfloat16),
                      preferred_element_type=jnp.float32)        # (196, 128)

    # Stage pooled1 (bf16) in a zero-tailed VMEM buffer so conv2 can be done
    # as 25 statically shifted matmuls (rows past 196 read zeros; the only
    # rows they pollute are invalid border rows the pool matrix never reads).
    pbuf[0:P1_HW, :] = pooled1.astype(jnp.bfloat16)
    pbuf[P1_HW:PBUF_ROWS, :] = jnp.zeros((PBUF_ROWS - P1_HW, OC_PAD),
                                         jnp.bfloat16)

    # ---- conv2 as a sum of 25 shifted matmuls (no im2col, stays in VMEM) ---
    a2 = jnp.zeros((P1_HW, OC_PAD), jnp.float32)
    for dh in range(KSZ):
        for dw in range(KSZ):
            k = dh * KSZ + dw
            s = dh * P1_W + dw
            a2 = a2 + jnp.dot(pbuf[s:s + P1_HW, :],
                              w2_ref[k * OC_PAD:(k + 1) * OC_PAD, :],
                              preferred_element_type=jnp.float32)
    a2 = jnp.maximum(a2 + b2_ref[...], 0.0)                      # (196, 128)

    # ---- AvgPool2d(2,2) (bf16 matmul); selects only valid 10x10 rows -------
    pooled2 = jnp.dot(p2_ref[...], a2.astype(jnp.bfloat16),
                      preferred_element_type=jnp.float32)        # (25, 128)
    p2b = pooled2.astype(jnp.bfloat16)

    # ---- fc1: contract (spatial, channel) without any in-kernel flatten ----
    h = jnp.zeros((1, FC_PAD), jnp.float32)
    for q in range(P2_HW):
        h = h + jnp.dot(p2b[q:q + 1, :],
                        f1_ref[q * OC_PAD:(q + 1) * OC_PAD, :],
                        preferred_element_type=jnp.float32)
    h = jnp.maximum(h + fb1_ref[...], 0.0)

    # ---- fc2 + ReLU, fc3 ----------------------------------------------------
    h = jnp.dot(h.astype(jnp.bfloat16), f2_ref[...],
                preferred_element_type=jnp.float32)
    h = jnp.maximum(h + fb2_ref[...], 0.0)
    h = jnp.dot(h.astype(jnp.bfloat16), f3_ref[...],
                preferred_element_type=jnp.float32)
    o_ref[0] = h + fb3_ref[...]


# ----------------------------------------------------------------------------
# One-time (host side, outside jit) parameter preparation.
# ----------------------------------------------------------------------------
def _pool_matrix_np(oh, ow):
    """(PH*PW, OH*OW) avg-pool-as-matmul matrix with the 0.25 folded in."""
    ph, pw = oh // 2, ow // 2
    p = np.zeros((ph * pw, oh * ow), np.float32)
    for i in range(ph):
        for j in range(pw):
            for di in range(2):
                for dj in range(2):
                    p[i * pw + j, (2 * i + di) * ow + (2 * j + dj)] = 0.25
    return p


def _pool2_matrix_np():
    """(25, 196) pool matrix reading the valid 10x10 conv2 rows embedded in
    the 14x14 frame (row index h*14 + w), with 0.25 folded in."""
    p = np.zeros((P2_HW, P1_HW), np.float32)
    for i in range(5):
        for j in range(5):
            for di in range(2):
                for dj in range(2):
                    p[i * 5 + j, (2 * i + di) * P1_W + (2 * j + dj)] = 0.25
    return p


def prepare_params(params):
    """torch-layout params -> padded bf16/f32 tensors consumed by the kernel."""
    f32 = np.float32

    # conv1: (6, 3, 5, 5) -> (128, 128); K order = (kh, kw, c).
    w = np.asarray(params["conv1_w"], f32)
    wm = w.transpose(2, 3, 1, 0).reshape(KSZ * KSZ * 3, 6)
    w1c = np.zeros((K1_PAD, OC_PAD), f32)
    w1c[:KSZ * KSZ * 3, :6] = wm
    b1c = np.zeros((1, OC_PAD), f32)
    b1c[0, :6] = np.asarray(params["conv1_b"], f32)

    # conv2: (16, 6, 5, 5) -> (25*128, 128); row = tap*128 + in_channel.
    w = np.asarray(params["conv2_w"], f32)
    w2c = np.zeros((KSZ * KSZ * OC_PAD, OC_PAD), f32)
    for dh in range(KSZ):
        for dw in range(KSZ):
            k = dh * KSZ + dw
            w2c[k * OC_PAD:k * OC_PAD + 6, :16] = w[:, :, dh, dw].T
    b2c = np.zeros((1, OC_PAD), f32)
    b2c[0, :16] = np.asarray(params["conv2_b"], f32)

    # fc1: (120, 400) with torch flatten index c*25 + p  ->  (25*128, 128)
    # row = p*128 + c, matching the channel-padded pooled2 layout.
    w = np.asarray(params["fc1_w"], f32).reshape(120, 16, P2_HW)   # (f, c, p)
    wf1 = np.zeros((P2_HW * OC_PAD, FC_PAD), f32)
    for p in range(P2_HW):
        wf1[p * OC_PAD:p * OC_PAD + 16, :120] = w[:, :, p].T
    bf1 = np.zeros((1, FC_PAD), f32)
    bf1[0, :120] = np.asarray(params["fc1_b"], f32)

    # fc2: (84, 120) -> (128, 128); fc3: (120, 84) -> (128, 128).
    wf2 = np.zeros((FC_PAD, FC_PAD), f32)
    wf2[:120, :84] = np.asarray(params["fc2_w"], f32).T
    bf2 = np.zeros((1, FC_PAD), f32)
    bf2[0, :84] = np.asarray(params["fc2_b"], f32)
    wf3 = np.zeros((FC_PAD, FC_PAD), f32)
    wf3[:84, :120] = np.asarray(params["fc3_w"], f32).T
    bf3 = np.zeros((1, FC_PAD), f32)
    bf3[0, :120] = np.asarray(params["fc3_b"], f32)

    bf16 = jnp.bfloat16
    return {
        "w1c": jnp.asarray(w1c, bf16), "b1c": jnp.asarray(b1c),
        "p1": jnp.asarray(_pool_matrix_np(28, 28), bf16),
        "w2c": jnp.asarray(w2c, bf16), "b2c": jnp.asarray(b2c),
        "p2": jnp.asarray(_pool2_matrix_np(), bf16),
        "wf1": jnp.asarray(wf1, bf16), "bf1": jnp.asarray(bf1),
        "wf2": jnp.asarray(wf2, bf16), "bf2": jnp.asarray(bf2),
        "wf3": jnp.asarray(wf3, bf16), "bf3": jnp.asarray(bf3),
    }


# ----------------------------------------------------------------------------
# Forward pass (jitted): tiny im2col glue for conv1 + ONE pallas_call.
# ----------------------------------------------------------------------------
def _im2col_conv1(x_nhwc):
    """(N, 32, 32, 3) bf16 -> (N, 784, 128); K flatten order = (kh, kw, c)."""
    n, h, w, c = x_nhwc.shape
    oh, ow = h - KSZ + 1, w - KSZ + 1
    patches = [x_nhwc[:, dh:dh + oh, dw:dw + ow, :]
               for dh in range(KSZ) for dw in range(KSZ)]
    cols = jnp.stack(patches, axis=3).reshape(n, oh * ow, KSZ * KSZ * c)
    return jnp.pad(cols, ((0, 0), (0, 0), (0, K1_PAD - KSZ * KSZ * c)))


def lenet_forward(x, p):
    """x: (N, 3, 32, 32) NCHW f32, p: prepare_params(...) -> (N, 120) f32."""
    n = x.shape[0]
    assert x.shape[1:] == (3, 32, 32)
    x = x.transpose(0, 2, 3, 1).astype(jnp.bfloat16)          # NHWC, once
    # conv1 im2col kept as cheap XLA glue on the tiny input.
    # TODO(synk): fold conv1's patch extraction in-kernel as well (shifted
    # matmuls) if the handful of fused XLA slice ops ever shows up in traces.
    cols1 = _im2col_conv1(x)                                   # (N, 784, 128)

    n_pad = n + (n % 2)                                        # keep 2 TCs fed
    if n_pad != n:
        cols1 = jnp.pad(cols1, ((0, n_pad - n), (0, 0), (0, 0)))

    const = lambda i: (0, 0)                                   # weights/pools
    out = pl.pallas_call(
        _lenet_kernel,
        out_shape=jax.ShapeDtypeStruct((n_pad, 1, FC_PAD), jnp.float32),
        grid=(n_pad,),
        in_specs=[
            pl.BlockSpec((1, C1_HW, K1_PAD), lambda i: (i, 0, 0)),
            pl.BlockSpec((K1_PAD, OC_PAD), const),             # conv1 W
            pl.BlockSpec((1, OC_PAD), const),                  # conv1 b
            pl.BlockSpec((P1_HW, C1_HW), const),               # pool1 (bf16)
            pl.BlockSpec((KSZ * KSZ * OC_PAD, OC_PAD), const),  # conv2 W
            pl.BlockSpec((1, OC_PAD), const),                  # conv2 b
            pl.BlockSpec((P2_HW, P1_HW), const),               # pool2 (bf16)
            pl.BlockSpec((P2_HW * OC_PAD, FC_PAD), const),     # fc1 W
            pl.BlockSpec((1, FC_PAD), const),                  # fc1 b
            pl.BlockSpec((FC_PAD, FC_PAD), const),             # fc2 W
            pl.BlockSpec((1, FC_PAD), const),                  # fc2 b
            pl.BlockSpec((FC_PAD, FC_PAD), const),             # fc3 W
            pl.BlockSpec((1, FC_PAD), const),                  # fc3 b
        ],
        out_specs=pl.BlockSpec((1, 1, FC_PAD), lambda i: (i, 0, 0)),
        scratch_shapes=[pltpu.VMEM((PBUF_ROWS, OC_PAD), jnp.bfloat16)],
        compiler_params=pltpu.CompilerParams(
            dimension_semantics=("parallel",)),
    )(cols1, p["w1c"], p["b1c"], p["p1"], p["w2c"], p["b2c"], p["p2"],
      p["wf1"], p["bf1"], p["wf2"], p["bf2"], p["wf3"], p["bf3"])
    return out[:n, 0, :120]


# ----------------------------------------------------------------------------
# Parameter init (matches the PyTorch module's shapes / layouts).
# ----------------------------------------------------------------------------
def init_params(key):
    ks = jax.random.split(key, 10)

    def w(k, shape, fan_in):
        return jax.random.normal(k, shape, jnp.float32) * (1.0 / jnp.sqrt(fan_in))

    return {
        # PyTorch Conv2d weight layout: (out_channels, in_channels, kH, kW)
        "conv1_w": w(ks[0], (6, 3, 5, 5), 3 * 5 * 5),
        "conv1_b": w(ks[1], (6,), 3 * 5 * 5),
        "conv2_w": w(ks[2], (16, 6, 5, 5), 6 * 5 * 5),
        "conv2_b": w(ks[3], (16,), 6 * 5 * 5),
        # PyTorch Linear weight layout: (out_features, in_features)
        "fc1_w": w(ks[4], (120, 16 * 5 * 5), 400),
        "fc1_b": w(ks[5], (120,), 400),
        "fc2_w": w(ks[6], (84, 120), 120),
        "fc2_b": w(ks[7], (84,), 120),
        "fc3_w": w(ks[8], (120, 84), 84),
        "fc3_b": w(ks[9], (120,), 84),
    }


if __name__ == "__main__":
    key = jax.random.PRNGKey(0)
    k_param, k_x = jax.random.split(key)
    params = init_params(k_param)
    prepped = prepare_params(params)          # one-time, outside the jit
    # LeNet's 16*5*5 flatten implies 32x32 spatial input (NCHW).
    x = jax.random.normal(k_x, (2, 3, 32, 32), jnp.float32)

    fwd = jax.jit(lenet_forward)
    out = jax.block_until_ready(fwd(x, prepped))
    assert out.shape == (2, 120) and out.dtype == jnp.float32
    print("KERNEL_OK")
</pallas_src>

<mosaic_0001>
module attributes {stable_mosaic.version = 11 : i64} {
  func.func @_lenet_kernel(%arg0: i32, %arg1: memref<1x784x128xbf16, #tpu.memory_space<vmem>>, %arg2: memref<128x128xbf16, #tpu.memory_space<vmem>>, %arg3: memref<1x128xf32, #tpu.memory_space<vmem>>, %arg4: memref<196x784xbf16, #tpu.memory_space<vmem>>, %arg5: memref<3200x128xbf16, #tpu.memory_space<vmem>>, %arg6: memref<1x128xf32, #tpu.memory_space<vmem>>, %arg7: memref<25x196xbf16, #tpu.memory_space<vmem>>, %arg8: memref<3200x128xbf16, #tpu.memory_space<vmem>>, %arg9: memref<1x128xf32, #tpu.memory_space<vmem>>, %arg10: memref<128x128xbf16, #tpu.memory_space<vmem>>, %arg11: memref<1x128xf32, #tpu.memory_space<vmem>>, %arg12: memref<128x128xbf16, #tpu.memory_space<vmem>>, %arg13: memref<1x128xf32, #tpu.memory_space<vmem>>, %arg14: memref<1x1x128xf32, #tpu.memory_space<vmem>>, %arg15: memref<256x128xbf16, #tpu.memory_space<vmem>>) attributes {dimension_semantics = [#tpu.dimension_semantics<parallel>], iteration_bounds = array<i64: 2>, scalar_prefetch = 0 : i64, scratch_operands = 1 : i64, tpu.core_type = #tpu.core_type<tc>, window_params = [{transform_indices = @transform_0, window_bounds = array<i64: 1, 784, 128>}, {pipeline_mode = #tpu.pipeline_mode<synchronous>, transform_indices = @transform_1, window_bounds = array<i64: 128, 128>}, {pipeline_mode = #tpu.pipeline_mode<synchronous>, transform_indices = @transform_2, window_bounds = array<i64: 1, 128>}, {pipeline_mode = #tpu.pipeline_mode<synchronous>, transform_indices = @transform_3, window_bounds = array<i64: 196, 784>}, {pipeline_mode = #tpu.pipeline_mode<synchronous>, transform_indices = @transform_4, window_bounds = array<i64: 3200, 128>}, {pipeline_mode = #tpu.pipeline_mode<synchronous>, transform_indices = @transform_5, window_bounds = array<i64: 1, 128>}, {pipeline_mode = #tpu.pipeline_mode<synchronous>, transform_indices = @transform_6, window_bounds = array<i64: 25, 196>}, {pipeline_mode = #tpu.pipeline_mode<synchronous>, transform_indices = @transform_7, window_bounds = array<i64: 3200, 128>}, {pipeline_mode = #tpu.pipeline_mode<synchronous>, transform_indices = @transform_8, window_bounds = array<i64: 1, 128>}, {pipeline_mode = #tpu.pipeline_mode<synchronous>, transform_indices = @transform_9, window_bounds = array<i64: 128, 128>}, {pipeline_mode = #tpu.pipeline_mode<synchronous>, transform_indices = @transform_10, window_bounds = array<i64: 1, 128>}, {pipeline_mode = #tpu.pipeline_mode<synchronous>, transform_indices = @transform_11, window_bounds = array<i64: 128, 128>}, {pipeline_mode = #tpu.pipeline_mode<synchronous>, transform_indices = @transform_12, window_bounds = array<i64: 1, 128>}, {transform_indices = @transform_13, window_bounds = array<i64: 1, 1, 128>}]} {
    %c0 = arith.constant 0 : index
    %c0_0 = arith.constant 0 : index
    %c0_1 = arith.constant 0 : index
    %0 = vector.load %arg1[%c0, %c0_0, %c0_1] : memref<1x784x128xbf16, #tpu.memory_space<vmem>>, vector<1x784x128xbf16>
    %1 = vector.shape_cast %0 : vector<1x784x128xbf16> to vector<784x128xbf16>
    %c0_2 = arith.constant 0 : index
    %c0_3 = arith.constant 0 : index
    %2 = vector.load %arg2[%c0_2, %c0_3] : memref<128x128xbf16, #tpu.memory_space<vmem>>, vector<128x128xbf16>
    %cst = arith.constant dense<0.000000e+00> : vector<784x128xf32>
    %3 = tpu.matmul %1, %2, %cst {dimension_numbers = #tpu.dot_dimension_numbers<[1], [0], [0], [1], [0, 0, 1, 1], [], []>} : vector<784x128xbf16>, vector<128x128xbf16>, vector<784x128xf32> -> vector<784x128xf32>
    %c0_4 = arith.constant 0 : index
    %c0_5 = arith.constant 0 : index
    %4 = vector.load %arg3[%c0_4, %c0_5] : memref<1x128xf32, #tpu.memory_space<vmem>>, vector<1x128xf32>
    %5 = vector.broadcast %4 : vector<1x128xf32> to vector<784x128xf32>
    %6 = arith.addf %3, %5 : vector<784x128xf32>
    %cst_6 = arith.constant 0.000000e+00 : f32
    %7 = vector.broadcast %cst_6 : f32 to vector<784x128xf32>
    %8 = arith.maximumf %6, %7 : vector<784x128xf32>
    %c0_7 = arith.constant 0 : index
    %c0_8 = arith.constant 0 : index
    %9 = vector.load %arg4[%c0_7, %c0_8] : memref<196x784xbf16, #tpu.memory_space<vmem>>, vector<196x784xbf16>
    %10 = arith.truncf %8 : vector<784x128xf32> to vector<784x128xbf16>
    %cst_9 = arith.constant dense<0.000000e+00> : vector<196x128xf32>
    %11 = tpu.matmul %9, %10, %cst_9 {dimension_numbers = #tpu.dot_dimension_numbers<[1], [0], [0], [1], [0, 0, 1, 1], [], []>} : vector<196x784xbf16>, vector<784x128xbf16>, vector<196x128xf32> -> vector<196x128xf32>
    %12 = arith.truncf %11 : vector<196x128xf32> to vector<196x128xbf16>
    %c0_10 = arith.constant 0 : index
    %c0_11 = arith.constant 0 : index
    %13 = vector.load %arg15[%c0_10, %c0_11] : memref<256x128xbf16, #tpu.memory_space<vmem>>, vector<196x128xbf16>
    tpu.vector_store %arg15[%c0_10, %c0_11], %12 {strides = array<i32>} : memref<256x128xbf16, #tpu.memory_space<vmem>>, vector<196x128xbf16>,
    %cst_12 = arith.constant 0.000000e+00 : bf16
    %14 = vector.broadcast %cst_12 : bf16 to vector<60x128xbf16>
    %c196 = arith.constant 196 : index
    %c0_13 = arith.constant 0 : index
    %15 = vector.load %arg15[%c196, %c0_13] : memref<256x128xbf16, #tpu.memory_space<vmem>>, vector<60x128xbf16>
    tpu.vector_store %arg15[%c196, %c0_13], %14 {strides = array<i32>} : memref<256x128xbf16, #tpu.memory_space<vmem>>, vector<60x128xbf16>,
    %cst_14 = arith.constant 0.000000e+00 : f32
    %16 = vector.broadcast %cst_14 : f32 to vector<196x128xf32>
    %c0_15 = arith.constant 0 : index
    %c0_16 = arith.constant 0 : index
    %17 = vector.load %arg15[%c0_15, %c0_16] : memref<256x128xbf16, #tpu.memory_space<vmem>>, vector<196x128xbf16>
    %c0_17 = arith.constant 0 : index
    %c0_18 = arith.constant 0 : index
    %18 = vector.load %arg5[%c0_17, %c0_18] : memref<3200x128xbf16, #tpu.memory_space<vmem>>, vector<128x128xbf16>
    %cst_19 = arith.constant dense<0.000000e+00> : vector<196x128xf32>
    %19 = tpu.matmul %17, %18, %cst_19 {dimension_numbers = #tpu.dot_dimension_numbers<[1], [0], [0], [1], [0, 0, 1, 1], [], []>} : vector<196x128xbf16>, vector<128x128xbf16>, vector<196x128xf32> -> vector<196x128xf32>
    %20 = arith.addf %16, %19 : vector<196x128xf32>
    %c1 = arith.constant 1 : index
    %c0_20 = arith.constant 0 : index
    %21 = vector.load %arg15[%c1, %c0_20] : memref<256x128xbf16, #tpu.memory_space<vmem>>, vector<196x128xbf16>
    %c128 = arith.constant 128 : index
    %c0_21 = arith.constant 0 : index
    %22 = vector.load %arg5[%c128, %c0_21] : memref<3200x128xbf16, #tpu.memory_space<vmem>>, vector<128x128xbf16>
    %cst_22 = arith.constant dense<0.000000e+00> : vector<196x128xf32>
    %23 = tpu.matmul %21, %22, %cst_22 {dimension_numbers = #tpu.dot_dimension_numbers<[1], [0], [0], [1], [0, 0, 1, 1], [], []>} : vector<196x128xbf16>, vector<128x128xbf16>, vector<196x128xf32> -> vector<196x128xf32>
    %24 = arith.addf %20, %23 : vector<196x128xf32>
    %c2 = arith.constant 2 : index
    %c0_23 = arith.constant 0 : index
    %25 = vector.load %arg15[%c2, %c0_23] : memref<256x128xbf16, #tpu.memory_space<vmem>>, vector<196x128xbf16>
    %c256 = arith.constant 256 : index
    %c0_24 = arith.constant 0 : index
    %26 = vector.load %arg5[%c256, %c0_24] : memref<3200x128xbf16, #tpu.memory_space<vmem>>, vector<128x128xbf16>
    %cst_25 = arith.constant dense<0.000000e+00> : vector<196x128xf32>
    %27 = tpu.matmul %25, %26, %cst_25 {dimension_numbers = #tpu.dot_dimension_numbers<[1], [0], [0], [1], [0, 0, 1, 1], [], []>} : vector<196x128xbf16>, vector<128x128xbf16>, vector<196x128xf32> -> vector<196x128xf32>
    %28 = arith.addf %24, %27 : vector<196x128xf32>
    %c3 = arith.constant 3 : index
    %c0_26 = arith.constant 0 : index
    %29 = vector.load %arg15[%c3, %c0_26] : memref<256x128xbf16, #tpu.memory_space<vmem>>, vector<196x128xbf16>
    %c384 = arith.constant 384 : index
    %c0_27 = arith.constant 0 : index
    %30 = vector.load %arg5[%c384, %c0_27] : memref<3200x128xbf16, #tpu.memory_space<vmem>>, vector<128x128xbf16>
    %cst_28 = arith.constant dense<0.000000e+00> : vector<196x128xf32>
    %31 = tpu.matmul %29, %30, %cst_28 {dimension_numbers = #tpu.dot_dimension_numbers<[1], [0], [0], [1], [0, 0, 1, 1], [], []>} : vector<196x128xbf16>, vector<128x128xbf16>, vector<196x128xf32> -> vector<196x128xf32>
    %32 = arith.addf %28, %31 : vector<196x128xf32>
    %c4 = arith.constant 4 : index
    %c0_29 = arith.constant 0 : index
    %33 = vector.load %arg15[%c4, %c0_29] : memref<256x128xbf16, #tpu.memory_space<vmem>>, vector<196x128xbf16>
    %c512 = arith.constant 512 : index
    %c0_30 = arith.constant 0 : index
    %34 = vector.load %arg5[%c512, %c0_30] : memref<3200x128xbf16, #tpu.memory_space<vmem>>, vector<128x128xbf16>
    %cst_31 = arith.constant dense<0.000000e+00> : vector<196x128xf32>
    %35 = tpu.matmul %33, %34, %cst_31 {dimension_numbers = #tpu.dot_dimension_numbers<[1], [0], [0], [1], [0, 0, 1, 1], [], []>} : vector<196x128xbf16>, vector<128x128xbf16>, vector<196x128xf32> -> vector<196x128xf32>
    %36 = arith.addf %32, %35 : vector<196x128xf32>
    %c14 = arith.constant 14 : index
    %c0_32 = arith.constant 0 : index
    %37 = vector.load %arg15[%c14, %c0_32] : memref<256x128xbf16, #tpu.memory_space<vmem>>, vector<196x128xbf16>
    %c640 = arith.constant 640 : index
    %c0_33 = arith.constant 0 : index
    %38 = vector.load %arg5[%c640, %c0_33] : memref<3200x128xbf16, #tpu.memory_space<vmem>>, vector<128x128xbf16>
    %cst_34 = arith.constant dense<0.000000e+00> : vector<196x128xf32>
    %39 = tpu.matmul %37, %38, %cst_34 {dimension_numbers = #tpu.dot_dimension_numbers<[1], [0], [0], [1], [0, 0, 1, 1], [], []>} : vector<196x128xbf16>, vector<128x128xbf16>, vector<196x128xf32> -> vector<196x128xf32>
    %40 = arith.addf %36, %39 : vector<196x128xf32>
    %c15 = arith.constant 15 : index
    %c0_35 = arith.constant 0 : index
    %41 = vector.load %arg15[%c15, %c0_35] : memref<256x128xbf16, #tpu.memory_space<vmem>>, vector<196x128xbf16>
    %c768 = arith.constant 768 : index
    %c0_36 = arith.constant 0 : index
    %42 = vector.load %arg5[%c768, %c0_36] : memref<3200x128xbf16, #tpu.memory_space<vmem>>, vector<128x128xbf16>
    %cst_37 = arith.constant dense<0.000000e+00> : vector<196x128xf32>
    %43 = tpu.matmul %41, %42, %cst_37 {dimension_numbers = #tpu.dot_dimension_numbers<[1], [0], [0], [1], [0, 0, 1, 1], [], []>} : vector<196x128xbf16>, vector<128x128xbf16>, vector<196x128xf32> -> vector<196x128xf32>
    %44 = arith.addf %40, %43 : vector<196x128xf32>
    %c16 = arith.constant 16 : index
    %c0_38 = arith.constant 0 : index
    %45 = vector.load %arg15[%c16, %c0_38] : memref<256x128xbf16, #tpu.memory_space<vmem>>, vector<196x128xbf16>
    %c896 = arith.constant 896 : index
    %c0_39 = arith.constant 0 : index
    %46 = vector.load %arg5[%c896, %c0_39] : memref<3200x128xbf16, #tpu.memory_space<vmem>>, vector<128x128xbf16>
    %cst_40 = arith.constant dense<0.000000e+00> : vector<196x128xf32>
    %47 = tpu.matmul %45, %46, %cst_40 {dimension_numbers = #tpu.dot_dimension_numbers<[1], [0], [0], [1], [0, 0, 1, 1], [], []>} : vector<196x128xbf16>, vector<128x128xbf16>, vector<196x128xf32> -> vector<196x128xf32>
    %48 = arith.addf %44, %47 : vector<196x128xf32>
    %c17 = arith.constant 17 : index
    %c0_41 = arith.constant 0 : index
    %49 = vector.load %arg15[%c17, %c0_41] : memref<256x128xbf16, #tpu.memory_space<vmem>>, vector<196x128xbf16>
    %c1024 = arith.constant 1024 : index
    %c0_42 = arith.constant 0 : index
    %50 = vector.load %arg5[%c1024, %c0_42] : memref<3200x128xbf16, #tpu.memory_space<vmem>>, vector<128x128xbf16>
    %cst_43 = arith.constant dense<0.000000e+00> : vector<196x128xf32>
    %51 = tpu.matmul %49, %50, %cst_43 {dimension_numbers = #tpu.dot_dimension_numbers<[1], [0], [0], [1], [0, 0, 1, 1], [], []>} : vector<196x128xbf16>, vector<128x128xbf16>, vector<196x128xf32> -> vector<196x128xf32>
    %52 = arith.addf %48, %51 : vector<196x128xf32>
    %c18 = arith.constant 18 : index
    %c0_44 = arith.constant 0 : index
    %53 = vector.load %arg15[%c18, %c0_44] : memref<256x128xbf16, #tpu.memory_space<vmem>>, vector<196x128xbf16>
    %c1152 = arith.constant 1152 : index
    %c0_45 = arith.constant 0 : index
    %54 = vector.load %arg5[%c1152, %c0_45] : memref<3200x128xbf16, #tpu.memory_space<vmem>>, vector<128x128xbf16>
    %cst_46 = arith.constant dense<0.000000e+00> : vector<196x128xf32>
    %55 = tpu.matmul %53, %54, %cst_46 {dimension_numbers = #tpu.dot_dimension_numbers<[1], [0], [0], [1], [0, 0, 1, 1], [], []>} : vector<196x128xbf16>, vector<128x128xbf16>, vector<196x128xf32> -> vector<196x128xf32>
    %56 = arith.addf %52, %55 : vector<196x128xf32>
    %c28 = arith.constant 28 : index
    %c0_47 = arith.constant 0 : index
    %57 = vector.load %arg15[%c28, %c0_47] : memref<256x128xbf16, #tpu.memory_space<vmem>>, vector<196x128xbf16>
    %c1280 = arith.constant 1280 : index
    %c0_48 = arith.constant 0 : index
    %58 = vector.load %arg5[%c1280, %c0_48] : memref<3200x128xbf16, #tpu.memory_space<vmem>>, vector<128x128xbf16>
    %cst_49 = arith.constant dense<0.000000e+00> : vector<196x128xf32>
    %59 = tpu.matmul %57, %58, %cst_49 {dimension_numbers = #tpu.dot_dimension_numbers<[1], [0], [0], [1], [0, 0, 1, 1], [], []>} : vector<196x128xbf16>, vector<128x128xbf16>, vector<196x128xf32> -> vector<196x128xf32>
    %60 = arith.addf %56, %59 : vector<196x128xf32>
    %c29 = arith.constant 29 : index
    %c0_50 = arith.constant 0 : index
    %61 = vector.load %arg15[%c29, %c0_50] : memref<256x128xbf16, #tpu.memory_space<vmem>>, vector<196x128xbf16>
    %c1408 = arith.constant 1408 : index
    %c0_51 = arith.constant 0 : index
    %62 = vector.load %arg5[%c1408, %c0_51] : memref<3200x128xbf16, #tpu.memory_space<vmem>>, vector<128x128xbf16>
    %cst_52 = arith.constant dense<0.000000e+00> : vector<196x128xf32>
    %63 = tpu.matmul %61, %62, %cst_52 {dimension_numbers = #tpu.dot_dimension_numbers<[1], [0], [0], [1], [0, 0, 1, 1], [], []>} : vector<196x128xbf16>, vector<128x128xbf16>, vector<196x128xf32> -> vector<196x128xf32>
    %64 = arith.addf %60, %63 : vector<196x128xf32>
    %c30 = arith.constant 30 : index
    %c0_53 = arith.constant 0 : index
    %65 = vector.load %arg15[%c30, %c0_53] : memref<256x128xbf16, #tpu.memory_space<vmem>>, vector<196x128xbf16>
    %c1536 = arith.constant 1536 : index
    %c0_54 = arith.constant 0 : index
    %66 = vector.load %arg5[%c1536, %c0_54] : memref<3200x128xbf16, #tpu.memory_space<vmem>>, vector<128x128xbf16>
    %cst_55 = arith.constant dense<0.000000e+00> : vector<196x128xf32>
    %67 = tpu.matmul %65, %66, %cst_55 {dimension_numbers = #tpu.dot_dimension_numbers<[1], [0], [0], [1], [0, 0, 1, 1], [], []>} : vector<196x128xbf16>, vector<128x128xbf16>, vector<196x128xf32> -> vector<196x128xf32>
    %68 = arith.addf %64, %67 : vector<196x128xf32>
    %c31 = arith.constant 31 : index
    %c0_56 = arith.constant 0 : index
    %69 = vector.load %arg15[%c31, %c0_56] : memref<256x128xbf16, #tpu.memory_space<vmem>>, vector<196x128xbf16>
    %c1664 = arith.constant 1664 : index
    %c0_57 = arith.constant 0 : index
    %70 = vector.load %arg5[%c1664, %c0_57] : memref<3200x128xbf16, #tpu.memory_space<vmem>>, vector<128x128xbf16>
    %cst_58 = arith.constant dense<0.000000e+00> : vector<196x128xf32>
    %71 = tpu.matmul %69, %70, %cst_58 {dimension_numbers = #tpu.dot_dimension_numbers<[1], [0], [0], [1], [0, 0, 1, 1], [], []>} : vector<196x128xbf16>, vector<128x128xbf16>, vector<196x128xf32> -> vector<196x128xf32>
    %72 = arith.addf %68, %71 : vector<196x128xf32>
    %c32 = arith.constant 32 : index
    %c0_59 = arith.constant 0 : index
    %73 = vector.load %arg15[%c32, %c0_59] : memref<256x128xbf16, #tpu.memory_space<vmem>>, vector<196x128xbf16>
    %c1792 = arith.constant 1792 : index
    %c0_60 = arith.constant 0 : index
    %74 = vector.load %arg5[%c1792, %c0_60] : memref<3200x128xbf16, #tpu.memory_space<vmem>>, vector<128x128xbf16>
    %cst_61 = arith.constant dense<0.000000e+00> : vector<196x128xf32>
    %75 = tpu.matmul %73, %74, %cst_61 {dimension_numbers = #tpu.dot_dimension_numbers<[1], [0], [0], [1], [0, 0, 1, 1], [], []>} : vector<196x128xbf16>, vector<128x128xbf16>, vector<196x128xf32> -> vector<196x128xf32>
    %76 = arith.addf %72, %75 : vector<196x128xf32>
    %c42 = arith.constant 42 : index
    %c0_62 = arith.constant 0 : index
    %77 = vector.load %arg15[%c42, %c0_62] : memref<256x128xbf16, #tpu.memory_space<vmem>>, vector<196x128xbf16>
    %c1920 = arith.constant 1920 : index
    %c0_63 = arith.constant 0 : index
    %78 = vector.load %arg5[%c1920, %c0_63] : memref<3200x128xbf16, #tpu.memory_space<vmem>>, vector<128x128xbf16>
    %cst_64 = arith.constant dense<0.000000e+00> : vector<196x128xf32>
    %79 = tpu.matmul %77, %78, %cst_64 {dimension_numbers = #tpu.dot_dimension_numbers<[1], [0], [0], [1], [0, 0, 1, 1], [], []>} : vector<196x128xbf16>, vector<128x128xbf16>, vector<196x128xf32> -> vector<196x128xf32>
    %80 = arith.addf %76, %79 : vector<196x128xf32>
    %c43 = arith.constant 43 : index
    %c0_65 = arith.constant 0 : index
    %81 = vector.load %arg15[%c43, %c0_65] : memref<256x128xbf16, #tpu.memory_space<vmem>>, vector<196x128xbf16>
    %c2048 = arith.constant 2048 : index
    %c0_66 = arith.constant 0 : index
    %82 = vector.load %arg5[%c2048, %c0_66] : memref<3200x128xbf16, #tpu.memory_space<vmem>>, vector<128x128xbf16>
    %cst_67 = arith.constant dense<0.000000e+00> : vector<196x128xf32>
    %83 = tpu.matmul %81, %82, %cst_67 {dimension_numbers = #tpu.dot_dimension_numbers<[1], [0], [0], [1], [0, 0, 1, 1], [], []>} : vector<196x128xbf16>, vector<128x128xbf16>, vector<196x128xf32> -> vector<196x128xf32>
    %84 = arith.addf %80, %83 : vector<196x128xf32>
    %c44 = arith.constant 44 : index
    %c0_68 = arith.constant 0 : index
    %85 = vector.load %arg15[%c44, %c0_68] : memref<256x128xbf16, #tpu.memory_space<vmem>>, vector<196x128xbf16>
    %c2176 = arith.constant 2176 : index
    %c0_69 = arith.constant 0 : index
    %86 = vector.load %arg5[%c2176, %c0_69] : memref<3200x128xbf16, #tpu.memory_space<vmem>>, vector<128x128xbf16>
    %cst_70 = arith.constant dense<0.000000e+00> : vector<196x128xf32>
    %87 = tpu.matmul %85, %86, %cst_70 {dimension_numbers = #tpu.dot_dimension_numbers<[1], [0], [0], [1], [0, 0, 1, 1], [], []>} : vector<196x128xbf16>, vector<128x128xbf16>, vector<196x128xf32> -> vector<196x128xf32>
    %88 = arith.addf %84, %87 : vector<196x128xf32>
    %c45 = arith.constant 45 : index
    %c0_71 = arith.constant 0 : index
    %89 = vector.load %arg15[%c45, %c0_71] : memref<256x128xbf16, #tpu.memory_space<vmem>>, vector<196x128xbf16>
    %c2304 = arith.constant 2304 : index
    %c0_72 = arith.constant 0 : index
    %90 = vector.load %arg5[%c2304, %c0_72] : memref<3200x128xbf16, #tpu.memory_space<vmem>>, vector<128x128xbf16>
    %cst_73 = arith.constant dense<0.000000e+00> : vector<196x128xf32>
    %91 = tpu.matmul %89, %90, %cst_73 {dimension_numbers = #tpu.dot_dimension_numbers<[1], [0], [0], [1], [0, 0, 1, 1], [], []>} : vector<196x128xbf16>, vector<128x128xbf16>, vector<196x128xf32> -> vector<196x128xf32>
    %92 = arith.addf %88, %91 : vector<196x128xf32>
    %c46 = arith.constant 46 : index
    %c0_74 = arith.constant 0 : index
    %93 = vector.load %arg15[%c46, %c0_74] : memref<256x128xbf16, #tpu.memory_space<vmem>>, vector<196x128xbf16>
    %c2432 = arith.constant 2432 : index
    %c0_75 = arith.constant 0 : index
    %94 = vector.load %arg5[%c2432, %c0_75] : memref<3200x128xbf16, #tpu.memory_space<vmem>>, vector<128x128xbf16>
    %cst_76 = arith.constant dense<0.000000e+00> : vector<196x128xf32>
    %95 = tpu.matmul %93, %94, %cst_76 {dimension_numbers = #tpu.dot_dimension_numbers<[1], [0], [0], [1], [0, 0, 1, 1], [], []>} : vector<196x128xbf16>, vector<128x128xbf16>, vector<196x128xf32> -> vector<196x128xf32>
    %96 = arith.addf %92, %95 : vector<196x128xf32>
    %c56 = arith.constant 56 : index
    %c0_77 = arith.constant 0 : index
    %97 = vector.load %arg15[%c56, %c0_77] : memref<256x128xbf16, #tpu.memory_space<vmem>>, vector<196x128xbf16>
    %c2560 = arith.constant 2560 : index
    %c0_78 = arith.constant 0 : index
    %98 = vector.load %arg5[%c2560, %c0_78] : memref<3200x128xbf16, #tpu.memory_space<vmem>>, vector<128x128xbf16>
    %cst_79 = arith.constant dense<0.000000e+00> : vector<196x128xf32>
    %99 = tpu.matmul %97, %98, %cst_79 {dimension_numbers = #tpu.dot_dimension_numbers<[1], [0], [0], [1], [0, 0, 1, 1], [], []>} : vector<196x128xbf16>, vector<128x128xbf16>, vector<196x128xf32> -> vector<196x128xf32>
    %100 = arith.addf %96, %99 : vector<196x128xf32>
    %c57 = arith.constant 57 : index
    %c0_80 = arith.constant 0 : index
    %101 = vector.load %arg15[%c57, %c0_80] : memref<256x128xbf16, #tpu.memory_space<vmem>>, vector<196x128xbf16>
    %c2688 = arith.constant 2688 : index
    %c0_81 = arith.constant 0 : index
    %102 = vector.load %arg5[%c2688, %c0_81] : memref<3200x128xbf16, #tpu.memory_space<vmem>>, vector<128x128xbf16>
    %cst_82 = arith.constant dense<0.000000e+00> : vector<196x128xf32>
    %103 = tpu.matmul %101, %102, %cst_82 {dimension_numbers = #tpu.dot_dimension_numbers<[1], [0], [0], [1], [0, 0, 1, 1], [], []>} : vector<196x128xbf16>, vector<128x128xbf16>, vector<196x128xf32> -> vector<196x128xf32>
    %104 = arith.addf %100, %103 : vector<196x128xf32>
    %c58 = arith.constant 58 : index
    %c0_83 = arith.constant 0 : index
    %105 = vector.load %arg15[%c58, %c0_83] : memref<256x128xbf16, #tpu.memory_space<vmem>>, vector<196x128xbf16>
    %c2816 = arith.constant 2816 : index
    %c0_84 = arith.constant 0 : index
    %106 = vector.load %arg5[%c2816, %c0_84] : memref<3200x128xbf16, #tpu.memory_space<vmem>>, vector<128x128xbf16>
    %cst_85 = arith.constant dense<0.000000e+00> : vector<196x128xf32>
    %107 = tpu.matmul %105, %106, %cst_85 {dimension_numbers = #tpu.dot_dimension_numbers<[1], [0], [0], [1], [0, 0, 1, 1], [], []>} : vector<196x128xbf16>, vector<128x128xbf16>, vector<196x128xf32> -> vector<196x128xf32>
    %108 = arith.addf %104, %107 : vector<196x128xf32>
    %c59 = arith.constant 59 : index
    %c0_86 = arith.constant 0 : index
    %109 = vector.load %arg15[%c59, %c0_86] : memref<256x128xbf16, #tpu.memory_space<vmem>>, vector<196x128xbf16>
    %c2944 = arith.constant 2944 : index
    %c0_87 = arith.constant 0 : index
    %110 = vector.load %arg5[%c2944, %c0_87] : memref<3200x128xbf16, #tpu.memory_space<vmem>>, vector<128x128xbf16>
    %cst_88 = arith.constant dense<0.000000e+00> : vector<196x128xf32>
    %111 = tpu.matmul %109, %110, %cst_88 {dimension_numbers = #tpu.dot_dimension_numbers<[1], [0], [0], [1], [0, 0, 1, 1], [], []>} : vector<196x128xbf16>, vector<128x128xbf16>, vector<196x128xf32> -> vector<196x128xf32>
    %112 = arith.addf %108, %111 : vector<196x128xf32>
    %c60 = arith.constant 60 : index
    %c0_89 = arith.constant 0 : index
    %113 = vector.load %arg15[%c60, %c0_89] : memref<256x128xbf16, #tpu.memory_space<vmem>>, vector<196x128xbf16>
    %c3072 = arith.constant 3072 : index
    %c0_90 = arith.constant 0 : index
    %114 = vector.load %arg5[%c3072, %c0_90] : memref<3200x128xbf16, #tpu.memory_space<vmem>>, vector<128x128xbf16>
    %cst_91 = arith.constant dense<0.000000e+00> : vector<196x128xf32>
    %115 = tpu.matmul %113, %114, %cst_91 {dimension_numbers = #tpu.dot_dimension_numbers<[1], [0], [0], [1], [0, 0, 1, 1], [], []>} : vector<196x128xbf16>, vector<128x128xbf16>, vector<196x128xf32> -> vector<196x128xf32>
    %116 = arith.addf %112, %115 : vector<196x128xf32>
    %c0_92 = arith.constant 0 : index
    %c0_93 = arith.constant 0 : index
    %117 = vector.load %arg6[%c0_92, %c0_93] : memref<1x128xf32, #tpu.memory_space<vmem>>, vector<1x128xf32>
    %118 = vector.broadcast %117 : vector<1x128xf32> to vector<196x128xf32>
    %119 = arith.addf %116, %118 : vector<196x128xf32>
    %cst_94 = arith.constant 0.000000e+00 : f32
    %120 = vector.broadcast %cst_94 : f32 to vector<196x128xf32>
    %121 = arith.maximumf %119, %120 : vector<196x128xf32>
    %c0_95 = arith.constant 0 : index
    %c0_96 = arith.constant 0 : index
    %122 = vector.load %arg7[%c0_95, %c0_96] : memref<25x196xbf16, #tpu.memory_space<vmem>>, vector<25x196xbf16>
    %123 = arith.truncf %121 : vector<196x128xf32> to vector<196x128xbf16>
    %cst_97 = arith.constant dense<0.000000e+00> : vector<25x128xf32>
    %124 = tpu.matmul %122, %123, %cst_97 {dimension_numbers = #tpu.dot_dimension_numbers<[1], [0], [0], [1], [0, 0, 1, 1], [], []>} : vector<25x196xbf16>, vector<196x128xbf16>, vector<25x128xf32> -> vector<25x128xf32>
    %125 = arith.truncf %124 : vector<25x128xf32> to vector<25x128xbf16>
    %cst_98 = arith.constant 0.000000e+00 : f32
    %126 = vector.broadcast %cst_98 : f32 to vector<1x128xf32>
    %127 = vector.extract_strided_slice %125 {offsets = [0, 0], sizes = [1, 128], strides = [1, 1]} : vector<25x128xbf16> to vector<1x128xbf16>
    %c0_99 = arith.constant 0 : index
    %c0_100 = arith.constant 0 : index
    %128 = vector.load %arg8[%c0_99, %c0_100] : memref<3200x128xbf16, #tpu.memory_space<vmem>>, vector<128x128xbf16>
    %cst_101 = arith.constant dense<0.000000e+00> : vector<1x128xf32>
    %129 = tpu.matmul %127, %128, %cst_101 {dimension_numbers = #tpu.dot_dimension_numbers<[1], [0], [0], [1], [0, 0, 1, 1], [], []>} : vector<1x128xbf16>, vector<128x128xbf16>, vector<1x128xf32> -> vector<1x128xf32>
    %130 = arith.addf %126, %129 : vector<1x128xf32>
    %131 = vector.extract_strided_slice %125 {offsets = [1, 0], sizes = [1, 128], strides = [1, 1]} : vector<25x128xbf16> to vector<1x128xbf16>
    %c128_102 = arith.constant 128 : index
    %c0_103 = arith.constant 0 : index
    %132 = vector.load %arg8[%c128_102, %c0_103] : memref<3200x128xbf16, #tpu.memory_space<vmem>>, vector<128x128xbf16>
    %cst_104 = arith.constant dense<0.000000e+00> : vector<1x128xf32>
    %133 = tpu.matmul %131, %132, %cst_104 {dimension_numbers = #tpu.dot_dimension_numbers<[1], [0], [0], [1], [0, 0, 1, 1], [], []>} : vector<1x128xbf16>, vector<128x128xbf16>, vector<1x128xf32> -> vector<1x128xf32>
    %134 = arith.addf %130, %133 : vector<1x128xf32>
    %135 = vector.extract_strided_slice %125 {offsets = [2, 0], sizes = [1, 128], strides = [1, 1]} : vector<25x128xbf16> to vector<1x128xbf16>
    %c256_105 = arith.constant 256 : index
    %c0_106 = arith.constant 0 : index
    %136 = vector.load %arg8[%c256_105, %c0_106] : memref<3200x128xbf16, #tpu.memory_space<vmem>>, vector<128x128xbf16>
    %cst_107 = arith.constant dense<0.000000e+00> : vector<1x128xf32>
    %137 = tpu.matmul %135, %136, %cst_107 {dimension_numbers = #tpu.dot_dimension_numbers<[1], [0], [0], [1], [0, 0, 1, 1], [], []>} : vector<1x128xbf16>, vector<128x128xbf16>, vector<1x128xf32> -> vector<1x128xf32>
    %138 = arith.addf %134, %137 : vector<1x128xf32>
    %139 = vector.extract_strided_slice %125 {offsets = [3, 0], sizes = [1, 128], strides = [1, 1]} : vector<25x128xbf16> to vector<1x128xbf16>
    %c384_108 = arith.constant 384 : index
    %c0_109 = arith.constant 0 : index
    %140 = vector.load %arg8[%c384_108, %c0_109] : memref<3200x128xbf16, #tpu.memory_space<vmem>>, vector<128x128xbf16>
    %cst_110 = arith.constant dense<0.000000e+00> : vector<1x128xf32>
    %141 = tpu.matmul %139, %140, %cst_110 {dimension_numbers = #tpu.dot_dimension_numbers<[1], [0], [0], [1], [0, 0, 1, 1], [], []>} : vector<1x128xbf16>, vector<128x128xbf16>, vector<1x128xf32> -> vector<1x128xf32>
    %142 = arith.addf %138, %141 : vector<1x128xf32>
    %143 = vector.extract_strided_slice %125 {offsets = [4, 0], sizes = [1, 128], strides = [1, 1]} : vector<25x128xbf16> to vector<1x128xbf16>
    %c512_111 = arith.constant 512 : index
    %c0_112 = arith.constant 0 : index
    %144 = vector.load %arg8[%c512_111, %c0_112] : memref<3200x128xbf16, #tpu.memory_space<vmem>>, vector<128x128xbf16>
    %cst_113 = arith.constant dense<0.000000e+00> : vector<1x128xf32>
    %145 = tpu.matmul %143, %144, %cst_113 {dimension_numbers = #tpu.dot_dimension_numbers<[1], [0], [0], [1], [0, 0, 1, 1], [], []>} : vector<1x128xbf16>, vector<128x128xbf16>, vector<1x128xf32> -> vector<1x128xf32>
    %146 = arith.addf %142, %145 : vector<1x128xf32>
    %147 = vector.extract_strided_slice %125 {offsets = [5, 0], sizes = [1, 128], strides = [1, 1]} : vector<25x128xbf16> to vector<1x128xbf16>
    %c640_114 = arith.constant 640 : index
    %c0_115 = arith.constant 0 : index
    %148 = vector.load %arg8[%c640_114, %c0_115] : memref<3200x128xbf16, #tpu.memory_space<vmem>>, vector<128x128xbf16>
    %cst_116 = arith.constant dense<0.000000e+00> : vector<1x128xf32>
    %149 = tpu.matmul %147, %148, %cst_116 {dimension_numbers = #tpu.dot_dimension_numbers<[1], [0], [0], [1], [0, 0, 1, 1], [], []>} : vector<1x128xbf16>, vector<128x128xbf16>, vector<1x128xf32> -> vector<1x128xf32>
    %150 = arith.addf %146, %149 : vector<1x128xf32>
    %151 = vector.extract_strided_slice %125 {offsets = [6, 0], sizes = [1, 128], strides = [1, 1]} : vector<25x128xbf16> to vector<1x128xbf16>
    %c768_117 = arith.constant 768 : index
    %c0_118 = arith.constant 0 : index
    %152 = vector.load %arg8[%c768_117, %c0_118] : memref<3200x128xbf16, #tpu.memory_space<vmem>>, vector<128x128xbf16>
    %cst_119 = arith.constant dense<0.000000e+00> : vector<1x128xf32>
    %153 = tpu.matmul %151, %152, %cst_119 {dimension_numbers = #tpu.dot_dimension_numbers<[1], [0], [0], [1], [0, 0, 1, 1], [], []>} : vector<1x128xbf16>, vector<128x128xbf16>, vector<1x128xf32> -> vector<1x128xf32>
    %154 = arith.addf %150, %153 : vector<1x128xf32>
    %155 = vector.extract_strided_slice %125 {offsets = [7, 0], sizes = [1, 128], strides = [1, 1]} : vector<25x128xbf16> to vector<1x128xbf16>
    %c896_120 = arith.constant 896 : index
    %c0_121 = arith.constant 0 : index
    %156 = vector.load %arg8[%c896_120, %c0_121] : memref<3200x128xbf16, #tpu.memory_space<vmem>>, vector<128x128xbf16>
    %cst_122 = arith.constant dense<0.000000e+00> : vector<1x128xf32>
    %157 = tpu.matmul %155, %156, %cst_122 {dimension_numbers = #tpu.dot_dimension_numbers<[1], [0], [0], [1], [0, 0, 1, 1], [], []>} : vector<1x128xbf16>, vector<128x128xbf16>, vector<1x128xf32> -> vector<1x128xf32>
    %158 = arith.addf %154, %157 : vector<1x128xf32>
    %159 = vector.extract_strided_slice %125 {offsets = [8, 0], sizes = [1, 128], strides = [1, 1]} : vector<25x128xbf16> to vector<1x128xbf16>
    %c1024_123 = arith.constant 1024 : index
    %c0_124 = arith.constant 0 : index
    %160 = vector.load %arg8[%c1024_123, %c0_124] : memref<3200x128xbf16, #tpu.memory_space<vmem>>, vector<128x128xbf16>
    %cst_125 = arith.constant dense<0.000000e+00> : vector<1x128xf32>
    %161 = tpu.matmul %159, %160, %cst_125 {dimension_numbers = #tpu.dot_dimension_numbers<[1], [0], [0], [1], [0, 0, 1, 1], [], []>} : vector<1x128xbf16>, vector<128x128xbf16>, vector<1x128xf32> -> vector<1x128xf32>
    %162 = arith.addf %158, %161 : vector<1x128xf32>
    %163 = vector.extract_strided_slice %125 {offsets = [9, 0], sizes = [1, 128], strides = [1, 1]} : vector<25x128xbf16> to vector<1x128xbf16>
    %c1152_126 = arith.constant 1152 : index
    %c0_127 = arith.constant 0 : index
    %164 = vector.load %arg8[%c1152_126, %c0_127] : memref<3200x128xbf16, #tpu.memory_space<vmem>>, vector<128x128xbf16>
    %cst_128 = arith.constant dense<0.000000e+00> : vector<1x128xf32>
    %165 = tpu.matmul %163, %164, %cst_128 {dimension_numbers = #tpu.dot_dimension_numbers<[1], [0], [0], [1], [0, 0, 1, 1], [], []>} : vector<1x128xbf16>, vector<128x128xbf16>, vector<1x128xf32> -> vector<1x128xf32>
    %166 = arith.addf %162, %165 : vector<1x128xf32>
    %167 = vector.extract_strided_slice %125 {offsets = [10, 0], sizes = [1, 128], strides = [1, 1]} : vector<25x128xbf16> to vector<1x128xbf16>
    %c1280_129 = arith.constant 1280 : index
    %c0_130 = arith.constant 0 : index
    %168 = vector.load %arg8[%c1280_129, %c0_130] : memref<3200x128xbf16, #tpu.memory_space<vmem>>, vector<128x128xbf16>
    %cst_131 = arith.constant dense<0.000000e+00> : vector<1x128xf32>
    %169 = tpu.matmul %167, %168, %cst_131 {dimension_numbers = #tpu.dot_dimension_numbers<[1], [0], [0], [1], [0, 0, 1, 1], [], []>} : vector<1x128xbf16>, vector<128x128xbf16>, vector<1x128xf32> -> vector<1x128xf32>
    %170 = arith.addf %166, %169 : vector<1x128xf32>
    %171 = vector.extract_strided_slice %125 {offsets = [11, 0], sizes = [1, 128], strides = [1, 1]} : vector<25x128xbf16> to vector<1x128xbf16>
    %c1408_132 = arith.constant 1408 : index
    %c0_133 = arith.constant 0 : index
    %172 = vector.load %arg8[%c1408_132, %c0_133] : memref<3200x128xbf16, #tpu.memory_space<vmem>>, vector<128x128xbf16>
    %cst_134 = arith.constant dense<0.000000e+00> : vector<1x128xf32>
    %173 = tpu.matmul %171, %172, %cst_134 {dimension_numbers = #tpu.dot_dimension_numbers<[1], [0], [0], [1], [0, 0, 1, 1], [], []>} : vector<1x128xbf16>, vector<128x128xbf16>, vector<1x128xf32> -> vector<1x128xf32>
    %174 = arith.addf %170, %173 : vector<1x128xf32>
    %175 = vector.extract_strided_slice %125 {offsets = [12, 0], sizes = [1, 128], strides = [1, 1]} : vector<25x128xbf16> to vector<1x128xbf16>
    %c1536_135 = arith.constant 1536 : index
    %c0_136 = arith.constant 0 : index
    %176 = vector.load %arg8[%c1536_135, %c0_136] : memref<3200x128xbf16, #tpu.memory_space<vmem>>, vector<128x128xbf16>
    %cst_137 = arith.constant dense<0.000000e+00> : vector<1x128xf32>
    %177 = tpu.matmul %175, %176, %cst_137 {dimension_numbers = #tpu.dot_dimension_numbers<[1], [0], [0], [1], [0, 0, 1, 1], [], []>} : vector<1x128xbf16>, vector<128x128xbf16>, vector<1x128xf32> -> vector<1x128xf32>
    %178 = arith.addf %174, %177 : vector<1x128xf32>
    %179 = vector.extract_strided_slice %125 {offsets = [13, 0], sizes = [1, 128], strides = [1, 1]} : vector<25x128xbf16> to vector<1x128xbf16>
    %c1664_138 = arith.constant 1664 : index
    %c0_139 = arith.constant 0 : index
    %180 = vector.load %arg8[%c1664_138, %c0_139] : memref<3200x128xbf16, #tpu.memory_space<vmem>>, vector<128x128xbf16>
    %cst_140 = arith.constant dense<0.000000e+00> : vector<1x128xf32>
    %181 = tpu.matmul %179, %180, %cst_140 {dimension_numbers = #tpu.dot_dimension_numbers<[1], [0], [0], [1], [0, 0, 1, 1], [], []>} : vector<1x128xbf16>, vector<128x128xbf16>, vector<1x128xf32> -> vector<1x128xf32>
    %182 = arith.addf %178, %181 : vector<1x128xf32>
    %183 = vector.extract_strided_slice %125 {offsets = [14, 0], sizes = [1, 128], strides = [1, 1]} : vector<25x128xbf16> to vector<1x128xbf16>
    %c1792_141 = arith.constant 1792 : index
    %c0_142 = arith.constant 0 : index
    %184 = vector.load %arg8[%c1792_141, %c0_142] : memref<3200x128xbf16, #tpu.memory_space<vmem>>, vector<128x128xbf16>
    %cst_143 = arith.constant dense<0.000000e+00> : vector<1x128xf32>
    %185 = tpu.matmul %183, %184, %cst_143 {dimension_numbers = #tpu.dot_dimension_numbers<[1], [0], [0], [1], [0, 0, 1, 1], [], []>} : vector<1x128xbf16>, vector<128x128xbf16>, vector<1x128xf32> -> vector<1x128xf32>
    %186 = arith.addf %182, %185 : vector<1x128xf32>
    %187 = vector.extract_strided_slice %125 {offsets = [15, 0], sizes = [1, 128], strides = [1, 1]} : vector<25x128xbf16> to vector<1x128xbf16>
    %c1920_144 = arith.constant 1920 : index
    %c0_145 = arith.constant 0 : index
    %188 = vector.load %arg8[%c1920_144, %c0_145] : memref<3200x128xbf16, #tpu.memory_space<vmem>>, vector<128x128xbf16>
    %cst_146 = arith.constant dense<0.000000e+00> : vector<1x128xf32>
    %189 = tpu.matmul %187, %188, %cst_146 {dimension_numbers = #tpu.dot_dimension_numbers<[1], [0], [0], [1], [0, 0, 1, 1], [], []>} : vector<1x128xbf16>, vector<128x128xbf16>, vector<1x128xf32> -> vector<1x128xf32>
    %190 = arith.addf %186, %189 : vector<1x128xf32>
    %191 = vector.extract_strided_slice %125 {offsets = [16, 0], sizes = [1, 128], strides = [1, 1]} : vector<25x128xbf16> to vector<1x128xbf16>
    %c2048_147 = arith.constant 2048 : index
    %c0_148 = arith.constant 0 : index
    %192 = vector.load %arg8[%c2048_147, %c0_148] : memref<3200x128xbf16, #tpu.memory_space<vmem>>, vector<128x128xbf16>
    %cst_149 = arith.constant dense<0.000000e+00> : vector<1x128xf32>
    %193 = tpu.matmul %191, %192, %cst_149 {dimension_numbers = #tpu.dot_dimension_numbers<[1], [0], [0], [1], [0, 0, 1, 1], [], []>} : vector<1x128xbf16>, vector<128x128xbf16>, vector<1x128xf32> -> vector<1x128xf32>
    %194 = arith.addf %190, %193 : vector<1x128xf32>
    %195 = vector.extract_strided_slice %125 {offsets = [17, 0], sizes = [1, 128], strides = [1, 1]} : vector<25x128xbf16> to vector<1x128xbf16>
    %c2176_150 = arith.constant 2176 : index
    %c0_151 = arith.constant 0 : index
    %196 = vector.load %arg8[%c2176_150, %c0_151] : memref<3200x128xbf16, #tpu.memory_space<vmem>>, vector<128x128xbf16>
    %cst_152 = arith.constant dense<0.000000e+00> : vector<1x128xf32>
    %197 = tpu.matmul %195, %196, %cst_152 {dimension_numbers = #tpu.dot_dimension_numbers<[1], [0], [0], [1], [0, 0, 1, 1], [], []>} : vector<1x128xbf16>, vector<128x128xbf16>, vector<1x128xf32> -> vector<1x128xf32>
    %198 = arith.addf %194, %197 : vector<1x128xf32>
    %199 = vector.extract_strided_slice %125 {offsets = [18, 0], sizes = [1, 128], strides = [1, 1]} : vector<25x128xbf16> to vector<1x128xbf16>
    %c2304_153 = arith.constant 2304 : index
    %c0_154 = arith.constant 0 : index
    %200 = vector.load %arg8[%c2304_153, %c0_154] : memref<3200x128xbf16, #tpu.memory_space<vmem>>, vector<128x128xbf16>
    %cst_155 = arith.constant dense<0.000000e+00> : vector<1x128xf32>
    %201 = tpu.matmul %199, %200, %cst_155 {dimension_numbers = #tpu.dot_dimension_numbers<[1], [0], [0], [1], [0, 0, 1, 1], [], []>} : vector<1x128xbf16>, vector<128x128xbf16>, vector<1x128xf32> -> vector<1x128xf32>
    %202 = arith.addf %198, %201 : vector<1x128xf32>
    %203 = vector.extract_strided_slice %125 {offsets = [19, 0], sizes = [1, 128], strides = [1, 1]} : vector<25x128xbf16> to vector<1x128xbf16>
    %c2432_156 = arith.constant 2432 : index
    %c0_157 = arith.constant 0 : index
    %204 = vector.load %arg8[%c2432_156, %c0_157] : memref<3200x128xbf16, #tpu.memory_space<vmem>>, vector<128x128xbf16>
    %cst_158 = arith.constant dense<0.000000e+00> : vector<1x128xf32>
    %205 = tpu.matmul %203, %204, %cst_158 {dimension_numbers = #tpu.dot_dimension_numbers<[1], [0], [0], [1], [0, 0, 1, 1], [], []>} : vector<1x128xbf16>, vector<128x128xbf16>, vector<1x128xf32> -> vector<1x128xf32>
    %206 = arith.addf %202, %205 : vector<1x128xf32>
    %207 = vector.extract_strided_slice %125 {offsets = [20, 0], sizes = [1, 128], strides = [1, 1]} : vector<25x128xbf16> to vector<1x128xbf16>
    %c2560_159 = arith.constant 2560 : index
    %c0_160 = arith.constant 0 : index
    %208 = vector.load %arg8[%c2560_159, %c0_160] : memref<3200x128xbf16, #tpu.memory_space<vmem>>, vector<128x128xbf16>
    %cst_161 = arith.constant dense<0.000000e+00> : vector<1x128xf32>
    %209 = tpu.matmul %207, %208, %cst_161 {dimension_numbers = #tpu.dot_dimension_numbers<[1], [0], [0], [1], [0, 0, 1, 1], [], []>} : vector<1x128xbf16>, vector<128x128xbf16>, vector<1x128xf32> -> vector<1x128xf32>
    %210 = arith.addf %206, %209 : vector<1x128xf32>
    %211 = vector.extract_strided_slice %125 {offsets = [21, 0], sizes = [1, 128], strides = [1, 1]} : vector<25x128xbf16> to vector<1x128xbf16>
    %c2688_162 = arith.constant 2688 : index
    %c0_163 = arith.constant 0 : index
    %212 = vector.load %arg8[%c2688_162, %c0_163] : memref<3200x128xbf16, #tpu.memory_space<vmem>>, vector<128x128xbf16>
    %cst_164 = arith.constant dense<0.000000e+00> : vector<1x128xf32>
    %213 = tpu.matmul %211, %212, %cst_164 {dimension_numbers = #tpu.dot_dimension_numbers<[1], [0], [0], [1], [0, 0, 1, 1], [], []>} : vector<1x128xbf16>, vector<128x128xbf16>, vector<1x128xf32> -> vector<1x128xf32>
    %214 = arith.addf %210, %213 : vector<1x128xf32>
    %215 = vector.extract_strided_slice %125 {offsets = [22, 0], sizes = [1, 128], strides = [1, 1]} : vector<25x128xbf16> to vector<1x128xbf16>
    %c2816_165 = arith.constant 2816 : index
    %c0_166 = arith.constant 0 : index
    %216 = vector.load %arg8[%c2816_165, %c0_166] : memref<3200x128xbf16, #tpu.memory_space<vmem>>, vector<128x128xbf16>
    %cst_167 = arith.constant dense<0.000000e+00> : vector<1x128xf32>
    %217 = tpu.matmul %215, %216, %cst_167 {dimension_numbers = #tpu.dot_dimension_numbers<[1], [0], [0], [1], [0, 0, 1, 1], [], []>} : vector<1x128xbf16>, vector<128x128xbf16>, vector<1x128xf32> -> vector<1x128xf32>
    %218 = arith.addf %214, %217 : vector<1x128xf32>
    %219 = vector.extract_strided_slice %125 {offsets = [23, 0], sizes = [1, 128], strides = [1, 1]} : vector<25x128xbf16> to vector<1x128xbf16>
    %c2944_168 = arith.constant 2944 : index
    %c0_169 = arith.constant 0 : index
    %220 = vector.load %arg8[%c2944_168, %c0_169] : memref<3200x128xbf16, #tpu.memory_space<vmem>>, vector<128x128xbf16>
    %cst_170 = arith.constant dense<0.000000e+00> : vector<1x128xf32>
    %221 = tpu.matmul %219, %220, %cst_170 {dimension_numbers = #tpu.dot_dimension_numbers<[1], [0], [0], [1], [0, 0, 1, 1], [], []>} : vector<1x128xbf16>, vector<128x128xbf16>, vector<1x128xf32> -> vector<1x128xf32>
    %222 = arith.addf %218, %221 : vector<1x128xf32>
    %223 = vector.extract_strided_slice %125 {offsets = [24, 0], sizes = [1, 128], strides = [1, 1]} : vector<25x128xbf16> to vector<1x128xbf16>
    %c3072_171 = arith.constant 3072 : index
    %c0_172 = arith.constant 0 : index
    %224 = vector.load %arg8[%c3072_171, %c0_172] : memref<3200x128xbf16, #tpu.memory_space<vmem>>, vector<128x128xbf16>
    %cst_173 = arith.constant dense<0.000000e+00> : vector<1x128xf32>
    %225 = tpu.matmul %223, %224, %cst_173 {dimension_numbers = #tpu.dot_dimension_numbers<[1], [0], [0], [1], [0, 0, 1, 1], [], []>} : vector<1x128xbf16>, vector<128x128xbf16>, vector<1x128xf32> -> vector<1x128xf32>
    %226 = arith.addf %222, %225 : vector<1x128xf32>
    %c0_174 = arith.constant 0 : index
    %c0_175 = arith.constant 0 : index
    %227 = vector.load %arg9[%c0_174, %c0_175] : memref<1x128xf32, #tpu.memory_space<vmem>>, vector<1x128xf32>
    %228 = arith.addf %226, %227 : vector<1x128xf32>
    %cst_176 = arith.constant 0.000000e+00 : f32
    %229 = vector.broadcast %cst_176 : f32 to vector<1x128xf32>
    %230 = arith.maximumf %228, %229 : vector<1x128xf32>
    %231 = arith.truncf %230 : vector<1x128xf32> to vector<1x128xbf16>
    %c0_177 = arith.constant 0 : index
    %c0_178 = arith.constant 0 : index
    %232 = vector.load %arg10[%c0_177, %c0_178] : memref<128x128xbf16, #tpu.memory_space<vmem>>, vector<128x128xbf16>
    %cst_179 = arith.constant dense<0.000000e+00> : vector<1x128xf32>
    %233 = tpu.matmul %231, %232, %cst_179 {dimension_numbers = #tpu.dot_dimension_numbers<[1], [0], [0], [1], [0, 0, 1, 1], [], []>} : vector<1x128xbf16>, vector<128x128xbf16>, vector<1x128xf32> -> vector<1x128xf32>
    %c0_180 = arith.constant 0 : index
    %c0_181 = arith.constant 0 : index
    %234 = vector.load %arg11[%c0_180, %c0_181] : memref<1x128xf32, #tpu.memory_space<vmem>>, vector<1x128xf32>
    %235 = arith.addf %233, %234 : vector<1x128xf32>
    %cst_182 = arith.constant 0.000000e+00 : f32
    %236 = vector.broadcast %cst_182 : f32 to vector<1x128xf32>
    %237 = arith.maximumf %235, %236 : vector<1x128xf32>
    %238 = arith.truncf %237 : vector<1x128xf32> to vector<1x128xbf16>
    %c0_183 = arith.constant 0 : index
    %c0_184 = arith.constant 0 : index
    %239 = vector.load %arg12[%c0_183, %c0_184] : memref<128x128xbf16, #tpu.memory_space<vmem>>, vector<128x128xbf16>
    %cst_185 = arith.constant dense<0.000000e+00> : vector<1x128xf32>
    %240 = tpu.matmul %238, %239, %cst_185 {dimension_numbers = #tpu.dot_dimension_numbers<[1], [0], [0], [1], [0, 0, 1, 1], [], []>} : vector<1x128xbf16>, vector<128x128xbf16>, vector<1x128xf32> -> vector<1x128xf32>
    %c0_186 = arith.constant 0 : index
    %c0_187 = arith.constant 0 : index
    %241 = vector.load %arg13[%c0_186, %c0_187] : memref<1x128xf32, #tpu.memory_space<vmem>>, vector<1x128xf32>
    %242 = arith.addf %240, %241 : vector<1x128xf32>
    %c0_188 = arith.constant 0 : index
    %c0_189 = arith.constant 0 : index
    %c0_190 = arith.constant 0 : index
    %243 = vector.load %arg14[%c0_188, %c0_189, %c0_190] : memref<1x1x128xf32, #tpu.memory_space<vmem>>, vector<1x1x128xf32>
    %244 = vector.shape_cast %243 : vector<1x1x128xf32> to vector<1x128xf32>
    %245 = vector.shape_cast %242 : vector<1x128xf32> to vector<1x1x128xf32>
    tpu.vector_store %arg14[%c0_188, %c0_189, %c0_190], %245 {strides = array<i32>} : memref<1x1x128xf32, #tpu.memory_space<vmem>>, vector<1x1x128xf32>,
    return
  }
  func.func @transform_0(%arg0: i32) -> (i32, i32, i32) {
    %c0_i32 = arith.constant 0 : i32
    %c0_i32_0 = arith.constant 0 : i32
    %c0_i32_1 = arith.constant 0 : i32
    return %arg0, %c0_i32, %c0_i32_0 : i32, i32, i32
  }
  func.func @transform_1(%arg0: i32) -> (i32, i32) {
    %c0_i32 = arith.constant 0 : i32
    %c0_i32_0 = arith.constant 0 : i32
    %c0_i32_1 = arith.constant 0 : i32
    return %c0_i32, %c0_i32_0 : i32, i32
  }
  func.func @transform_2(%arg0: i32) -> (i32, i32) {
    %c0_i32 = arith.constant 0 : i32
    %c0_i32_0 = arith.constant 0 : i32
    %c0_i32_1 = arith.constant 0 : i32
    return %c0_i32, %c0_i32_0 : i32, i32
  }
  func.func @transform_3(%arg0: i32) -> (i32, i32) {
    %c0_i32 = arith.constant 0 : i32
    %c0_i32_0 = arith.constant 0 : i32
    %c0_i32_1 = arith.constant 0 : i32
    return %c0_i32, %c0_i32_0 : i32, i32
  }
  func.func @transform_4(%arg0: i32) -> (i32, i32) {
    %c0_i32 = arith.constant 0 : i32
    %c0_i32_0 = arith.constant 0 : i32
    %c0_i32_1 = arith.constant 0 : i32
    return %c0_i32, %c0_i32_0 : i32, i32
  }
  func.func @transform_5(%arg0: i32) -> (i32, i32) {
    %c0_i32 = arith.constant 0 : i32
    %c0_i32_0 = arith.constant 0 : i32
    %c0_i32_1 = arith.constant 0 : i32
    return %c0_i32, %c0_i32_0 : i32, i32
  }
  func.func @transform_6(%arg0: i32) -> (i32, i32) {
    %c0_i32 = arith.constant 0 : i32
    %c0_i32_0 = arith.constant 0 : i32
    %c0_i32_1 = arith.constant 0 : i32
    return %c0_i32, %c0_i32_0 : i32, i32
  }
  func.func @transform_7(%arg0: i32) -> (i32, i32) {
    %c0_i32 = arith.constant 0 : i32
    %c0_i32_0 = arith.constant 0 : i32
    %c0_i32_1 = arith.constant 0 : i32
    return %c0_i32, %c0_i32_0 : i32, i32
  }
  func.func @transform_8(%arg0: i32) -> (i32, i32) {
    %c0_i32 = arith.constant 0 : i32
    %c0_i32_0 = arith.constant 0 : i32
    %c0_i32_1 = arith.constant 0 : i32
    return %c0_i32, %c0_i32_0 : i32, i32
  }
  func.func @transform_9(%arg0: i32) -> (i32, i32) {
    %c0_i32 = arith.constant 0 : i32
    %c0_i32_0 = arith.constant 0 : i32
    %c0_i32_1 = arith.constant 0 : i32
    return %c0_i32, %c0_i32_0 : i32, i32
  }
  func.func @transform_10(%arg0: i32) -> (i32, i32) {
    %c0_i32 = arith.constant 0 : i32
    %c0_i32_0 = arith.constant 0 : i32
    %c0_i32_1 = arith.constant 0 : i32
    return %c0_i32, %c0_i32_0 : i32, i32
  }
  func.func @transform_11(%arg0: i32) -> (i32, i32) {
    %c0_i32 = arith.constant 0 : i32
    %c0_i32_0 = arith.constant 0 : i32
    %c0_i32_1 = arith.constant 0 : i32
    return %c0_i32, %c0_i32_0 : i32, i32
  }
  func.func @transform_12(%arg0: i32) -> (i32, i32) {
    %c0_i32 = arith.constant 0 : i32
    %c0_i32_0 = arith.constant 0 : i32
    %c0_i32_1 = arith.constant 0 : i32
    return %c0_i32, %c0_i32_0 : i32, i32
  }
  func.func @transform_13(%arg0: i32) -> (i32, i32, i32) {
    %c0_i32 = arith.constant 0 : i32
    %c0_i32_0 = arith.constant 0 : i32
    %c0_i32_1 = arith.constant 0 : i32
    return %arg0, %c0_i32, %c0_i32_0 : i32, i32, i32
  }
}

</mosaic_0001>

<bundles_post_ra>
// kernel: lenet_forward.1
= control target key start
LH: loop header
LB: loop body
LE: loop exit
PB: predicated region body
PF: predicated region fallthrough
CT: control target
= control target key end

     0   :  { %s20369_s0 = inlined_call_operand.vmem [shape: bf16[2,784,128], index: 0, kind: input, shape index: {}]   ;;  %s20370_s1 = inlined_call_operand.vmem [shape: bf16[128,128], index: 1, kind: input, shape index: {}]   ;;  %s20371_s2 = inlined_call_operand.vmem [shape: f32[1,128], index: 2, kind: input, shape index: {}]   ;;  %s20372_s3 = inlined_call_operand.vmem [shape: bf16[196,784], index: 3, kind: input, shape index: {}]   ;;  %s20373_s4 = inlined_call_operand.vmem [shape: bf16[3200,128], index: 4, kind: input, shape index: {}]   ;;  %s20374_s5 = inlined_call_operand.vmem [shape: f32[1,128], index: 5, kind: input, shape index: {}]   ;;  %s20375_s6 = inlined_call_operand.vmem [shape: bf16[25,196], index: 6, kind: input, shape index: {}]   ;;  %s20376_s7 = inlined_call_operand.vmem [shape: bf16[3200,128], index: 7, kind: input, shape index: {}]   ;;  %s20377_s8 = inlined_call_operand.vmem [shape: f32[1,128], index: 8, kind: input, shape index: {}]   ;;  %s20378_s9 = inlined_call_operand.vmem [shape: bf16[128,128], index: 9, kind: input, shape index: {}]   ;;  %s20379_s10 = inlined_call_operand.vmem [shape: f32[1,128], index: 10, kind: input, shape index: {}]   ;;  %s20380_s11 = inlined_call_operand.vmem [shape: bf16[128,128], index: 11, kind: input, shape index: {}]   ;;  %s20381_s12 = inlined_call_operand.vmem [shape: f32[1,128], index: 12, kind: input, shape index: {}]   ;;  %s20382_s13 = inlined_call_operand.hbm [shape: f32[2,1,128], index: 13, kind: output, shape index: {}]  }
   0x1   :  { %20538 = sst [smem:[#allocation113_spill]] %s20369_s0 }
   0x2   :  { %18 = vsyncpa [#allocation4], 0 }
   0x3   :  { %20 = vsyncpa [#allocation4 + $0x1], 0  ;;  %s14777_s25 = smov 0   ;;  %s14779_s26 = smov 0  }
   0x4   :  { %s14781_s27 = smov 0   ;;  %s14783_s28 = smov 0  }
   0x5 LB: > { %20539 = sst [smem:[#allocation6_spill]] %s14700_s27  ;;  %s14798_s29 = sadd.s32 4294967295, %s14704_s28   ;;  %s14704_s28 = sphi %s14783_s28, %s21173_s28   ;;  %s14700_s27 = sphi %s14781_s27, %s21175_s27   ;;  %s14696_s26 = sphi %s14779_s26, %s21177_s26   ;;  %s14692_s25 = sphi %s14777_s25, %s21176_s25  }
   0x6   : > { %s11109_s30 = sadd.s32 4294967294, %s14704_s28   ;;  %s14802_s14 = sadd.s32 1, %s14704_s28  }
   0x7   : > { %20540 = sst [smem:[#allocation7_spill]] %s14802_s14  ;;  %s311_s15 = sadd.s32 1, %s14700_s27 }
   0x8   : > { %s308_s16 = ssub.s32 %s14704_s28, %s14802_s14  ;;  %p321_p0 = scmp.ne.s32.totalorder %s14700_s27, %s14696_s26 }
   0x9   : > { %p309_p1 = scmp.eq.s32.totalorder %s308_s16, 0  ;;  %p322_p2 = scmp.eq.s32.totalorder %s14798_s29, 1 }
   0xa   : > { %p327_p3 = scmp.ne.s32.totalorder %s14696_s26, %s14692_s25  ;;  %p328_p4 = scmp.eq.s32.totalorder %s11109_s30, 1 }
   0xb   : > { %s14813_s17 = scalar_select %p309_p1, %s14700_s27, %s311_s15  }
   0xc   : > { %p14815_p5 = por %p322_p2, %p321_p0  ;;  %p14819_p6 = por %p328_p4, %p327_p3 }
   0xd   : > { %20541 = sst [smem:[#allocation8_spill]] %s14813_s17  ;;  %p11112_p7 = scmp.ge.s32.totalorder %s14704_s28, 1 }
   0xe   : > { %p390_p8 = scmp.lt.s32.totalorder %s14704_s28, 3 }
  0x10   : > { %p391_p9 = pnand %p11112_p7, %p390_p8 }
  0x12   : > { %394 = sbr.rel (%p391_p9) target bundleno = 3494 (0xda6), region = 72 }
  0x17   : > { %v13659_v0 = vld [vmem:[%s20370_s1 + $0x38] sm:$0xff]  ;;  %v13658_v1 = vld [vmem:[%s20370_s1 + $0x30] sm:$0xff]  ;;  %v13657_v2 = vld [vmem:[%s20370_s1 + $0x28] sm:$0xff]  ;;  %p433_p10 = scmp.lt.s32.totalorder %s14798_s29, 1  ;;  %s20544_s0 = sld [smem:[#allocation113_spill]]  ;;  %vm1844_vm0 = vcmask 130048  }
  0x18   : > { %899 = vmatpush.bf16.msra.mxu0 %v13659_v0  ;;  %v13656_v3 = vld [vmem:[%s20370_s1 + $0x20] sm:$0xff]  ;;  %v13655_v4 = vld [vmem:[%s20370_s1 + $0x18] sm:$0xff]  ;;  %v13654_v5 = vld [vmem:[%s20370_s1 + $0x10] sm:$0xff]  ;;  %vm2574_vm1 = vsmask.f32 7424  ;;  %vm3415_vm2 = vcmask 1045504   ;;  %s11050_s17 = scalar_lea.hbm %s20382_s13, %s14798_s29 }
  0x19   : > { %s434_s23 = scalar_select %p433_p10, %s14798_s29, 1  ;;  %v13653_v6 = vld [vmem:[%s20370_s1 + $0x8] sm:$0xff]  ;;  %v13652_v7 = vld [vmem:[%s20370_s1] sm:$0xff]  ;;  %vm3174_vm3 = vsmask.f32 6400  ;;  %vm3707_vm4 = vcmask 1044480  }
  0x1a   : > { %v14868_v18 = vld [vmem:[%s20371_s2] ss:$0 sm:$0xff]  ;;  %vm3912_vm5 = vsmask.f32 4352  ;;  %vm2969_vm6 = vcmask 1046528   ;;  %vm8827_vm8 = vcmask 1041408  }
  0x1b   : > { %s14568_s27 = smul.u32 392, %s434_s23  ;;  %vm5257_vm7 = vsmask.f32 5376  ;;  %vm8820_vm9 = vcmask 556032   ;;  %s431_s21 = sand.u32 1, %s14696_s26  }
  0x1c   : > { %900 = vmatpush.bf16.msra.mxu0 %v13658_v1  ;;  %s432_s24 = scalar_lea.vmem [#allocation3], %s431_s21  ;;  %s11054_s15 = sshll.u32 %s11050_s17, 4  ;;  %s11055_s15 = int_to_ptr.hbm [resolvable:$true] %s11054_s15 }
  0x1d   : > { %s14854_s14 = scalar_lea.vmem %s20544_s0, %s14568_s27  ;;  %s11052_s30 = sshll.u32 %s432_s24, 4  ;;  %s11053_s30 = int_to_ptr.vmem [resolvable:$true] %s11052_s30 }
  0x1e   : > { %v13603_v8 = vld [vmem:[%s14854_s14] sm:$0xff]  ;;  %v13604_v9 = vld [vmem:[%s14854_s14 + $0x8] sm:$0xff]  ;;  %v13605_v10 = vld [vmem:[%s14854_s14 + $0x10] sm:$0xff]  ;;  %s11042_s16 = scalar_lea.sflag [#allocation4], %s431_s21  ;;  %s14656_s20 = sshra.s32 %s11055_s15, 4  ;;  %s14657_s20 = int_to_ptr.hbm [resolvable:$true] %s14656_s20 }
  0x1f   : > { %v13606_v11 = vld [vmem:[%s14854_s14 + $0x18] sm:$0xff]  ;;  %v13607_v12 = vld [vmem:[%s14854_s14 + $0x20] sm:$0xff]  ;;  %v13608_v13 = vld [vmem:[%s14854_s14 + $0x28] sm:$0xff]  ;;  %s14658_s0 = scalar_lea.hbm %s14657_s20, 1  ;;  %s14662_s27 = scalar_lea.hbm %s20382_s13, 2 }
  0x20   : > { %901 = vmatpush.bf16.msra.mxu0 %v13657_v2  ;;  %v13609_v14 = vld [vmem:[%s14854_s14 + $0x30] sm:$0xff]  ;;  %v13610_v15 = vld [vmem:[%s14854_s14 + $0x38] sm:$0xff]  ;;  %v13611_v16 = vld [vmem:[%s14854_s14 + $0x40] sm:$0xff]  ;;  %p14659_p11 = scmp.ne.s32.totalorder %s14657_s20, %s14658_s0  ;;  %p14663_p0 = scmp.lt.s32.totalorder %s14657_s20, %s20382_s13 }
  0x21   : > { %v13612_v25 = vld [vmem:[%s14854_s14 + $0x48] sm:$0xff]  ;;  %v13613_v33 = vld [vmem:[%s14854_s14 + $0x50] sm:$0xff]  ;;  %v13614_v41 = vld [vmem:[%s14854_s14 + $0x58] sm:$0xff]  ;;  %p14664_p1 = scmp.lt.s32.totalorder %s14662_s27, %s14658_s0 }
  0x22   : > { %v13615_v49 = vld [vmem:[%s14854_s14 + $0x60] sm:$0xff]  ;;  %v13616_v52 = vld [vmem:[%s14854_s14 + $0x68] sm:$0xff]  ;;  %v13617_v55 = vld [vmem:[%s14854_s14 + $0x70] sm:$0xff]  ;;  %p14660_p12 = pnand %p14659_p11, %p14815_p5 }
  0x23   : > { %v13618_v58 = vld [vmem:[%s14854_s14 + $0x78] sm:$0xff]  ;;  %p14665_p2 = por %p14664_p1, %p14663_p0 }
  0x24   : > { %902 = vmatpush.bf16.msra.mxu0 %v13656_v3  ;;  %p14661_p13 = pneg %p14660_p12 }
  0x26   : > { %p14666_p3 = pnand %p14665_p2, %p14661_p13 }
  0x28   : > { %903 = vmatpush.bf16.msra.mxu0 %v13655_v4 }
  0x2c   : > { %904 = vmatpush.bf16.msra.mxu0 %v13654_v5 }
  0x30   : > { %905 = vmatpush.bf16.msra.mxu0 %v13653_v6 }
  0x34   : > { %906 = vmatpush.bf16.msra.mxu0 %v13652_v7 }
  0x37   : > { %907 = vmatmul.bf16.vlgmr.msra.gmra.mxu0 %v13603_v8  ;;  %v13619_v8 = vld [vmem:[%s14854_s14 + $0x80] sm:$0xff] }
  0x47   : > { %912 = vmatmul.bf16.gmra.mxu0 %v13604_v9 }
  0x57   : > { %917 = vmatmul.bf16.gmra.mxu0 %v13605_v10 }
  0x67   : > { %922 = vmatmul.bf16.gmra.mxu0 %v13606_v11 }
  0x77   : > { %927 = vmatmul.bf16.gmra.mxu0 %v13607_v12 }
  0x87   : > { %932 = vmatmul.bf16.gmra.mxu0 %v13608_v13 }
  0x97   : > { %937 = vmatmul.bf16.gmra.mxu0 %v13609_v14 }
  0xa7   : > { %942 = vmatmul.bf16.gmra.mxu0 %v13610_v15 }
  0xb4   : > { %v908_v17 = vpop.f32.mrf.mxu0 }
  0xb5   : > { %v909_v19 = vadd.f32 %v14868_v18, %v908_v17 }
  0xb7   : > { %947 = vmatmul.bf16.gmra.mxu0 %v13611_v16  ;;  %v1153_v22 = vmax.f32 %v909_v19, 0.0 }
  0xbc   : > { %v910_v20 = vpop.f32.mrf.mxu0 }
  0xbd   : > { %v911_v21 = vadd.f32 %v14868_v18, %v910_v20 }
  0xbf   : > { %v1154_v23 = vmax.f32 %v911_v21, 0.0 }
  0xc1   : > { %v14872_v24 = vpack.c.bf16 %v1154_v23, %v1153_v22 }
  0xc4   : > { %v913_v26 = vpop.f32.mrf.mxu0 }
  0xc5   : > { %v914_v27 = vadd.f32 %v14868_v18, %v913_v26 }
  0xc7   : > { %952 = vmatmul.bf16.gmra.mxu0 %v13612_v25  ;;  %v1155_v30 = vmax.f32 %v914_v27, 0.0  ;;  %v13620_v27 = vld [vmem:[%s14854_s14 + $0x88] sm:$0xff] }
  0xcc   : > { %v915_v28 = vpop.f32.mrf.mxu0 }
  0xcd   : > { %v916_v29 = vadd.f32 %v14868_v18, %v915_v28 }
  0xcf   : > { %v1156_v31 = vmax.f32 %v916_v29, 0.0 }
  0xd1   : > { %v14877_v32 = vpack.c.bf16 %v1156_v31, %v1155_v30 }
  0xd4   : > { %v918_v34 = vpop.f32.mrf.mxu0 }
  0xd5   : > { %v919_v35 = vadd.f32 %v14868_v18, %v918_v34 }
  0xd7   : > { %957 = vmatmul.bf16.gmra.mxu0 %v13613_v33  ;;  %v1157_v38 = vmax.f32 %v919_v35, 0.0 }
  0xdc   : > { %v920_v36 = vpop.f32.mrf.mxu0 }
  0xdd   : > { %v921_v37 = vadd.f32 %v14868_v18, %v920_v36  ;;  %v13621_v36 = vld [vmem:[%s14854_s14 + $0x90] sm:$0xff] }
  0xdf   : > { %v1158_v39 = vmax.f32 %v921_v37, 0.0 }
  0xe1   : > { %v1353_v40 = vpack.c.bf16 %v1158_v39, %v1157_v38 }
  0xe4   : > { %v923_v42 = vpop.f32.mrf.mxu0 }
  0xe5   : > { %v924_v43 = vadd.f32 %v14868_v18, %v923_v42 }
  0xe7   : > { %962 = vmatmul.bf16.gmra.mxu0 %v13614_v41  ;;  %v1159_v46 = vmax.f32 %v924_v43, 0.0  ;;  %v13622_v43 = vld [vmem:[%s14854_s14 + $0x98] sm:$0xff] }
  0xec   : > { %v925_v44 = vpop.f32.mrf.mxu0 }
  0xed   : > { %v926_v45 = vadd.f32 %v14868_v18, %v925_v44 }
  0xef   : > { %v1160_v47 = vmax.f32 %v926_v45, 0.0 }
  0xf1   : > { %v1354_v48 = vpack.c.bf16 %v1160_v47, %v1159_v46 }
  0xf4   : > { %v928_v50 = vpop.f32.mrf.mxu0 }
  0xf5   : > { %v929_v13 = vadd.f32 %v14868_v18, %v928_v50  ;;  %v13623_v50 = vld [vmem:[%s14854_s14 + $0xa0] sm:$0xff] }
  0xf7   : > { %967 = vmatmul.bf16.gmra.mxu0 %v13615_v49  ;;  %v1161_v17 = vmax.f32 %v929_v13, 0.0 }
  0xfc   : > { %v930_v51 = vpop.f32.mrf.mxu0 }
  0xfd   : > { %v931_v10 = vadd.f32 %v14868_v18, %v930_v51 }
  0xff   : > { %v1162_v15 = vmax.f32 %v931_v10, 0.0 }
 0x101   : > { %v1355_v22 = vpack.c.bf16 %v1162_v15, %v1161_v17 }
 0x104   : > { %v933_v53 = vpop.f32.mrf.mxu0 }
 0x105   : > { %v934_v6 = vadd.f32 %v14868_v18, %v933_v53  ;;  %v13624_v53 = vld [vmem:[%s14854_s14 + $0xa8] sm:$0xff] }
 0x107   : > { %972 = vmatmul.bf16.gmra.mxu0 %v13616_v52  ;;  %v1163_v14 = vmax.f32 %v934_v6, 0.0 }
 0x10c   : > { %v935_v54 = vpop.f32.mrf.mxu0 }
 0x10d   : > { %v936_v3 = vadd.f32 %v14868_v18, %v935_v54 }
 0x10f   : > { %v1164_v11 = vmax.f32 %v936_v3, 0.0 }
 0x111   : > { %v1356_v16 = vpack.c.bf16 %v1164_v11, %v1163_v14 }
 0x114   : > { %v938_v56 = vpop.f32.mrf.mxu0 }
 0x115   : > { %v939_v0 = vadd.f32 %v14868_v18, %v938_v56  ;;  %v13625_v56 = vld [vmem:[%s14854_s14 + $0xb0] sm:$0xff] }
 0x117   : > { %977 = vmatmul.bf16.gmra.mxu0 %v13617_v55  ;;  %v1165_v7 = vmax.f32 %v939_v0, 0.0 }
 0x11c   : > { %v940_v57 = vpop.f32.mrf.mxu0 }
 0x11d   : > { %v941_v62 = vadd.f32 %v14868_v18, %v940_v57 }
 0x11f   : > { %v1166_v4 = vmax.f32 %v941_v62, 0.0 }
 0x121   : > { %v1357_v12 = vpack.c.bf16 %v1166_v4, %v1165_v7 }
 0x124   : > { %v943_v59 = vpop.f32.mrf.mxu0 }
 0x125   : > { %v944_v60 = vadd.f32 %v14868_v18, %v943_v59  ;;  %v13626_v59 = vld [vmem:[%s14854_s14 + $0xb8] sm:$0xff] }
 0x127   : > { %982 = vmatmul.bf16.gmra.mxu0 %v13618_v58  ;;  %v1167_v1 = vmax.f32 %v944_v60, 0.0 }
 0x12c   : > { %v945_v61 = vpop.f32.mrf.mxu0 }
 0x12d   : > { %v946_v63 = vadd.f32 %v14868_v18, %v945_v61 }
 0x12f   : > { %v1168_v2 = vmax.f32 %v946_v63, 0.0 }
 0x131   : > { %v1358_v5 = vpack.c.bf16 %v1168_v2, %v1167_v1 }
 0x133   : > { %1884 = vmatpush.bf16.msra.mxu1 %v1358_v5 }
 0x134   : > { %v948_v9 = vpop.f32.mrf.mxu0 }
 0x135   : > { %v949_v19 = vadd.f32 %v14868_v18, %v948_v9  ;;  %v13627_v9 = vld [vmem:[%s14854_s14 + $0xc0] sm:$0xff] }
 0x137   : > { %987 = vmatmul.bf16.gmra.mxu0 %v13619_v8  ;;  %1885 = vmatpush.bf16.msra.mxu1 %v1357_v12  ;;  %v1169_v23 = vmax.f32 %v949_v19, 0.0 }
 0x13b   : > { %1886 = vmatpush.bf16.msra.mxu1 %v1356_v16 }
 0x13c   : > { %v950_v20 = vpop.f32.mrf.mxu0 }
 0x13d   : > { %v951_v21 = vadd.f32 %v14868_v18, %v950_v20 }
 0x13f   : > { %v1170_v25 = vmax.f32 %v951_v21, 0.0  ;;  %1887 = vmatpush.bf16.msra.mxu1 %v1355_v22 }
 0x141   : > { %v14900_v26 = vpack.c.bf16 %v1170_v25, %v1169_v23 }
 0x143   : > { %1888 = vmatpush.bf16.msra.mxu1 %v1354_v48 }
 0x144   : > { %v953_v28 = vpop.f32.mrf.mxu0 }
 0x145   : > { %v954_v29 = vadd.f32 %v14868_v18, %v953_v28 }
 0x147   : > { %992 = vmatmul.bf16.gmra.mxu0 %v13620_v27  ;;  %1889 = vmatpush.bf16.msra.mxu1 %v1353_v40  ;;  %v1171_v33 = vmax.f32 %v954_v29, 0.0  ;;  %v13628_v29 = vld [vmem:[%s14854_s14 + $0xc8] sm:$0xff] }
 0x14b   : > { %1890 = vmatpush.bf16.msra.mxu1 %v14877_v32 }
 0x14c   : > { %v955_v30 = vpop.f32.mrf.mxu0 }
 0x14d   : > { %v956_v31 = vadd.f32 %v14868_v18, %v955_v30 }
 0x14f   : > { %v1172_v34 = vmax.f32 %v956_v31, 0.0  ;;  %1891 = vmatpush.bf16.msra.mxu1 %v14872_v24 }
 0x151   : > { %v14907_v35 = vpack.c.bf16 %v1172_v34, %v1171_v33 }
 0x154   : > { %v958_v37 = vpop.f32.mrf.mxu0 }
 0x155   : > { %v959_v38 = vadd.f32 %v14868_v18, %v958_v37 }
 0x157   : > { %997 = vmatmul.bf16.gmra.mxu0 %v13621_v36  ;;  %v1173_v32 = vmax.f32 %v959_v38, 0.0 }
 0x15c   : > { %v960_v39 = vpop.f32.mrf.mxu0 }
 0x15d   : > { %v961_v40 = vadd.f32 %v14868_v18, %v960_v39  ;;  %v13629_v39 = vld [vmem:[%s14854_s14 + $0xd0] sm:$0xff] }
 0x15f   : > { %v1174_v41 = vmax.f32 %v961_v40, 0.0 }
 0x161   : > { %v1361_v42 = vpack.c.bf16 %v1174_v41, %v1173_v32 }
 0x164   : > { %v963_v44 = vpop.f32.mrf.mxu0 }
 0x165   : > { %v964_v24 = vadd.f32 %v14868_v18, %v963_v44  ;;  %v11344_v44 = vld [vmem:[%s20372_s3] sm:$0xf] }
 0x167   : > { %1002 = vmatmul.bf16.gmra.mxu0 %v13622_v43  ;;  %v1175_v47 = vmax.f32 %v964_v24, 0.0 }
 0x16c   : > { %v965_v45 = vpop.f32.mrf.mxu0 }
 0x16d   : > { %v966_v46 = vadd.f32 %v14868_v18, %v965_v45 }
 0x16f   : > { %v1176_v48 = vmax.f32 %v966_v46, 0.0  ;;  %v13630_v46 = vld [vmem:[%s14854_s14 + $0xd8] sm:$0xff] }
 0x171   : > { %v1362_v49 = vpack.c.bf16 %v1176_v48, %v1175_v47 }
 0x174   : > { %v968_v51 = vpop.f32.mrf.mxu0 }
 0x175   : > { %v969_v14 = vadd.f32 %v14868_v18, %v968_v51 }
 0x177   : > { %1007 = vmatmul.bf16.gmra.mxu0 %v13623_v50  ;;  %v1177_v19 = vmax.f32 %v969_v14, 0.0  ;;  %v11346_v14 = vld [vmem:[%s20372_s3 + $0x1c] sm:$0xf0] }
 0x17c   : > { %v970_v52 = vpop.f32.mrf.mxu0 }
 0x17d   : > { %v971_v11 = vadd.f32 %v14868_v18, %v970_v52 }
 0x17f   : > { %v1178_v16 = vmax.f32 %v971_v11, 0.0  ;;  %v13634_v11 = vld [vmem:[%s14854_s14 + $0xf8] sm:$0xff] }
 0x181   : > { %v1363_v23 = vpack.c.bf16 %v1178_v16, %v1177_v19 }
 0x184   : > { %v973_v54 = vpop.f32.mrf.mxu0 }
 0x185   : > { %v974_v7 = vadd.f32 %v14868_v18, %v973_v54  ;;  %v13670_v54 = vld [vmem:[%s20372_s3 + $0x50] sm:$0xf0] }
 0x187   : > { %1012 = vmatmul.bf16.gmra.mxu0 %v13624_v53  ;;  %v1179_v15 = vmax.f32 %v974_v7, 0.0  ;;  %v11372_v53 = vld [vmem:[%s20372_s3 + $0x38] sm:$0xf] }
 0x18c   : > { %v975_v55 = vpop.f32.mrf.mxu0 }
 0x18d   : > { %v976_v4 = vadd.f32 %v14868_v18, %v975_v55  ;;  %v11373_v55 = vor.u32 %v13670_v54, %v11372_v53  ;;  %v11512_v54 = vld [vmem:[%s20372_s3 + $0x150] sm:$0xf] }
 0x18f   : > { %v1180_v12 = vmax.f32 %v976_v4, 0.0 }
 0x191   : > { %v1364_v17 = vpack.c.bf16 %v1180_v12, %v1179_v15 }
 0x194   : > { %v978_v57 = vpop.f32.mrf.mxu0 }
 0x195   : > { %v979_v1 = vadd.f32 %v14868_v18, %v978_v57  ;;  %v13631_v57 = vld [vmem:[%s14854_s14 + $0xe0] sm:$0xff] }
 0x197   : > { %1017 = vmatmul.bf16.gmra.mxu0 %v13625_v56  ;;  %v1181_v8 = vmax.f32 %v979_v1, 0.0 }
 0x19c   : > { %v980_v58 = vpop.f32.mrf.mxu0 }
 0x19d   : > { %v981_v63 = vadd.f32 %v14868_v18, %v980_v58 }
 0x19f   : > { %v1182_v5 = vmax.f32 %v981_v63, 0.0  ;;  %v13632_v63 = vld [vmem:[%s14854_s14 + $0xe8] sm:$0xff] }
 0x1a1   : > { %v1365_v13 = vpack.c.bf16 %v1182_v5, %v1181_v8  ;;  %v13633_v5 = vld [vmem:[%s14854_s14 + $0xf0] sm:$0xff]  ;;  %v11456_v8 = vld [vmem:[%s20372_s3 + $0xe0] sm:$0xf] }
 0x1a4   : > { %v983_v60 = vpop.f32.mrf.mxu0 }
 0x1a5   : > { %v984_v61 = vadd.f32 %v14868_v18, %v983_v60  ;;  %v11400_v60 = vld [vmem:[%s20372_s3 + $0x70] sm:$0xf] }
 0x1a7   : > { %1022 = vmatmul.bf16.gmra.mxu0 %v13626_v59  ;;  %v1183_v2 = vmax.f32 %v984_v61, 0.0  ;;  %v13677_v61 = vld [vmem:[%s20372_s3 + $0x88] sm:$0xf0] }
 0x1ac   : > { %v985_v62 = vpop.f32.mrf.mxu0 }
 0x1ad   : > { %v986_v0 = vadd.f32 %v14868_v18, %v985_v62  ;;  %v11401_v62 = vor.u32 %v13677_v61, %v11400_v60  ;;  %v13674_v61 = vld [vmem:[%s20372_s3 + $0x74] sm:$0xf] }
 0x1af   : > { %v1184_v3 = vmax.f32 %v986_v0, 0.0 }
 0x1b1   : > { %v1366_v6 = vpack.c.bf16 %v1184_v3, %v1183_v2  ;;  %v11428_v2 = vld [vmem:[%s20372_s3 + $0xa8] sm:$0xf]  ;;  %v13684_v3 = vld [vmem:[%s20372_s3 + $0xc0] sm:$0xf0] }
 0x1b2   : > { %v11429_v4 = vor.u32 %v13684_v3, %v11428_v2 }
 0x1b3   : > { %1957 = vmatpush.bf16.msra.mxu2 %v1366_v6 }
 0x1b4   : > { %v988_v10 = vpop.f32.mrf.mxu0 }
 0x1b5   : > { %v989_v20 = vadd.f32 %v14868_v18, %v988_v10 }
 0x1b7   : > { %1027 = vmatmul.bf16.gmra.mxu0 %v13627_v9  ;;  %1958 = vmatpush.bf16.msra.mxu2 %v1365_v13  ;;  %v1185_v25 = vmax.f32 %v989_v20, 0.0  ;;  %v13691_v9 = vld [vmem:[%s20372_s3 + $0xf8] sm:$0xf0]  ;;  %v13660_v13 = vld [vmem:[%s20372_s3 + $0x4] sm:$0xf] }
 0x1b8   : > { %v11457_v10 = vor.u32 %v13691_v9, %v11456_v8  ;;  %v11349_v15 = vor.u32 %v13660_v13, %v11346_v14  ;;  %v13637_v9 = vld [vmem:[%s14854_s14 + $0x110] sm:$0xff]  ;;  %v11380_v14 = vld [vmem:[%s20372_s3 + $0x40] sm:$0xf] }
 0x1bb   : > { %1959 = vmatpush.bf16.msra.mxu2 %v1364_v17 }
 0x1bc   : > { %v990_v21 = vpop.f32.mrf.mxu0 }
 0x1bd   : > { %v991_v22 = vadd.f32 %v14868_v18, %v990_v21 }
 0x1bf   : > { %v1186_v27 = vmax.f32 %v991_v22, 0.0  ;;  %1960 = vmatpush.bf16.msra.mxu2 %v1363_v23 }
 0x1c1   : > { %v14930_v28 = vpack.c.bf16 %v1186_v27, %v1185_v25  ;;  %v11484_v25 = vld [vmem:[%s20372_s3 + $0x118] sm:$0xf]  ;;  %v13698_v27 = vld [vmem:[%s20372_s3 + $0x130] sm:$0xf0] }
 0x1c3   : > { %1961 = vmatpush.bf16.msra.mxu2 %v1362_v49 }
 0x1c4   : > { %v993_v30 = vpop.f32.mrf.mxu0 }
 0x1c5   : > { %v994_v31 = vadd.f32 %v14868_v18, %v993_v30 }
 0x1c7   : > { %1032 = vmatmul.bf16.gmra.mxu0 %v13628_v29  ;;  %1962 = vmatpush.bf16.msra.mxu2 %v1361_v42  ;;  %v1187_v36 = vmax.f32 %v994_v31, 0.0  ;;  %v11485_v29 = vor.u32 %v13698_v27, %v11484_v25  ;;  %v13719_v25 = vld [vmem:[%s20372_s3 + $0x1d8] sm:$0xf0] }
 0x1cb   : > { %1963 = vmatpush.bf16.msra.mxu2 %v14907_v35 }
 0x1cc   : > { %v995_v33 = vpop.f32.mrf.mxu0 }
 0x1cd   : > { %v996_v34 = vadd.f32 %v14868_v18, %v995_v33 }
 0x1cf   : > { %v1188_v37 = vmax.f32 %v996_v34, 0.0  ;;  %1964 = vmatpush.bf16.msra.mxu2 %v14900_v26  ;;  %v13663_v26 = vld [vmem:[%s20372_s3 + $0x18] sm:$0xf0] }
 0x1d0   : > { %v11345_v24 = vor.u32 %v13663_v26, %v11344_v44  ;;  %v11374_v44 = vld [vmem:[%s20372_s3 + $0x54] sm:$0xf0] }
 0x1d1   : > { %v14937_v38 = vpack.c.bf16 %v1188_v37, %v1187_v36  ;;  %v13635_v37 = vld [vmem:[%s14854_s14 + $0x100] sm:$0xff] }
 0x1d2   : > { %1892 = vmatmul.bf16.vlgmr.msra.gmra.mxu1 %v11345_v24  ;;  %1965 = vmatmul.bf16.vlgmr.msra.gmra.mxu2 %v11349_v15  ;;  %v13671_v15 = vld [vmem:[%s20372_s3 + $0x58] sm:$0xf0] }
 0x1d4   : > { %v998_v40 = vpop.f32.mrf.mxu0 }
 0x1d5   : > { %v999_v32 = vadd.f32 %v14868_v18, %v998_v40 }
 0x1d7   : > { %1037 = vmatmul.bf16.gmra.mxu0 %v13629_v39  ;;  %v1189_v43 = vmax.f32 %v999_v32, 0.0 }
 0x1dc   : > { %v1000_v41 = vpop.f32.mrf.mxu0 }
 0x1dd   : > { %v1001_v42 = vadd.f32 %v14868_v18, %v1000_v41 }
 0x1df   : > { %v1190_v35 = vmax.f32 %v1001_v42, 0.0 }
 0x1e1   : > { %v14948_v45 = vpack.c.bf16 %v1190_v35, %v1189_v43  ;;  %v13667_v35 = vld [vmem:[%s20372_s3 + $0x3c] sm:$0xf] }
 0x1e2   : > { %1897 = vmatmul.bf16.gmra.mxu1 %v11373_v55  ;;  %v11377_v26 = vor.u32 %v13667_v35, %v11374_v44  ;;  %v13705_v55 = vld [vmem:[%s20372_s3 + $0x168] sm:$0xf0] }
 0x1e4   : > { %v1003_v47 = vpop.f32.mrf.mxu0  ;;  %1970 = vmatmul.bf16.gmra.mxu2 %v11377_v26 }
 0x1e5   : > { %v1004_v48 = vadd.f32 %v14868_v18, %v1003_v47 }
 0x1e7   : > { %1042 = vmatmul.bf16.gmra.mxu0 %v13630_v46  ;;  %v1191_v51 = vmax.f32 %v1004_v48, 0.0 }
 0x1ec   : > { %v1005_v49 = vpop.f32.mrf.mxu0 }
 0x1ed   : > { %v1006_v50 = vadd.f32 %v14868_v18, %v1005_v49 }
 0x1ef   : > { %v1192_v52 = vmax.f32 %v1006_v50, 0.0 }
 0x1f1   : > { %v14959_v56 = vpack.c.bf16 %v1192_v52, %v1191_v51 }
 0x1f2   : > { %1902 = vmatmul.bf16.gmra.mxu1 %v11401_v62  ;;  %v11402_v62 = vld [vmem:[%s20372_s3 + $0x8c] sm:$0xf0] }
 0x1f4   : > { %v1008_v58 = vpop.f32.mrf.mxu0 }
 0x1f5   : > { %v1009_v42 = vadd.f32 %v14868_v18, %v1008_v58 }
 0x1f7   : > { %1047 = vmatmul.bf16.gmra.mxu0 %v13631_v57  ;;  %v1193_v47 = vmax.f32 %v1009_v42, 0.0  ;;  %v11513_v57 = vor.u32 %v13705_v55, %v11512_v54  ;;  %v11436_v55 = vld [vmem:[%s20372_s3 + $0xb0] sm:$0xf] }
 0x1fc   : > { %v1010_v59 = vpop.f32.mrf.mxu0 }
 0x1fd   : > { %v1011_v40 = vadd.f32 %v14868_v18, %v1010_v59  ;;  %v13636_v59 = vld [vmem:[%s14854_s14 + $0x108] sm:$0xff] }
 0x1ff   : > { %v1194_v24 = vmax.f32 %v1011_v40, 0.0  ;;  %v11408_v40 = vld [vmem:[%s20372_s3 + $0x78] sm:$0xf] }
 0x201   : > { %v1371_v51 = vpack.c.bf16 %v1194_v24, %v1193_v47  ;;  %v11596_v24 = vld [vmem:[%s20372_s3 + $0x1f8] sm:$0xf] }
 0x202   : > { %1907 = vmatmul.bf16.gmra.mxu1 %v11429_v4 }
 0x204   : > { %v1013_v0 = vpop.f32.mrf.mxu0 }
 0x205   : > { %v1014_v34 = vadd.f32 %v14868_v18, %v1013_v0 }
 0x207   : > { %1052 = vmatmul.bf16.gmra.mxu0 %v13632_v63  ;;  %v1195_v43 = vmax.f32 %v1014_v34, 0.0  ;;  %v11405_v63 = vor.u32 %v13674_v61, %v11402_v62  ;;  %v13688_v34 = vld [vmem:[%s20372_s3 + $0xe4] sm:$0xf]  ;;  %v11624_v62 = vld [vmem:[%s20372_s3 + $0x230] sm:$0xf] }
 0x209   : > { %1975 = vmatmul.bf16.gmra.mxu2 %v11405_v63  ;;  %v13733_v63 = vld [vmem:[%s20372_s3 + $0x248] sm:$0xf0] }
 0x20c   : > { %v1015_v1 = vpop.f32.mrf.mxu0 }
 0x20d   : > { %v1016_v30 = vadd.f32 %v14868_v18, %v1015_v1 }
 0x20f   : > { %v1196_v32 = vmax.f32 %v1016_v30, 0.0  ;;  %v13638_v30 = vld [vmem:[%s14854_s14 + $0x118] sm:$0xff] }
 0x211   : > { %v1372_v46 = vpack.c.bf16 %v1196_v32, %v1195_v43  ;;  %v13678_v32 = vld [vmem:[%s20372_s3 + $0x90] sm:$0xf0] }
 0x212   : > { %1912 = vmatmul.bf16.gmra.mxu1 %v11457_v10  ;;  %v11409_v43 = vor.u32 %v13678_v32, %v11408_v40  ;;  %v11570_v40 = vld [vmem:[%s20372_s3 + $0x1dc] sm:$0xf0] }
 0x214   : > { %v1018_v6 = vpop.f32.mrf.mxu0 }
 0x215   : > { %v1019_v21 = vadd.f32 %v14868_v18, %v1018_v6  ;;  %v13712_v6 = vld [vmem:[%s20372_s3 + $0x1a0] sm:$0xf0] }
 0x217   : > { %1057 = vmatmul.bf16.gmra.mxu0 %v13633_v5  ;;  %v1197_v36 = vmax.f32 %v1019_v21, 0.0 }
 0x21c   : > { %v1020_v7 = vpop.f32.mrf.mxu0 }
 0x21d   : > { %v1021_v19 = vadd.f32 %v14868_v18, %v1020_v7 }
 0x21f   : > { %v1198_v31 = vmax.f32 %v1021_v19, 0.0  ;;  %v11381_v19 = vor.u32 %v13671_v15, %v11380_v14  ;;  %v13709_v15 = vld [vmem:[%s20372_s3 + $0x18c] sm:$0xf] }
 0x221   : > { %v1373_v41 = vpack.c.bf16 %v1198_v31, %v1197_v36  ;;  %v11458_v36 = vld [vmem:[%s20372_s3 + $0xfc] sm:$0xf0] }
 0x222   : > { %1917 = vmatmul.bf16.gmra.mxu1 %v11485_v29 }
 0x224   : > { %v1023_v12 = vpop.f32.mrf.mxu0 }
 0x225   : > { %v1024_v16 = vadd.f32 %v14868_v18, %v1023_v12 }
 0x227   : > { %1062 = vmatmul.bf16.gmra.mxu0 %v13634_v11  ;;  %v1199_v22 = vmax.f32 %v1024_v16, 0.0  ;;  %v11430_v11 = vld [vmem:[%s20372_s3 + $0xc4] sm:$0xf0] }
 0x22c   : > { %v1025_v17 = vpop.f32.mrf.mxu0 }
 0x22d   : > { %v1026_v20 = vadd.f32 %v14868_v18, %v1025_v17 }
 0x22f   : > { %v1200_v23 = vmax.f32 %v1026_v20, 0.0 }
 0x231   : > { %v1374_v33 = vpack.c.bf16 %v1200_v23, %v1199_v22  ;;  %v11568_v23 = vld [vmem:[%s20372_s3 + $0x1c0] sm:$0xf] }
 0x232   : > { %1922 = vmatmul.bf16.gmra.mxu1 %v11513_v57  ;;  %v11569_v27 = vor.u32 %v13719_v25, %v11568_v23  ;;  %v13685_v57 = vld [vmem:[%s20372_s3 + $0xc8] sm:$0xf0]  ;;  %v15167_v23 = vld [vmem:[%s20372_s3 + $0x2a0] sm:$0x33] }
 0x233   : > { %2030 = vmatpush.bf16.msra.mxu3 %v1374_v33 }
 0x234   : > { %v1028_v39 = vpop.f32.mrf.mxu0 }
 0x235   : > { %v1029_v48 = vadd.f32 %v14868_v18, %v1028_v39 }
 0x237   : > { %1067 = vmatmul.bf16.gmra.mxu0 %v13635_v37  ;;  %2031 = vmatpush.bf16.msra.mxu3 %v1373_v41  ;;  %v1201_v52 = vmax.f32 %v1029_v48, 0.0  ;;  %v11461_v37 = vor.u32 %v13688_v34, %v11458_v36  ;;  %v13642_v34 = vld [vmem:[%s14854_s14 + $0x138] sm:$0xff] }
 0x23b   : > { %2032 = vmatpush.bf16.msra.mxu3 %v1372_v46  ;;  %v13726_v46 = vld [vmem:[%s20372_s3 + $0x210] sm:$0xf0] }
 0x23c   : > { %v1030_v49 = vpop.f32.mrf.mxu0  ;;  %v11597_v47 = vor.u32 %v13726_v46, %v11596_v24 }
 0x23d   : > { %v1031_v50 = vadd.f32 %v14868_v18, %v1030_v49  ;;  %v13639_v49 = vld [vmem:[%s14854_s14 + $0x120] sm:$0xff] }
 0x23f   : > { %v1202_v53 = vmax.f32 %v1031_v50, 0.0  ;;  %2033 = vmatpush.bf16.msra.mxu3 %v1371_v51 }
 0x241   : > { %v15018_v58 = vpack.c.bf16 %v1202_v53, %v1201_v52  ;;  %v13695_v52 = vld [vmem:[%s20372_s3 + $0x11c] sm:$0xf]  ;;  %v11486_v53 = vld [vmem:[%s20372_s3 + $0x134] sm:$0xf0] }
 0x242   : > { %v11489_v54 = vor.u32 %v13695_v52, %v11486_v53 }
 0x243   : > { %2034 = vmatpush.bf16.msra.mxu3 %v14959_v56  ;;  %v11352_v56 = vld [vmem:[%s20372_s3 + $0x8] sm:$0xf] }
 0x244   : > { %v1033_v60 = vpop.f32.mrf.mxu0 }
 0x245   : > { %v1034_v0 = vadd.f32 %v14868_v18, %v1033_v60  ;;  %v11437_v60 = vor.u32 %v13685_v57, %v11436_v55 }
 0x247   : > { %1072 = vmatmul.bf16.gmra.mxu0 %v13636_v59  ;;  %2035 = vmatpush.bf16.msra.mxu3 %v14948_v45  ;;  %v13664_v45 = vld [vmem:[%s20372_s3 + $0x20] sm:$0xf0]  ;;  %v1203_v4 = vmax.f32 %v1034_v0, 0.0  ;;  %v11625_v0 = vor.u32 %v13733_v63, %v11624_v62 }
 0x248   : > { %v11353_v3 = vor.u32 %v13664_v45, %v11352_v56  ;;  %v13640_v56 = vld [vmem:[%s14854_s14 + $0x128] sm:$0xff] }
 0x24b   : > { %2036 = vmatpush.bf16.msra.mxu3 %v14937_v38  ;;  %v11540_v38 = vld [vmem:[%s20372_s3 + $0x188] sm:$0xf] }
 0x24c   : > { %v1035_v1 = vpop.f32.mrf.mxu0  ;;  %v11541_v7 = vor.u32 %v13712_v6, %v11540_v38  ;;  %v13692_v38 = vld [vmem:[%s20372_s3 + $0x100] sm:$0xf0] }
 0x24d   : > { %v1036_v2 = vadd.f32 %v14868_v18, %v1035_v1 }
 0x24e   : > { %1927 = vmatmul.bf16.gmra.mxu1 %v11541_v7 }
 0x24f   : > { %v1204_v5 = vmax.f32 %v1036_v2, 0.0  ;;  %2037 = vmatpush.bf16.msra.mxu3 %v14930_v28  ;;  %v13681_v28 = vld [vmem:[%s20372_s3 + $0xac] sm:$0xf]  ;;  %v15062_v22 = vpop.f32.mrf.mxu1  ;;  %v13702_v2 = vld [vmem:[%s20372_s3 + $0x154] sm:$0xf] }
 0x250   : > { %v11433_v12 = vor.u32 %v13681_v28, %v11430_v11  ;;  %v13740_v28 = vld [vmem:[%s20372_s3 + $0x280] sm:$0xf0] }
 0x251   : > { %v15045_v8 = vpack.c.bf16 %v1204_v5, %v1203_v4  ;;  %v11464_v5 = vld [vmem:[%s20372_s3 + $0xe8] sm:$0xf] }
 0x252   : > { %2038 = vmatmul.bf16.vlgmr.msra.gmra.mxu3 %v11353_v3  ;;  %1980 = vmatmul.bf16.gmra.mxu2 %v11433_v12  ;;  %v11514_v3 = vld [vmem:[%s20372_s3 + $0x16c] sm:$0xf0]  ;;  %v11465_v7 = vor.u32 %v13692_v38, %v11464_v5 }
 0x253   : > { %v11517_v4 = vor.u32 %v13702_v2, %v11514_v3  ;;  %v13641_v12 = vld [vmem:[%s14854_s14 + $0x130] sm:$0xff] }
 0x254   : > { %v1038_v10 = vpop.f32.mrf.mxu0 }
 0x255   : > { %v1039_v13 = vadd.f32 %v14868_v18, %v1038_v10  ;;  %v11652_v10 = vld [vmem:[%s20372_s3 + $0x268] sm:$0xf]  ;;  %v15190_v46 = vpop.f32.mrf.mxu2 }
 0x256   : > { %v11653_v11 = vor.u32 %v13740_v28, %v11652_v10 }
 0x257   : > { %1077 = vmatmul.bf16.gmra.mxu0 %v13637_v9  ;;  %v1205_v20 = vmax.f32 %v1039_v13, 0.0  ;;  %v15073_v33 = vpop.f32.mrf.mxu1 }
 0x25c   : > { %v1040_v16 = vpop.f32.mrf.mxu0 }
 0x25d   : > { %v1041_v17 = vadd.f32 %v14868_v18, %v1040_v16  ;;  %v11542_v16 = vld [vmem:[%s20372_s3 + $0x1a4] sm:$0xf0]  ;;  %v15200_v5 = vpop.f32.mrf.mxu2 }
 0x25e   : > { %1932 = vmatmul.bf16.gmra.mxu1 %v11569_v27  ;;  %v1668_v27 = vunpack.c.l.b16 %v15167_v23 }
 0x25f   : > { %v1206_v21 = vmax.f32 %v1041_v17, 0.0  ;;  %v15089_v26 = vpop.f32.mrf.mxu1  ;;  %v11545_v17 = vor.u32 %v13709_v15, %v11542_v16  ;;  %v13713_v15 = vld [vmem:[%s20372_s3 + $0x1a8] sm:$0xf0] }
 0x261   : > { %v15070_v29 = vpack.c.bf16 %v1206_v21, %v1205_v20  ;;  %v13699_v20 = vld [vmem:[%s20372_s3 + $0x138] sm:$0xf0] }
 0x262   : > { %2043 = vmatmul.bf16.gmra.mxu3 %v11381_v19  ;;  %1985 = vmatmul.bf16.gmra.mxu2 %v11461_v37  ;;  %v11492_v19 = vld [vmem:[%s20372_s3 + $0x120] sm:$0xf] }
 0x263   : > { %v11493_v25 = vor.u32 %v13699_v20, %v11492_v19 }
 0x264   : > { %v1043_v31 = vpop.f32.mrf.mxu0 }
 0x265   : > { %v1044_v39 = vadd.f32 %v14868_v18, %v1043_v31  ;;  %v1759_v31 = vpack.c.b16 %v1668_v27, %v1668_v27 }
 0x267   : > { %1082 = vmatmul.bf16.gmra.mxu0 %v13638_v30  ;;  %v1207_v35 = vmax.f32 %v1044_v39, 0.0  ;;  %v15102_v51 = vpop.f32.mrf.mxu1  ;;  %v13716_v39 = vld [vmem:[%s20372_s3 + $0x1c4] sm:$0xf]  ;;  %v15220_v20 = vpop.f32.mrf.mxu2 }
 0x268   : > { %v11573_v32 = vor.u32 %v13716_v39, %v11570_v40 }
 0x26c   : > { %v1045_v41 = vpop.f32.mrf.mxu0 }
 0x26d   : > { %v1046_v42 = vadd.f32 %v14868_v18, %v1045_v41 }
 0x26e   : > { %1937 = vmatmul.bf16.gmra.mxu1 %v11597_v47 }
 0x26f   : > { %v1208_v44 = vmax.f32 %v1046_v42, 0.0  ;;  %v15118_v61 = vpop.f32.mrf.mxu1  ;;  %v11520_v42 = vld [vmem:[%s20372_s3 + $0x158] sm:$0xf]  ;;  %v15228_v40 = vpop.f32.mrf.mxu2 }
 0x271   : > { %v15097_v48 = vpack.c.bf16 %v1208_v44, %v1207_v35 }
 0x272   : > { %2048 = vmatmul.bf16.gmra.mxu3 %v11409_v43  ;;  %1990 = vmatmul.bf16.gmra.mxu2 %v11489_v54  ;;  %v13706_v43 = vld [vmem:[%s20372_s3 + $0x170] sm:$0xf0] }
 0x273   : > { %v11521_v47 = vor.u32 %v13706_v43, %v11520_v42  ;;  %v11626_v42 = vld [vmem:[%s20372_s3 + $0x24c] sm:$0xf0] }
 0x274   : > { %v15100_v50 = vpop.f32.mrf.mxu0 }
 0x275   : > { %v1049_v38 = vadd.f32 %v14868_v18, %v15100_v50 }
 0x277   : > { %1087 = vmatmul.bf16.gmra.mxu0 %v13639_v49  ;;  %v15127_v1 = vpop.f32.mrf.mxu1 }
 0x27c   : > { %v15116_v59 = vpop.f32.mrf.mxu0 }
 0x27d   : > { %v1051_v2 = vadd.f32 %v14868_v18, %v15116_v59  ;;  %v11598_v59 = vld [vmem:[%s20372_s3 + $0x214] sm:$0xf0] }
 0x27e   : > { %1942 = vmatmul.bf16.gmra.mxu1 %v11625_v0  ;;  %v13643_v0 = vld [vmem:[%s14854_s14 + $0x140] sm:$0xff] }
 0x27f   : > { %v15141_v9 = vpop.f32.mrf.mxu1  ;;  %v1210_v28 = vmax.f32 %v1051_v2, 0.0 }
 0x282   : > { %2053 = vmatmul.bf16.gmra.mxu3 %v11437_v60  ;;  %1995 = vmatmul.bf16.gmra.mxu2 %v11517_v4 }
 0x284   : > { %v1053_v45 = vpop.f32.mrf.mxu0 }
 0x285   : > { %v1054_v62 = vadd.f32 %v14868_v18, %v1053_v45  ;;  %v13723_v45 = vld [vmem:[%s20372_s3 + $0x1fc] sm:$0xf] }
 0x286   : > { %v11601_v10 = vor.u32 %v13723_v45, %v11598_v59  ;;  %v11382_v59 = vld [vmem:[%s20372_s3 + $0x5c] sm:$0xf0] }
 0x287   : > { %1092 = vmatmul.bf16.gmra.mxu0 %v13640_v56  ;;  %v15150_v14 = vpop.f32.mrf.mxu1 }
 0x28c   : > { %v1055_v6 = vpop.f32.mrf.mxu0 }
 0x28d   : > { %v1056_v55 = vadd.f32 %v14868_v18, %v1055_v6  ;;  %v1211_v6 = vmax.f32 %v1054_v62, 0.0 }
 0x28e   : > { %1947 = vmatmul.bf16.gmra.mxu1 %v11653_v11 }
 0x28f   : > { %v15170_v30 = vpop.f32.mrf.mxu1  ;;  %v1212_v3 = vmax.f32 %v1056_v55, 0.0 }
 0x291   : > { %v1380_v11 = vpack.c.bf16 %v1212_v3, %v1211_v6  ;;  %v11654_v6 = vld [vmem:[%s20372_s3 + $0x284] sm:$0xf0] }
 0x292   : > { %2058 = vmatmul.bf16.gmra.mxu3 %v11465_v7  ;;  %2000 = vmatmul.bf16.gmra.mxu2 %v11545_v17 }
 0x294   : > { %v1058_v13 = vpop.f32.mrf.mxu0 }
 0x295   : > { %v1059_v49 = vadd.f32 %v14868_v18, %v1058_v13  ;;  %v11548_v13 = vld [vmem:[%s20372_s3 + $0x190] sm:$0xf] }
 0x297   : > { %1097 = vmatmul.bf16.gmra.mxu0 %v13641_v12  ;;  %v15173_v37 = vpop.f32.mrf.mxu1  ;;  %v1213_v63 = vmax.f32 %v1059_v49, 0.0  ;;  %v1209_v12 = vmax.f32 %v1049_v38, 0.0 }
 0x299   : > { %v1379_v19 = vpack.c.bf16 %v1210_v28, %v1209_v12  ;;  %v13727_v28 = vld [vmem:[%s20372_s3 + $0x218] sm:$0xf0]  ;;  %v1969_v12 = vadd.f32 %v15200_v5, %v15073_v33  ;;  %v1972_v33 = vadd.f32 %v15220_v20, %v15089_v26  ;;  %v11410_v26 = vld [vmem:[%s20372_s3 + $0x94] sm:$0xf0] }
 0x29a   : > { %v13646_v5 = vld [vmem:[%s14854_s14 + $0x158] sm:$0xff] }
 0x29b   : > { %v11632_v20 = vld [vmem:[%s20372_s3 + $0x238] sm:$0xf] }
 0x29c   : > { %v1060_v21 = vpop.f32.mrf.mxu0 }
 0x29d   : > { %v1061_v44 = vadd.f32 %v14868_v18, %v1060_v21  ;;  %v11549_v21 = vor.u32 %v13713_v15, %v11548_v13 }
 0x29e   : > { %1952 = vmatmul.bf16.gmra.mxu1 %v1759_v31 }
 0x29f   : > { %v15193_v54 = vpop.f32.mrf.mxu1  ;;  %v1214_v57 = vmax.f32 %v1061_v44, 0.0  ;;  %v11576_v44 = vld [vmem:[%s20372_s3 + $0x1c8] sm:$0xf] }
 0x2a1   : > { %v1381_v4 = vpack.c.bf16 %v1214_v57, %v1213_v63  ;;  %v1967_v63 = vadd.f32 %v15190_v46, %v15062_v22  ;;  %v13668_v22 = vld [vmem:[%s20372_s3 + $0x44] sm:$0xf] }
 0x2a2   : > { %2063 = vmatmul.bf16.gmra.mxu3 %v11493_v25  ;;  %2005 = vmatmul.bf16.gmra.mxu2 %v11573_v32 }
 0x2a4   : > { %v1063_v36 = vpop.f32.mrf.mxu0 }
 0x2a5   : > { %v1064_v41 = vadd.f32 %v14868_v18, %v1063_v36  ;;  %v13644_v36 = vld [vmem:[%s14854_s14 + $0x148] sm:$0xff] }
 0x2a7   : > { %1102 = vmatmul.bf16.gmra.mxu0 %v13642_v34  ;;  %v1215_v52 = vmax.f32 %v1064_v41, 0.0  ;;  %v15204_v7 = vpop.f32.mrf.mxu1  ;;  %v13730_v41 = vld [vmem:[%s20372_s3 + $0x234] sm:$0xf] }
 0x2a8   : > { %v11629_v43 = vor.u32 %v13730_v41, %v11626_v42 }
 0x2ac   : > { %v1065_v35 = vpop.f32.mrf.mxu0 }
 0x2ad   : > { %v1066_v24 = vadd.f32 %v14868_v18, %v1065_v35 }
 0x2af   : > { %v1216_v53 = vmax.f32 %v1066_v24, 0.0  ;;  %v15222_v31 = vpop.f32.mrf.mxu1  ;;  %v13720_v24 = vld [vmem:[%s20372_s3 + $0x1e0] sm:$0xf0] }
 0x2b1   : > { %v1382_v60 = vpack.c.bf16 %v1216_v53, %v1215_v52  ;;  %v15254_v52 = vpop.f32.mrf.mxu2 }
 0x2b2   : > { %2068 = vmatmul.bf16.gmra.mxu3 %v11521_v47  ;;  %2010 = vmatmul.bf16.gmra.mxu2 %v11601_v10  ;;  %v11604_v10 = vld [vmem:[%s20372_s3 + $0x200] sm:$0xf] }
 0x2b3   : > { %2103 = vmatpush.bf16.msrb.mxu1 %v1382_v60 }
 0x2b4   : > { %v1068_v56 = vpop.f32.mrf.mxu0 }
 0x2b5   : > { %v1069_v50 = vadd.f32 %v14868_v18, %v1068_v56 }
 0x2b7   : > { %1107 = vmatmul.bf16.gmra.mxu0 %v13643_v0  ;;  %2104 = vmatpush.bf16.msrb.mxu1 %v1381_v4  ;;  %v1217_v25 = vmax.f32 %v1069_v50, 0.0  ;;  %v15231_v32 = vpop.f32.mrf.mxu1  ;;  %v13645_v0 = vld [vmem:[%s14854_s14 + $0x150] sm:$0xff] }
 0x2b8   : > { %20545 = vst [vmem:[#allocation9_spill] sm:$0xff] %v15231_v32 }
 0x2b9   : > { %v15264_v3 = vpop.f32.mrf.mxu2 }
 0x2bb   : > { %2105 = vmatpush.bf16.msrb.mxu1 %v1380_v11 }
 0x2bc   : > { %v1070_v16 = vpop.f32.mrf.mxu0 }
 0x2bd   : > { %v1071_v17 = vadd.f32 %v14868_v18, %v1070_v16  ;;  %v11385_v16 = vor.u32 %v13668_v22, %v11382_v59 }
 0x2bf   : > { %v1218_v27 = vmax.f32 %v1071_v17, 0.0  ;;  %2106 = vmatpush.bf16.msrb.mxu1 %v1379_v19  ;;  %v11605_v19 = vor.u32 %v13727_v28, %v11604_v10  ;;  %v13682_v28 = vld [vmem:[%s20372_s3 + $0xb4] sm:$0xf] }
 0x2c1   : > { %v15224_v34 = vpack.c.bf16 %v1218_v27, %v1217_v25 }
 0x2c2   : > { %2073 = vmatmul.bf16.gmra.mxu3 %v11549_v21  ;;  %2015 = vmatmul.bf16.gmra.mxu2 %v11629_v43 }
 0x2c3   : > { %2107 = vmatpush.bf16.msrb.mxu1 %v15097_v48  ;;  %v13661_v48 = vld [vmem:[%s20372_s3 + $0xc] sm:$0xf] }
 0x2c4   : > { %v1073_v39 = vpop.f32.mrf.mxu0 }
 0x2c5   : > { %v1074_v35 = vadd.f32 %v14868_v18, %v1073_v39 }
 0x2c7   : > { %1112 = vmatmul.bf16.gmra.mxu0 %v13644_v36  ;;  %2108 = vmatpush.bf16.msrb.mxu1 %v15070_v29  ;;  %v11354_v29 = vld [vmem:[%s20372_s3 + $0x24] sm:$0xf0]  ;;  %v1219_v55 = vmax.f32 %v1074_v35, 0.0  ;;  %v13675_v35 = vld [vmem:[%s20372_s3 + $0x7c] sm:$0xf] }
 0x2c8   : > { %v11357_v53 = vor.u32 %v13661_v48, %v11354_v29 }
 0x2cb   : > { %2109 = vmatpush.bf16.msrb.mxu1 %v15045_v8  ;;  %v11577_v8 = vor.u32 %v13720_v24, %v11576_v44  ;;  %v15257_v60 = vpop.f32.mrf.mxu1  ;;  %v13734_v44 = vld [vmem:[%s20372_s3 + $0x250] sm:$0xf0] }
 0x2cc   : > { %v1075_v47 = vpop.f32.mrf.mxu0 }
 0x2cd   : > { %v1076_v49 = vadd.f32 %v14868_v18, %v1075_v47 }
 0x2cf   : > { %v1220_v57 = vmax.f32 %v1076_v49, 0.0  ;;  %2110 = vmatpush.bf16.msrb.mxu1 %v15018_v58  ;;  %v13737_v58 = vld [vmem:[%s20372_s3 + $0x26c] sm:$0xf] }
 0x2d0   : > { %v11657_v45 = vor.u32 %v13737_v58, %v11654_v6  ;;  %v1977_v6 = vadd.f32 %v15254_v52, %v15118_v61  ;;  %v11438_v61 = vld [vmem:[%s20372_s3 + $0xcc] sm:$0xf0] }
 0x2d1   : > { %v15259_v62 = vpack.c.bf16 %v1220_v57, %v1219_v55  ;;  %v11633_v55 = vor.u32 %v13734_v44, %v11632_v20  ;;  %v1669_v57 = vunpack.c.h.b16 %v15167_v23  ;;  %v11660_v52 = vld [vmem:[%s20372_s3 + $0x270] sm:$0xf] }
 0x2d2   : > { %2111 = vmatmul.bf16.vlgmr.msrb.gmra.mxu1 %v11357_v53  ;;  %2078 = vmatmul.bf16.gmra.mxu3 %v11577_v8  ;;  %v11413_v8 = vor.u32 %v13675_v35, %v11410_v26  ;;  %v15373_v26 = vld [vmem:[%s20372_s3 + $0x2a8] sm:$0x33] }
 0x2d3   : > { %v15268_v38 = vpop.f32.mrf.mxu1  ;;  %2020 = vmatmul.bf16.gmra.mxu2 %v11657_v45  ;;  %v13647_v45 = vld [vmem:[%s14854_s14 + $0x160] sm:$0xff]  ;;  %v1670_v20 = vunpack.c.l.b16 %v15373_v26 }
 0x2d4   : > { %v1078_v56 = vpop.f32.mrf.mxu0  ;;  %20546 = vst [vmem:[#allocation10_spill] sm:$0xff] %v15268_v38  ;;  %v1671_v38 = vunpack.c.h.b16 %v15373_v26 }
 0x2d5   : > { %v2039_v2 = vpop.f32.mrf.mxu3  ;;  %v1079_v46 = vadd.f32 %v14868_v18, %v1078_v56  ;;  %v15294_v18 = vld [vmem:[%s20371_s2] ss:$0 sm:$0xff]  ;;  %v1981_v15 = vpop.f32.mrf.mxu2 }
 0x2d6   : > { %v15266_v4 = vadd.f32 %v2039_v2, %v1967_v63  ;;  %v1760_v2 = vpack.c.b16 %v1669_v57, %v1669_v57 }
 0x2d7   : > { %1117 = vmatmul.bf16.gmra.mxu0 %v13645_v0  ;;  %v1221_v21 = vmax.f32 %v1079_v46, 0.0 }
 0x2db   : > { %v15299_v27 = vpop.f32.mrf.mxu1 }
 0x2dc   : > { %v1080_v11 = vpop.f32.mrf.mxu0 }
 0x2dd   : > { %v1081_v50 = vadd.f32 %v15294_v18, %v1080_v11  ;;  %v2041_v13 = vpop.f32.mrf.mxu3  ;;  %v15306_v42 = vpop.f32.mrf.mxu2  ;;  %v13741_v11 = vld [vmem:[%s20372_s3 + $0x288] sm:$0xf0] }
 0x2de   : > { %v15297_v17 = vadd.f32 %v2041_v13, %v1969_v12 }
 0x2df   : > { %v1222_v25 = vmax.f32 %v1081_v50, 0.0 }
 0x2e1   : > { %v15301_v36 = vpack.c.bf16 %v1222_v25, %v1221_v21  ;;  %v1982_v25 = vadd.f32 %v1981_v15, %v15141_v9  ;;  %v13689_v9 = vld [vmem:[%s20372_s3 + $0xec] sm:$0xf]  ;;  %v11466_v15 = vld [vmem:[%s20372_s3 + $0x104] sm:$0xf0] }
 0x2e2   : > { %2116 = vmatmul.bf16.gmra.mxu1 %v11385_v16  ;;  %2083 = vmatmul.bf16.gmra.mxu3 %v11605_v19  ;;  %v11441_v16 = vor.u32 %v13682_v28, %v11438_v61  ;;  %v11661_v19 = vor.u32 %v13741_v11, %v11660_v52  ;;  %v13696_v61 = vld [vmem:[%s20372_s3 + $0x124] sm:$0xf] }
 0x2e3   : > { %v15310_v48 = vpop.f32.mrf.mxu1  ;;  %2025 = vmatmul.bf16.gmra.mxu2 %v1760_v2 }
 0x2e4   : > { %v1083_v39 = vpop.f32.mrf.mxu0  ;;  %20547 = vst [vmem:[#allocation11_spill] sm:$0xff] %v15310_v48 }
 0x2e5   : > { %v2044_v41 = vpop.f32.mrf.mxu3  ;;  %v1084_v29 = vadd.f32 %v15294_v18, %v1083_v39  ;;  %v1986_v53 = vpop.f32.mrf.mxu2 }
 0x2e6   : > { %v15308_v43 = vadd.f32 %v2044_v41, %v1972_v33  ;;  %v13648_v33 = vld [vmem:[%s14854_s14 + $0x168] sm:$0xff] }
 0x2e7   : > { %1122 = vmatmul.bf16.gmra.mxu0 %v13646_v5  ;;  %v1223_v63 = vmax.f32 %v1084_v29, 0.0 }
 0x2eb   : > { %v15329_v56 = vpop.f32.mrf.mxu1 }
 0x2ec   : > { %v1085_v24 = vpop.f32.mrf.mxu0 }
 0x2ed   : > { %v1086_v47 = vadd.f32 %v15294_v18, %v1085_v24  ;;  %v15326_v49 = vpop.f32.mrf.mxu3  ;;  %v15338_v59 = vpop.f32.mrf.mxu2 }
 0x2ef   : > { %v1224_v0 = vmax.f32 %v1086_v47, 0.0 }
 0x2f1   : > { %v15331_v58 = vpack.c.bf16 %v1224_v0, %v1223_v63  ;;  %v1987_v63 = vadd.f32 %v1986_v53, %v15170_v30  ;;  %v13649_v0 = vld [vmem:[%s14854_s14 + $0x170] sm:$0xff]  ;;  %v11494_v30 = vld [vmem:[%s20372_s3 + $0x13c] sm:$0xf0] }
 0x2f2   : > { %2121 = vmatmul.bf16.gmra.mxu1 %v11413_v8  ;;  %2088 = vmatmul.bf16.gmra.mxu3 %v11633_v55  ;;  %v11469_v8 = vor.u32 %v13689_v9, %v11466_v15  ;;  %v1761_v55 = vpack.c.b16 %v1670_v20, %v1670_v20 }
 0x2f3   : > { %v15342_v10 = vpop.f32.mrf.mxu1 }
 0x2f4   : > { %v15336_v22 = vpop.f32.mrf.mxu0  ;;  %20548 = vst [vmem:[#allocation12_spill] sm:$0xff] %v15342_v10 }
 0x2f5   : > { %v2049_v46 = vpop.f32.mrf.mxu3  ;;  %v1991_v13 = vpop.f32.mrf.mxu2 }
 0x2f6   : > { %v15340_v23 = vadd.f32 %v2049_v46, %v1977_v6 }
 0x2f7   : > { %1127 = vmatmul.bf16.gmra.mxu0 %v13647_v45 }
 0x2fb   : > { %v15360_v21 = vpop.f32.mrf.mxu1 }
 0x2fc   : > { %v15356_v12 = vpop.f32.mrf.mxu0 }
 0x2fd   : > { %v15358_v50 = vpop.f32.mrf.mxu3  ;;  %v15364_v41 = vpop.f32.mrf.mxu2 }
 0x302   : > { %2126 = vmatmul.bf16.gmra.mxu1 %v11441_v16  ;;  %2093 = vmatmul.bf16.gmra.mxu3 %v11661_v19  ;;  %v11497_v16 = vor.u32 %v13696_v61, %v11494_v30 }
 0x303   : > { %v15368_v29 = vpop.f32.mrf.mxu1 }
 0x304   : > { %v1093_v5 = vpop.f32.mrf.mxu0  ;;  %20549 = vst [vmem:[#allocation13_spill] sm:$0xff] %v15368_v29 }
 0x305   : > { %v2054_v39 = vpop.f32.mrf.mxu3  ;;  %v1996_v47 = vpop.f32.mrf.mxu2 }
 0x306   : > { %v15366_v35 = vadd.f32 %v2054_v39, %v1982_v25  ;;  %v1992_v25 = vadd.f32 %v1991_v13, %v15193_v54  ;;  %v1997_v29 = vadd.f32 %v1996_v47, %v15222_v31  ;;  %v1089_v31 = vadd.f32 %v15294_v18, %v15336_v22 }
 0x307   : > { %1132 = vmatmul.bf16.gmra.mxu0 %v13648_v33  ;;  %v13650_v33 = vld [vmem:[%s14854_s14 + $0x178] sm:$0xff] }
 0x30b   : > { %v15384_v57 = vpop.f32.mrf.mxu1 }
 0x30c   : > { %v1095_v44 = vpop.f32.mrf.mxu0 }
 0x30d   : > { %v15382_v24 = vpop.f32.mrf.mxu3  ;;  %v15388_v45 = vpop.f32.mrf.mxu2 }
 0x30e   : > { %20550 = vst [vmem:[#allocation14_spill] sm:$0xff] %v15388_v45 }
 0x312   : > { %2131 = vmatmul.bf16.gmra.mxu1 %v11469_v8  ;;  %2098 = vmatmul.bf16.gmra.mxu3 %v1761_v55 }
 0x313   : > { %v15392_v28 = vpop.f32.mrf.mxu1 }
 0x314   : > { %v1098_v2 = vpop.f32.mrf.mxu0  ;;  %20551 = vst [vmem:[#allocation15_spill] sm:$0xff] %v15392_v28 }
 0x315   : > { %v2059_v6 = vpop.f32.mrf.mxu3  ;;  %v2001_v11 = vpop.f32.mrf.mxu2 }
 0x316   : > { %v15390_v46 = vadd.f32 %v2059_v6, %v1987_v63  ;;  %v13703_v63 = vld [vmem:[%s20372_s3 + $0x15c] sm:$0xf] }
 0x317   : > { %1137 = vmatmul.bf16.gmra.mxu0 %v13649_v0  ;;  %v11522_v0 = vld [vmem:[%s20372_s3 + $0x174] sm:$0xf0] }
 0x31b   : > { %v15402_v19 = vpop.f32.mrf.mxu1 }
 0x31c   : > { %v1100_v53 = vpop.f32.mrf.mxu0 }
 0x31d   : > { %v15400_v52 = vpop.f32.mrf.mxu3  ;;  %v15406_v9 = vpop.f32.mrf.mxu2  ;;  %v1101_v13 = vadd.f32 %v15294_v18, %v1100_v53  ;;  %v1094_v53 = vadd.f32 %v15294_v18, %v1093_v5 }
 0x31e   : > { %20552 = vst [vmem:[#allocation16_spill] sm:$0xff] %v15406_v9 }
 0x31f   : > { %v1227_v47 = vmax.f32 %v1094_v53, 0.0 }
 0x322   : > { %2136 = vmatmul.bf16.gmra.mxu1 %v11497_v16  ;;  %v11525_v16 = vor.u32 %v13703_v63, %v11522_v0  ;;  %v1091_v63 = vadd.f32 %v15294_v18, %v15356_v12  ;;  %v13710_v12 = vld [vmem:[%s20372_s3 + $0x194] sm:$0xf] }
 0x323   : > { %v1955_v8 = vpop.f32.mrf.mxu1 }
 0x324   : > { %v1103_v39 = vpop.f32.mrf.mxu0  ;;  %v1230_v8 = vmax.f32 %v1101_v13, 0.0  ;;  %v1226_v5 = vmax.f32 %v1091_v63, 0.0  ;;  %v1225_v13 = vmax.f32 %v1089_v31, 0.0  ;;  %v13717_v63 = vld [vmem:[%s20372_s3 + $0x1cc] sm:$0xf] }
 0x325   : > { %v2064_v20 = vpop.f32.mrf.mxu3  ;;  %v1104_v55 = vadd.f32 %v15294_v18, %v1103_v39  ;;  %v2006_v30 = vpop.f32.mrf.mxu2 }
 0x326   : > { %v15408_v15 = vadd.f32 %v2064_v20, %v1992_v25  ;;  %v1099_v25 = vadd.f32 %v15294_v18, %v1098_v2  ;;  %v1096_v20 = vadd.f32 %v15294_v18, %v1095_v44 }
 0x327   : > { %1142 = vmatmul.bf16.gmra.mxu0 %v13650_v33  ;;  %v1231_v33 = vmax.f32 %v1104_v55, 0.0 }
 0x328   : > { %v1229_v10 = vmax.f32 %v1099_v25, 0.0  ;;  %v1228_v2 = vmax.f32 %v1096_v20, 0.0 }
 0x32a   : > { %v1389_v55 = vpack.c.bf16 %v1230_v8, %v1229_v10  ;;  %v11550_v10 = vld [vmem:[%s20372_s3 + $0x1ac] sm:$0xf0] }
 0x32c   : > { %v1105_v54 = vpop.f32.mrf.mxu0 }
 0x32d   : > { %v1106_v6 = vadd.f32 %v15294_v18, %v1105_v54  ;;  %v15419_v61 = vpop.f32.mrf.mxu3  ;;  %v13651_v54 = vld [vmem:[%s14854_s14 + $0x180] sm:$0xff] }
 0x32e   : > { %20553 = vst [vmem:[#allocation17_spill] sm:$0xff] %v15419_v61 }
 0x32f   : > { %v1232_v39 = vmax.f32 %v1106_v6, 0.0  ;;  %v15430_v6 = vpop.f32.mrf.mxu2 }
 0x330   : > { %20554 = vst [vmem:[#allocation18_spill] sm:$0xff] %v15430_v6 }
 0x331   : > { %v1390_v28 = vpack.c.bf16 %v1232_v39, %v1231_v33  ;;  %v11553_v33 = vor.u32 %v13710_v12, %v11550_v10  ;;  %v2002_v39 = vadd.f32 %v2001_v11, %v15257_v60  ;;  %v11578_v60 = vld [vmem:[%s20372_s3 + $0x1e4] sm:$0xf0]  ;;  %v13665_v11 = vld [vmem:[%s20372_s3 + $0x28] sm:$0xf0] }
 0x332   : > { %2141 = vmatmul.bf16.gmra.mxu1 %v11525_v16  ;;  %v1387_v16 = vpack.c.bf16 %v1226_v5, %v1225_v13  ;;  %v2007_v5 = vadd.f32 %v2006_v30, %v15299_v27  ;;  %v11388_v27 = vld [vmem:[%s20372_s3 + $0x48] sm:$0xf]  ;;  %v13672_v30 = vld [vmem:[%s20372_s3 + $0x60] sm:$0xf0] }
 0x333   : > { %2176 = vmatpush.bf16.msrb.mxu2 %v1390_v28  ;;  %v1388_v28 = vpack.c.bf16 %v1228_v2, %v1227_v47 }
 0x334   : > { %v15426_v48 = vpop.f32.mrf.mxu0 }
 0x335   : > { %v2069_v0 = vpop.f32.mrf.mxu3 }
 0x336   : > { %v15432_v44 = vadd.f32 %v2069_v0, %v1997_v29 }
 0x337   : > { %1147 = vmatmul.bf16.gmra.mxu0 %v13651_v54  ;;  %2177 = vmatpush.bf16.msrb.mxu2 %v1389_v55  ;;  %v2011_v22 = vpop.f32.mrf.mxu2  ;;  %v11581_v55 = vor.u32 %v13717_v63, %v11578_v60  ;;  %v11389_v63 = vor.u32 %v13672_v30, %v11388_v27 }
 0x33b   : > { %2178 = vmatpush.bf16.msrb.mxu2 %v1388_v28 }
 0x33c   : > { %v15442_v29 = vpop.f32.mrf.mxu0 }
 0x33d   : > { %v15444_v25 = vpop.f32.mrf.mxu3 }
 0x33e   : > { %20555 = vst [vmem:[#allocation19_spill] sm:$0xff] %v15444_v25 }
 0x33f   : > { %2179 = vmatpush.bf16.msrb.mxu2 %v1387_v16  ;;  %v15452_v54 = vpop.f32.mrf.mxu2 }
 0x340   : > { %20556 = vst [vmem:[#allocation20_spill] sm:$0xff] %v15452_v54 }
 0x342   : > { %2146 = vmatmul.bf16.gmra.mxu1 %v11553_v33  ;;  %v11606_v33 = vld [vmem:[%s20372_s3 + $0x21c] sm:$0xf0] }
 0x343   : > { %2180 = vmatpush.bf16.msrb.mxu2 %v15331_v58  ;;  %v11360_v58 = vld [vmem:[%s20372_s3 + $0x10] sm:$0xf] }
 0x344   : > { %v15448_v20 = vpop.f32.mrf.mxu0  ;;  %v11361_v0 = vor.u32 %v13665_v11, %v11360_v58  ;;  %v2012_v11 = vadd.f32 %v2011_v22, %v15329_v56  ;;  %v11416_v56 = vld [vmem:[%s20372_s3 + $0x80] sm:$0xf]  ;;  %v13679_v22 = vld [vmem:[%s20372_s3 + $0x98] sm:$0xf0] }
 0x345   : > { %v2074_v8 = vpop.f32.mrf.mxu3  ;;  %v11417_v30 = vor.u32 %v13679_v22, %v11416_v56 }
 0x346   : > { %v15450_v53 = vadd.f32 %v2074_v8, %v2002_v39 }
 0x347   : > { %2181 = vmatpush.bf16.msrb.mxu2 %v15301_v36  ;;  %v2016_v47 = vpop.f32.mrf.mxu2 }
 0x34b   : > { %2182 = vmatpush.bf16.msrb.mxu2 %v15259_v62 }
 0x34c   : > { %v15468_v2 = vpop.f32.mrf.mxu0 }
 0x34d   : > { %v15470_v36 = vpop.f32.mrf.mxu3 }
 0x34e   : > { %20557 = vst [vmem:[#allocation21_spill] sm:$0xff] %v15470_v36 }
 0x34f   : > { %v2112_v31 = vpop.f32.mrf.mxu1  ;;  %2183 = vmatpush.bf16.msrb.mxu2 %v15224_v34  ;;  %v13724_v34 = vld [vmem:[%s20372_s3 + $0x204] sm:$0xf] }
 0x350   : > { %v15474_v62 = vadd.f32 %v2112_v31, %v15266_v4  ;;  %v15487_v4 = vpop.f32.mrf.mxu2  ;;  %v11609_v8 = vor.u32 %v13724_v34, %v11606_v33 }
 0x351   : > { %20558 = vst [vmem:[#allocation22_spill] sm:$0xff] %v15487_v4 }
 0x352   : > { %2151 = vmatmul.bf16.gmra.mxu1 %v11581_v55  ;;  %2184 = vmatmul.bf16.vlgmr.msrb.gmra.mxu2 %v11361_v0 }
 0x354   : > { %v15477_v28 = vpop.f32.mrf.mxu0 }
 0x355   : > { %v2079_v13 = vpop.f32.mrf.mxu3 }
 0x356   : > { %v15479_v12 = vadd.f32 %v2079_v13, %v2007_v5 }
 0x357   : > { %v2114_v10 = vpop.f32.mrf.mxu1 }
 0x358   : > { %v15482_v16 = vadd.f32 %v2114_v10, %v15297_v17  ;;  %v2021_v0 = vpop.f32.mrf.mxu2  ;;  %v13731_v10 = vld [vmem:[%s20372_s3 + $0x23c] sm:$0xf] }
 0x35c   : > { %v15498_v17 = vpop.f32.mrf.mxu0 }
 0x35d   : > { %v15500_v39 = vpop.f32.mrf.mxu3 }
 0x35e   : > { %20559 = vst [vmem:[#allocation23_spill] sm:$0xff] %v15500_v39 }
 0x35f   : > { %v2117_v60 = vpop.f32.mrf.mxu1 }
 0x360   : > { %v15503_v58 = vadd.f32 %v2117_v60, %v15308_v43  ;;  %v11634_v43 = vld [vmem:[%s20372_s3 + $0x254] sm:$0xf0] }
 0x361   : > { %v11637_v27 = vor.u32 %v13731_v10, %v11634_v43  ;;  %v13738_v10 = vld [vmem:[%s20372_s3 + $0x274] sm:$0xf] }
 0x362   : > { %2156 = vmatmul.bf16.gmra.mxu1 %v11609_v8  ;;  %2189 = vmatmul.bf16.gmra.mxu2 %v11389_v63  ;;  %v15528_v8 = vpop.f32.mrf.mxu2 }
 0x363   : > { %20561 = vst [vmem:[#allocation25_spill] sm:$0xff] %v15528_v8 }
 0x364   : > { %v15506_v55 = vpop.f32.mrf.mxu0 }
 0x365   : > { %v2084_v31 = vpop.f32.mrf.mxu3 }
 0x366   : > { %v15508_v5 = vadd.f32 %v2084_v31, %v2012_v11  ;;  %v2017_v11 = vadd.f32 %v2016_v47, %v15360_v21  ;;  %v11444_v21 = vld [vmem:[%s20372_s3 + $0xb8] sm:$0xf]  ;;  %v13686_v47 = vld [vmem:[%s20372_s3 + $0xd0] sm:$0xf0] }
 0x367   : > { %v15510_v13 = vpop.f32.mrf.mxu1  ;;  %v11445_v22 = vor.u32 %v13686_v47, %v11444_v21 }
 0x36a   : > { %v2026_v39 = vpop.f32.mrf.mxu2 }
 0x36b   : > { %v2027_v26 = vadd.f32 %v2026_v39, %v15402_v19 }
 0x36c   : > { %v15524_v34 = vpop.f32.mrf.mxu0 }
 0x36d   : > { %v15526_v33 = vpop.f32.mrf.mxu3 }
 0x36e   : > { %20560 = vst [vmem:[#allocation24_spill] sm:$0xff] %v15526_v33 }
 0x36f   : > { %v2122_v63 = vpop.f32.mrf.mxu1 }
 0x370   : > { %v15531_v60 = vadd.f32 %v2122_v63, %v15340_v23  ;;  %v11662_v23 = vld [vmem:[%s20372_s3 + $0x28c] sm:$0xf0] }
 0x371   : > { %v11665_v56 = vor.u32 %v13738_v10, %v11662_v23  ;;  %v11472_v10 = vld [vmem:[%s20372_s3 + $0xf0] sm:$0xf] }
 0x372   : > { %2161 = vmatmul.bf16.gmra.mxu1 %v11637_v27  ;;  %2194 = vmatmul.bf16.gmra.mxu2 %v11417_v30  ;;  %v2028_v27 = vpop.f32.mrf.mxu2 }
 0x374   : > { %v15534_v31 = vpop.f32.mrf.mxu0 }
 0x375   : > { %v2089_v4 = vpop.f32.mrf.mxu3 }
 0x376   : > { %v15536_v54 = vadd.f32 %v2089_v4, %v2017_v11  ;;  %v2022_v11 = vadd.f32 %v2021_v0, %v15384_v57  ;;  %v1762_v57 = vpack.c.b16 %v1671_v38, %v1671_v38  ;;  %v13700_v38 = vld [vmem:[%s20372_s3 + $0x140] sm:$0xf0] }
 0x377   : > { %v15538_v6 = vpop.f32.mrf.mxu1 }
 0x37c   : > { %v1130_v4 = vpop.f32.mrf.mxu0 }
 0x37d   : > { %v15552_v43 = vpop.f32.mrf.mxu3 }
 0x37e   : > { %20562 = vst [vmem:[#allocation26_spill] sm:$0xff] %v15552_v43 }
 0x37f   : > { %v2127_v30 = vpop.f32.mrf.mxu1 }
 0x380   : > { %v15555_v63 = vadd.f32 %v2127_v30, %v15366_v35  ;;  %v13693_v35 = vld [vmem:[%s20372_s3 + $0x108] sm:$0xf0] }
 0x381   : > { %v11473_v0 = vor.u32 %v13693_v35, %v11472_v10 }
 0x382   : > { %2166 = vmatmul.bf16.gmra.mxu1 %v11665_v56  ;;  %2199 = vmatmul.bf16.gmra.mxu2 %v11445_v22 }
 0x384   : > { %v1133_v8 = vpop.f32.mrf.mxu0 }
 0x385   : > { %v2094_v33 = vpop.f32.mrf.mxu3 }
 0x386   : > { %v15558_v36 = vadd.f32 %v2094_v33, %v2022_v11  ;;  %v11500_v11 = vld [vmem:[%s20372_s3 + $0x128] sm:$0xf] }
 0x387   : > { %v15560_v9 = vpop.f32.mrf.mxu1  ;;  %v11501_v35 = vor.u32 %v13700_v38, %v11500_v11 }
 0x38c   : > { %v1135_v23 = vpop.f32.mrf.mxu0 }
 0x38d   : > { %v15569_v21 = vpop.f32.mrf.mxu3  ;;  %v1136_v25 = vadd.f32 %v15294_v18, %v1135_v23 }
 0x38e   : > { %20563 = vst [vmem:[#allocation27_spill] sm:$0xff] %v15569_v21 }
 0x38f   : > { %v2132_v47 = vpop.f32.mrf.mxu1 }
 0x390   : > { %v15572_v33 = vadd.f32 %v2132_v47, %v15390_v46 }
 0x392   : > { %2171 = vmatmul.bf16.gmra.mxu1 %v1762_v57  ;;  %2204 = vmatmul.bf16.gmra.mxu2 %v11473_v0 }
 0x394   : > { %v1138_v56 = vpop.f32.mrf.mxu0 }
 0x395   : > { %v2099_v22 = vpop.f32.mrf.mxu3 }
 0x396   : > { %v15575_v27 = vadd.f32 %v2099_v22, %v2027_v26  ;;  %v11528_v26 = vld [vmem:[%s20372_s3 + $0x160] sm:$0xf]  ;;  %v13707_v22 = vld [vmem:[%s20372_s3 + $0x178] sm:$0xf0] }
 0x397   : > { %v15577_v30 = vpop.f32.mrf.mxu1  ;;  %v11529_v38 = vor.u32 %v13707_v22, %v11528_v26  ;;  %v1131_v26 = vadd.f32 %v15294_v18, %v1130_v4  ;;  %v1244_v22 = vmax.f32 %v1136_v25, 0.0  ;;  %v1121_v25 = vadd.f32 %v15294_v18, %v15498_v17  ;;  %v13666_v17 = vld [vmem:[%s20372_s3 + $0x30] sm:$0xf0] }
 0x399   : > { %v1242_v23 = vmax.f32 %v1131_v26, 0.0  ;;  %v11368_v26 = vld [vmem:[%s20372_s3 + $0x18] sm:$0xf] }
 0x39c   : > { %v1140_v46 = vpop.f32.mrf.mxu0 }
 0x39d   : > { %v2101_v10 = vpop.f32.mrf.mxu3  ;;  %v1141_v11 = vadd.f32 %v15294_v18, %v1140_v46 }
 0x39f   : > { %v2137_v57 = vpop.f32.mrf.mxu1  ;;  %v1246_v45 = vmax.f32 %v1141_v11, 0.0 }
 0x3a0   : > { %v15586_v19 = vadd.f32 %v2137_v57, %v15408_v15 }
 0x3a2   : > { %2209 = vmatmul.bf16.gmra.mxu2 %v11501_v35  ;;  %v1139_v35 = vadd.f32 %v15294_v18, %v1138_v56 }
 0x3a4   : > { %v1143_v39 = vpop.f32.mrf.mxu0  ;;  %v1245_v61 = vmax.f32 %v1139_v35, 0.0 }
 0x3a5   : > { %v1144_v47 = vadd.f32 %v15294_v18, %v1143_v39 }
 0x3a6   : > { %v1397_v56 = vpack.c.bf16 %v1246_v45, %v1245_v61  ;;  %v11556_v45 = vld [vmem:[%s20372_s3 + $0x198] sm:$0xf]  ;;  %v13714_v61 = vld [vmem:[%s20372_s3 + $0x1b0] sm:$0xf0] }
 0x3a7   : > { %v15588_v0 = vpop.f32.mrf.mxu1  ;;  %v1247_v57 = vmax.f32 %v1144_v47, 0.0  ;;  %v1129_v47 = vadd.f32 %v15294_v18, %v15534_v31 }
 0x3a8   : > { %20564 = vst [vmem:[#allocation28_spill] sm:$0xff] %v15588_v0  ;;  %v1134_v0 = vadd.f32 %v15294_v18, %v1133_v8 }
 0x3a9   : > { %v1241_v4 = vmax.f32 %v1129_v47, 0.0  ;;  %v1238_v47 = vmax.f32 %v1121_v25, 0.0 }
 0x3ac   : > { %v1145_v10 = vpop.f32.mrf.mxu0 }
 0x3ad   : > { %v1146_v15 = vadd.f32 %v15294_v18, %v1145_v10  ;;  %v1243_v10 = vmax.f32 %v1134_v0, 0.0 }
 0x3af   : > { %v1248_v21 = vmax.f32 %v1146_v15, 0.0  ;;  %v2142_v43 = vpop.f32.mrf.mxu1  ;;  %v1395_v15 = vpack.c.bf16 %v1242_v23, %v1241_v4  ;;  %v13802_v23 = vld [vmem:[%s20373_s4 + $0x178] sm:$0xff]  ;;  %v1109_v4 = vadd.f32 %v15294_v18, %v15426_v48  ;;  %v11362_v48 = vld [vmem:[%s20372_s3 + $0x2c] sm:$0xf0] }
 0x3b0   : > { %v15601_v39 = vadd.f32 %v2142_v43, %v15432_v44  ;;  %v1126_v43 = vadd.f32 %v15294_v18, %v15524_v34  ;;  %3794 = vmatpush.bf16.msrb.mxu0 %v13802_v23 }
 0x3b1   : > { %v1398_v32 = vpack.c.bf16 %v1248_v21, %v1247_v57  ;;  %v1396_v21 = vpack.c.bf16 %v1244_v22, %v1243_v10 }
 0x3b2   : > { %2214 = vmatmul.bf16.gmra.mxu2 %v11529_v38  ;;  %v1240_v31 = vmax.f32 %v1126_v43, 0.0  ;;  %v1119_v38 = vadd.f32 %v15294_v18, %v15477_v28  ;;  %v11369_v43 = vor.u32 %v13666_v17, %v11368_v26 }
 0x3b3   : > { %2249 = vmatpush.bf16.msrb.mxu3 %v1398_v32  ;;  %v1124_v32 = vadd.f32 %v15294_v18, %v15506_v55  ;;  %v11557_v55 = vor.u32 %v13714_v61, %v11556_v45 }
 0x3b4   : > { %v1148_v46 = vpop.f32.mrf.mxu0 }
 0x3b5   : > { %v1149_v8 = vadd.f32 %v15294_v18, %v1148_v46  ;;  %v1239_v35 = vmax.f32 %v1124_v32, 0.0 }
 0x3b7   : > { %v15608_v44 = vpop.f32.mrf.mxu1  ;;  %2250 = vmatpush.bf16.msrb.mxu3 %v1397_v56  ;;  %v1249_v0 = vmax.f32 %v1149_v8, 0.0  ;;  %v1116_v56 = vadd.f32 %v15294_v18, %v15468_v2  ;;  %v1394_v10 = vpack.c.bf16 %v1240_v31, %v1239_v35  ;;  %v1114_v8 = vadd.f32 %v15294_v18, %v15448_v20  ;;  %v11584_v31 = vld [vmem:[%s20372_s3 + $0x1d0] sm:$0xf]  ;;  %v13673_v35 = vld [vmem:[%s20372_s3 + $0x68] sm:$0xf0] }
 0x3b9   : > { %v1236_v2 = vmax.f32 %v1116_v56, 0.0  ;;  %v1235_v45 = vmax.f32 %v1114_v8, 0.0 }
 0x3bb   : > { %2251 = vmatpush.bf16.msrb.mxu3 %v1396_v21  ;;  %v1237_v21 = vmax.f32 %v1119_v38, 0.0  ;;  %v1392_v25 = vpack.c.bf16 %v1236_v2, %v1235_v45  ;;  %v11396_v38 = vld [vmem:[%s20372_s3 + $0x50] sm:$0xf]  ;;  %v13680_v2 = vld [vmem:[%s20372_s3 + $0xa0] sm:$0xf0] }
 0x3bc   : > { %v1150_v34 = vpop.f32.mrf.mxu0 }
 0x3bd   : > { %v1151_v11 = vadd.f32 %v15294_v18, %v1150_v34  ;;  %v1393_v32 = vpack.c.bf16 %v1238_v47, %v1237_v21  ;;  %v1233_v34 = vmax.f32 %v1109_v4, 0.0  ;;  %v11612_v47 = vld [vmem:[%s20372_s3 + $0x208] sm:$0xf] }
 0x3bf   : > { %v1250_v57 = vmax.f32 %v1151_v11, 0.0  ;;  %v2147_v46 = vpop.f32.mrf.mxu1  ;;  %2252 = vmatpush.bf16.msrb.mxu3 %v1395_v15 }
 0x3c0   : > { %v15633_v22 = vadd.f32 %v2147_v46, %v15450_v53  ;;  %v1111_v53 = vadd.f32 %v15294_v18, %v15442_v29  ;;  %v13721_v29 = vld [vmem:[%s20372_s3 + $0x1e8] sm:$0xf0]  ;;  %v13662_v18 = vld [vmem:[%s20372_s3 + $0x14] sm:$0xf]  ;;  %v11397_v46 = vor.u32 %v13673_v35, %v11396_v38 }
 0x3c1   : > { %v1399_v28 = vpack.c.bf16 %v1250_v57, %v1249_v0  ;;  %v11585_v11 = vor.u32 %v13721_v29, %v11584_v31  ;;  %v11365_v15 = vor.u32 %v13662_v18, %v11362_v48 }
 0x3c2   : > { %2219 = vmatmul.bf16.gmra.mxu2 %v11557_v55  ;;  %v1234_v20 = vmax.f32 %v1111_v53, 0.0  ;;  %v11424_v53 = vld [vmem:[%s20372_s3 + $0x88] sm:$0xf] }
 0x3c3   : > { %2253 = vmatpush.bf16.msrb.mxu3 %v1394_v10  ;;  %2329 = vmatpush.bf16.msra.mxu1 %v1399_v28  ;;  %v13669_v28 = vld [vmem:[%s20372_s3 + $0x4c] sm:$0xf]  ;;  %v11425_v4 = vor.u32 %v13680_v2, %v11424_v53 }
 0x3c4   : > { %v1391_v0 = vpack.c.bf16 %v1234_v20, %v1233_v34  ;;  %v13676_v34 = vld [vmem:[%s20372_s3 + $0x84] sm:$0xf] }
 0x3c6   : > { %11678 = vmatmul.msk.bf16.vlgmr.msra.gmra.mxu1 %vm1844_vm0, %v11369_v43 }
 0x3c7   : > { %v15647_v61 = vpop.f32.mrf.mxu1  ;;  %2254 = vmatpush.bf16.msrb.mxu3 %v1393_v32 }
 0x3cb   : > { %2255 = vmatpush.bf16.msrb.mxu3 %v1392_v25  ;;  %v11640_v25 = vld [vmem:[%s20372_s3 + $0x240] sm:$0xf] }
 0x3cf   : > { %v2152_v55 = vpop.f32.mrf.mxu1  ;;  %2256 = vmatpush.bf16.msrb.mxu3 %v1391_v0  ;;  %v11452_v0 = vld [vmem:[%s20372_s3 + $0xc0] sm:$0xf] }
 0x3d0   : > { %v15668_v57 = vadd.f32 %v2152_v55, %v15479_v12  ;;  %v13728_v12 = vld [vmem:[%s20372_s3 + $0x220] sm:$0xf0] }
 0x3d1   : > { %v11613_v23 = vor.u32 %v13728_v12, %v11612_v47  ;;  %v13683_v47 = vld [vmem:[%s20372_s3 + $0xbc] sm:$0xf] }
 0x3d2   : > { %2224 = vmatmul.bf16.gmra.mxu2 %v11585_v11  ;;  %2257 = vmatmul.bf16.vlgmr.msrb.gmra.mxu3 %v11365_v15  ;;  %v13687_v11 = vld [vmem:[%s20372_s3 + $0xd8] sm:$0xf0] }
 0x3d3   : > { %v11453_v55 = vor.u32 %v13687_v11, %v11452_v0  ;;  %v13701_v0 = vld [vmem:[%s20372_s3 + $0x148] sm:$0xf0] }
 0x3d5   : > { %v2185_v26 = vpop.f32.mrf.mxu2 }
 0x3d6   : > { %v15671_v17 = vadd.f32 %v2185_v26, %v15474_v62  ;;  %11679 = vmatmul.msk.bf16.gmra.mxu1 %vm1844_vm0, %v11397_v46  ;;  %v11390_v62 = vld [vmem:[%s20372_s3 + $0x64] sm:$0xf0]  ;;  %v11668_v26 = vld [vmem:[%s20372_s3 + $0x278] sm:$0xf] }
 0x3d7   : > { %v15674_v56 = vpop.f32.mrf.mxu1  ;;  %v11393_v8 = vor.u32 %v13669_v28, %v11390_v62 }
 0x3dd   : > { %v2187_v10 = vpop.f32.mrf.mxu2 }
 0x3de   : > { %v15689_v43 = vadd.f32 %v2187_v10, %v15482_v16 }
 0x3df   : > { %v2157_v21 = vpop.f32.mrf.mxu1 }
 0x3e0   : > { %v15698_v32 = vadd.f32 %v2157_v21, %v15508_v5  ;;  %v13735_v5 = vld [vmem:[%s20372_s3 + $0x258] sm:$0xf0] }
 0x3e1   : > { %v11641_v29 = vor.u32 %v13735_v5, %v11640_v25  ;;  %v15767_v25 = vld [vmem:[%s20372_s3 + $0x2b0] sm:$0x33] }
 0x3e2   : > { %2229 = vmatmul.bf16.gmra.mxu2 %v11613_v23  ;;  %2262 = vmatmul.bf16.gmra.mxu3 %v11393_v8  ;;  %v11480_v23 = vld [vmem:[%s20372_s3 + $0xf8] sm:$0xf]  ;;  %v13694_v8 = vld [vmem:[%s20372_s3 + $0x110] sm:$0xf0]  ;;  %v1672_v5 = vunpack.c.l.b16 %v15767_v25 }
 0x3e3   : > { %v11481_v53 = vor.u32 %v13694_v8, %v11480_v23 }
 0x3e5   : > { %v2190_v45 = vpop.f32.mrf.mxu2 }
 0x3e6   : > { %v15701_v16 = vadd.f32 %v2190_v45, %v15503_v58  ;;  %11680 = vmatmul.msk.bf16.gmra.mxu1 %vm1844_vm0, %v11425_v4  ;;  %v11418_v58 = vld [vmem:[%s20372_s3 + $0x9c] sm:$0xf0] }
 0x3e7   : > { %v15704_v20 = vpop.f32.mrf.mxu1  ;;  %v11421_v18 = vor.u32 %v13676_v34, %v11418_v58  ;;  %v1763_v58 = vpack.c.b16 %v1672_v5, %v1672_v5  ;;  %v11530_v5 = vld [vmem:[%s20372_s3 + $0x17c] sm:$0xf0] }
 0x3e8   : > { %20565 = vst [vmem:[#allocation29_spill] sm:$0xff] %v15704_v20 }
 0x3ed   : > { %v15718_v31 = vpop.f32.mrf.mxu2 }
 0x3ef   : > { %v2162_v48 = vpop.f32.mrf.mxu1 }
 0x3f0   : > { %v15727_v15 = vadd.f32 %v2162_v48, %v15536_v54  ;;  %v13742_v54 = vld [vmem:[%s20372_s3 + $0x290] sm:$0xf0]  ;;  %v11508_v48 = vld [vmem:[%s20372_s3 + $0x130] sm:$0xf] }
 0x3f1   : > { %v11669_v28 = vor.u32 %v13742_v54, %v11668_v26 }
 0x3f2   : > { %2234 = vmatmul.bf16.gmra.mxu2 %v11641_v29  ;;  %2267 = vmatmul.bf16.gmra.mxu3 %v11421_v18 }
 0x3f5   : > { %v2195_v38 = vpop.f32.mrf.mxu2 }
 0x3f6   : > { %v15730_v35 = vadd.f32 %v2195_v38, %v15531_v60  ;;  %11681 = vmatmul.msk.bf16.gmra.mxu1 %vm1844_vm0, %v11453_v55  ;;  %v11446_v60 = vld [vmem:[%s20372_s3 + $0xd4] sm:$0xf0]  ;;  %v11509_v55 = vor.u32 %v13701_v0, %v11508_v48  ;;  %v13711_v0 = vld [vmem:[%s20372_s3 + $0x19c] sm:$0xf] }
 0x3f7   : > { %v15733_v46 = vpop.f32.mrf.mxu1  ;;  %v11449_v62 = vor.u32 %v13683_v47, %v11446_v60  ;;  %v13697_v47 = vld [vmem:[%s20372_s3 + $0x12c] sm:$0xf]  ;;  %v11502_v60 = vld [vmem:[%s20372_s3 + $0x144] sm:$0xf0] }
 0x3f8   : > { %20566 = vst [vmem:[#allocation30_spill] sm:$0xff] %v15733_v46 }
 0x3fd   : > { %v15747_v12 = vpop.f32.mrf.mxu2 }
 0x3ff   : > { %v2167_v10 = vpop.f32.mrf.mxu1 }
 0x400   : > { %v15756_v21 = vadd.f32 %v2167_v10, %v15558_v36  ;;  %v13690_v36 = vld [vmem:[%s20372_s3 + $0xf4] sm:$0xf] }
 0x402   : > { %2239 = vmatmul.bf16.gmra.mxu2 %v11669_v28  ;;  %2272 = vmatmul.bf16.gmra.mxu3 %v11449_v62  ;;  %v11505_v28 = vor.u32 %v13697_v47, %v11502_v60  ;;  %v11536_v62 = vld [vmem:[%s20372_s3 + $0x168] sm:$0xf]  ;;  %v11592_v47 = vld [vmem:[%s20372_s3 + $0x1d8] sm:$0xf] }
 0x403   : > { %v13770_v60 = vld [vmem:[%s20373_s4 + $0x78] sm:$0xff] }
 0x404   : > { %2739 = vmatpush.bf16.msra.mxu2 %v13770_v60 }
 0x405   : > { %v2200_v2 = vpop.f32.mrf.mxu2 }
 0x406   : > { %v15759_v4 = vadd.f32 %v2200_v2, %v15555_v63  ;;  %11682 = vmatmul.msk.bf16.gmra.mxu1 %vm1844_vm0, %v11481_v53  ;;  %v11474_v63 = vld [vmem:[%s20372_s3 + $0x10c] sm:$0xf0]  ;;  %v13704_v2 = vld [vmem:[%s20372_s3 + $0x164] sm:$0xf] }
 0x407   : > { %v15762_v45 = vpop.f32.mrf.mxu1  ;;  %v11477_v29 = vor.u32 %v13690_v36, %v11474_v63  ;;  %v13801_v53 = vld [vmem:[%s20373_s4 + $0x170] sm:$0xff]  ;;  %v11533_v63 = vor.u32 %v13704_v2, %v11530_v5 }
 0x408   : > { %20567 = vst [vmem:[#allocation31_spill] sm:$0xff] %v15762_v45  ;;  %3795 = vmatpush.bf16.msrb.mxu0 %v13801_v53  ;;  %v13768_v53 = vld [vmem:[%s20373_s4 + $0x68] sm:$0xff]  ;;  %v13718_v5 = vld [vmem:[%s20372_s3 + $0x1d4] sm:$0xf] }
 0x40d   : > { %v15776_v34 = vpop.f32.mrf.mxu2 }
 0x40f   : > { %v2172_v18 = vpop.f32.mrf.mxu1 }
 0x410   : > { %v15785_v11 = vadd.f32 %v2172_v18, %v15575_v27 }
 0x412   : > { %2244 = vmatmul.bf16.gmra.mxu2 %v1763_v58  ;;  %2277 = vmatmul.bf16.gmra.mxu3 %v11477_v29  ;;  %v13715_v58 = vld [vmem:[%s20372_s3 + $0x1b8] sm:$0xf0] }
 0x415   : > { %v2205_v38 = vpop.f32.mrf.mxu2 }
 0x416   : > { %v15788_v26 = vadd.f32 %v2205_v38, %v15572_v33  ;;  %11683 = vmatmul.msk.bf16.gmra.mxu1 %vm1844_vm0, %v11509_v55  ;;  %v13708_v33 = vld [vmem:[%s20372_s3 + $0x180] sm:$0xf0]  ;;  %v11558_v55 = vld [vmem:[%s20372_s3 + $0x1b4] sm:$0xf0] }
 0x417   : > { %v2174_v54 = vpop.f32.mrf.mxu1  ;;  %v11537_v10 = vor.u32 %v13708_v33, %v11536_v62 }
 0x418   : > { %v11561_v54 = vor.u32 %v13711_v0, %v11558_v55  ;;  %v13766_v0 = vld [vmem:[%s20373_s4 + $0x58] sm:$0xff] }
 0x41d   : > { %v15797_v27 = vpop.f32.mrf.mxu2 }
 0x422   : > { %2282 = vmatmul.bf16.gmra.mxu3 %v11505_v28 }
 0x425   : > { %v2210_v23 = vpop.f32.mrf.mxu2 }
 0x426   : > { %v15806_v8 = vadd.f32 %v2210_v23, %v15586_v19  ;;  %11684 = vmatmul.msk.bf16.gmra.mxu1 %vm1844_vm0, %v11537_v10  ;;  %v11564_v19 = vld [vmem:[%s20372_s3 + $0x1a0] sm:$0xf]  ;;  %v13769_v10 = vld [vmem:[%s20373_s4 + $0x70] sm:$0xff] }
 0x427   : > { %v11565_v29 = vor.u32 %v13715_v58, %v11564_v19  ;;  %2740 = vmatpush.bf16.msra.mxu2 %v13769_v10 }
 0x42b   : > { %2741 = vmatpush.bf16.msra.mxu2 %v13768_v53  ;;  %v13799_v53 = vld [vmem:[%s20373_s4 + $0x160] sm:$0xff] }
 0x42d   : > { %v15818_v36 = vpop.f32.mrf.mxu2 }
 0x432   : > { %2287 = vmatmul.bf16.gmra.mxu3 %v11533_v63  ;;  %v11586_v63 = vld [vmem:[%s20372_s3 + $0x1ec] sm:$0xf0] }
 0x433   : > { %v11589_v58 = vor.u32 %v13718_v5, %v11586_v63  ;;  %v13777_v5 = vld [vmem:[%s20373_s4 + $0xb0] sm:$0xff]  ;;  %v13764_v63 = vld [vmem:[%s20373_s4 + $0x48] sm:$0xff] }
 0x435   : > { %v2215_v18 = vpop.f32.mrf.mxu2 }
 0x436   : > { %v15827_v48 = vadd.f32 %v2215_v18, %v15601_v39  ;;  %11685 = vmatmul.msk.bf16.gmra.mxu1 %vm1844_vm0, %v11565_v29  ;;  %v13722_v39 = vld [vmem:[%s20372_s3 + $0x1f0] sm:$0xf0]  ;;  %v11620_v29 = vld [vmem:[%s20372_s3 + $0x210] sm:$0xf]  ;;  %v13729_v18 = vld [vmem:[%s20372_s3 + $0x228] sm:$0xf0] }
 0x437   : > { %v11593_v28 = vor.u32 %v13722_v39, %v11592_v47  ;;  %v11621_v55 = vor.u32 %v13729_v18, %v11620_v29  ;;  %v11614_v29 = vld [vmem:[%s20372_s3 + $0x224] sm:$0xf0] }
 0x43d   : > { %v15836_v38 = vpop.f32.mrf.mxu2 }
 0x442   : > { %2292 = vmatmul.bf16.gmra.mxu3 %v11561_v54  ;;  %v13800_v54 = vld [vmem:[%s20373_s4 + $0x168] sm:$0xff] }
 0x443   : > { %v2331_v62 = vpop.f32.mrf.mxu1  ;;  %3796 = vmatpush.bf16.msrb.mxu0 %v13800_v54  ;;  %v13776_v54 = vld [vmem:[%s20373_s4 + $0xa8] sm:$0xff] }
 0x445   : > { %v2220_v33 = vpop.f32.mrf.mxu2 }
 0x446   : > { %v15851_v23 = vadd.f32 %v2220_v33, %v15633_v22  ;;  %11686 = vmatmul.msk.bf16.gmra.mxu1 %vm1844_vm0, %v11593_v28  ;;  %v13767_v22 = vld [vmem:[%s20373_s4 + $0x60] sm:$0xff]  ;;  %v13778_v28 = vld [vmem:[%s20373_s4 + $0xb8] sm:$0xff]  ;;  %v13765_v33 = vld [vmem:[%s20373_s4 + $0x50] sm:$0xff] }
 0x447   : > { %2742 = vmatpush.bf16.msra.mxu2 %v13767_v22  ;;  %3056 = vmatpush.bf16.msrb.mxu1 %v13778_v28 }
 0x448   : > { %3797 = vmatpush.bf16.msrb.mxu0 %v13799_v53  ;;  %v13797_v53 = vld [vmem:[%s20373_s4 + $0x150] sm:$0xff] }
 0x44b   : > { %v2333_v2 = vpop.f32.mrf.mxu1  ;;  %2743 = vmatpush.bf16.msra.mxu2 %v13766_v0  ;;  %3057 = vmatpush.bf16.msrb.mxu1 %v13777_v5 }
 0x44d   : > { %v15863_v19 = vpop.f32.mrf.mxu2 }
 0x44f   : > { %2744 = vmatpush.bf16.msra.mxu2 %v13765_v33  ;;  %3058 = vmatpush.bf16.msrb.mxu1 %v13776_v54 }
 0x452   : > { %2297 = vmatmul.bf16.gmra.mxu3 %v11589_v58  ;;  %v13725_v58 = vld [vmem:[%s20372_s3 + $0x20c] sm:$0xf] }
 0x453   : > { %v15880_v47 = vpop.f32.mrf.mxu1  ;;  %2745 = vmatpush.bf16.msra.mxu2 %v13764_v63  ;;  %v11617_v33 = vor.u32 %v13725_v58, %v11614_v29 }
 0x455   : > { %v2225_v39 = vpop.f32.mrf.mxu2  ;;  %v2258_v60 = vpop.f32.mrf.mxu3 }
 0x456   : > { %v15889_v10 = vadd.f32 %v2225_v39, %v15668_v57  ;;  %11687 = vmatmul.msk.bf16.gmra.mxu1 %vm1844_vm0, %v11621_v55  ;;  %v13798_v57 = vld [vmem:[%s20373_s4 + $0x158] sm:$0xff]  ;;  %v2259_v18 = vadd.f32 %v2258_v60, %v15671_v17  ;;  %v13763_v39 = vld [vmem:[%s20373_s4 + $0x40] sm:$0xff]  ;;  %v11648_v17 = vld [vmem:[%s20372_s3 + $0x248] sm:$0xf] }
 0x457   : > { %3798 = vmatpush.bf16.msrb.mxu0 %v13798_v57  ;;  %v13736_v60 = vld [vmem:[%s20372_s3 + $0x260] sm:$0xf0]  ;;  %2746 = vmatpush.bf16.msra.mxu2 %v13763_v39  ;;  %v13774_v39 = vld [vmem:[%s20373_s4 + $0x98] sm:$0xff] }
 0x458   : > { %v2332_v5 = vadd.f32 %v2331_v62, %v2259_v18  ;;  %v13775_v57 = vld [vmem:[%s20373_s4 + $0xa0] sm:$0xff]  ;;  %v11649_v29 = vor.u32 %v13736_v60, %v11648_v17  ;;  %v13761_v18 = vld [vmem:[%s20373_s4 + $0x30] sm:$0xff]  ;;  %v13760_v60 = vld [vmem:[%s20373_s4 + $0x28] sm:$0xff] }
 0x459   : > { %3059 = vmatpush.bf16.msrb.mxu1 %v13775_v57 }
 0x45b   : > { %v15904_v22 = vpop.f32.mrf.mxu1  ;;  %3799 = vmatpush.bf16.msrb.mxu0 %v13797_v53  ;;  %v13795_v53 = vld [vmem:[%s20373_s4 + $0x140] sm:$0xff] }
 0x45d   : > { %v15913_v0 = vpop.f32.mrf.mxu2  ;;  %v2260_v55 = vpop.f32.mrf.mxu3  ;;  %3060 = vmatpush.bf16.msrb.mxu1 %v13774_v39 }
 0x45e   : > { %v2261_v28 = vadd.f32 %v2260_v55, %v15689_v43  ;;  %v13762_v43 = vld [vmem:[%s20373_s4 + $0x38] sm:$0xff]  ;;  %v13796_v55 = vld [vmem:[%s20373_s4 + $0x148] sm:$0xff] }
 0x45f   : > { %2876 = vmatpush.bf16.msra.mxu3 %v13762_v43  ;;  %3800 = vmatpush.bf16.msrb.mxu0 %v13796_v55  ;;  %v13772_v55 = vld [vmem:[%s20373_s4 + $0x88] sm:$0xff] }
 0x460   : > { %v2334_v63 = vadd.f32 %v2333_v2, %v2261_v28  ;;  %v1974_v28 = vadd.f32 %v15228_v40, %v15102_v51  ;;  %v13773_v51 = vld [vmem:[%s20373_s4 + $0x90] sm:$0xff] }
 0x461   : > { %3061 = vmatpush.bf16.msrb.mxu1 %v13773_v51 }
 0x462   : > { %v15937_v58 = vpack.c.bf16 %v2334_v63, %v2332_v5  ;;  %2302 = vmatmul.bf16.gmra.mxu3 %v11617_v33  ;;  %v2047_v17 = vadd.f32 %v15326_v49, %v1974_v28  ;;  %v13732_v5 = vld [vmem:[%s20372_s3 + $0x244] sm:$0xf]  ;;  %v11642_v49 = vld [vmem:[%s20372_s3 + $0x25c] sm:$0xf0] }
 0x463   : > { %v15942_v54 = vpop.f32.mrf.mxu1  ;;  %2877 = vmatpush.bf16.msra.mxu3 %v13761_v18  ;;  %3801 = vmatpush.bf16.msrb.mxu0 %v13795_v53  ;;  %v11645_v39 = vor.u32 %v13732_v5, %v11642_v49 }
 0x464   : > { %14225 = vst [vmem:[#allocation2] sm:$0xff] %v15937_v58   ;;  %v2120_v40 = vadd.f32 %v15510_v13, %v2047_v17  ;;  %v13759_v13 = vld [vmem:[%s20373_s4 + $0x20] sm:$0xff]  ;;  %v13758_v17 = vld [vmem:[%s20373_s4 + $0x18] sm:$0xff]  ;;  %v14284_v5 = vunpack.c.h.b16 %v15937_v58 }
 0x465   : > { %v2230_v62 = vpop.f32.mrf.mxu2  ;;  %v2263_v2 = vpop.f32.mrf.mxu3  ;;  %3062 = vmatpush.bf16.msrb.mxu1 %v13772_v55 }
 0x466   : > { %v15954_v33 = vadd.f32 %v2230_v62, %v15698_v32  ;;  %11688 = vmatmul.msk.bf16.gmra.mxu1 %vm1844_vm0, %v11649_v29  ;;  %v2193_v63 = vadd.f32 %v15718_v31, %v2120_v40  ;;  %v2264_v43 = vadd.f32 %v2263_v2, %v15701_v16  ;;  %v11676_v31 = vld [vmem:[%s20372_s3 + $0x280] sm:$0xf]  ;;  %v13743_v16 = vld [vmem:[%s20372_s3 + $0x298] sm:$0xf0] }
 0x467   : > { %2878 = vmatpush.bf16.msra.mxu3 %v13760_v60  ;;  %v13771_v60 = vld [vmem:[%s20373_s4 + $0x80] sm:$0xff]  ;;  %v11677_v40 = vor.u32 %v13743_v16, %v11676_v31  ;;  %v13756_v16 = vld [vmem:[%s20373_s4 + $0x8] sm:$0xff] }
 0x468   : > { %v2337_v2 = vadd.f32 %v15880_v47, %v2264_v43 }
 0x469   : > { %3063 = vmatpush.bf16.msrb.mxu1 %v13771_v60 }
 0x46b   : > { %v15968_v32 = vpop.f32.mrf.mxu1  ;;  %v2949_v62 = vld [vmem:[#allocation2] sm:$0xe]  ;;  %2879 = vmatpush.bf16.msra.mxu3 %v13759_v13  ;;  %v13757_v13 = vld [vmem:[%s20373_s4 + $0x10] sm:$0xff] }
 0x46c   : > { %v2967_v53 = vunpack.c.l.b16 %v2949_v62  ;;  %v3395_v47 = vld [vmem:[#allocation2] sm:$0xc]  ;;  %v2578_v62 = vshll.u32 %v15937_v58, 16 }
 0x46d   : > { %v15978_v57 = vpop.f32.mrf.mxu2  ;;  %v2265_v29 = vpop.f32.mrf.mxu3 }
 0x46e   : > { %20568 = vst [vmem:[#allocation32_spill] sm:$0xff] %v15978_v57  ;;  %v2266_v18 = vadd.f32 %v2265_v29, %v2193_v63  ;;  %v1979_v63 = vadd.f32 %v15264_v3, %v15127_v1  ;;  %v13739_v1 = vld [vmem:[%s20372_s3 + $0x27c] sm:$0xf]  ;;  %v11670_v3 = vld [vmem:[%s20372_s3 + $0x294] sm:$0xf0] }
 0x46f   : > { %2880 = vmatpush.bf16.msra.mxu3 %v13758_v17  ;;  %v11673_v60 = vor.u32 %v13739_v1, %v11670_v3 }
 0x470   : > { %v2339_v28 = vadd.f32 %v15904_v22, %v2266_v18  ;;  %v16006_v22 = vpack.c.b16 %v14284_v5, %v2967_v53  ;;  %v3413_v18 = vunpack.c.l.b16 %v3395_v47 }
 0x472   : > { %v16000_v51 = vpack.c.bf16 %v2339_v28, %v2337_v2  ;;  %2307 = vmatmul.bf16.gmra.mxu3 %v11645_v39  ;;  %v2052_v39 = vadd.f32 %v15358_v50, %v1979_v63  ;;  %v3176_v31 = vshrl.u32 %v16006_v22, 16  ;;  %v3179_v2 = vshll.u32 %v16006_v22, 16 }
 0x473   : > { %v16003_v49 = vpop.f32.mrf.mxu1  ;;  %2881 = vmatpush.bf16.msra.mxu3 %v13757_v13  ;;  %v2580_v50 = vrot.slane %v2578_v62, 1  ;;  %v3414_v28 = vpack.c.b16 %v14284_v5, %v3413_v18  ;;  %v2576_v63 = vshrl.u32 %v15937_v58, 16 }
 0x474   : > { %14381 = vst [vmem:[#allocation2 + $0x8] sm:$0xff] %v16000_v51   ;;  %v3178_v13 = vrot.slane %v3176_v31, 1  ;;  %v3181_v1 = vrot.slane %v3179_v2, 2 }
 0x475   : > { %v2235_v43 = vpop.f32.mrf.mxu2  ;;  %v2268_v29 = vpop.f32.mrf.mxu3  ;;  %v3416_v31 = vrot.slane %v3414_v28, 2 }
 0x476   : > { %v16014_v55 = vadd.f32 %v2235_v43, %v15727_v15  ;;  %11689 = vmatmul.msk.bf16.gmra.mxu1 %vm1844_vm0, %v11677_v40  ;;  %v2125_v15 = vadd.f32 %v15538_v6, %v2052_v39  ;;  %v1350_v6 = vld [vmem:[%s20372_s3 + $0x2b8] sm:$0x3]  ;;  %v2269_v47 = vadd.f32 %v2268_v29, %v15730_v35  ;;  %v13755_v39 = vld [vmem:[%s20373_s4] sm:$0xff]  ;;  %v2581_v29 = vor.u32 %v2580_v50, %v2576_v63 }
 0x477   : > { %2882 = vmatpush.bf16.msra.mxu3 %v13756_v16  ;;  %v14418_v16 = vld [vmem:[#allocation2 + $0x4] sm:$0x8]  ;;  %v3182_v3 = vor.u32 %v3181_v1, %v3178_v13 }
 0x478   : > { %20569 = vst [vmem:[#allocation33_spill] sm:$0xff] %v16014_v55  ;;  %v2198_v53 = vadd.f32 %v15747_v12, %v2125_v15  ;;  %v1674_v15 = vunpack.c.l.b16 %v1350_v6  ;;  %v2342_v57 = vadd.f32 %v15942_v54, %v2269_v47 }
 0x47a   : > { %v1765_v63 = vpack.c.b16 %v1674_v15, %v1674_v15 }
 0x47b   : > { %v16032_v17 = vpop.f32.mrf.mxu1  ;;  %v16034_v40 = vld [vmem:[#allocation2 + $0x8] sm:$0xff]  ;;  %2883 = vmatpush.bf16.msra.mxu3 %v13755_v39 }
 0x47c   : > { %v14525_v43 = vld [vmem:[#allocation2 + $0x4] sm:$0xf0]   ;;  %v2583_v62 = vshll.u32 %v16034_v40, 16  ;;  %v2587_v18 = vshrl.u32 %v16034_v40, 16  ;;  %v20571_v50 = vrot.slane %v16034_v40, 2 }
 0x47d   : > { %v16041_v5 = vpop.f32.mrf.mxu2  ;;  %v2270_v12 = vpop.f32.mrf.mxu3  ;;  %v14419_v55 = vor.u32 %v14525_v43, %v14418_v16 }
 0x47e   : > { %20570 = vst [vmem:[#allocation34_spill] sm:$0xff] %v16041_v5  ;;  %v2271_v35 = vadd.f32 %v2270_v12, %v2198_v53  ;;  %v2585_v45 = vrot.slane %v2583_v62, 1  ;;  %v3183_v5 = vrot.slane %v2587_v18, 1  ;;  %v3184_v46 = vrot.slane %v2583_v62, 2 }
 0x47f   : > { %v16059_v28 = vsel %vm3415_vm2, %v3416_v31, %v20571_v50  ;;  %v3917_v13 = vshll.u32 %v14419_v55, 16  ;;  %v3708_v39 = vrot.slane %v14419_v55, 3 }
 0x480   : > { %v2344_v20 = vadd.f32 %v15968_v32, %v2271_v35  ;;  %v2586_v2 = vsel %vm2574_vm1, %v2581_v29, %v2585_v45  ;;  %v16054_v53 = vor.u32 %v3184_v46, %v3183_v5  ;;  %v3914_v32 = vshrl.u32 %v14419_v55, 16 }
 0x481   : > { %2747 = vmatmul.bf16.vlgmr.msra.gmra.mxu2 %v2586_v2  ;;  %v20388_v46 = vunpack.c.h.b16 %v16000_v51  ;;  %v1984_v5 = vadd.f32 %v15306_v42, %v15150_v14  ;;  %v3919_v35 = vrot.slane %v3917_v13, 4  ;;  %v1673_v29 = vunpack.c.h.b16 %v15767_v25 }
 0x482   : > { %v14234_v6 = vpack.c.bf16 %v2344_v20, %v2342_v57  ;;  %2312 = vmatmul.bf16.gmra.mxu3 %v11673_v60  ;;  %v16065_v54 = vsel %vm3174_vm3, %v3182_v3, %v16054_v53  ;;  %v3916_v1 = vrot.slane %v3914_v32, 3 }
 0x483   : > { %v16061_v43 = vpop.f32.mrf.mxu1  ;;  %v2057_v62 = vadd.f32 %v15382_v24, %v1984_v5 }
 0x484   : > { %14382 = vst [vmem:[#allocation2 + $0x10] sm:$0xff] %v14234_v6   ;;  %v14291_v47 = vunpack.c.l.b16 %v14234_v6  ;;  %v3920_v6 = vor.u32 %v3919_v35, %v3916_v1 }
 0x485   : > { %v2240_v12 = vpop.f32.mrf.mxu2  ;;  %v2273_v20 = vpop.f32.mrf.mxu3 }
 0x486   : > { %v16071_v57 = vadd.f32 %v2240_v12, %v15756_v21  ;;  %11690 = vmatmul.msk.bf16.gmra.mxu1 %vm1844_vm0, %v1765_v63  ;;  %v16076_v60 = vpack.c.b16 %v14291_v47, %v20388_v46  ;;  %v2130_v21 = vadd.f32 %v15560_v9, %v2057_v62  ;;  %v2274_v50 = vadd.f32 %v2273_v20, %v15759_v4 }
 0x487   : > { %v1764_v12 = vpack.c.b16 %v1673_v29, %v1673_v29  ;;  %v2589_v4 = vor.u32 %v2587_v18, %v2585_v45  ;;  %v2971_v29 = vrot.slane %v16034_v40, 1 }
 0x488   : > { %v3709_v3 = vrot.slane %v16076_v60, 3  ;;  %v3922_v14 = vshrl.u32 %v16076_v60, 16  ;;  %v3925_v42 = vshll.u32 %v16076_v60, 16  ;;  %v2203_v2 = vadd.f32 %v15776_v34, %v2130_v21 }
 0x489   : > { %v2347_v1 = vadd.f32 %v16003_v49, %v2274_v50 }
 0x48a   : > { %v3710_v15 = vsel %vm3707_vm4, %v3708_v39, %v3709_v3  ;;  %v3924_v16 = vrot.slane %v3922_v14, 3  ;;  %v3927_v24 = vrot.slane %v3925_v42, 4  ;;  %v20572_v14 = vrot.slane %v16034_v40, 2 }
 0x48b   : > { %v16087_v31 = vpop.f32.mrf.mxu1  ;;  %v16089_v55 = vld [vmem:[#allocation2 + $0x10] sm:$0xff]  ;;  %3802 = vmatmul.bf16.vlgmr.msrb.gmra.mxu0 %v3710_v15 }
 0x48c   : > { %v16093_v9 = vor.u32 %v3927_v24, %v3924_v16  ;;  %v2591_v32 = vshll.u32 %v16089_v55, 16  ;;  %v2595_v47 = vshrl.u32 %v16089_v55, 16  ;;  %v3419_v13 = vrot.slane %v16089_v55, 2  ;;  %v14404_v49 = vld [vmem:[#allocation2 + $0x10] sm:$0xff]   ;;  %v5150_v24 = vld [vmem:[#allocation2 + $0xc] sm:$0xc] }
 0x48d   : > { %v16095_v25 = vpop.f32.mrf.mxu2  ;;  %v2275_v63 = vpop.f32.mrf.mxu3 }
 0x48e   : > { %v2276_v5 = vadd.f32 %v2275_v63, %v2203_v2  ;;  %v16102_v62 = vsel %vm3912_vm5, %v3920_v6, %v16093_v9  ;;  %v2593_v34 = vrot.slane %v2591_v32, 1  ;;  %v3187_v20 = vrot.slane %v2595_v47, 1 }
 0x48f   : > { %v3188_v39 = vrot.slane %v2591_v32, 2  ;;  %v16113_v42 = vsel %vm3415_vm2, %v20572_v14, %v3419_v13  ;;  %v14335_v63 = vunpack.c.l.b16 %v14404_v49  ;;  %v1989_v32 = vadd.f32 %v15338_v59, %v15173_v37 }
 0x490   : > { %v2349_v35 = vadd.f32 %v16032_v17, %v2276_v5  ;;  %v2594_v21 = vsel %vm2574_vm1, %v2589_v4, %v2593_v34  ;;  %v2970_v17 = vrot.slane %v16006_v22, 1  ;;  %v5218_v22 = vunpack.c.l.b16 %v5150_v24 }
 0x491   : > { %v16117_v15 = vor.u32 %v3188_v39, %v3187_v20  ;;  %2752 = vmatmul.bf16.gmra.mxu2 %v2594_v21  ;;  %v2597_v59 = vor.u32 %v2595_v47, %v2593_v34 }
 0x492   : > { %v14239_v45 = vpack.c.bf16 %v2349_v35, %v2347_v1  ;;  %2317 = vmatmul.bf16.gmra.mxu3 %v1764_v12  ;;  %v2972_v6 = vsel %vm2969_vm6, %v2970_v17, %v2971_v29  ;;  %v5533_v12 = vld [vmem:[#allocation2 + $0xc] sm:$0x8]  ;;  %v5244_v4 = vpack.c.b16 %v14335_v63, %v5218_v22 }
 0x493   : > { %v16119_v18 = vpop.f32.mrf.mxu1  ;;  %v16125_v16 = vsel %vm3174_vm3, %v16054_v53, %v16117_v15  ;;  %v2062_v53 = vadd.f32 %v15400_v52, %v1989_v32  ;;  %v5551_v21 = vunpack.c.l.b16 %v5533_v12 }
 0x494   : > { %14383 = vst [vmem:[#allocation2 + $0x18] sm:$0xff] %v14239_v45   ;;  %v5259_v24 = vshrl.u32 %v5244_v4, 16  ;;  %v5262_v47 = vshll.u32 %v5244_v4, 16 }
 0x495   : > { %v2245_v2 = vpop.f32.mrf.mxu2  ;;  %v2278_v50 = vpop.f32.mrf.mxu3  ;;  %v2135_v20 = vadd.f32 %v15577_v30, %v2062_v53 }
 0x496   : > { %v16133_v5 = vadd.f32 %v2245_v2, %v15785_v11  ;;  %3064 = vmatmul.bf16.vlgmr.msrb.gmra.mxu1 %v2972_v6  ;;  %v2279_v39 = vadd.f32 %v2278_v50, %v15788_v26  ;;  %v20390_v11 = vrot.slane %v16089_v55, 1 }
 0x497   : > { %v2208_v37 = vadd.f32 %v15797_v27, %v2135_v20 }
 0x498   : > { %v2352_v34 = vadd.f32 %v16061_v43, %v2279_v39  ;;  %v16163_v39 = vpack.c.b16 %v14335_v63, %v5551_v21  ;;  %v5261_v63 = vrot.slane %v5259_v24, 2  ;;  %v5264_v21 = vrot.slane %v5262_v47, 3 }
 0x49a   : > { %20574 = vst [vmem:[#allocation36_spill] sm:$0xff] %v16163_v39 }
 0x49b   : > { %v16138_v1 = vpop.f32.mrf.mxu1  ;;  %v16140_v35 = vld [vmem:[#allocation2 + $0x18] sm:$0xff] }
 0x49c   : > { %v16142_v14 = vld [vmem:[#allocation2 + $0x14] sm:$0xff]   ;;  %v2599_v52 = vshll.u32 %v16140_v35, 16  ;;  %v2603_v30 = vshrl.u32 %v16140_v35, 16  ;;  %v3421_v4 = vrot.slane %v16140_v35, 2 }
 0x49d   : > { %v2280_v45 = vpop.f32.mrf.mxu3  ;;  %v3711_v49 = vrot.slane %v16142_v14, 3  ;;  %v2247_v26 = vpop.f32.mrf.mxu2  ;;  %v16149_v17 = vld [vmem:[#allocation2 + $0x14] sm:$0xff]   ;;  %v3931_v50 = vshrl.u32 %v16142_v14, 16  ;;  %v3934_v27 = vshll.u32 %v16142_v14, 16 }
 0x49e   : > { %20573 = vst [vmem:[#allocation35_spill] sm:$0xff] %v16149_v17  ;;  %v2281_v2 = vadd.f32 %v2280_v45, %v2208_v37  ;;  %v2601_v6 = vrot.slane %v2599_v52, 1  ;;  %v3191_v22 = vrot.slane %v2603_v30, 1  ;;  %v3192_v12 = vrot.slane %v2599_v52, 2 }
 0x49f   : > { %v3712_v32 = vsel %vm3707_vm4, %v3709_v3, %v3711_v49  ;;  %v3933_v20 = vrot.slane %v3931_v50, 3  ;;  %v3936_v37 = vrot.slane %v3934_v27, 4  ;;  %v20387_v43 = vshrl.u32 %v16149_v17, 16 }
 0x4a0   : > { %v2354_v53 = vadd.f32 %v16087_v31, %v2281_v2  ;;  %3807 = vmatmul.bf16.gmra.mxu0 %v3712_v32  ;;  %v2602_v45 = vsel %vm2574_vm1, %v2597_v59, %v2601_v6  ;;  %v16166_v60 = vor.u32 %v3192_v12, %v3191_v22  ;;  %v20386_v31 = vshll.u32 %v16149_v17, 16  ;;  %v20575_v22 = vld [vmem:[#allocation17_spill] sm:$0xff] }
 0x4a1   : > { %2757 = vmatmul.bf16.gmra.mxu2 %v2602_v45  ;;  %v16168_v3 = vor.u32 %v3936_v37, %v3933_v20  ;;  %v16178_v59 = vsel %vm3415_vm2, %v3419_v13, %v3421_v4  ;;  %v5269_v50 = vrot.slane %v20387_v43, 2  ;;  %v2974_v13 = vsel %vm2969_vm6, %v2971_v29, %v20390_v11  ;;  %v6165_v20 = vld [vmem:[#allocation2 + $0x14] sm:$0xe] }
 0x4a2   : > { %v14244_v26 = vpack.c.bf16 %v2354_v53, %v2352_v34  ;;  %2884 = vmatmul.bf16.vlgmr.msra.gmra.mxu3 %v15937_v58  ;;  %v16183_v58 = vsel %vm3174_vm3, %v16117_v15, %v16166_v60  ;;  %v5272_v24 = vrot.slane %v20386_v31, 3  ;;  %v1994_v15 = vadd.f32 %v15364_v41, %v15204_v7  ;;  %v20578_v7 = vld [vmem:[#allocation28_spill] sm:$0xff] }
 0x4a3   : > { %v16171_v52 = vpop.f32.mrf.mxu1  ;;  %v16188_v2 = vsel %vm3912_vm5, %v16093_v9, %v16168_v3  ;;  %v5553_v9 = vrot.slane %v16163_v39, 3  ;;  %v20389_v47 = vrot.slane %v16149_v17, 3  ;;  %v5265_v34 = vor.u32 %v5264_v21, %v5261_v63  ;;  %v16220_v21 = vld [vmem:[#allocation2 + $0x18] sm:$0xf] }
 0x4a4   : > { %14384 = vst [vmem:[#allocation2 + $0x20] sm:$0xff] %v14244_v26   ;;  %v5273_v32 = vor.u32 %v5272_v24, %v5269_v50  ;;  %v2067_v53 = vadd.f32 %v20575_v22, %v1994_v15  ;;  %v2605_v15 = vor.u32 %v2603_v30, %v2601_v6  ;;  %v20391_v31 = vunpack.c.l.b16 %v16220_v21 }
 0x4a5   : > { %v2283_v27 = vpop.f32.mrf.mxu3  ;;  %v16207_v29 = vsel %vm3707_vm4, %v5553_v9, %v20389_v47  ;;  %20579 = vst [vmem:[#allocation28_spill] sm:$0xff] %v16220_v21  ;;  %v20394_v47 = vrot.slane %v16140_v35, 1 }
 0x4a6   : > { %3069 = vmatmul.bf16.gmra.mxu1 %v2974_v13  ;;  %20576 = vst [vmem:[#allocation17_spill] sm:$0xff] %v16207_v29  ;;  %v16210_v12 = vsel %vm5257_vm7, %v5265_v34, %v5273_v32  ;;  %v2140_v41 = vadd.f32 %v20578_v7, %v2067_v53  ;;  %v2284_v37 = vadd.f32 %v2283_v27, %v15806_v8  ;;  %v6231_v13 = vunpack.c.l.b16 %v6165_v20 }
 0x4a7   : > { %20577 = vst [vmem:[#allocation37_spill] sm:$0xff] %v16210_v12 }
 0x4a8   : > { %v2213_v50 = vadd.f32 %v15818_v36, %v2140_v41  ;;  %v2357_v36 = vadd.f32 %v16119_v18, %v2284_v37 }
 0x4ab   : > { %v16214_v45 = vpop.f32.mrf.mxu1  ;;  %v16216_v26 = vld [vmem:[#allocation2 + $0x20] sm:$0xff] }
 0x4ac   : > { %v16218_v63 = vld [vmem:[#allocation2 + $0x1c] sm:$0xff]   ;;  %v2607_v9 = vshll.u32 %v16216_v26, 16  ;;  %v2611_v22 = vshrl.u32 %v16216_v26, 16  ;;  %v20395_v18 = vrot.slane %v16216_v26, 2 }
 0x4ad   : > { %v2285_v24 = vpop.f32.mrf.mxu3  ;;  %v20396_v34 = vrot.slane %v16218_v63, 3  ;;  %v16226_v8 = vld [vmem:[#allocation2 + $0x1c] sm:$0xff]   ;;  %v3940_v53 = vshrl.u32 %v16218_v63, 16  ;;  %v3943_v7 = vshll.u32 %v16218_v63, 16 }
 0x4ae   : > { %20580 = vst [vmem:[#allocation38_spill] sm:$0xff] %v16226_v8  ;;  %v2286_v27 = vadd.f32 %v2285_v24, %v2213_v50  ;;  %v2609_v20 = vrot.slane %v2607_v9, 1  ;;  %v3195_v6 = vrot.slane %v2611_v22, 1  ;;  %v3196_v50 = vrot.slane %v2607_v9, 2 }
 0x4af   : > { %v3714_v30 = vsel %vm3707_vm4, %v3711_v49, %v20396_v34  ;;  %v3942_v24 = vrot.slane %v3940_v53, 3  ;;  %v3945_v43 = vrot.slane %v3943_v7, 4  ;;  %v20392_v37 = vshrl.u32 %v16226_v8, 16 }
 0x4b0   : > { %v2359_v41 = vadd.f32 %v16138_v1, %v2286_v27  ;;  %3812 = vmatmul.bf16.gmra.mxu0 %v3714_v30  ;;  %v2610_v46 = vsel %vm2574_vm1, %v2605_v15, %v2609_v20  ;;  %v16243_v14 = vor.u32 %v3196_v50, %v3195_v6  ;;  %v20393_v1 = vshll.u32 %v16226_v8, 16  ;;  %v16257_v27 = vld [vmem:[#allocation2 + $0x1c] sm:$0xff] }
 0x4b1   : > { %2762 = vmatmul.bf16.gmra.mxu2 %v2610_v46  ;;  %v16245_v49 = vor.u32 %v3945_v43, %v3942_v24  ;;  %v16255_v15 = vsel %vm3415_vm2, %v3421_v4, %v20395_v18  ;;  %v5278_v4 = vrot.slane %v20392_v37, 2  ;;  %v6270_v50 = vrot.slane %v16257_v27, 1  ;;  %v20584_v24 = vld [vmem:[#allocation19_spill] sm:$0xff] }
 0x4b2   : > { %v14249_v11 = vpack.c.bf16 %v2359_v41, %v2357_v36  ;;  %2889 = vmatmul.bf16.gmra.mxu3 %v16034_v40  ;;  %v16261_v40 = vpack.c.b16 %v20391_v31, %v6231_v13  ;;  %v16266_v46 = vsel %vm3174_vm3, %v16166_v60, %v16243_v14  ;;  %v20581_v13 = vrot.slane %v16089_v55, 1  ;;  %v20582_v60 = vld [vmem:[#allocation9_spill] sm:$0xff]  ;;  %v20583_v36 = vld [vmem:[#allocation14_spill] sm:$0xff] }
 0x4b3   : > { %v16248_v9 = vpop.f32.mrf.mxu1  ;;  %v16271_v43 = vsel %vm3912_vm5, %v16168_v3, %v16245_v49  ;;  %v5281_v7 = vrot.slane %v20393_v1, 3  ;;  %v1999_v30 = vadd.f32 %v20583_v36, %v20582_v60  ;;  %v5556_v3 = vrot.slane %v16226_v8, 3 }
 0x4b4   : > { %14385 = vst [vmem:[#allocation2 + $0x28] sm:$0xff] %v14249_v11   ;;  %v2976_v11 = vsel %vm2969_vm6, %v20581_v13, %v20394_v47  ;;  %v6269_v41 = vrot.slane %v16261_v40, 1  ;;  %v20585_v37 = vrot.slane %v16149_v17, 3 }
 0x4b5   : > { %v2288_v53 = vpop.f32.mrf.mxu3  ;;  %v5282_v6 = vor.u32 %v5281_v7, %v5278_v4  ;;  %v2072_v31 = vadd.f32 %v20584_v24, %v1999_v30 }
 0x4b6   : > { %3074 = vmatmul.bf16.gmra.mxu1 %v2976_v11  ;;  %v16291_v13 = vsel %vm3707_vm4, %v20585_v37, %v5556_v3  ;;  %v16297_v60 = vsel %vm2969_vm6, %v6269_v41, %v6270_v50  ;;  %v2289_v4 = vadd.f32 %v2288_v53, %v15827_v48 }
 0x4b7   : > { %20586 = vst [vmem:[#allocation9_spill] sm:$0xff] %v16291_v13  ;;  %v16294_v1 = vsel %vm5257_vm7, %v5273_v32, %v5282_v6  ;;  %v2145_v11 = vadd.f32 %v15608_v44, %v2072_v31  ;;  %v2613_v31 = vor.u32 %v2611_v22, %v2609_v20 }
 0x4b8   : > { %20587 = vst [vmem:[#allocation14_spill] sm:$0xff] %v16294_v1  ;;  %v2362_v34 = vadd.f32 %v16171_v52, %v2289_v4 }
 0x4b9   : > { %20588 = vst [vmem:[#allocation19_spill] sm:$0xff] %v16297_v60  ;;  %v2218_v24 = vadd.f32 %v15836_v38, %v2145_v11  ;;  %v20590_v38 = vrot.slane %v16218_v63, 3 }
 0x4bb   : > { %v16301_v7 = vpop.f32.mrf.mxu1  ;;  %v16303_v36 = vld [vmem:[#allocation2 + $0x28] sm:$0xff] }
 0x4bc   : > { %v16305_v30 = vld [vmem:[#allocation2 + $0x24] sm:$0xff]   ;;  %v2615_v47 = vshll.u32 %v16303_v36, 16  ;;  %v2619_v41 = vshrl.u32 %v16303_v36, 16  ;;  %v20399_v52 = vrot.slane %v16303_v36, 2 }
 0x4bd   : > { %v2290_v37 = vpop.f32.mrf.mxu3  ;;  %v20400_v32 = vrot.slane %v16305_v30, 3  ;;  %v16311_v18 = vld [vmem:[#allocation2 + $0x24] sm:$0xff]   ;;  %v3949_v48 = vshrl.u32 %v16305_v30, 16  ;;  %v3952_v53 = vshll.u32 %v16305_v30, 16 }
 0x4be   : > { %20589 = vst [vmem:[#allocation39_spill] sm:$0xff] %v16311_v18  ;;  %v2291_v44 = vadd.f32 %v2290_v37, %v2218_v24  ;;  %v2617_v60 = vrot.slane %v2615_v47, 1  ;;  %v3199_v13 = vrot.slane %v2619_v41, 1  ;;  %v3200_v1 = vrot.slane %v2615_v47, 2 }
 0x4bf   : > { %v3716_v11 = vsel %vm3707_vm4, %v20590_v38, %v20400_v32  ;;  %v3951_v24 = vrot.slane %v3949_v48, 3  ;;  %v3954_v22 = vrot.slane %v3952_v53, 4  ;;  %v20403_v37 = vrot.slane %v16216_v26, 1  ;;  %v16337_v48 = vld [vmem:[#allocation2 + $0x24] sm:$0xff] }
 0x4c0   : > { %v2364_v29 = vadd.f32 %v16214_v45, %v2291_v44  ;;  %3817 = vmatmul.bf16.gmra.mxu0 %v3716_v11  ;;  %v2618_v20 = vsel %vm2574_vm1, %v2613_v31, %v2617_v60  ;;  %v20398_v4 = vshrl.u32 %v16311_v18, 16  ;;  %v3201_v63 = vor.u32 %v3200_v1, %v3199_v13  ;;  %v20593_v11 = vld [vmem:[#allocation10_spill] sm:$0xff] }
 0x4c1   : > { %2767 = vmatmul.bf16.gmra.mxu2 %v2618_v20  ;;  %v3955_v38 = vor.u32 %v3954_v22, %v3951_v24  ;;  %v20401_v45 = vshll.u32 %v16311_v18, 16  ;;  %v20591_v47 = vrot.slane %v16216_v26, 2  ;;  %v20592_v13 = vrot.slane %v16140_v35, 1 }
 0x4c2   : > { %v14254_v21 = vpack.c.bf16 %v2364_v29, %v2362_v34  ;;  %2894 = vmatmul.bf16.gmra.mxu3 %v16089_v55  ;;  %v16341_v55 = vsel %vm3174_vm3, %v16243_v14, %v3201_v63  ;;  %v5287_v34 = vrot.slane %v20398_v4, 2  ;;  %v20594_v14 = vld [vmem:[#allocation16_spill] sm:$0xff]  ;;  %v20402_v20 = vrot.slane %v16337_v48, 1 }
 0x4c3   : > { %v16328_v44 = vpop.f32.mrf.mxu1  ;;  %v16335_v31 = vsel %vm3415_vm2, %v20591_v47, %v20399_v52  ;;  %v16345_v29 = vsel %vm3912_vm5, %v16245_v49, %v3955_v38  ;;  %v2978_v53 = vsel %vm2969_vm6, %v20592_v13, %v20403_v37  ;;  %v2004_v24 = vadd.f32 %v20594_v14, %v20593_v11  ;;  %v20595_v47 = vld [vmem:[#allocation21_spill] sm:$0xff] }
 0x4c4   : > { %14386 = vst [vmem:[#allocation2 + $0x30] sm:$0xff] %v14254_v21   ;;  %v5290_v21 = vrot.slane %v20401_v45, 3  ;;  %v5558_v49 = vrot.slane %v16311_v18, 3  ;;  %v16370_v13 = vsel %vm2969_vm6, %v6270_v50, %v20402_v20 }
 0x4c5   : > { %v2293_v1 = vpop.f32.mrf.mxu3  ;;  %v2077_v4 = vadd.f32 %v20595_v47, %v2004_v24  ;;  %20598 = vst [vmem:[#allocation21_spill] sm:$0xff] %v16370_v13 }
 0x4c6   : > { %3079 = vmatmul.bf16.gmra.mxu1 %v2978_v53  ;;  %v5291_v22 = vor.u32 %v5290_v21, %v5287_v34  ;;  %v16362_v52 = vsel %vm3707_vm4, %v5556_v3, %v5558_v49  ;;  %v2294_v11 = vadd.f32 %v2293_v1, %v15851_v23 }
 0x4c7   : > { %20596 = vst [vmem:[#allocation10_spill] sm:$0xff] %v16362_v52  ;;  %v2150_v53 = vadd.f32 %v15647_v61, %v2077_v4  ;;  %v2621_v4 = vor.u32 %v2619_v41, %v2617_v60 }
 0x4c8   : > { %v16365_v32 = vsel %vm5257_vm7, %v5282_v6, %v5291_v22  ;;  %v2367_v20 = vadd.f32 %v16248_v9, %v2294_v11 }
 0x4c9   : > { %20597 = vst [vmem:[#allocation16_spill] sm:$0xff] %v16365_v32  ;;  %v2223_v3 = vadd.f32 %v15863_v19, %v2150_v53  ;;  %v20600_v19 = vrot.slane %v16305_v30, 3 }
 0x4cb   : > { %v16374_v34 = vpop.f32.mrf.mxu1  ;;  %v16376_v21 = vld [vmem:[#allocation2 + $0x30] sm:$0xff] }
 0x4cc   : > { %v16378_v14 = vld [vmem:[#allocation2 + $0x2c] sm:$0xff]   ;;  %v2623_v6 = vshll.u32 %v16376_v21, 16  ;;  %v2627_v50 = vshrl.u32 %v16376_v21, 16  ;;  %v20408_v9 = vrot.slane %v16376_v21, 2 }
 0x4cd   : > { %v2295_v24 = vpop.f32.mrf.mxu3  ;;  %v20409_v47 = vrot.slane %v16378_v14, 3  ;;  %v16384_v45 = vld [vmem:[#allocation2 + $0x2c] sm:$0xff]   ;;  %v3958_v23 = vshrl.u32 %v16378_v14, 16  ;;  %v3961_v1 = vshll.u32 %v16378_v14, 16 }
 0x4ce   : > { %20599 = vst [vmem:[#allocation40_spill] sm:$0xff] %v16384_v45  ;;  %v2296_v61 = vadd.f32 %v2295_v24, %v2223_v3  ;;  %v2625_v37 = vrot.slane %v2623_v6, 1  ;;  %v3203_v13 = vrot.slane %v2627_v50, 1  ;;  %v3204_v32 = vrot.slane %v2623_v6, 2 }
 0x4cf   : > { %v3718_v53 = vsel %vm3707_vm4, %v20600_v19, %v20409_v47  ;;  %v3960_v3 = vrot.slane %v3958_v23, 3  ;;  %v3963_v60 = vrot.slane %v3961_v1, 4  ;;  %v20407_v24 = vrot.slane %v16303_v36, 1  ;;  %v20603_v1 = vld [vmem:[#allocation11_spill] sm:$0xff] }
 0x4d0   : > { %v2369_v52 = vadd.f32 %v16301_v7, %v2296_v61  ;;  %3822 = vmatmul.bf16.gmra.mxu0 %v3718_v53  ;;  %v2626_v41 = vsel %vm2574_vm1, %v2621_v4, %v2625_v37  ;;  %v20404_v11 = vshrl.u32 %v16384_v45, 16  ;;  %v16400_v30 = vor.u32 %v3204_v32, %v3203_v13 }
 0x4d1   : > { %2772 = vmatmul.bf16.gmra.mxu2 %v2626_v41  ;;  %v16402_v19 = vor.u32 %v3963_v60, %v3960_v3  ;;  %v20405_v7 = vshll.u32 %v16384_v45, 16  ;;  %v20601_v61 = vrot.slane %v16303_v36, 2  ;;  %v20602_v13 = vrot.slane %v16216_v26, 1  ;;  %v20605_v60 = vld [vmem:[#allocation23_spill] sm:$0xff] }
 0x4d2   : > { %v14259_v12 = vpack.c.bf16 %v2369_v52, %v2367_v20  ;;  %2899 = vmatmul.bf16.gmra.mxu3 %v16140_v35  ;;  %v16416_v35 = vsel %vm3174_vm3, %v3201_v63, %v16400_v30  ;;  %v5296_v52 = vrot.slane %v20404_v11, 2  ;;  %v20604_v63 = vld [vmem:[#allocation18_spill] sm:$0xff]  ;;  %v6477_v11 = vshll.u32 %v16261_v40, 16 }
 0x4d3   : > { %v16405_v6 = vpop.f32.mrf.mxu1  ;;  %v16412_v4 = vsel %vm3415_vm2, %v20601_v61, %v20408_v9  ;;  %v16420_v32 = vsel %vm3912_vm5, %v3955_v38, %v16402_v19  ;;  %v2980_v23 = vsel %vm2969_vm6, %v20602_v13, %v20407_v24  ;;  %v2009_v53 = vadd.f32 %v20604_v63, %v20603_v1 }
 0x4d4   : > { %14387 = vst [vmem:[#allocation2 + $0x38] sm:$0xff] %v14259_v12   ;;  %v5299_v12 = vrot.slane %v20405_v7, 3  ;;  %v20406_v38 = vrot.slane %v16384_v45, 3  ;;  %v6474_v13 = vshrl.u32 %v16261_v40, 16 }
 0x4d5   : > { %v2298_v20 = vpop.f32.mrf.mxu3  ;;  %v2082_v41 = vadd.f32 %v20605_v60, %v2009_v53  ;;  %v6485_v53 = vshll.u32 %v16257_v27, 16  ;;  %v2629_v60 = vor.u32 %v2627_v50, %v2625_v37  ;;  %v20609_v50 = vrot.slane %v16378_v14, 3 }
 0x4d6   : > { %3084 = vmatmul.bf16.gmra.mxu1 %v2980_v23  ;;  %v16434_v3 = vor.u32 %v5299_v12, %v5296_v52  ;;  %v16440_v61 = vsel %vm3707_vm4, %v5558_v49, %v20406_v38  ;;  %v6482_v23 = vshrl.u32 %v16257_v27, 16  ;;  %v2299_v12 = vadd.f32 %v2298_v20, %v15889_v10 }
 0x4d7   : > { %20606 = vst [vmem:[#allocation11_spill] sm:$0xff] %v16440_v61  ;;  %v2155_v52 = vadd.f32 %v15674_v56, %v2082_v41  ;;  %v6476_v38 = vrot.slane %v6474_v13, 1 }
 0x4d8   : > { %v16446_v7 = vsel %vm5257_vm7, %v5291_v22, %v16434_v3  ;;  %v6479_v22 = vrot.slane %v6477_v11, 2  ;;  %v6484_v41 = vrot.slane %v6482_v23, 1  ;;  %v2372_v47 = vadd.f32 %v16328_v44, %v2299_v12 }
 0x4d9   : > { %20607 = vst [vmem:[#allocation18_spill] sm:$0xff] %v16446_v7  ;;  %v2228_v40 = vadd.f32 %v15913_v0, %v2155_v52  ;;  %v6487_v52 = vrot.slane %v6485_v53, 2  ;;  %v20419_v12 = vrot.slane %v16376_v21, 1 }
 0x4db   : > { %v16451_v1 = vpop.f32.mrf.mxu1  ;;  %v16453_v63 = vld [vmem:[#allocation2 + $0x38] sm:$0xff] }
 0x4dc   : > { %v16455_v49 = vld [vmem:[#allocation2 + $0x34] sm:$0xff]   ;;  %v2631_v9 = vshll.u32 %v16453_v63, 16  ;;  %v2635_v10 = vshrl.u32 %v16453_v63, 16 }
 0x4dd   : > { %v2300_v24 = vpop.f32.mrf.mxu3  ;;  %v20422_v56 = vrot.slane %v16455_v49, 3  ;;  %v16462_v20 = vld [vmem:[#allocation2 + $0x34] sm:$0xff]   ;;  %v3967_v27 = vshrl.u32 %v16455_v49, 16  ;;  %v3970_v0 = vshll.u32 %v16455_v49, 16 }
 0x4de   : > { %20608 = vst [vmem:[#allocation23_spill] sm:$0xff] %v16462_v20  ;;  %v2301_v61 = vadd.f32 %v2300_v24, %v2228_v40  ;;  %v2633_v37 = vrot.slane %v2631_v9, 1  ;;  %v3207_v13 = vrot.slane %v2635_v10, 1  ;;  %v3208_v23 = vrot.slane %v2631_v9, 2 }
 0x4df   : > { %v3720_v11 = vsel %vm3707_vm4, %v20609_v50, %v20422_v56  ;;  %v3969_v18 = vrot.slane %v3967_v27, 3  ;;  %v3972_v44 = vrot.slane %v3970_v0, 4  ;;  %v20421_v40 = vrot.slane %v16453_v63, 2  ;;  %v16492_v27 = vld [vmem:[#allocation2 + $0x2c] sm:$0xff] }
 0x4e0   : > { %v2374_v7 = vadd.f32 %v16374_v34, %v2301_v61  ;;  %3827 = vmatmul.bf16.gmra.mxu0 %v3720_v11  ;;  %v2634_v24 = vsel %vm2574_vm1, %v2629_v60, %v2633_v37  ;;  %v20417_v8 = vshrl.u32 %v16462_v20, 16  ;;  %v16478_v14 = vor.u32 %v3208_v23, %v3207_v13  ;;  %20611 = vst [vmem:[#allocation41_spill] sm:$0xff] %v16492_v27  ;;  %v20613_v11 = vld [vmem:[#allocation12_spill] sm:$0xff] }
 0x4e1   : > { %2777 = vmatmul.bf16.gmra.mxu2 %v2634_v24  ;;  %v16480_v53 = vor.u32 %v3972_v44, %v3969_v18  ;;  %v20416_v34 = vshll.u32 %v16462_v20, 16  ;;  %v20610_v61 = vrot.slane %v16376_v21, 2  ;;  %v20614_v13 = vld [vmem:[#allocation20_spill] sm:$0xff]  ;;  %v20420_v24 = vrot.slane %v16492_v27, 1 }
 0x4e2   : > { %v14264_v17 = vpack.c.bf16 %v2374_v7, %v2372_v47  ;;  %2904 = vmatmul.bf16.gmra.mxu3 %v16216_v26  ;;  %v16494_v47 = vor.u32 %v6487_v52, %v6484_v41  ;;  %v16499_v26 = vsel %vm3174_vm3, %v16400_v30, %v16478_v14  ;;  %v5305_v7 = vrot.slane %v20417_v8, 2 }
 0x4e3   : > { %v16483_v9 = vpop.f32.mrf.mxu1  ;;  %v16490_v60 = vsel %vm3415_vm2, %v20610_v61, %v20421_v40  ;;  %v16504_v18 = vsel %vm3912_vm5, %v16402_v19, %v16480_v53  ;;  %v20612_v41 = vrot.slane %v16303_v36, 1  ;;  %v5308_v50 = vrot.slane %v20416_v34, 3  ;;  %v20616_v61 = vld [vmem:[#allocation24_spill] sm:$0xff] }
 0x4e4   : > { %14388 = vst [vmem:[#allocation2 + $0x40] sm:$0xff] %v14264_v17   ;;  %v6480_v30 = vor.u32 %v6479_v22, %v6476_v38  ;;  %v2014_v52 = vadd.f32 %v20614_v13, %v20613_v11  ;;  %v20418_v19 = vrot.slane %v16462_v20, 3  ;;  %v20617_v38 = vrot.slane %v16384_v45, 3  ;;  %v20622_v11 = vld [vmem:[#allocation29_spill] sm:$0xff] }
 0x4e5   : > { %v2303_v0 = vpop.f32.mrf.mxu3  ;;  %v2982_v17 = vsel %vm2969_vm6, %v20612_v41, %v20419_v12  ;;  %v16518_v23 = vor.u32 %v5308_v50, %v5305_v7  ;;  %v20620_v50 = vrot.slane %v16337_v48, 1  ;;  %v2637_v8 = vor.u32 %v2635_v10, %v2633_v37 }
 0x4e6   : > { %3089 = vmatmul.bf16.gmra.mxu1 %v2982_v17  ;;  %v16522_v44 = vsel %vm3174_vm3, %v6480_v30, %v16494_v47  ;;  %v2087_v41 = vadd.f32 %v20616_v61, %v2014_v52  ;;  %v16531_v22 = vsel %vm3707_vm4, %v20617_v38, %v20418_v19  ;;  %v2304_v17 = vadd.f32 %v2303_v0, %v15954_v33  ;;  %v20623_v0 = vld [vmem:[#allocation32_spill] sm:$0xff] }
 0x4e7   : > { %20615 = vst [vmem:[#allocation12_spill] sm:$0xff] %v16522_v44  ;;  %v16537_v7 = vsel %vm5257_vm7, %v16434_v3, %v16518_v23  ;;  %v16544_v30 = vsel %vm2969_vm6, %v20620_v50, %v20420_v24  ;;  %v6491_v52 = vshrl.u32 %v16337_v48, 16  ;;  %v6494_v3 = vshll.u32 %v16337_v48, 16 }
 0x4e8   : > { %20618 = vst [vmem:[#allocation20_spill] sm:$0xff] %v16531_v22  ;;  %v2160_v13 = vadd.f32 %v20622_v11, %v2087_v41  ;;  %v2377_v19 = vadd.f32 %v16405_v6, %v2304_v17  ;;  %v20625_v6 = vrot.slane %v16455_v49, 3 }
 0x4e9   : > { %20619 = vst [vmem:[#allocation24_spill] sm:$0xff] %v16537_v7  ;;  %v6493_v48 = vrot.slane %v6491_v52, 1  ;;  %v6496_v17 = vrot.slane %v6494_v3, 2  ;;  %v20429_v7 = vrot.slane %v16453_v63, 1 }
 0x4ea   : > { %20621 = vst [vmem:[#allocation42_spill] sm:$0xff] %v16544_v30  ;;  %v2233_v34 = vadd.f32 %v20623_v0, %v2160_v13 }
 0x4eb   : > { %v16548_v61 = vpop.f32.mrf.mxu1  ;;  %v16550_v38 = vld [vmem:[#allocation2 + $0x40] sm:$0xff] }
 0x4ec   : > { %v16552_v33 = vld [vmem:[#allocation2 + $0x3c] sm:$0xff]   ;;  %v2639_v50 = vshll.u32 %v16550_v38, 16  ;;  %v2643_v11 = vshrl.u32 %v16550_v38, 16  ;;  %v20431_v52 = vrot.slane %v16550_v38, 2 }
 0x4ed   : > { %v2305_v12 = vpop.f32.mrf.mxu3  ;;  %v3721_v41 = vrot.slane %v16552_v33, 3  ;;  %v16560_v24 = vld [vmem:[#allocation2 + $0x3c] sm:$0xff]   ;;  %v3976_v56 = vshrl.u32 %v16552_v33, 16  ;;  %v3979_v30 = vshll.u32 %v16552_v33, 16 }
 0x4ee   : > { %20624 = vst [vmem:[#allocation29_spill] sm:$0xff] %v16560_v24  ;;  %v2306_v40 = vadd.f32 %v2305_v12, %v2233_v34  ;;  %v2641_v44 = vrot.slane %v2639_v50, 1  ;;  %v3211_v37 = vrot.slane %v2643_v11, 1  ;;  %v3212_v0 = vrot.slane %v2639_v50, 2 }
 0x4ef   : > { %v3722_v10 = vsel %vm3707_vm4, %v20625_v6, %v3721_v41  ;;  %v3978_v22 = vrot.slane %v3976_v56, 3  ;;  %v3981_v12 = vrot.slane %v3979_v30, 4  ;;  %v20428_v45 = vshrl.u32 %v16560_v24, 16 }
 0x4f0   : > { %v2379_v13 = vadd.f32 %v16451_v1, %v2306_v40  ;;  %3832 = vmatmul.bf16.gmra.mxu0 %v3722_v10  ;;  %v2642_v34 = vsel %vm2574_vm1, %v2637_v8, %v2641_v44  ;;  %v16575_v49 = vor.u32 %v3212_v0, %v3211_v37  ;;  %v20427_v1 = vshll.u32 %v16560_v24, 16  ;;  %v20630_v10 = vld [vmem:[#allocation22_spill] sm:$0xff] }
 0x4f1   : > { %2782 = vmatmul.bf16.gmra.mxu2 %v2642_v34  ;;  %v16577_v3 = vor.u32 %v3981_v12, %v3978_v22  ;;  %v20626_v8 = vrot.slane %v16453_v63, 2  ;;  %v16589_v30 = vor.u32 %v6496_v17, %v6493_v48  ;;  %v5314_v22 = vrot.slane %v20428_v45, 2  ;;  %v20632_v0 = vld [vmem:[#allocation26_spill] sm:$0xff] }
 0x4f2   : > { %v14269_v39 = vpack.c.bf16 %v2379_v13, %v2377_v19  ;;  %2909 = vmatmul.bf16.gmra.mxu3 %v16303_v36  ;;  %v16594_v36 = vsel %vm3174_vm3, %v16478_v14, %v16575_v49  ;;  %v20628_v48 = vrot.slane %v16376_v21, 1  ;;  %v5317_v6 = vrot.slane %v20427_v1, 3  ;;  %v20629_v14 = vld [vmem:[#allocation13_spill] sm:$0xff] }
 0x4f3   : > { %v16580_v56 = vpop.f32.mrf.mxu1  ;;  %v16587_v40 = vsel %vm3415_vm2, %v20626_v8, %v20431_v52  ;;  %v16599_v19 = vsel %vm3912_vm5, %v16480_v53, %v16577_v3  ;;  %v2019_v37 = vadd.f32 %v20630_v10, %v20629_v14  ;;  %v20430_v53 = vrot.slane %v16560_v24, 3 }
 0x4f4   : > { %20627 = vst [vmem:[#allocation32_spill] sm:$0xff] %v16587_v40  ;;  %v16613_v17 = vor.u32 %v5317_v6, %v5314_v22  ;;  %v16618_v13 = vsel %vm3174_vm3, %v16494_v47, %v16589_v30  ;;  %v14706_v34 = vmov 0   ;;  %v20637_v47 = vld [vmem:[#allocation33_spill] sm:$0xff] }
 0x4f5   : > { %14389 = vst [vmem:[#allocation2 + $0x48] sm:$0xff] %v14269_v39   ;;  %v2308_v50 = vpop.f32.mrf.mxu3  ;;  %v2984_v39 = vsel %vm2969_vm6, %v20628_v48, %v20429_v7  ;;  %v2092_v12 = vadd.f32 %v20632_v0, %v2019_v37  ;;  %v20634_v48 = vrot.slane %v16462_v20, 3 }
 0x4f6   : > { %3094 = vmatmul.bf16.gmra.mxu1 %v2984_v39  ;;  %20631 = vst [vmem:[#allocation13_spill] sm:$0xff] %v16618_v13  ;;  %v16624_v8 = vsel %vm5257_vm7, %v16518_v23, %v16613_v17  ;;  %v20636_v39 = vld [vmem:[#allocation30_spill] sm:$0xff]  ;;  %v2309_v14 = vadd.f32 %v2308_v50, %v20637_v47  ;;  %v2645_v50 = vor.u32 %v2643_v11, %v2641_v44 }
 0x4f7   : > { %2445 = vst [vmem:[#allocation2 + $0x60] sm:$0xc] %v14706_v34  ;;  %v16631_v22 = vsel %vm3707_vm4, %v20634_v48, %v20430_v53  ;;  %v2165_v6 = vadd.f32 %v20636_v39, %v2092_v12  ;;  %v20638_v23 = vld [vmem:[#allocation34_spill] sm:$0xff] }
 0x4f8   : > { %20633 = vst [vmem:[#allocation22_spill] sm:$0xff] %v16624_v8 }
 0x4f9   : > { %20635 = vst [vmem:[#allocation26_spill] sm:$0xff] %v16631_v22  ;;  %v2238_v1 = vadd.f32 %v20638_v23, %v2165_v6  ;;  %v2382_v6 = vadd.f32 %v16483_v9, %v2309_v14  ;;  %v20437_v14 = vrot.slane %v16550_v38, 1 }
 0x4fa   : > { %2446 = vst [vmem:[#allocation2 + $0x64] sm:$0xf] %v14706_v34 }
 0x4fb   : > { %v16635_v10 = vpop.f32.mrf.mxu1  ;;  %2447 = vst [vmem:[#allocation2 + $0x68] sm:$0xf] %v14706_v34 }
 0x4fc   : > { %v16637_v37 = vld [vmem:[#allocation2 + $0x48] sm:$0xff]  ;;  %2448 = vst [vmem:[#allocation2 + $0x6c] sm:$0xf] %v14706_v34 }
 0x4fd   : > { %v16639_v0 = vld [vmem:[#allocation2 + $0x44] sm:$0xff]   ;;  %v2310_v45 = vpop.f32.mrf.mxu3  ;;  %v2647_v7 = vshll.u32 %v16637_v37, 16  ;;  %v20434_v12 = vshrl.u32 %v16637_v37, 16  ;;  %2449 = vst [vmem:[#allocation2 + $0x70] sm:$0xf] %v14706_v34  ;;  %v20433_v8 = vrot.slane %v16637_v37, 2 }
 0x4fe   : > { %v20432_v48 = vrot.slane %v16639_v0, 3  ;;  %v2311_v39 = vadd.f32 %v2310_v45, %v2238_v1  ;;  %2450 = vst [vmem:[#allocation2 + $0x74] sm:$0xf] %v14706_v34  ;;  %v3985_v47 = vshrl.u32 %v16639_v0, 16  ;;  %v3988_v53 = vshll.u32 %v16639_v0, 16  ;;  %v16647_v52 = vld [vmem:[#allocation2 + $0x44] sm:$0xff]  }
 0x4ff   : > { %20639 = vst [vmem:[#allocation30_spill] sm:$0xff] %v16647_v52  ;;  %v2649_v23 = vrot.slane %v2647_v7, 1  ;;  %v3215_v45 = vrot.slane %v20434_v12, 1  ;;  %v3216_v11 = vrot.slane %v2647_v7, 2  ;;  %v20640_v7 = vrot.slane %v16550_v38, 2  ;;  %v20647_v12 = vld [vmem:[#allocation31_spill] sm:$0xff] }
 0x500   : > { %v3724_v13 = vsel %vm3707_vm4, %v3721_v41, %v20432_v48  ;;  %2451 = vst [vmem:[#allocation2 + $0x78] sm:$0xf] %v14706_v34  ;;  %v2384_v44 = vadd.f32 %v16548_v61, %v2311_v39  ;;  %v3987_v1 = vrot.slane %v3985_v47, 3  ;;  %v3990_v22 = vrot.slane %v3988_v53, 4 }
 0x501   : > { %3837 = vmatmul.bf16.gmra.mxu0 %v3724_v13  ;;  %2452 = vst [vmem:[#allocation2 + $0x7c] sm:$0xf] %v14706_v34  ;;  %v2650_v9 = vsel %vm2574_vm1, %v2645_v50, %v2649_v23  ;;  %v16662_v41 = vor.u32 %v3216_v11, %v3215_v45  ;;  %v20436_v61 = vshrl.u32 %v16647_v52, 16  ;;  %v16674_v53 = vsel %vm3415_vm2, %v20640_v7, %v20433_v8  ;;  %v20644_v45 = vld [vmem:[#allocation15_spill] sm:$0xff] }
 0x502   : > { %v14274_v33 = vpack.c.bf16 %v2384_v44, %v2382_v6  ;;  %2914 = vmatmul.bf16.gmra.mxu3 %v16376_v21  ;;  %2787 = vmatmul.bf16.gmra.mxu2 %v2650_v9  ;;  %v16664_v48 = vor.u32 %v3990_v22, %v3987_v1  ;;  %20641 = vst [vmem:[#allocation33_spill] sm:$0xff] %v16674_v53  ;;  %v20435_v34 = vshll.u32 %v16647_v52, 16  ;;  %v20643_v47 = vrot.slane %v16453_v63, 1  ;;  %v20645_v44 = vld [vmem:[#allocation25_spill] sm:$0xff]  ;;  %v20646_v9 = vld [vmem:[#allocation27_spill] sm:$0xff] }
 0x503   : > { %v16667_v13 = vpop.f32.mrf.mxu1  ;;  %v16680_v21 = vsel %vm3174_vm3, %v16575_v49, %v16662_v41  ;;  %v2024_v11 = vadd.f32 %v20645_v44, %v20644_v45  ;;  %v5323_v49 = vrot.slane %v20436_v61, 2  ;;  %v20438_v1 = vrot.slane %v16647_v52, 3 }
 0x504   : > { %14390 = vst [vmem:[#allocation2 + $0x50] sm:$0xff] %v14274_v33   ;;  %v16685_v22 = vsel %vm3912_vm5, %v16577_v3, %v16664_v48  ;;  %v16687_v50 = vpop.f32.mrf.mxu2  ;;  %v2986_v6 = vsel %vm2969_vm6, %v20643_v47, %v20437_v14  ;;  %v5326_v3 = vrot.slane %v20435_v34, 3  ;;  %v6500_v7 = vshrl.u32 %v16492_v27, 16 }
 0x505   : > { %20642 = vst [vmem:[#allocation34_spill] sm:$0xff] %v16685_v22  ;;  %v2313_v39 = vpop.f32.mrf.mxu3  ;;  %v2097_v33 = vadd.f32 %v20646_v9, %v2024_v11  ;;  %v6503_v9 = vshll.u32 %v16492_v27, 16  ;;  %v20654_v20 = vrot.slane %v16639_v0, 3 }
 0x506   : > { %3099 = vmatmul.bf16.gmra.mxu1 %v2986_v6  ;;  %v16703_v8 = vor.u32 %v5326_v3, %v5323_v49  ;;  %v20648_v6 = vrot.slane %v16560_v24, 3  ;;  %v2314_v44 = vadd.f32 %v2313_v39, %v16071_v57  ;;  %v6502_v3 = vrot.slane %v6500_v7, 1 }
 0x507   : > { %v2170_v47 = vadd.f32 %v20647_v12, %v2097_v33  ;;  %v6505_v40 = vrot.slane %v6503_v9, 2 }
 0x508   : > { %v16711_v45 = vsel %vm3707_vm4, %v20648_v6, %v20438_v1  ;;  %v16721_v11 = vsel %vm5257_vm7, %v16613_v17, %v16703_v8  ;;  %v16724_v49 = vpop.f32.mrf.mxu0 }
 0x509   : > { %20649 = vst [vmem:[#allocation15_spill] sm:$0xff] %v16711_v45  ;;  %v2243_v12 = vadd.f32 %v16095_v25, %v2170_v47  ;;  %v20653_v25 = vshrl.u32 %v16637_v37, 16 }
 0x50a   : > { %20650 = vst [vmem:[#allocation25_spill] sm:$0xff] %v16721_v11  ;;  %v2387_v11 = vadd.f32 %v16580_v56, %v2314_v44 }
 0x50b   : > { %v2393_v34 = vpop.f32.mrf.mxu1  ;;  %v16714_v61 = vld [vmem:[#allocation2 + $0x50] sm:$0xff]  ;;  %20651 = vst [vmem:[#allocation27_spill] sm:$0xff] %v16724_v49  ;;  %v2653_v47 = vor.u32 %v20653_v25, %v2649_v23 }
 0x50c   : > { %v16716_v14 = vld [vmem:[#allocation2 + $0x4c] sm:$0xff]   ;;  %v16727_v6 = vpop.f32.mrf.mxu2  ;;  %v2655_v57 = vshll.u32 %v16714_v61, 16  ;;  %v2659_v1 = vshrl.u32 %v16714_v61, 16  ;;  %v3435_v56 = vrot.slane %v16714_v61, 2 }
 0x50d   : > { %v2315_v33 = vpop.f32.mrf.mxu3  ;;  %v3725_v34 = vrot.slane %v16716_v14, 3  ;;  %v16733_v17 = vld [vmem:[#allocation2 + $0x4c] sm:$0xff]   ;;  %v3994_v7 = vshrl.u32 %v16716_v14, 16  ;;  %v3997_v27 = vshll.u32 %v16716_v14, 16 }
 0x50e   : > { %20652 = vst [vmem:[#allocation31_spill] sm:$0xff] %v16733_v17  ;;  %v2316_v45 = vadd.f32 %v2315_v33, %v2243_v12  ;;  %v2657_v24 = vrot.slane %v2655_v57, 1  ;;  %v3219_v49 = vrot.slane %v2659_v1, 1  ;;  %v3220_v23 = vrot.slane %v2655_v57, 2 }
 0x50f   : > { %v3726_v39 = vsel %vm3707_vm4, %v20654_v20, %v3725_v34  ;;  %v3996_v33 = vrot.slane %v3994_v7, 3  ;;  %v3999_v25 = vrot.slane %v3997_v27, 4  ;;  %v20445_v44 = vshrl.u32 %v16733_v17, 16  ;;  %v13786_v20 = vld [vmem:[%s20373_s4 + $0xf8] sm:$0xff] }
 0x510   : > { %v2389_v12 = vadd.f32 %v16635_v10, %v2316_v45  ;;  %v2658_v53 = vsel %vm2574_vm1, %v2653_v47, %v2657_v24  ;;  %v16755_v10 = vor.u32 %v3220_v23, %v3219_v49  ;;  %v20444_v27 = vshll.u32 %v16733_v17, 16  ;;  %3297 = vmatpush.bf16.msrb.mxu2 %v13786_v20  ;;  %v16791_v23 = vpop.f32.mrf.mxu0 }
 0x511   : > { %3842 = vmatmul.bf16.gmra.mxu0 %v3726_v39  ;;  %v16757_v0 = vor.u32 %v3999_v25, %v3996_v33  ;;  %v20655_v57 = vrot.slane %v16637_v37, 2  ;;  %v20658_v47 = vrot.slane %v16637_v37, 1  ;;  %20661 = vst [vmem:[#allocation46_spill] sm:$0xff] %v16791_v23  ;;  %v13785_v33 = vld [vmem:[%s20373_s4 + $0xf0] sm:$0xff]  ;;  %v20446_v20 = vrot.slane %v16733_v17, 3 }
 0x512   : > { %v14279_v22 = vpack.c.bf16 %v2389_v12, %v2387_v11  ;;  %2919 = vmatmul.bf16.gmra.mxu3 %v16453_v63  ;;  %2792 = vmatmul.bf16.gmra.mxu2 %v2658_v53  ;;  %v16770_v63 = vsel %vm3174_vm3, %v16662_v41, %v16755_v10  ;;  %v5332_v11 = vrot.slane %v20445_v44, 2  ;;  %v5335_v41 = vrot.slane %v20444_v27, 3 }
 0x513   : > { %v16760_v45 = vpop.f32.mrf.mxu1  ;;  %v16765_v9 = vsel %vm3415_vm2, %v20655_v57, %v3435_v56  ;;  %v16775_v53 = vsel %vm3912_vm5, %v16664_v48, %v16757_v0  ;;  %v16788_v12 = vor.u32 %v6505_v40, %v6502_v3 }
 0x514   : > { %20656 = vst [vmem:[#allocation43_spill] sm:$0xff] %v16765_v9  ;;  %v16779_v39 = vpop.f32.mrf.mxu2  ;;  %v16796_v25 = vor.u32 %v5335_v41, %v5332_v11  ;;  %3298 = vmatpush.bf16.msrb.mxu2 %v13785_v33 }
 0x515   : > { %14391 = vst [vmem:[#allocation2 + $0x58] sm:$0xff] %v14279_v22   ;;  %v2318_v49 = vpop.f32.mrf.mxu3  ;;  %v20659_v22 = vrot.slane %v16550_v38, 1  ;;  %v16815_v11 = vsel %vm3174_vm3, %v16589_v30, %v16788_v12 }
 0x516   : > { %20657 = vst [vmem:[#allocation44_spill] sm:$0xff] %v16775_v53  ;;  %v2319_v48 = vadd.f32 %v2318_v49, %v16133_v5  ;;  %v16803_v40 = vsel %vm5257_vm7, %v16703_v8, %v16796_v25  ;;  %v20663_v5 = vrot.slane %v16647_v52, 3  ;;  %v3625_v53 = vld [vmem:[#allocation2 + $0x68] sm:$0x1] }
 0x517   : > { %v2988_v7 = vsel %vm2969_vm6, %v20659_v22, %v20658_v47  ;;  %20660 = vst [vmem:[#allocation45_spill] sm:$0xff] %v16788_v12 }
 0x518   : > { %3104 = vmatmul.bf16.gmra.mxu1 %v2988_v7  ;;  %v2392_v57 = vadd.f32 %v16667_v13, %v2319_v48  ;;  %20662 = vst [vmem:[#allocation47_spill] sm:$0xff] %v16803_v40  ;;  %v16810_v3 = vsel %vm3707_vm4, %v20663_v5, %v20446_v20  ;;  %v13784_v13 = vld [vmem:[%s20373_s4 + $0xe8] sm:$0xff]  ;;  %v13783_v5 = vld [vmem:[%s20373_s4 + $0xe0] sm:$0xff] }
 0x519   : > { %20664 = vst [vmem:[#allocation48_spill] sm:$0xff] %v16810_v3  ;;  %3299 = vmatpush.bf16.msrb.mxu2 %v13784_v13  ;;  %v13834_v13 = vld [vmem:[%s20373_s4 + $0x278] sm:$0xff] }
 0x51a   : > { %20665 = vst [vmem:[#allocation49_spill] sm:$0xff] %v16815_v11  ;;  %v2419_v49 = vpack.c.bf16 %v2392_v57, %v2392_v57  ;;  %4764 = vmatpush.bf16.msra.mxu0 %v13834_v13 }
 0x51b   : > { %v16820_v47 = vpop.f32.mrf.mxu1 }
 0x51c   : > { %v16822_v8 = vld [vmem:[#allocation2 + $0x58] sm:$0xff]  ;;  %2444 = vst [vmem:[#allocation2 + $0x60] sm:$0x3] %v2419_v49  ;;  %v16826_v41 = vpop.f32.mrf.mxu2 }
 0x51d   : > { %v16824_v22 = vld [vmem:[#allocation2 + $0x54] sm:$0xff]   ;;  %v2320_v7 = vpop.f32.mrf.mxu3  ;;  %v2663_v48 = vshll.u32 %v16822_v8, 16  ;;  %v20449_v33 = vshrl.u32 %v16822_v8, 16  ;;  %v16831_v57 = vpop.f32.mrf.mxu0  ;;  %3300 = vmatpush.bf16.msrb.mxu2 %v13783_v5 }
 0x51e   : > { %v20448_v30 = vrot.slane %v16824_v22, 3  ;;  %20666 = vst [vmem:[#allocation50_spill] sm:$0xff] %v16831_v57  ;;  %v4003_v27 = vshrl.u32 %v16824_v22, 16  ;;  %v4006_v49 = vshll.u32 %v16824_v22, 16  ;;  %v2661_v7 = vor.u32 %v2659_v1, %v2657_v24  ;;  %v16933_v57 = vld [vmem:[#allocation2 + $0x54] sm:$0xff]  }
 0x51f   : > { %v16841_v44 = vrot.slane %v2663_v48, 1  ;;  %v3223_v12 = vrot.slane %v20449_v33, 1  ;;  %v3224_v11 = vrot.slane %v2663_v48, 2  ;;  %v20667_v1 = vrot.slane %v16822_v8, 2  ;;  %v13781_v33 = vld [vmem:[%s20373_s4 + $0xd0] sm:$0xff]  ;;  %20675 = vst [vmem:[#allocation57_spill] sm:$0xff] %v16933_v57 }
 0x520   : > { %v3728_v20 = vsel %vm3707_vm4, %v3725_v34, %v20448_v30  ;;  %v4005_v3 = vrot.slane %v4003_v27, 3  ;;  %v4008_v24 = vrot.slane %v4006_v49, 4  ;;  %v20452_v34 = vrot.slane %v16714_v61, 1 }
 0x521   : > { %3847 = vmatmul.bf16.gmra.mxu0 %v3728_v20  ;;  %v16856_v40 = vsel %vm3415_vm2, %v3435_v56, %v20667_v1  ;;  %v2666_v14 = vsel %vm2574_vm1, %v2661_v7, %v16841_v44  ;;  %v13782_v20 = vld [vmem:[%s20373_s4 + $0xd8] sm:$0xff]  ;;  %v16865_v48 = vor.u32 %v3224_v11, %v3223_v12  ;;  %v3892_v11 = vld [vmem:[#allocation2 + $0x68] sm:$0x3] }
 0x522   : > { %20668 = vst [vmem:[#allocation51_spill] sm:$0xff] %v16856_v40  ;;  %2924 = vmatmul.bf16.gmra.mxu3 %v16550_v38  ;;  %2797 = vmatmul.bf16.gmra.mxu2 %v2666_v14  ;;  %v16867_v27 = vor.u32 %v4008_v24, %v4005_v3  ;;  %v13833_v38 = vld [vmem:[%s20373_s4 + $0x270] sm:$0xff]  ;;  %v20672_v14 = vrot.slane %v16637_v37, 1 }
 0x523   : > { %20669 = vst [vmem:[#allocation52_spill] sm:$0xff] %v16865_v48  ;;  %v16869_v5 = vpop.f32.mrf.mxu1  ;;  %v2494_v56 = vld [vmem:[#allocation2 + $0x60] sm:$0x7]  ;;  %3301 = vmatpush.bf16.msrb.mxu2 %v13782_v20  ;;  %v16881_v12 = vsel %vm3174_vm3, %v16755_v10, %v16865_v48  ;;  %4765 = vmatpush.bf16.msra.mxu0 %v13833_v38  ;;  %v13780_v38 = vld [vmem:[%s20373_s4 + $0xc8] sm:$0xff] }
 0x524   : > { %v16871_v49 = vld [vmem:[#allocation2 + $0x5c] sm:$0xff]   ;;  %v2560_v7 = vunpack.c.l.b16 %v2494_v56  ;;  %20670 = vst [vmem:[#allocation53_spill] sm:$0xff] %v16881_v12  ;;  %v16886_v3 = vsel %vm3912_vm5, %v16757_v0, %v16867_v27  ;;  %v16888_v24 = vpop.f32.mrf.mxu2  ;;  %v2990_v20 = vsel %vm2969_vm6, %v20672_v14, %v20452_v34  ;;  %v16908_v14 = vunpack.c.l.b16 %v3892_v11 }
 0x525   : > { %v16873_v1 = vld [vmem:[#allocation2 + $0x60] sm:$0xff]   ;;  %20671 = vst [vmem:[#allocation54_spill] sm:$0xff] %v16886_v3  ;;  %v2885_v13 = vpop.f32.mrf.mxu3  ;;  %v16896_v10 = vpop.f32.mrf.mxu0  ;;  %v13810_v0 = vld [vmem:[%s20373_s4 + $0x1b8] sm:$0xff]  ;;  %v4012_v52 = vshrl.u32 %v16871_v49, 16  ;;  %v20679_v12 = vrot.slane %v16871_v49, 3 }
 0x526   : > { %v2886_v56 = vadd.f32 %v2885_v13, %v16687_v50  ;;  %20673 = vst [vmem:[#allocation55_spill] sm:$0xff] %v16896_v10  ;;  %v16898_v30 = vpack.c.b16 %v2560_v7, %v2560_v7  ;;  %v20454_v40 = vunpack.c.h.b16 %v16873_v1  ;;  %4090 = vmatpush.bf16.msra.mxu1 %v13810_v0  ;;  %v13832_v50 = vld [vmem:[%s20373_s4 + $0x268] sm:$0xff]  ;;  %v16939_v23 = vld [vmem:[#allocation2 + $0x5c] sm:$0xff]  }
 0x527   : > { %20674 = vst [vmem:[#allocation56_spill] sm:$0xff] %v16908_v14  ;;  %3302 = vmatpush.bf16.msrb.mxu2 %v13781_v33  ;;  %v4014_v11 = vrot.slane %v4012_v52, 3  ;;  %v4015_v33 = vshll.u32 %v16871_v49, 16  ;;  %4766 = vmatpush.bf16.msra.mxu0 %v13832_v50 }
 0x528   : > { %3109 = vmatmul.bf16.gmra.mxu1 %v2990_v20  ;;  %v2671_v7 = vshll.u32 %v16898_v30, 16  ;;  %v16915_v13 = vadd.f32 %v16760_v45, %v2886_v56  ;;  %v13809_v20 = vld [vmem:[%s20373_s4 + $0x1b0] sm:$0xff]  ;;  %v3911_v45 = vpack.c.b16 %v16908_v14, %v20454_v40  ;;  %v13831_v56 = vld [vmem:[%s20373_s4 + $0x260] sm:$0xff]  ;;  %20676 = vst [vmem:[#allocation58_spill] sm:$0xff] %v16939_v23 }
 0x529   : > { %v4017_v10 = vrot.slane %v4015_v33, 4  ;;  %v13808_v33 = vld [vmem:[%s20373_s4 + $0x1a8] sm:$0xff]  ;;  %v13779_v14 = vld [vmem:[%s20373_s4 + $0xc0] sm:$0xff] }
 0x52a   : > { %4091 = vmatpush.bf16.msra.mxu1 %v13809_v20  ;;  %v16937_v48 = vrot.slane %v2671_v7, 1  ;;  %v4021_v34 = vshrl.u32 %v3911_v45, 16  ;;  %v4024_v50 = vshll.u32 %v3911_v45, 16  ;;  %v20678_v45 = vshrl.u32 %v16822_v8, 16 }
 0x52b   : > { %v16924_v0 = vpop.f32.mrf.mxu1  ;;  %3303 = vmatpush.bf16.msrb.mxu2 %v13780_v38  ;;  %v4018_v7 = vor.u32 %v4017_v10, %v4014_v11  ;;  %4767 = vmatpush.bf16.msra.mxu0 %v13831_v56  ;;  %v13830_v10 = vld [vmem:[%s20373_s4 + $0x258] sm:$0xff] }
 0x52c   : > { %v16935_v9 = vpop.f32.mrf.mxu2  ;;  %v2669_v3 = vor.u32 %v20678_v45, %v16841_v44  ;;  %v4023_v38 = vrot.slane %v4021_v34, 3  ;;  %v16971_v34 = vld [vmem:[#allocation2 + $0x64] sm:$0xff]  }
 0x52d   : > { %v2887_v52 = vpop.f32.mrf.mxu3  ;;  %v16942_v20 = vpop.f32.mrf.mxu0  ;;  %v16967_v44 = vsel %vm3912_vm5, %v16867_v27, %v4018_v7  ;;  %20682 = vst [vmem:[#allocation61_spill] sm:$0xff] %v16971_v34  ;;  %v13807_v27 = vld [vmem:[%s20373_s4 + $0x1a0] sm:$0xff] }
 0x52e   : > { %v2888_v40 = vadd.f32 %v2887_v52, %v16727_v6  ;;  %20677 = vst [vmem:[#allocation59_spill] sm:$0xff] %v16942_v20  ;;  %v20680_v6 = vrot.slane %v16824_v22, 3  ;;  %v4026_v20 = vrot.slane %v4024_v50, 4  ;;  %4092 = vmatpush.bf16.msra.mxu1 %v13808_v33  ;;  %v20456_v22 = vshrl.u32 %v16933_v57, 16 }
 0x52f   : > { %20681 = vst [vmem:[#allocation60_spill] sm:$0xff] %v16967_v44  ;;  %v2674_v56 = vsel %vm2574_vm1, %v2669_v3, %v16937_v48  ;;  %3304 = vmatpush.bf16.msrb.mxu2 %v13779_v14  ;;  %v20459_v33 = vshrl.u32 %v16939_v23, 16  ;;  %v3693_v3 = vunpack.c.l.b16 %v3625_v53  ;;  %4768 = vmatpush.bf16.msra.mxu0 %v13830_v10  ;;  %v20685_v10 = vrot.slane %v16822_v8, 1 }
 0x530   : > { %v3730_v52 = vsel %vm3707_vm4, %v20680_v6, %v20679_v12  ;;  %v16963_v11 = vadd.f32 %v16820_v47, %v2888_v40  ;;  %v20458_v12 = vshll.u32 %v16933_v57, 16  ;;  %v16975_v50 = vor.u32 %v4026_v20, %v4023_v38  ;;  %v13794_v47 = vld [vmem:[%s20373_s4 + $0x138] sm:$0xff] }
 0x531   : > { %3852 = vmatmul.bf16.gmra.mxu0 %v3730_v52  ;;  %v20460_v40 = vshll.u32 %v16939_v23, 16  ;;  %3502 = vmatpush.bf16.msrb.mxu3 %v13794_v47  ;;  %v5341_v6 = vrot.slane %v20456_v22, 2 }
 0x532   : > { %20683 = vst [vmem:[#allocation62_spill] sm:$0xff] %v16975_v50  ;;  %2929 = vmatmul.bf16.gmra.mxu3 %v16637_v37  ;;  %2802 = vmatmul.bf16.gmra.mxu2 %v2674_v56  ;;  %v16990_v14 = vsel %vm3912_vm5, %v4018_v7, %v16975_v50  ;;  %v13829_v37 = vld [vmem:[%s20373_s4 + $0x250] sm:$0xff]  ;;  %v20686_v7 = vrot.slane %v16714_v61, 1  ;;  %v5344_v47 = vrot.slane %v20458_v12, 3 }
 0x533   : > { %v16986_v45 = vpop.f32.mrf.mxu1  ;;  %20684 = vst [vmem:[#allocation63_spill] sm:$0xff] %v16990_v14  ;;  %4093 = vmatpush.bf16.msra.mxu1 %v13807_v27  ;;  %v5350_v27 = vrot.slane %v20459_v33, 2  ;;  %v5353_v38 = vrot.slane %v20460_v40, 3  ;;  %v13793_v50 = vld [vmem:[%s20373_s4 + $0x130] sm:$0xff]  ;;  %4769 = vmatpush.bf16.msra.mxu0 %v13829_v37 }
 0x534   : > { %v16999_v53 = vpop.f32.mrf.mxu2  ;;  %v2992_v56 = vsel %vm2969_vm6, %v20686_v7, %v20685_v10  ;;  %v13806_v10 = vld [vmem:[%s20373_s4 + $0x198] sm:$0xff]  ;;  %v20688_v7 = vunpack.c.h.b16 %v16873_v1  ;;  %v5345_v33 = vor.u32 %v5344_v47, %v5341_v6 }
 0x535   : > { %v2890_v52 = vpop.f32.mrf.mxu3  ;;  %v17013_v20 = vpop.f32.mrf.mxu0  ;;  %v5354_v40 = vor.u32 %v5353_v38, %v5350_v27  ;;  %3503 = vmatpush.bf16.msrb.mxu3 %v13793_v50  ;;  %v20692_v50 = vshll.u32 %v16971_v34, 16 }
 0x536   : > { %v2891_v22 = vadd.f32 %v2890_v52, %v16779_v39  ;;  %20687 = vst [vmem:[#allocation64_spill] sm:$0xff] %v17013_v20  ;;  %v17023_v12 = vpack.c.b16 %v3693_v3, %v20688_v7  ;;  %v13828_v39 = vld [vmem:[%s20373_s4 + $0x248] sm:$0xff]  ;;  %v20689_v20 = vshrl.u32 %v16971_v34, 16  ;;  %v17036_v3 = vsel %vm5257_vm7, %v16796_v25, %v5345_v33  ;;  %v13827_v7 = vld [vmem:[%s20373_s4 + $0x240] sm:$0xff] }
 0x537   : > { %4094 = vmatpush.bf16.msra.mxu1 %v13806_v10  ;;  %20690 = vst [vmem:[#allocation65_spill] sm:$0xff] %v17036_v3  ;;  %v17039_v37 = vsel %vm5257_vm7, %v5345_v33, %v5354_v40  ;;  %v5362_v38 = vrot.slane %v20692_v50, 3  ;;  %v5572_v25 = vrot.slane %v16939_v23, 3  ;;  %4770 = vmatpush.bf16.msra.mxu0 %v13828_v39  ;;  %v20461_v10 = vrot.slane %v16971_v34, 3 }
 0x538   : > { %3114 = vmatmul.bf16.gmra.mxu1 %v2992_v56  ;;  %v17029_v52 = vadd.f32 %v16869_v5, %v2891_v22  ;;  %v5570_v56 = vrot.slane %v16933_v57, 3  ;;  %v5359_v14 = vrot.slane %v20689_v20, 2  ;;  %20691 = vst [vmem:[#allocation66_spill] sm:$0xff] %v17039_v37  ;;  %v13792_v5 = vld [vmem:[%s20373_s4 + $0x128] sm:$0xff]  ;;  %v13805_v22 = vld [vmem:[%s20373_s4 + $0x190] sm:$0xff]  ;;  %v20693_v20 = vrot.slane %v16733_v17, 3 }
 0x539   : > { %3504 = vmatpush.bf16.msrb.mxu3 %v13792_v5  ;;  %v2675_v5 = vshrl.u32 %v16898_v30, 16  ;;  %v17130_v37 = vld [vmem:[#allocation2 + $0x4c] sm:$0xff] }
 0x53a   : > { %v17052_v6 = vsel %vm3707_vm4, %v20693_v20, %v5570_v56  ;;  %v17058_v27 = vor.u32 %v5362_v38, %v5359_v14  ;;  %v17065_v50 = vsel %vm3707_vm4, %v5570_v56, %v5572_v25  ;;  %v17076_v14 = vsel %vm3707_vm4, %v5572_v25, %v20461_v10  ;;  %v13791_v56 = vld [vmem:[%s20373_s4 + $0x120] sm:$0xff] }
 0x53b   : > { %20694 = vst [vmem:[#allocation67_spill] sm:$0xff] %v17052_v6  ;;  %v17055_v33 = vpop.f32.mrf.mxu1  ;;  %4095 = vmatpush.bf16.msra.mxu1 %v13805_v22  ;;  %v20700_v22 = vrot.slane %v17023_v12, 3  ;;  %4771 = vmatpush.bf16.msra.mxu0 %v13827_v7  ;;  %v20463_v10 = vrot.slane %v16898_v30, 1  ;;  %v6539_v23 = vshll.u32 %v17130_v37, 16 }
 0x53c   : > { %20695 = vst [vmem:[#allocation68_spill] sm:$0xff] %v17058_v27  ;;  %v17067_v6 = vpop.f32.mrf.mxu2  ;;  %v17071_v47 = vsel %vm5257_vm7, %v5354_v40, %v17058_v27  ;;  %v13804_v40 = vld [vmem:[%s20373_s4 + $0x188] sm:$0xff] }
 0x53d   : > { %20696 = vst [vmem:[#allocation69_spill] sm:$0xff] %v17065_v50  ;;  %v2892_v20 = vpop.f32.mrf.mxu3  ;;  %v17079_v38 = vpop.f32.mrf.mxu0  ;;  %v20701_v50 = vrot.slane %v16871_v49, 3  ;;  %3505 = vmatpush.bf16.msrb.mxu3 %v13791_v56  ;;  %v13790_v49 = vld [vmem:[%s20373_s4 + $0x118] sm:$0xff] }
 0x53e   : > { %20697 = vst [vmem:[#allocation70_spill] sm:$0xff] %v17071_v47  ;;  %v2893_v39 = vadd.f32 %v2892_v20, %v16826_v41  ;;  %v2677_v41 = vor.u32 %v2675_v5, %v16937_v48  ;;  %v13803_v48 = vld [vmem:[%s20373_s4 + $0x180] sm:$0xff] }
 0x53f   : > { %20698 = vst [vmem:[#allocation71_spill] sm:$0xff] %v17076_v14  ;;  %v3732_v25 = vsel %vm3707_vm4, %v20701_v50, %v20700_v22  ;;  %4096 = vmatpush.bf16.msra.mxu1 %v13804_v40  ;;  %v7538_v14 = vld [vmem:[#allocation2 + $0x1c] sm:$0xff]   ;;  %v17107_v50 = vld [vmem:[#allocation2 + $0x24] sm:$0xff]  ;;  %v20705_v40 = vrot.slane %v16822_v8, 1 }
 0x540   : > { %20699 = vst [vmem:[#allocation72_spill] sm:$0xff] %v17079_v38  ;;  %v17095_v20 = vadd.f32 %v16924_v0, %v2893_v39  ;;  %v8083_v0 = vld [vmem:[#allocation2 + $0x1c] sm:$0xe]  ;;  %v17109_v39 = vld [vmem:[#allocation2 + $0x44] sm:$0xff]  ;;  %v17111_v5 = vunpack.c.h.b16 %v7538_v14  ;;  %v13789_v14 = vld [vmem:[%s20373_s4 + $0x110] sm:$0xff]  ;;  %v20472_v27 = vshrl.u32 %v17107_v50, 16 }
 0x541   : > { %3857 = vmatmul.bf16.gmra.mxu0 %v3732_v25  ;;  %20702 = vst [vmem:[#allocation73_spill] sm:$0xff] %v17107_v50  ;;  %3506 = vmatpush.bf16.msrb.mxu3 %v13790_v49  ;;  %v2994_v22 = vsel %vm2969_vm6, %v20705_v40, %v20463_v10  ;;  %v8101_v49 = vunpack.c.l.b16 %v8083_v0  ;;  %v13788_v0 = vld [vmem:[%s20373_s4 + $0x108] sm:$0xff]  ;;  %v6536_v40 = vshrl.u32 %v17130_v37, 16 }
 0x542   : > { %2934 = vmatmul.bf16.gmra.mxu3 %v16714_v61  ;;  %2807 = vmatmul.bf16.gmra.mxu2 %v2677_v41  ;;  %20703 = vst [vmem:[#allocation74_spill] sm:$0xff] %v17109_v39 }
 0x543   : > { %v17105_v7 = vpop.f32.mrf.mxu1  ;;  %20704 = vst [vmem:[#allocation75_spill] sm:$0xff] %v17111_v5  ;;  %4097 = vmatpush.bf16.msra.mxu1 %v13803_v48  ;;  %v6527_v48 = vshrl.u32 %v17109_v39, 16  ;;  %v6538_v38 = vrot.slane %v6536_v40, 1  ;;  %v4658_v40 = vld [vmem:[#allocation2 + $0x8] sm:$0xe] }
 0x544   : > { %v17113_v56 = vpop.f32.mrf.mxu2 }
 0x545   : > { %v2895_v61 = vpop.f32.mrf.mxu3  ;;  %v17121_v41 = vpop.f32.mrf.mxu0  ;;  %3507 = vmatpush.bf16.msrb.mxu3 %v13789_v14  ;;  %v6282_v14 = vrot.slane %v17130_v37, 1  ;;  %v6529_v10 = vrot.slane %v6527_v48, 1  ;;  %v13787_v48 = vld [vmem:[%s20373_s4 + $0x100] sm:$0xff]  ;;  %v6541_v37 = vrot.slane %v6539_v23, 2 }
 0x546   : > { %v2896_v25 = vadd.f32 %v2895_v61, %v16888_v24  ;;  %20706 = vst [vmem:[#allocation76_spill] sm:$0xff] %v17121_v41  ;;  %v6530_v24 = vshll.u32 %v17109_v39, 16  ;;  %v17135_v61 = vpack.c.b16 %v17111_v5, %v8101_v49 }
 0x548   : > { %3119 = vmatmul.bf16.gmra.mxu1 %v2994_v22  ;;  %v17128_v47 = vadd.f32 %v16986_v45, %v2896_v25  ;;  %20707 = vst [vmem:[#allocation77_spill] sm:$0xff] %v17135_v61  ;;  %v8315_v45 = vrot.slane %v20472_v27, 1  ;;  %v6532_v3 = vrot.slane %v6530_v24, 2  ;;  %v8308_v49 = vshrl.u32 %v17135_v61, 16 }
 0x549   : > { %3508 = vmatpush.bf16.msrb.mxu3 %v13788_v0  ;;  %v8311_v57 = vshll.u32 %v17135_v61, 16  ;;  %v20708_v27 = vshll.u32 %v17107_v50, 16  ;;  %v20710_v24 = vrot.slane %v17109_v39, 1  ;;  %v20712_v61 = vrot.slane %v17023_v12, 3 }
 0x54a   : > { %v6542_v50 = vor.u32 %v6541_v37, %v6538_v38  ;;  %v17197_v37 = vld [vmem:[#allocation2 + $0x10] sm:$0xff] }
 0x54b   : > { %v17138_v22 = vpop.f32.mrf.mxu1  ;;  %v8316_v17 = vrot.slane %v20708_v27, 2  ;;  %v17164_v0 = vsel %vm2969_vm6, %v20710_v24, %v6282_v14 }
 0x54c   : > { %v17148_v34 = vpop.f32.mrf.mxu2  ;;  %20711 = vst [vmem:[#allocation79_spill] sm:$0xff] %v17164_v0 }
 0x54d   : > { %v2897_v5 = vpop.f32.mrf.mxu3  ;;  %v17156_v41 = vpop.f32.mrf.mxu0  ;;  %3509 = vmatpush.bf16.msrb.mxu3 %v13787_v48  ;;  %v17173_v44 = vor.u32 %v8316_v17, %v8315_v45  ;;  %v13894_v45 = vld [vmem:[#allocation2 + $0x54] sm:$0xff] }
 0x54e   : > { %v2898_v25 = vadd.f32 %v2897_v5, %v16935_v9  ;;  %20709 = vst [vmem:[#allocation78_spill] sm:$0xff] %v17156_v41  ;;  %v8310_v9 = vrot.slane %v8308_v49, 1  ;;  %v17171_v5 = vor.u32 %v6532_v3, %v6529_v10  ;;  %v8313_v41 = vrot.slane %v8311_v57, 2 }
 0x54f   : > { %20714 = vst [vmem:[#allocation81_spill] sm:$0xff] %v17173_v44  ;;  %v4676_v3 = vunpack.c.l.b16 %v4658_v40  ;;  %v20717_v10 = vrot.slane %v16898_v30, 1  ;;  %v20718_v49 = vunpack.c.h.b16 %v16000_v51 }
 0x550   : > { %v17169_v27 = vadd.f32 %v17055_v33, %v2898_v25  ;;  %20713 = vst [vmem:[#allocation80_spill] sm:$0xff] %v17171_v5  ;;  %v17179_v12 = vsel %vm3174_vm3, %v17171_v5, %v6542_v50  ;;  %v8314_v33 = vor.u32 %v8313_v41, %v8310_v9  ;;  %v2477_v41 = vld [vmem:[#allocation2 + $0x60] sm:$0x3]  ;;  %v4679_v9 = vrot.slane %v17197_v37, 1 }
 0x551   : > { %3862 = vmatmul.bf16.gmra.mxu0 %v20712_v61  ;;  %20715 = vst [vmem:[#allocation82_spill] sm:$0xff] %v17179_v12  ;;  %v4677_v48 = vpack.c.b16 %v20718_v49, %v4676_v3  ;;  %v2813_v40 = vunpack.c.l.b16 %v2477_v41  ;;  %v13895_v5 = vld [vmem:[#allocation2 + $0x5c] sm:$0xff] }
 0x552   : > { %2939 = vmatmul.bf16.gmra.mxu3 %v16822_v8  ;;  %3305 = vmatmul.bf16.vlgmr.msrb.gmra.mxu2 %v16065_v54  ;;  %v17185_v57 = vsel %vm3174_vm3, %v8314_v33, %v17173_v44  ;;  %v6548_v44 = vshll.u32 %v13894_v45, 16 }
 0x553   : > { %v3085_v23 = vpop.f32.mrf.mxu1  ;;  %20716 = vst [vmem:[#allocation83_spill] sm:$0xff] %v17185_v57  ;;  %v2814_v12 = vpack.c.b16 %v2813_v40, %v2813_v40 }
 0x554   : > { %v17181_v25 = vpop.f32.mrf.mxu2  ;;  %v6550_v57 = vrot.slane %v6548_v44, 2 }
 0x555   : > { %v2900_v61 = vpop.f32.mrf.mxu3  ;;  %v17190_v54 = vpop.f32.mrf.mxu0 }
 0x556   : > { %v2901_v17 = vadd.f32 %v2900_v61, %v16999_v53  ;;  %v6284_v53 = vrot.slane %v13894_v45, 1  ;;  %v4678_v61 = vrot.slane %v4677_v48, 1  ;;  %v17212_v48 = vld [vmem:[#allocation2 + $0x64] sm:$0xff] }
 0x557   : > { %20720 = vst [vmem:[#allocation85_spill] sm:$0xff] %v17212_v48 }
 0x558   : > { %3124 = vmatmul.bf16.gmra.mxu1 %v20717_v10  ;;  %v17193_v38 = vadd.f32 %v17105_v7, %v2901_v17  ;;  %v6545_v10 = vshrl.u32 %v13894_v45, 16  ;;  %v17206_v51 = vsel %vm2969_vm6, %v6282_v14, %v6284_v53  ;;  %v4680_v3 = vsel %vm2969_vm6, %v4678_v61, %v4679_v9 }
 0x559   : > { %20719 = vst [vmem:[#allocation84_spill] sm:$0xff] %v17206_v51  ;;  %v20480_v61 = vrot.slane %v17212_v48, 1 }
 0x55a   : > { %v6547_v49 = vrot.slane %v6545_v10, 1  ;;  %v6554_v10 = vshrl.u32 %v13895_v5, 16 }
 0x55b   : > { %v3087_v24 = vpop.f32.mrf.mxu1 }
 0x55c   : > { %v17200_v30 = vpop.f32.mrf.mxu2  ;;  %v6551_v45 = vor.u32 %v6550_v57, %v6547_v49  ;;  %v6557_v57 = vshll.u32 %v13895_v5, 16 }
 0x55d   : > { %v2902_v33 = vpop.f32.mrf.mxu3  ;;  %v17203_v17 = vpop.f32.mrf.mxu0 }
 0x55e   : > { %v2903_v7 = vadd.f32 %v2902_v33, %v17067_v6  ;;  %v17216_v14 = vsel %vm3174_vm3, %v6542_v50, %v6551_v45  ;;  %v6286_v33 = vrot.slane %v13895_v5, 1  ;;  %v6556_v50 = vrot.slane %v6554_v10, 1 }
 0x55f   : > { %20721 = vst [vmem:[#allocation86_spill] sm:$0xff] %v17216_v14  ;;  %v17237_v14 = vld [vmem:[#allocation2 + $0x3c] sm:$0xff] }
 0x560   : > { %v17210_v41 = vadd.f32 %v17138_v22, %v2903_v7  ;;  %20724 = vst [vmem:[#allocation89_spill] sm:$0xff] %v17237_v14  ;;  %v20484_v5 = vshll.u32 %v17237_v14, 16 }
 0x561   : > { %4772 = vmatmul.bf16.vlgmr.msra.gmra.mxu0 %v4680_v3  ;;  %v17233_v3 = vld [vmem:[#allocation2 + $0x18] sm:$0xff]  }
 0x562   : > { %2944 = vmatmul.bf16.gmra.mxu3 %v2814_v12  ;;  %3310 = vmatmul.bf16.gmra.mxu2 %v16125_v16  ;;  %v17226_v12 = vsel %vm2969_vm6, %v6284_v53, %v6286_v33  ;;  %v17231_v16 = vsel %vm2969_vm6, %v6286_v33, %v20480_v61 }
 0x563   : > { %v3090_v6 = vpop.f32.mrf.mxu1  ;;  %20722 = vst [vmem:[#allocation87_spill] sm:$0xff] %v17226_v12  ;;  %v4681_v12 = vrot.slane %v17233_v3, 1 }
 0x564   : > { %v17219_v40 = vpop.f32.mrf.mxu2  ;;  %20723 = vst [vmem:[#allocation88_spill] sm:$0xff] %v17231_v16 }
 0x565   : > { %v2905_v44 = vpop.f32.mrf.mxu3  ;;  %v17223_v7 = vpop.f32.mrf.mxu0  ;;  %v4682_v39 = vsel %vm2969_vm6, %v4679_v9, %v4681_v12 }
 0x566   : > { %v2906_v22 = vadd.f32 %v2905_v44, %v17113_v56  ;;  %v6559_v56 = vrot.slane %v6557_v57, 2  ;;  %v6566_v44 = vshll.u32 %v17212_v48, 16 }
 0x568   : > { %4098 = vmatmul.bf16.vlgmr.msra.gmra.mxu1 %v16102_v62  ;;  %v17235_v49 = vadd.f32 %v3085_v23, %v2906_v22  ;;  %v6563_v62 = vshrl.u32 %v17212_v48, 16  ;;  %v6560_v51 = vor.u32 %v6559_v56, %v6556_v50  ;;  %v6568_v33 = vrot.slane %v6566_v44, 2 }
 0x569   : > { %v20483_v23 = vshrl.u32 %v17237_v14, 16 }
 0x56a   : > { %v6565_v0 = vrot.slane %v6563_v62, 1  ;;  %v17245_v22 = vsel %vm3174_vm3, %v6551_v45, %v6560_v51  ;;  %v8328_v45 = vrot.slane %v20484_v5, 2 }
 0x56b   : > { %v3092_v53 = vpop.f32.mrf.mxu1  ;;  %20725 = vst [vmem:[#allocation90_spill] sm:$0xff] %v17245_v22  ;;  %v8327_v62 = vrot.slane %v20483_v23, 1  ;;  %v17278_v23 = vld [vmem:[#allocation2 + $0x44] sm:$0xff]  ;;  %v13928_v22 = vld [vmem:[#allocation2 + $0x4c] sm:$0xff] }
 0x56c   : > { %v2780_v10 = vpop.f32.mrf.mxu2  ;;  %v17250_v48 = vor.u32 %v6568_v33, %v6565_v0  ;;  %v17265_v0 = vld [vmem:[#allocation2 + $0x3c] sm:$0xff]  ;;  %20730 = vst [vmem:[#allocation95_spill] sm:$0xff] %v17278_v23  ;;  %v20491_v5 = vshll.u32 %v17278_v23, 16 }
 0x56d   : > { %v2907_v61 = vpop.f32.mrf.mxu3  ;;  %v17248_v16 = vpop.f32.mrf.mxu0  ;;  %20728 = vst [vmem:[#allocation93_spill] sm:$0xff] %v17265_v0  ;;  %v20487_v33 = vrot.slane %v17265_v0, 3 }
 0x56e   : > { %v2908_v57 = vadd.f32 %v2907_v61, %v17148_v34  ;;  %20726 = vst [vmem:[#allocation91_spill] sm:$0xff] %v17250_v48  ;;  %v17257_v56 = vsel %vm3174_vm3, %v6560_v51, %v17250_v48 }
 0x56f   : > { %20727 = vst [vmem:[#allocation92_spill] sm:$0xff] %v17257_v56 }
 0x570   : > { %v17253_v50 = vadd.f32 %v3087_v24, %v2908_v57  ;;  %v17267_v24 = vor.u32 %v8328_v45, %v8327_v62 }
 0x571   : > { %4777 = vmatmul.bf16.gmra.mxu0 %v4682_v39  ;;  %v13927_v39 = vld [vmem:[#allocation2 + $0x44] sm:$0xff] }
 0x572   : > { %3510 = vmatmul.bf16.vlgmr.msrb.gmra.mxu3 %v16059_v28  ;;  %3315 = vmatmul.bf16.gmra.mxu2 %v16183_v58  ;;  %20729 = vst [vmem:[#allocation94_spill] sm:$0xff] %v17267_v24  ;;  %v7365_v57 = vrot.slane %v13927_v39, 3  ;;  %v17274_v28 = vld [vmem:[#allocation2 + $0x20] sm:$0xff]   ;;  %v20490_v39 = vshrl.u32 %v17278_v23, 16 }
 0x573   : > { %v3095_v34 = vpop.f32.mrf.mxu1 }
 0x574   : > { %v2783_v61 = vpop.f32.mrf.mxu2  ;;  %v17283_v62 = vsel %vm3707_vm4, %v20487_v33, %v7365_v57  ;;  %v8331_v33 = vrot.slane %v20490_v39, 1 }
 0x575   : > { %v2910_v9 = vpop.f32.mrf.mxu3  ;;  %v17271_v44 = vpop.f32.mrf.mxu0  ;;  %20731 = vst [vmem:[#allocation96_spill] sm:$0xff] %v17283_v62  ;;  %v8332_v62 = vrot.slane %v20491_v5, 2 }
 0x576   : > { %v2911_v51 = vadd.f32 %v2910_v9, %v17181_v25  ;;  %v4683_v25 = vrot.slane %v17274_v28, 1 }
 0x578   : > { %4103 = vmatmul.bf16.gmra.mxu1 %v16188_v2  ;;  %v17276_v58 = vadd.f32 %v3090_v6, %v2911_v51  ;;  %v4684_v51 = vsel %vm2969_vm6, %v4681_v12, %v4683_v25 }
 0x57b   : > { %v3097_v45 = vpop.f32.mrf.mxu1 }
 0x57c   : > { %v2785_v9 = vpop.f32.mrf.mxu2 }
 0x57d   : > { %v2912_v2 = vpop.f32.mrf.mxu3 }
 0x57e   : > { %v2913_v48 = vadd.f32 %v2912_v2, %v17200_v30  ;;  %v17289_v6 = vpop.f32.mrf.mxu0  ;;  %v17300_v30 = vor.u32 %v8332_v62, %v8331_v33 }
 0x580   : > { %v17292_v0 = vadd.f32 %v3092_v53, %v2913_v48  ;;  %20732 = vst [vmem:[#allocation97_spill] sm:$0xff] %v17300_v30  ;;  %v17305_v48 = vsel %vm3174_vm3, %v17267_v24, %v17300_v30 }
 0x581   : > { %4782 = vmatmul.bf16.gmra.mxu0 %v4684_v51  ;;  %20733 = vst [vmem:[#allocation98_spill] sm:$0xff] %v17305_v48  ;;  %v17311_v51 = vld [vmem:[#allocation2 + $0x28] sm:$0xff]  }
 0x582   : > { %3515 = vmatmul.bf16.gmra.mxu3 %v16113_v42  ;;  %3320 = vmatmul.bf16.gmra.mxu2 %v16266_v46  ;;  %v7367_v42 = vrot.slane %v13928_v22, 3  ;;  %v4685_v39 = vrot.slane %v17311_v51, 1 }
 0x583   : > { %v3100_v56 = vpop.f32.mrf.mxu1 }
 0x584   : > { %v17316_v33 = vsel %vm3707_vm4, %v7365_v57, %v7367_v42 }
 0x585   : > { %v2915_v2 = vpop.f32.mrf.mxu3  ;;  %v2788_v14 = vpop.f32.mrf.mxu2  ;;  %20734 = vst [vmem:[#allocation99_spill] sm:$0xff] %v17316_v33 }
 0x586   : > { %v2916_v12 = vadd.f32 %v2915_v2, %v17219_v40  ;;  %v17309_v53 = vpop.f32.mrf.mxu0 }
 0x588   : > { %4108 = vmatmul.bf16.gmra.mxu1 %v16271_v43  ;;  %v17313_v46 = vadd.f32 %v3095_v34, %v2916_v12  ;;  %v4686_v43 = vsel %vm2969_vm6, %v4683_v25, %v4685_v39  ;;  %v13929_v34 = vld [vmem:[#allocation2 + $0x54] sm:$0xff] }
 0x58b   : > { %v3102_v62 = vpop.f32.mrf.mxu1 }
 0x58d   : > { %v2917_v5 = vpop.f32.mrf.mxu3  ;;  %v2790_v30 = vpop.f32.mrf.mxu2 }
 0x58e   : > { %v2918_v48 = vadd.f32 %v2917_v5, %v2780_v10  ;;  %v17319_v24 = vpop.f32.mrf.mxu0  ;;  %v7369_v10 = vrot.slane %v13929_v34, 3  ;;  %v17329_v5 = vld [vmem:[#allocation2 + $0x30] sm:$0xff]  }
 0x590   : > { %v17322_v40 = vadd.f32 %v3097_v45, %v2918_v48  ;;  %v17334_v45 = vsel %vm3707_vm4, %v7367_v42, %v7369_v10  ;;  %v13930_v48 = vld [vmem:[#allocation2 + $0x5c] sm:$0xff] }
 0x591   : > { %4787 = vmatmul.bf16.gmra.mxu0 %v4686_v43  ;;  %20736 = vst [vmem:[#allocation101_spill] sm:$0xff] %v17334_v45  ;;  %v17337_v43 = vld [vmem:[#allocation2 + $0x64] sm:$0xff] }
 0x592   : > { %3520 = vmatmul.bf16.gmra.mxu3 %v16178_v59  ;;  %3325 = vmatmul.bf16.gmra.mxu2 %v16341_v55  ;;  %v4687_v55 = vrot.slane %v17329_v5, 1  ;;  %20737 = vst [vmem:[#allocation102_spill] sm:$0xff] %v17337_v43 }
 0x594   : > { %v4688_v34 = vsel %vm2969_vm6, %v4685_v39, %v4687_v55 }
 0x595   : > { %v3105_v22 = vpop.f32.mrf.mxu1  ;;  %v2920_v57 = vpop.f32.mrf.mxu3 }
 0x596   : > { %v2793_v2 = vpop.f32.mrf.mxu2  ;;  %v2921_v12 = vadd.f32 %v2920_v57, %v2783_v61  ;;  %v17327_v33 = vpop.f32.mrf.mxu0 }
 0x597   : > { %20735 = vst [vmem:[#allocation100_spill] sm:$0xff] %v17327_v33  ;;  %v7371_v33 = vrot.slane %v13930_v48, 3 }
 0x598   : > { %4113 = vmatmul.bf16.gmra.mxu1 %v16345_v29  ;;  %v17331_v25 = vadd.f32 %v3100_v56, %v2921_v12  ;;  %v20496_v56 = vrot.slane %v17337_v43, 3 }
 0x599   : > { %v17346_v42 = vsel %vm3707_vm4, %v7369_v10, %v7371_v33 }
 0x59a   : > { %20738 = vst [vmem:[#allocation103_spill] sm:$0xff] %v17346_v42  ;;  %v17351_v45 = vsel %vm3707_vm4, %v7371_v33, %v20496_v56 }
 0x59b   : > { %20739 = vst [vmem:[#allocation104_spill] sm:$0xff] %v17351_v45 }
 0x59d   : > { %v3107_v59 = vpop.f32.mrf.mxu1  ;;  %v2922_v23 = vpop.f32.mrf.mxu3 }
 0x59e   : > { %v2795_v61 = vpop.f32.mrf.mxu2  ;;  %v2923_v57 = vadd.f32 %v2922_v23, %v2785_v9  ;;  %v17339_v29 = vpop.f32.mrf.mxu0 }
 0x5a0   : > { %v17343_v12 = vadd.f32 %v3102_v62, %v2923_v57  ;;  %v17358_v57 = vld [vmem:[#allocation2 + $0x38] sm:$0xff]  }
 0x5a1   : > { %4792 = vmatmul.bf16.gmra.mxu0 %v4688_v34  ;;  %v4689_v33 = vrot.slane %v17358_v57, 1 }
 0x5a2   : > { %3525 = vmatmul.bf16.gmra.mxu3 %v16255_v15  ;;  %3330 = vmatmul.bf16.gmra.mxu2 %v16416_v35 }
 0x5a3   : > { %v4690_v35 = vsel %vm2969_vm6, %v4687_v55, %v4689_v33 }
 0x5a5   : > { %v3110_v23 = vpop.f32.mrf.mxu1  ;;  %v2925_v9 = vpop.f32.mrf.mxu3 }
 0x5a6   : > { %v2798_v39 = vpop.f32.mrf.mxu2  ;;  %v2926_v48 = vadd.f32 %v2925_v9, %v2788_v14  ;;  %v17356_v62 = vpop.f32.mrf.mxu0 }
 0x5a8   : > { %4118 = vmatmul.bf16.gmra.mxu1 %v16420_v32  ;;  %v17360_v10 = vadd.f32 %v3105_v22, %v2926_v48 }
 0x5ad   : > { %v3112_v34 = vpop.f32.mrf.mxu1  ;;  %v2927_v56 = vpop.f32.mrf.mxu3 }
 0x5ae   : > { %v2800_v43 = vpop.f32.mrf.mxu2  ;;  %v2928_v15 = vadd.f32 %v2927_v56, %v2790_v30  ;;  %v17363_v45 = vpop.f32.mrf.mxu0  ;;  %v17373_v30 = vld [vmem:[#allocation2 + $0x40] sm:$0xff]  }
 0x5af   : > { %20740 = vst [vmem:[#allocation105_spill] sm:$0xff] %v17363_v45 }
 0x5b0   : > { %v17366_v14 = vadd.f32 %v3107_v59, %v2928_v15  ;;  %v4691_v59 = vrot.slane %v17373_v30, 1 }
 0x5b1   : > { %4797 = vmatmul.bf16.gmra.mxu0 %v4690_v35 }
 0x5b2   : > { %3530 = vmatmul.bf16.gmra.mxu3 %v16335_v31  ;;  %3335 = vmatmul.bf16.gmra.mxu2 %v16499_v26  ;;  %v4692_v26 = vsel %vm2969_vm6, %v4689_v33, %v4691_v59 }
 0x5b5   : > { %v3115_v32 = vpop.f32.mrf.mxu1  ;;  %v2930_v22 = vpop.f32.mrf.mxu3 }
 0x5b6   : > { %v2803_v9 = vpop.f32.mrf.mxu2  ;;  %v2931_v48 = vadd.f32 %v2930_v22, %v2793_v2  ;;  %v17371_v42 = vpop.f32.mrf.mxu0 }
 0x5b7   : > { %20741 = vst [vmem:[#allocation106_spill] sm:$0xff] %v17371_v42 }
 0x5b8   : > { %4123 = vmatmul.bf16.gmra.mxu1 %v16504_v18  ;;  %v17375_v56 = vadd.f32 %v3110_v23, %v2931_v48 }
 0x5bd   : > { %v3117_v55 = vpop.f32.mrf.mxu1  ;;  %v2932_v15 = vpop.f32.mrf.mxu3 }
 0x5be   : > { %v2805_v35 = vpop.f32.mrf.mxu2  ;;  %v2933_v31 = vadd.f32 %v2932_v15, %v2795_v61  ;;  %v17378_v45 = vpop.f32.mrf.mxu0  ;;  %v17388_v61 = vld [vmem:[#allocation2 + $0x48] sm:$0xff]  }
 0x5bf   : > { %20742 = vst [vmem:[#allocation107_spill] sm:$0xff] %v17378_v45 }
 0x5c0   : > { %v17381_v2 = vadd.f32 %v3112_v34, %v2933_v31  ;;  %20744 = vst [vmem:[#allocation109_spill] sm:$0xff] %v17388_v61  ;;  %v4693_v34 = vrot.slane %v17388_v61, 1  ;;  %v20746_v61 = vld [vmem:[#allocation34_spill] sm:$0xff] }
 0x5c1   : > { %4802 = vmatmul.bf16.gmra.mxu0 %v4692_v26 }
 0x5c2   : > { %3535 = vmatmul.bf16.gmra.mxu3 %v16412_v4  ;;  %3340 = vmatmul.bf16.gmra.mxu2 %v16594_v36  ;;  %v4694_v36 = vsel %vm2969_vm6, %v4691_v59, %v4693_v34 }
 0x5c5   : > { %v3120_v18 = vpop.f32.mrf.mxu1  ;;  %v2935_v23 = vpop.f32.mrf.mxu3 }
 0x5c6   : > { %v2808_v22 = vpop.f32.mrf.mxu2  ;;  %v2936_v48 = vadd.f32 %v2935_v23, %v2798_v39  ;;  %v17386_v42 = vpop.f32.mrf.mxu0 }
 0x5c7   : > { %20743 = vst [vmem:[#allocation108_spill] sm:$0xff] %v17386_v42 }
 0x5c8   : > { %4128 = vmatmul.bf16.gmra.mxu1 %v16599_v19  ;;  %v17390_v15 = vadd.f32 %v3115_v32, %v2936_v48 }
 0x5cd   : > { %v3122_v33 = vpop.f32.mrf.mxu1  ;;  %v2937_v31 = vpop.f32.mrf.mxu3 }
 0x5ce   : > { %v2810_v26 = vpop.f32.mrf.mxu2  ;;  %v2938_v4 = vadd.f32 %v2937_v31, %v2800_v43  ;;  %v17393_v45 = vpop.f32.mrf.mxu0  ;;  %v17402_v31 = vld [vmem:[#allocation2 + $0x50] sm:$0xff]  }
 0x5cf   : > { %20745 = vst [vmem:[#allocation110_spill] sm:$0xff] %v17393_v45 }
 0x5d0   : > { %v17396_v39 = vadd.f32 %v3117_v55, %v2938_v4  ;;  %20747 = vst [vmem:[#allocation34_spill] sm:$0xff] %v17402_v31  ;;  %v4695_v55 = vrot.slane %v17402_v31, 1  ;;  %v20761_v31 = vld [vmem:[#allocation46_spill] sm:$0xff] }
 0x5d1   : > { %4807 = vmatmul.bf16.gmra.mxu0 %v4694_v36 }
 0x5d2   : > { %3540 = vmatmul.bf16.gmra.mxu3 %v16490_v60  ;;  %3345 = vmatmul.bf16.gmra.mxu2 %v16680_v21 }
 0x5d5   : > { %v3125_v19 = vpop.f32.mrf.mxu1  ;;  %v2940_v32 = vpop.f32.mrf.mxu3 }
 0x5d6   : > { %v3306_v23 = vpop.f32.mrf.mxu2  ;;  %v2941_v48 = vadd.f32 %v2940_v32, %v2803_v9  ;;  %v3865_v43 = vpop.f32.mrf.mxu0  ;;  %v13818_v32 = vld [vmem:[%s20373_s4 + $0x1f8] sm:$0xff] }
 0x5d7   : > { %v3370_v42 = vadd.f32 %v3306_v23, %v16915_v13  ;;  %v4696_v13 = vsel %vm2969_vm6, %v4693_v34, %v4695_v55  ;;  %4278 = vmatpush.bf16.msra.mxu2 %v13818_v32  ;;  %v20750_v34 = vld [vmem:[#allocation44_spill] sm:$0xff] }
 0x5d8   : > { %4133 = vmatmul.bf16.gmra.mxu1 %v20746_v61  ;;  %v17404_v26 = vadd.f32 %v3120_v18, %v2941_v48  ;;  %v20749_v61 = vld [vmem:[#allocation32_spill] sm:$0xff] }
 0x5d9   : > { %v17426_v43 = vld [vmem:[#allocation2 + $0x58] sm:$0xff]  }
 0x5da   : > { %20752 = vst [vmem:[#allocation44_spill] sm:$0xff] %v17426_v43 }
 0x5dd   : > { %v3127_v59 = vpop.f32.mrf.mxu1  ;;  %v2942_v4 = vpop.f32.mrf.mxu3 }
 0x5de   : > { %v3308_v60 = vpop.f32.mrf.mxu2  ;;  %v2943_v36 = vadd.f32 %v2942_v4, %v2805_v35  ;;  %v17410_v45 = vpop.f32.mrf.mxu0  ;;  %v3154_v4 = vld [vmem:[#allocation2 + $0x60] sm:$0xf] }
 0x5df   : > { %v17408_v21 = vadd.f32 %v3308_v60, %v16963_v11  ;;  %20748 = vst [vmem:[#allocation111_spill] sm:$0xff] %v17410_v45  ;;  %v13854_v45 = vld [vmem:[%s20373_s4 + $0x2b8] sm:$0xff] }
 0x5e0   : > { %v17413_v9 = vadd.f32 %v3122_v33, %v2943_v36  ;;  %5052 = vmatpush.bf16.msrb.mxu1 %v13854_v45  ;;  %v13876_v45 = vld [vmem:[%s20373_s4 + $0x368] sm:$0xff] }
 0x5e1   : > { %4812 = vmatmul.bf16.gmra.mxu0 %v4696_v13 }
 0x5e2   : > { %3545 = vmatmul.bf16.gmra.mxu3 %v20749_v61  ;;  %3350 = vmatmul.bf16.gmra.mxu2 %v16770_v63  ;;  %v13817_v63 = vld [vmem:[%s20373_s4 + $0x1f0] sm:$0xff]  ;;  %v3172_v61 = vunpack.c.l.b16 %v3154_v4 }
 0x5e3   : > { %4279 = vmatpush.bf16.msra.mxu2 %v13817_v63  ;;  %v20755_v63 = vld [vmem:[#allocation53_spill] sm:$0xff] }
 0x5e5   : > { %v4099_v18 = vpop.f32.mrf.mxu1  ;;  %v2945_v35 = vpop.f32.mrf.mxu3 }
 0x5e6   : > { %v3311_v23 = vpop.f32.mrf.mxu2  ;;  %v2946_v11 = vadd.f32 %v2945_v35, %v2808_v22  ;;  %v17424_v33 = vpop.f32.mrf.mxu0  ;;  %v4697_v22 = vrot.slane %v17426_v43, 1  ;;  %v13813_v43 = vld [vmem:[%s20373_s4 + $0x1d0] sm:$0xff] }
 0x5e7   : > { %v17421_v48 = vadd.f32 %v3311_v23, %v17029_v52  ;;  %20751 = vst [vmem:[#allocation32_spill] sm:$0xff] %v17424_v33  ;;  %v13816_v52 = vld [vmem:[%s20373_s4 + $0x1e8] sm:$0xff]  ;;  %v13815_v23 = vld [vmem:[%s20373_s4 + $0x1e0] sm:$0xff] }
 0x5e8   : > { %4138 = vmatmul.bf16.gmra.mxu1 %v20750_v34  ;;  %v17431_v59 = vadd.f32 %v3125_v19, %v2946_v11  ;;  %4280 = vmatpush.bf16.msra.mxu2 %v13816_v52  ;;  %v4698_v19 = vsel %vm2969_vm6, %v4695_v55, %v4697_v22  ;;  %v17448_v11 = vpack.c.b16 %v3172_v61, %v3172_v61  ;;  %v20754_v34 = vld [vmem:[#allocation33_spill] sm:$0xff]  ;;  %v13878_v55 = vld [vmem:[%s20373_s4 + $0x378] sm:$0xff] }
 0x5e9   : > { %5879 = vmatpush.bf16.msrb.mxu0 %v13878_v55 }
 0x5ea   : > { %v3231_v61 = vshll.u32 %v17448_v11, 16 }
 0x5ec   : > { %4281 = vmatpush.bf16.msra.mxu2 %v13815_v23  ;;  %v20756_v23 = vld [vmem:[#allocation54_spill] sm:$0xff]  ;;  %v3233_v55 = vrot.slane %v3231_v61, 2 }
 0x5ed   : > { %v17433_v60 = vpop.f32.mrf.mxu1  ;;  %v2947_v36 = vpop.f32.mrf.mxu3 }
 0x5ee   : > { %v3313_v13 = vpop.f32.mrf.mxu2  ;;  %v17442_v35 = vpop.f32.mrf.mxu0 }
 0x5ef   : > { %v17440_v32 = vadd.f32 %v3313_v13, %v17095_v20  ;;  %20753 = vst [vmem:[#allocation112_spill] sm:$0xff] %v17442_v35  ;;  %v13814_v20 = vld [vmem:[%s20373_s4 + $0x1d8] sm:$0xff]  ;;  %v3228_v13 = vshrl.u32 %v17448_v11, 16 }
 0x5f0   : > { %4282 = vmatpush.bf16.msra.mxu2 %v13814_v20  ;;  %v20758_v35 = vld [vmem:[#allocation27_spill] sm:$0xff] }
 0x5f1   : > { %4817 = vmatmul.bf16.gmra.mxu0 %v4698_v19 }
 0x5f2   : > { %3550 = vmatmul.bf16.gmra.mxu3 %v20754_v34  ;;  %3355 = vmatmul.bf16.gmra.mxu2 %v20755_v63 }
 0x5f4   : > { %4283 = vmatpush.bf16.msra.mxu2 %v13813_v43 }
 0x5f5   : > { %v17452_v4 = vpop.f32.mrf.mxu1  ;;  %v3511_v52 = vpop.f32.mrf.mxu3 }
 0x5f6   : > { %v3316_v36 = vpop.f32.mrf.mxu2  ;;  %v3575_v19 = vadd.f32 %v3511_v52, %v3370_v42  ;;  %v17466_v63 = vpop.f32.mrf.mxu0  ;;  %v3230_v42 = vrot.slane %v3228_v13, 1 }
 0x5f7   : > { %v17463_v34 = vadd.f32 %v3316_v36, %v17128_v47  ;;  %20757 = vst [vmem:[#allocation33_spill] sm:$0xff] %v17466_v63  ;;  %v13877_v47 = vld [vmem:[%s20373_s4 + $0x370] sm:$0xff]  ;;  %v4376_v63 = vld [vmem:[#allocation2 + $0x68] sm:$0x7] }
 0x5f8   : > { %4143 = vmatmul.bf16.gmra.mxu1 %v20756_v23  ;;  %v3867_v33 = vadd.f32 %v20758_v35, %v3575_v19  ;;  %5880 = vmatpush.bf16.msrb.mxu0 %v13877_v47  ;;  %v4699_v35 = vrot.slane %v16873_v1, 1  ;;  %v13853_v36 = vld [vmem:[%s20373_s4 + $0x2b0] sm:$0xff]  ;;  %v13812_v19 = vld [vmem:[%s20373_s4 + $0x1c8] sm:$0xff] }
 0x5f9   : > { %5053 = vmatpush.bf16.msrb.mxu1 %v13853_v36  ;;  %4284 = vmatpush.bf16.msra.mxu2 %v13812_v19  ;;  %v20763_v36 = vld [vmem:[#allocation43_spill] sm:$0xff] }
 0x5fa   : > { %v17478_v52 = vadd.f32 %v4099_v18, %v3867_v33  ;;  %v17492_v33 = vor.u32 %v3233_v55, %v3230_v42  ;;  %v4700_v47 = vsel %vm2969_vm6, %v4697_v22, %v4699_v35  ;;  %v13875_v42 = vld [vmem:[%s20373_s4 + $0x360] sm:$0xff]  ;;  %v20770_v1 = vld [vmem:[#allocation51_spill] sm:$0xff] }
 0x5fb   : > { %v20762_v55 = vld [vmem:[#allocation52_spill] sm:$0xff] }
 0x5fc   : > { %20759 = vst [vmem:[#allocation53_spill] sm:$0xff] %v17478_v52  ;;  %5881 = vmatpush.bf16.msrb.mxu0 %v13876_v45  ;;  %v3235_v22 = vsel %vm3174_vm3, %v20762_v55, %v17492_v33  ;;  %v4394_v45 = vunpack.c.l.b16 %v4376_v63 }
 0x5fd   : > { %v17480_v20 = vpop.f32.mrf.mxu1  ;;  %v3513_v13 = vpop.f32.mrf.mxu3 }
 0x5fe   : > { %v3318_v18 = vpop.f32.mrf.mxu2  ;;  %v3576_v61 = vadd.f32 %v3513_v13, %v17408_v21  ;;  %v17498_v23 = vpop.f32.mrf.mxu0  ;;  %v13852_v21 = vld [vmem:[%s20373_s4 + $0x2a8] sm:$0xff]  ;;  %v13826_v13 = vld [vmem:[%s20373_s4 + $0x238] sm:$0xff]  ;;  %v17538_v55 = vpack.c.b16 %v4394_v45, %v4394_v45 }
 0x5ff   : > { %v17496_v43 = vadd.f32 %v3318_v18, %v17169_v27  ;;  %20760 = vst [vmem:[#allocation54_spill] sm:$0xff] %v17498_v23  ;;  %v13811_v27 = vld [vmem:[%s20373_s4 + $0x1c0] sm:$0xff]  ;;  %5054 = vmatpush.bf16.msrb.mxu1 %v13852_v21  ;;  %4560 = vmatpush.bf16.msra.mxu3 %v13826_v13 }
 0x600   : > { %v3868_v52 = vadd.f32 %v20761_v31, %v3576_v61  ;;  %4285 = vmatpush.bf16.msra.mxu2 %v13811_v27  ;;  %v13851_v18 = vld [vmem:[%s20373_s4 + $0x2a0] sm:$0xff]  ;;  %5882 = vmatpush.bf16.msrb.mxu0 %v13875_v42  ;;  %v13874_v61 = vld [vmem:[%s20373_s4 + $0x358] sm:$0xff]  ;;  %20766 = vst [vmem:[#allocation46_spill] sm:$0xff] %v17538_v55  ;;  %v20767_v42 = vld [vmem:[#allocation50_spill] sm:$0xff] }
 0x601   : > { %4822 = vmatmul.bf16.gmra.mxu0 %v4700_v47  ;;  %v20764_v21 = vld [vmem:[#allocation60_spill] sm:$0xff] }
 0x602   : > { %3555 = vmatmul.bf16.gmra.mxu3 %v20763_v36  ;;  %3360 = vmatmul.bf16.gmra.mxu2 %v3235_v22  ;;  %v17518_v31 = vadd.f32 %v17433_v60, %v3868_v52  ;;  %v13825_v36 = vld [vmem:[%s20373_s4 + $0x230] sm:$0xff] }
 0x603   : > { %5055 = vmatpush.bf16.msrb.mxu1 %v13851_v18  ;;  %4561 = vmatpush.bf16.msra.mxu3 %v13825_v36  ;;  %v4701_v18 = vrot.slane %v17538_v55, 1 }
 0x604   : > { %5883 = vmatpush.bf16.msrb.mxu0 %v13874_v61  ;;  %v13824_v61 = vld [vmem:[%s20373_s4 + $0x228] sm:$0xff] }
 0x605   : > { %v17520_v19 = vpop.f32.mrf.mxu1  ;;  %v3516_v60 = vpop.f32.mrf.mxu3  ;;  %v4702_v36 = vsel %vm2969_vm6, %v4699_v35, %v4701_v18 }
 0x606   : > { %v3321_v52 = vpop.f32.mrf.mxu2  ;;  %v3577_v63 = vadd.f32 %v3516_v60, %v17421_v48  ;;  %v17536_v27 = vpop.f32.mrf.mxu0  ;;  %v13850_v48 = vld [vmem:[%s20373_s4 + $0x298] sm:$0xff]  ;;  %v13849_v60 = vld [vmem:[%s20373_s4 + $0x290] sm:$0xff] }
 0x607   : > { %v17533_v47 = vadd.f32 %v3321_v52, %v17193_v38  ;;  %20765 = vst [vmem:[#allocation27_spill] sm:$0xff] %v17536_v27  ;;  %v13873_v38 = vld [vmem:[%s20373_s4 + $0x350] sm:$0xff]  ;;  %5056 = vmatpush.bf16.msrb.mxu1 %v13850_v48  ;;  %4562 = vmatpush.bf16.msra.mxu3 %v13824_v61  ;;  %v13823_v27 = vld [vmem:[%s20373_s4 + $0x220] sm:$0xff] }
 0x608   : > { %4148 = vmatmul.bf16.gmra.mxu1 %v20764_v21  ;;  %v3869_v22 = vadd.f32 %v20767_v42, %v3577_v63  ;;  %5884 = vmatpush.bf16.msrb.mxu0 %v13873_v38  ;;  %v20769_v48 = vld [vmem:[#allocation55_spill] sm:$0xff] }
 0x60a   : > { %v17551_v45 = vadd.f32 %v17452_v4, %v3869_v22  ;;  %v13872_v4 = vld [vmem:[%s20373_s4 + $0x348] sm:$0xff] }
 0x60b   : > { %5057 = vmatpush.bf16.msrb.mxu1 %v13849_v60  ;;  %4563 = vmatpush.bf16.msra.mxu3 %v13823_v27  ;;  %v13822_v60 = vld [vmem:[%s20373_s4 + $0x218] sm:$0xff] }
 0x60c   : > { %5885 = vmatpush.bf16.msrb.mxu0 %v13872_v4 }
 0x60d   : > { %v4111_v13 = vpop.f32.mrf.mxu1  ;;  %v3518_v52 = vpop.f32.mrf.mxu3 }
 0x60e   : > { %v3323_v63 = vpop.f32.mrf.mxu2  ;;  %v3578_v21 = vadd.f32 %v3518_v52, %v17440_v32  ;;  %v17567_v22 = vpop.f32.mrf.mxu0  ;;  %v13871_v32 = vld [vmem:[%s20373_s4 + $0x340] sm:$0xff] }
 0x60f   : > { %v17565_v42 = vadd.f32 %v3323_v63, %v17210_v41  ;;  %20768 = vst [vmem:[#allocation52_spill] sm:$0xff] %v17567_v22  ;;  %v13848_v41 = vld [vmem:[%s20373_s4 + $0x288] sm:$0xff]  ;;  %v13847_v52 = vld [vmem:[%s20373_s4 + $0x280] sm:$0xff]  ;;  %4564 = vmatpush.bf16.msra.mxu3 %v13822_v60  ;;  %v3439_v60 = vrot.slane %v17448_v11, 2 }
 0x610   : > { %v3870_v38 = vadd.f32 %v20769_v48, %v3578_v21  ;;  %5058 = vmatpush.bf16.msrb.mxu1 %v13848_v41  ;;  %5886 = vmatpush.bf16.msrb.mxu0 %v13871_v32  ;;  %v17624_v11 = vld [vmem:[#allocation2 + $0x8] sm:$0xff] }
 0x611   : > { %4827 = vmatmul.bf16.gmra.mxu0 %v4702_v36  ;;  %v20773_v36 = vld [vmem:[#allocation59_spill] sm:$0xff] }
 0x612   : > { %3560 = vmatmul.bf16.gmra.mxu3 %v20770_v1  ;;  %3365 = vmatmul.bf16.gmra.mxu2 %v17492_v33  ;;  %v17585_v35 = vadd.f32 %v17480_v20, %v3870_v38  ;;  %v20771_v20 = vld [vmem:[#allocation63_spill] sm:$0xff] }
 0x613   : > { %v13821_v38 = vld [vmem:[%s20373_s4 + $0x210] sm:$0xff] }
 0x614   : > { %5059 = vmatpush.bf16.msrb.mxu1 %v13847_v52  ;;  %4565 = vmatpush.bf16.msra.mxu3 %v13821_v38 }
 0x615   : > { %v4114_v61 = vpop.f32.mrf.mxu1  ;;  %v3521_v63 = vpop.f32.mrf.mxu3 }
 0x616   : > { %v3326_v4 = vpop.f32.mrf.mxu2  ;;  %v3579_v21 = vadd.f32 %v3521_v63, %v17463_v34  ;;  %v17598_v27 = vpop.f32.mrf.mxu0 }
 0x617   : > { %v17595_v33 = vadd.f32 %v3326_v4, %v17235_v49  ;;  %20772 = vst [vmem:[#allocation43_spill] sm:$0xff] %v17598_v27  ;;  %v13820_v49 = vld [vmem:[%s20373_s4 + $0x208] sm:$0xff]  ;;  %v20785_v27 = vld [vmem:[#allocation72_spill] sm:$0xff] }
 0x618   : > { %4153 = vmatmul.bf16.gmra.mxu1 %v20771_v20  ;;  %v3871_v48 = vadd.f32 %v20773_v36, %v3579_v21  ;;  %4566 = vmatpush.bf16.msra.mxu3 %v13820_v49  ;;  %v13819_v20 = vld [vmem:[%s20373_s4 + $0x200] sm:$0xff]  ;;  %v20777_v36 = vrot.slane %v16822_v8, 2 }
 0x61a   : > { %v17605_v41 = vadd.f32 %v17520_v19, %v3871_v48  ;;  %v20776_v19 = vld [vmem:[#allocation64_spill] sm:$0xff]  ;;  %v3440_v48 = vsel %vm3415_vm2, %v20777_v36, %v3439_v60 }
 0x61c   : > { %20774 = vst [vmem:[#allocation60_spill] sm:$0xff] %v17605_v41  ;;  %4567 = vmatpush.bf16.msra.mxu3 %v13819_v20  ;;  %v13836_v41 = vld [vmem:[#allocation2 + $0x14] sm:$0xff] }
 0x61d   : > { %v4116_v32 = vpop.f32.mrf.mxu1  ;;  %v3523_v34 = vpop.f32.mrf.mxu3 }
 0x61e   : > { %v3328_v1 = vpop.f32.mrf.mxu2  ;;  %v3580_v52 = vadd.f32 %v3523_v34, %v17496_v43  ;;  %v17615_v4 = vpop.f32.mrf.mxu0 }
 0x61f   : > { %v17613_v63 = vadd.f32 %v3328_v1, %v17253_v50  ;;  %20775 = vst [vmem:[#allocation50_spill] sm:$0xff] %v17615_v4 }
 0x620   : > { %v3872_v21 = vadd.f32 %v20776_v19, %v3580_v52  ;;  %v20780_v19 = vld [vmem:[#allocation62_spill] sm:$0xff] }
 0x621   : > { %4832 = vmatmul.bf16.gmra.mxu0 %v4701_v18  ;;  %v20779_v18 = vld [vmem:[#allocation36_spill] sm:$0xff] }
 0x622   : > { %3565 = vmatmul.bf16.gmra.mxu3 %v3440_v48  ;;  %4286 = vmatmul.bf16.vlgmr.msra.gmra.mxu2 %v17624_v11  ;;  %v17627_v50 = vadd.f32 %v4111_v13, %v3872_v21  ;;  %v5758_v34 = vshrl.u32 %v20779_v18, 16  ;;  %v5761_v1 = vshll.u32 %v20779_v18, 16  ;;  %v20782_v48 = vld [vmem:[#allocation35_spill] sm:$0xff] }
 0x623   : > { %v20783_v13 = vshrl.u32 %v20782_v48, 16  ;;  %v20784_v20 = vshll.u32 %v20782_v48, 16 }
 0x624   : > { %20778 = vst [vmem:[#allocation55_spill] sm:$0xff] %v17627_v50  ;;  %v5760_v55 = vrot.slane %v5758_v34, 3  ;;  %v5763_v23 = vrot.slane %v5761_v1, 4 }
 0x625   : > { %v4119_v43 = vpop.f32.mrf.mxu1  ;;  %v3526_v38 = vpop.f32.mrf.mxu3  ;;  %v5765_v21 = vrot.slane %v20783_v13, 3  ;;  %v5766_v4 = vrot.slane %v20784_v20, 4  ;;  %v12057_v20 = vld [vmem:[#allocation2 + $0xc] sm:$0xc] }
 0x626   : > { %v3331_v49 = vpop.f32.mrf.mxu2  ;;  %v3581_v52 = vadd.f32 %v3526_v38, %v17533_v47  ;;  %v17636_v36 = vpop.f32.mrf.mxu0 }
 0x627   : > { %v17633_v8 = vadd.f32 %v3331_v49, %v17276_v58  ;;  %20781 = vst [vmem:[#allocation51_spill] sm:$0xff] %v17636_v36  ;;  %v5767_v38 = vor.u32 %v5766_v4, %v5765_v21  ;;  %v13835_v58 = vld [vmem:[#allocation2 + $0xc] sm:$0xf0]  ;;  %v4967_v4 = vrot.slane %v13836_v41, 2  ;;  %v4399_v41 = vshll.u32 %v17624_v11, 16 }
 0x628   : > { %4158 = vmatmul.bf16.gmra.mxu1 %v20780_v19  ;;  %v3873_v22 = vadd.f32 %v20785_v27, %v3581_v52  ;;  %v5764_v19 = vor.u32 %v5763_v23, %v5760_v55  ;;  %v12058_v34 = vor.u32 %v13835_v58, %v12057_v20  ;;  %v20791_v20 = vld [vmem:[#allocation78_spill] sm:$0xff] }
 0x62a   : > { %v17643_v18 = vadd.f32 %v4114_v61, %v3873_v22  ;;  %v5768_v27 = vsel %vm3912_vm5, %v5764_v19, %v5767_v38  ;;  %v20786_v22 = vld [vmem:[#allocation76_spill] sm:$0xff] }
 0x62d   : > { %v4121_v47 = vpop.f32.mrf.mxu1  ;;  %v3528_v49 = vpop.f32.mrf.mxu3 }
 0x62e   : > { %v3333_v50 = vpop.f32.mrf.mxu2  ;;  %v3582_v36 = vadd.f32 %v3528_v49, %v17565_v42  ;;  %v17649_v48 = vpop.f32.mrf.mxu0  ;;  %v4966_v42 = vrot.slane %v12058_v34, 2  ;;  %v4404_v34 = vshll.u32 %v17197_v37, 16 }
 0x62f   : > { %v17647_v13 = vadd.f32 %v3333_v50, %v17292_v0 }
 0x630   : > { %v3874_v61 = vadd.f32 %v20786_v22, %v3582_v36  ;;  %v4968_v50 = vsel %vm3415_vm2, %v4966_v42, %v4967_v4 }
 0x631   : > { %5887 = vmatmul.bf16.vlgmr.msrb.gmra.mxu0 %v5768_v27 }
 0x632   : > { %3570 = vmatmul.bf16.gmra.mxu3 %v3439_v60  ;;  %4291 = vmatmul.bf16.gmra.mxu2 %v17197_v37  ;;  %v17654_v23 = vadd.f32 %v4116_v32, %v3874_v61  ;;  %v20788_v60 = vld [vmem:[#allocation38_spill] sm:$0xff] }
 0x633   : > { %v20789_v58 = vshrl.u32 %v20788_v60, 16  ;;  %v20790_v49 = vshll.u32 %v20788_v60, 16 }
 0x635   : > { %v4124_v55 = vpop.f32.mrf.mxu1  ;;  %v3531_v1 = vpop.f32.mrf.mxu3  ;;  %v5769_v32 = vrot.slane %v20789_v58, 3  ;;  %v5770_v19 = vrot.slane %v20790_v49, 4 }
 0x636   : > { %v3336_v0 = vpop.f32.mrf.mxu2  ;;  %v3583_v52 = vadd.f32 %v3531_v1, %v17595_v33  ;;  %v17661_v36 = vpop.f32.mrf.mxu0 }
 0x637   : > { %v17659_v21 = vadd.f32 %v3336_v0, %v17313_v46  ;;  %20787 = vst [vmem:[#allocation63_spill] sm:$0xff] %v17661_v36  ;;  %v4401_v46 = vrot.slane %v4399_v41, 1  ;;  %v5771_v61 = vor.u32 %v5770_v19, %v5769_v32  ;;  %v4397_v0 = vshrl.u32 %v17624_v11, 16  ;;  %v13837_v36 = vld [vmem:[#allocation2 + $0x1c] sm:$0xff] }
 0x638   : > { %5060 = vmatmul.bf16.vlgmr.msrb.gmra.mxu1 %v4968_v50  ;;  %v3875_v27 = vadd.f32 %v20791_v20, %v3583_v52  ;;  %v4406_v50 = vrot.slane %v4404_v34, 1  ;;  %v4969_v32 = vrot.slane %v13837_v36, 2 }
 0x639   : > { %v4402_v52 = vor.u32 %v4401_v46, %v4397_v0  ;;  %v20792_v46 = vld [vmem:[#allocation39_spill] sm:$0xff] }
 0x63a   : > { %v17670_v22 = vadd.f32 %v4119_v43, %v3875_v27  ;;  %v5772_v43 = vsel %vm3912_vm5, %v5767_v38, %v5771_v61  ;;  %v4970_v27 = vsel %vm3415_vm2, %v4967_v4, %v4969_v32  ;;  %v20793_v36 = vshrl.u32 %v20792_v46, 16 }
 0x63b   : > { %v4407_v41 = vsel %vm2574_vm1, %v4402_v52, %v4406_v50 }
 0x63d   : > { %v4126_v33 = vpop.f32.mrf.mxu1  ;;  %v3533_v42 = vpop.f32.mrf.mxu3 }
 0x63e   : > { %v3338_v1 = vpop.f32.mrf.mxu2  ;;  %v3584_v58 = vadd.f32 %v3533_v42, %v17613_v63  ;;  %v17677_v49 = vpop.f32.mrf.mxu0  ;;  %v5773_v42 = vrot.slane %v20793_v36, 3 }
 0x63f   : > { %v17675_v60 = vadd.f32 %v3338_v1, %v17322_v40  ;;  %v20794_v1 = vshll.u32 %v20792_v46, 16 }
 0x640   : > { %v3876_v20 = vadd.f32 %v17190_v54, %v3584_v58  ;;  %v4412_v58 = vshll.u32 %v17233_v3, 16 }
 0x641   : > { %5892 = vmatmul.bf16.gmra.mxu0 %v5772_v43 }
 0x642   : > { %4568 = vmatmul.bf16.vlgmr.msra.gmra.mxu3 %v4407_v41  ;;  %4296 = vmatmul.bf16.gmra.mxu2 %v17233_v3  ;;  %v17683_v11 = vadd.f32 %v4121_v47, %v3876_v20  ;;  %v5774_v47 = vrot.slane %v20794_v1, 4  ;;  %v4408_v20 = vshrl.u32 %v17197_v37, 16  ;;  %v4414_v41 = vrot.slane %v4412_v58, 1 }
 0x645   : > { %v4129_v63 = vpop.f32.mrf.mxu1  ;;  %v3536_v19 = vpop.f32.mrf.mxu3 }
 0x646   : > { %v3341_v40 = vpop.f32.mrf.mxu2  ;;  %v3585_v34 = vadd.f32 %v3536_v19, %v17633_v8  ;;  %v17690_v54 = vpop.f32.mrf.mxu0  ;;  %v5775_v8 = vor.u32 %v5774_v47, %v5773_v42  ;;  %v13838_v19 = vld [vmem:[#allocation2 + $0x24] sm:$0xff] }
 0x647   : > { %v17688_v38 = vadd.f32 %v3341_v40, %v17331_v25  ;;  %v4971_v42 = vrot.slane %v13838_v19, 2  ;;  %v4420_v19 = vshll.u32 %v17274_v28, 16 }
 0x648   : > { %5065 = vmatmul.bf16.gmra.mxu1 %v4970_v27  ;;  %v3877_v0 = vadd.f32 %v17203_v17, %v3585_v34  ;;  %v4410_v17 = vor.u32 %v4408_v20, %v4406_v50  ;;  %v5776_v34 = vsel %vm3912_vm5, %v5771_v61, %v5775_v8 }
 0x649   : > { %v4972_v47 = vsel %vm3415_vm2, %v4969_v32, %v4971_v42 }
 0x64a   : > { %v17698_v52 = vadd.f32 %v4124_v55, %v3877_v0  ;;  %v4415_v36 = vsel %vm2574_vm1, %v4410_v17, %v4414_v41  ;;  %v20795_v0 = vld [vmem:[#allocation40_spill] sm:$0xff] }
 0x64b   : > { %v20796_v58 = vshrl.u32 %v20795_v0, 16 }
 0x64d   : > { %v4131_v4 = vpop.f32.mrf.mxu1  ;;  %v3538_v43 = vpop.f32.mrf.mxu3 }
 0x64e   : > { %v3343_v25 = vpop.f32.mrf.mxu2  ;;  %v3586_v40 = vadd.f32 %v3538_v43, %v17647_v13  ;;  %v17705_v46 = vpop.f32.mrf.mxu0  ;;  %v5777_v43 = vrot.slane %v20796_v58, 3 }
 0x64f   : > { %v17703_v27 = vadd.f32 %v3343_v25, %v17343_v12  ;;  %v20797_v25 = vshll.u32 %v20795_v0, 16 }
 0x650   : > { %v3878_v55 = vadd.f32 %v17223_v7, %v3586_v40 }
 0x651   : > { %5897 = vmatmul.bf16.gmra.mxu0 %v5776_v34  ;;  %v4416_v34 = vshrl.u32 %v17233_v3, 16 }
 0x652   : > { %4573 = vmatmul.bf16.gmra.mxu3 %v4415_v36  ;;  %4301 = vmatmul.bf16.gmra.mxu2 %v17274_v28  ;;  %v17711_v37 = vadd.f32 %v4126_v33, %v3878_v55  ;;  %v5778_v33 = vrot.slane %v20797_v25, 4  ;;  %v4422_v55 = vrot.slane %v4420_v19, 1  ;;  %v13839_v36 = vld [vmem:[#allocation2 + $0x2c] sm:$0xff] }
 0x653   : > { %v4973_v58 = vrot.slane %v13839_v36, 2 }
 0x655   : > { %v4134_v13 = vpop.f32.mrf.mxu1  ;;  %v3541_v1 = vpop.f32.mrf.mxu3  ;;  %v4974_v25 = vsel %vm3415_vm2, %v4971_v42, %v4973_v58 }
 0x656   : > { %v3346_v12 = vpop.f32.mrf.mxu2  ;;  %v3587_v50 = vadd.f32 %v3541_v1, %v17659_v21  ;;  %v17718_v7 = vpop.f32.mrf.mxu0  ;;  %v5779_v21 = vor.u32 %v5778_v33, %v5777_v43  ;;  %v20798_v33 = vld [vmem:[#allocation23_spill] sm:$0xff] }
 0x657   : > { %v17716_v61 = vadd.f32 %v3346_v12, %v17360_v10 }
 0x658   : > { %5070 = vmatmul.bf16.gmra.mxu1 %v4972_v47  ;;  %v3879_v20 = vadd.f32 %v17248_v16, %v3587_v50  ;;  %v4418_v16 = vor.u32 %v4416_v34, %v4414_v41  ;;  %v5780_v50 = vsel %vm3912_vm5, %v5775_v8, %v5779_v21  ;;  %v4428_v34 = vshll.u32 %v17311_v51, 16 }
 0x65a   : > { %v17726_v40 = vadd.f32 %v4129_v63, %v3879_v20  ;;  %v4423_v0 = vsel %vm2574_vm1, %v4418_v16, %v4422_v55  ;;  %v20799_v20 = vshrl.u32 %v20798_v33, 16  ;;  %v4424_v16 = vshrl.u32 %v17274_v28, 16 }
 0x65c   : > { %v5781_v19 = vrot.slane %v20799_v20, 3 }
 0x65d   : > { %v4136_v32 = vpop.f32.mrf.mxu1  ;;  %v3543_v17 = vpop.f32.mrf.mxu3 }
 0x65e   : > { %v3348_v10 = vpop.f32.mrf.mxu2  ;;  %v3588_v1 = vadd.f32 %v3543_v17, %v17675_v60  ;;  %v17733_v47 = vpop.f32.mrf.mxu0  ;;  %v20800_v17 = vshll.u32 %v20798_v33, 16 }
 0x65f   : > { %v17731_v12 = vadd.f32 %v3348_v10, %v17366_v14 }
 0x660   : > { %v3880_v63 = vadd.f32 %v17271_v44, %v3588_v1 }
 0x661   : > { %5902 = vmatmul.bf16.gmra.mxu0 %v5780_v50  ;;  %v4430_v50 = vrot.slane %v4428_v34, 1 }
 0x662   : > { %4578 = vmatmul.bf16.gmra.mxu3 %v4423_v0  ;;  %4306 = vmatmul.bf16.gmra.mxu2 %v17311_v51  ;;  %v17739_v3 = vadd.f32 %v4131_v4, %v3880_v63  ;;  %v5782_v4 = vrot.slane %v20800_v17, 4  ;;  %v13840_v63 = vld [vmem:[#allocation2 + $0x34] sm:$0xff]  ;;  %v20801_v17 = vld [vmem:[#allocation29_spill] sm:$0xff] }
 0x663   : > { %v4975_v33 = vrot.slane %v13840_v63, 2  ;;  %v20803_v34 = vshll.u32 %v20801_v17, 16 }
 0x665   : > { %v4139_v60 = vpop.f32.mrf.mxu1  ;;  %v3546_v43 = vpop.f32.mrf.mxu3 }
 0x666   : > { %v3351_v14 = vpop.f32.mrf.mxu2  ;;  %v3589_v41 = vadd.f32 %v3546_v43, %v17688_v38  ;;  %v17746_v44 = vpop.f32.mrf.mxu0  ;;  %v5783_v38 = vor.u32 %v5782_v4, %v5781_v19  ;;  %v4976_v19 = vsel %vm3415_vm2, %v4973_v58, %v4975_v33  ;;  %v20802_v4 = vshrl.u32 %v20801_v17, 16 }
 0x667   : > { %v17744_v8 = vadd.f32 %v3351_v14, %v17375_v56 }
 0x668   : > { %5075 = vmatmul.bf16.gmra.mxu1 %v4974_v25  ;;  %v3881_v10 = vadd.f32 %v17289_v6, %v3589_v41  ;;  %v4426_v6 = vor.u32 %v4424_v16, %v4422_v55  ;;  %v5784_v25 = vsel %vm3912_vm5, %v5779_v21, %v5783_v38 }
 0x66a   : > { %v17754_v36 = vadd.f32 %v4134_v13, %v3881_v10  ;;  %v4431_v41 = vsel %vm2574_vm1, %v4426_v6, %v4430_v50  ;;  %v5785_v10 = vrot.slane %v20802_v4, 3 }
 0x66d   : > { %v4141_v42 = vpop.f32.mrf.mxu1  ;;  %v3548_v1 = vpop.f32.mrf.mxu3 }
 0x66e   : > { %v3353_v56 = vpop.f32.mrf.mxu2  ;;  %v3590_v0 = vadd.f32 %v3548_v1, %v17703_v27  ;;  %v17761_v14 = vpop.f32.mrf.mxu0 }
 0x66f   : > { %v17759_v43 = vadd.f32 %v3353_v56, %v17381_v2  ;;  %v4436_v56 = vshll.u32 %v17329_v5, 16 }
 0x670   : > { %v3882_v13 = vadd.f32 %v17309_v53, %v3590_v0  ;;  %v4432_v0 = vshrl.u32 %v17311_v51, 16 }
 0x671   : > { %5907 = vmatmul.bf16.gmra.mxu0 %v5784_v25  ;;  %v4438_v6 = vrot.slane %v4436_v56, 1  ;;  %v13841_v25 = vld [vmem:[#allocation2 + $0x3c] sm:$0xff] }
 0x672   : > { %4583 = vmatmul.bf16.gmra.mxu3 %v4431_v41  ;;  %4311 = vmatmul.bf16.gmra.mxu2 %v17329_v5  ;;  %v17767_v28 = vadd.f32 %v4136_v32, %v3882_v13  ;;  %v5786_v32 = vrot.slane %v20803_v34, 4  ;;  %v4977_v17 = vrot.slane %v13841_v25, 2 }
 0x675   : > { %v4144_v27 = vpop.f32.mrf.mxu1  ;;  %v3551_v20 = vpop.f32.mrf.mxu3 }
 0x676   : > { %v3356_v2 = vpop.f32.mrf.mxu2  ;;  %v3591_v55 = vadd.f32 %v3551_v20, %v17716_v61  ;;  %v17774_v53 = vpop.f32.mrf.mxu0  ;;  %v5787_v61 = vor.u32 %v5786_v32, %v5785_v10  ;;  %v4978_v10 = vsel %vm3415_vm2, %v4975_v33, %v4977_v17  ;;  %v20807_v32 = vld [vmem:[#allocation30_spill] sm:$0xff] }
 0x677   : > { %v17772_v21 = vadd.f32 %v3356_v2, %v17390_v15 }
 0x678   : > { %5080 = vmatmul.bf16.gmra.mxu1 %v4976_v19  ;;  %v3883_v1 = vadd.f32 %v17319_v24, %v3591_v55  ;;  %v4434_v24 = vor.u32 %v4432_v0, %v4430_v50  ;;  %v5788_v2 = vsel %vm3912_vm5, %v5783_v38, %v5787_v61  ;;  %v4444_v0 = vshll.u32 %v17358_v57, 16 }
 0x67a   : > { %v17782_v16 = vadd.f32 %v4139_v60, %v3883_v1  ;;  %v20805_v60 = vld [vmem:[#allocation100_spill] sm:$0xff]  ;;  %v4439_v55 = vsel %vm2574_vm1, %v4434_v24, %v4438_v6  ;;  %v20808_v1 = vshrl.u32 %v20807_v32, 16  ;;  %v4440_v24 = vshrl.u32 %v17329_v5, 16 }
 0x67c   : > { %v5789_v56 = vrot.slane %v20808_v1, 3 }
 0x67d   : > { %v4146_v58 = vpop.f32.mrf.mxu1  ;;  %v3553_v63 = vpop.f32.mrf.mxu3 }
 0x67e   : > { %v3358_v15 = vpop.f32.mrf.mxu2  ;;  %v3592_v13 = vadd.f32 %v3553_v63, %v17731_v12  ;;  %v17789_v20 = vpop.f32.mrf.mxu0  ;;  %v20809_v63 = vshll.u32 %v20807_v32, 16 }
 0x67f   : > { %v17787_v41 = vadd.f32 %v3358_v15, %v17396_v39  ;;  %20804 = vst [vmem:[#allocation59_spill] sm:$0xff] %v17789_v20 }
 0x680   : > { %v3884_v19 = vadd.f32 %v20805_v60, %v3592_v13  ;;  %v13842_v60 = vld [vmem:[#allocation2 + $0x44] sm:$0xff] }
 0x681   : > { %5912 = vmatmul.bf16.gmra.mxu0 %v5788_v2  ;;  %v4446_v2 = vrot.slane %v4444_v0, 1  ;;  %v20815_v0 = vld [vmem:[#allocation105_spill] sm:$0xff] }
 0x682   : > { %4588 = vmatmul.bf16.gmra.mxu3 %v4439_v55  ;;  %4316 = vmatmul.bf16.gmra.mxu2 %v17358_v57  ;;  %v17795_v51 = vadd.f32 %v4141_v42, %v3884_v19  ;;  %v5790_v42 = vrot.slane %v20809_v63, 4 }
 0x685   : > { %v4149_v12 = vpop.f32.mrf.mxu1  ;;  %v3556_v4 = vpop.f32.mrf.mxu3 }
 0x686   : > { %v3361_v39 = vpop.f32.mrf.mxu2  ;;  %v3593_v50 = vadd.f32 %v3556_v4, %v17744_v8  ;;  %v17802_v34 = vpop.f32.mrf.mxu0  ;;  %v5791_v8 = vor.u32 %v5790_v42, %v5789_v56  ;;  %v20812_v56 = vld [vmem:[#allocation31_spill] sm:$0xff] }
 0x687   : > { %v17800_v38 = vadd.f32 %v3361_v39, %v17404_v26  ;;  %20806 = vst [vmem:[#allocation64_spill] sm:$0xff] %v17802_v34  ;;  %v4442_v39 = vor.u32 %v4440_v24, %v4438_v6  ;;  %v20813_v63 = vshrl.u32 %v20812_v56, 16  ;;  %v20844_v34 = vld [vmem:[#allocation112_spill] sm:$0xff] }
 0x688   : > { %5085 = vmatmul.bf16.gmra.mxu1 %v4978_v10  ;;  %v3885_v15 = vadd.f32 %v17339_v29, %v3593_v50  ;;  %v5792_v29 = vsel %vm3912_vm5, %v5787_v61, %v5791_v8  ;;  %v4979_v50 = vrot.slane %v13842_v60, 2 }
 0x689   : > { %v4447_v10 = vsel %vm2574_vm1, %v4442_v39, %v4446_v2  ;;  %v5793_v42 = vrot.slane %v20813_v63, 3  ;;  %v20818_v63 = vld [vmem:[#allocation109_spill] sm:$0xff] }
 0x68a   : > { %v17810_v25 = vadd.f32 %v4144_v27, %v3885_v15  ;;  %v20814_v15 = vshll.u32 %v20812_v56, 16 }
 0x68d   : > { %v4151_v33 = vpop.f32.mrf.mxu1  ;;  %v3558_v13 = vpop.f32.mrf.mxu3 }
 0x68e   : > { %v3363_v26 = vpop.f32.mrf.mxu2  ;;  %v3594_v19 = vadd.f32 %v3558_v13, %v17759_v43  ;;  %v17815_v4 = vpop.f32.mrf.mxu0 }
 0x68f   : > { %v3393_v55 = vadd.f32 %v3363_v26, %v17413_v9  ;;  %20810 = vst [vmem:[#allocation36_spill] sm:$0xff] %v17815_v4  ;;  %v4980_v9 = vsel %vm3415_vm2, %v4977_v17, %v4979_v50  ;;  %v4452_v26 = vshll.u32 %v17373_v30, 16 }
 0x690   : > { %v3886_v27 = vadd.f32 %v17356_v62, %v3594_v19  ;;  %v4448_v19 = vshrl.u32 %v17358_v57, 16 }
 0x691   : > { %5917 = vmatmul.bf16.gmra.mxu0 %v5792_v29  ;;  %v4454_v39 = vrot.slane %v4452_v26, 1  ;;  %v13843_v29 = vld [vmem:[#allocation2 + $0x4c] sm:$0xff]  ;;  %v20820_v26 = vld [vmem:[#allocation57_spill] sm:$0xff] }
 0x692   : > { %4593 = vmatmul.bf16.gmra.mxu3 %v4447_v10  ;;  %4321 = vmatmul.bf16.gmra.mxu2 %v17373_v30  ;;  %v17821_v5 = vadd.f32 %v4146_v58, %v3886_v27  ;;  %v5794_v58 = vrot.slane %v20814_v15, 4  ;;  %v4981_v56 = vrot.slane %v13843_v29, 2 }
 0x695   : > { %v4154_v32 = vpop.f32.mrf.mxu1  ;;  %v3561_v43 = vpop.f32.mrf.mxu3 }
 0x696   : > { %v3366_v1 = vpop.f32.mrf.mxu2  ;;  %v3595_v6 = vadd.f32 %v3561_v43, %v17772_v21  ;;  %v17828_v62 = vpop.f32.mrf.mxu0  ;;  %v5795_v21 = vor.u32 %v5794_v58, %v5793_v42  ;;  %v4450_v43 = vor.u32 %v4448_v19, %v4446_v2  ;;  %v20822_v19 = vshll.u32 %v20820_v26, 16 }
 0x697   : > { %v17826_v61 = vadd.f32 %v3366_v1, %v17431_v59  ;;  %20811 = vst [vmem:[#allocation62_spill] sm:$0xff] %v17828_v62 }
 0x698   : > { %5090 = vmatmul.bf16.gmra.mxu1 %v4980_v9  ;;  %v3887_v13 = vadd.f32 %v20815_v0, %v3595_v6  ;;  %v5796_v1 = vsel %vm3912_vm5, %v5791_v8, %v5795_v21  ;;  %v20817_v9 = vld [vmem:[#allocation106_spill] sm:$0xff]  ;;  %v20819_v0 = vld [vmem:[#allocation53_spill] sm:$0xff]  ;;  %v5798_v29 = vrot.slane %v20822_v19, 4 }
 0x69a   : > { %v17836_v24 = vadd.f32 %v4149_v12, %v3887_v13  ;;  %v4455_v12 = vsel %vm2574_vm1, %v4450_v43, %v4454_v39  ;;  %v4460_v43 = vshll.u32 %v20818_v63, 16 }
 0x69d   : > { %v4156_v17 = vpop.f32.mrf.mxu1  ;;  %v3563_v60 = vpop.f32.mrf.mxu3 }
 0x69e   : > { %v3368_v59 = vpop.f32.mrf.mxu2  ;;  %v3596_v27 = vadd.f32 %v3563_v60, %v17787_v41  ;;  %v17840_v10 = vpop.f32.mrf.mxu0  ;;  %v4982_v41 = vsel %vm3415_vm2, %v4979_v50, %v4981_v56  ;;  %v20821_v60 = vshrl.u32 %v20820_v26, 16 }
 0x69f   : > { %20816 = vst [vmem:[#allocation35_spill] sm:$0xff] %v17840_v10 }
 0x6a0   : > { %v3888_v6 = vadd.f32 %v20817_v9, %v3596_v27  ;;  %v5797_v59 = vrot.slane %v20821_v60, 3  ;;  %v20825_v60 = vld [vmem:[#allocation108_spill] sm:$0xff] }
 0x6a1   : > { %5922 = vmatmul.bf16.gmra.mxu0 %v5796_v1 }
 0x6a2   : > { %4598 = vmatmul.bf16.gmra.mxu3 %v4455_v12  ;;  %4326 = vmatmul.bf16.gmra.mxu2 %v20818_v63  ;;  %v17846_v42 = vadd.f32 %v4151_v33, %v3888_v6  ;;  %v20823_v33 = vld [vmem:[#allocation107_spill] sm:$0xff]  ;;  %v5799_v9 = vor.u32 %v5798_v29, %v5797_v59  ;;  %v4456_v12 = vshrl.u32 %v17373_v30, 16  ;;  %v20826_v29 = vld [vmem:[#allocation34_spill] sm:$0xff] }
 0x6a4   : > { %v4458_v26 = vor.u32 %v4456_v12, %v4454_v39 }
 0x6a5   : > { %v4159_v57 = vpop.f32.mrf.mxu1  ;;  %v3566_v15 = vpop.f32.mrf.mxu3 }
 0x6a6   : > { %v4287_v58 = vpop.f32.mrf.mxu2  ;;  %v3597_v2 = vadd.f32 %v3566_v15, %v17800_v38  ;;  %v4835_v13 = vpop.f32.mrf.mxu0  ;;  %v4462_v15 = vrot.slane %v4460_v43, 1 }
 0x6a7   : > { %v17851_v8 = vadd.f32 %v4287_v58, %v20819_v0  ;;  %v13844_v58 = vld [vmem:[#allocation2 + $0x54] sm:$0xff] }
 0x6a8   : > { %5095 = vmatmul.bf16.gmra.mxu1 %v4982_v41  ;;  %v3889_v27 = vadd.f32 %v20823_v33, %v3597_v2  ;;  %v5800_v2 = vsel %vm3912_vm5, %v5795_v21, %v5799_v9  ;;  %v4463_v59 = vsel %vm2574_vm1, %v4458_v26, %v4462_v15  ;;  %v4983_v19 = vrot.slane %v13844_v58, 2 }
 0x6aa   : > { %v17859_v1 = vadd.f32 %v4154_v32, %v3889_v27  ;;  %v4984_v21 = vsel %vm3415_vm2, %v4981_v56, %v4983_v19  ;;  %v13861_v56 = vld [vmem:[%s20373_s4 + $0x2f0] sm:$0xff] }
 0x6ad   : > { %v4161_v50 = vpop.f32.mrf.mxu1  ;;  %v3568_v38 = vpop.f32.mrf.mxu3 }
 0x6ae   : > { %v4289_v6 = vpop.f32.mrf.mxu2  ;;  %v3598_v41 = vadd.f32 %v3568_v38, %v3393_v55  ;;  %v17865_v13 = vpop.f32.mrf.mxu0 }
 0x6af   : > { %v17863_v0 = vadd.f32 %v4289_v6, %v17518_v31  ;;  %20824 = vst [vmem:[#allocation72_spill] sm:$0xff] %v17865_v13  ;;  %v13862_v31 = vld [vmem:[%s20373_s4 + $0x2f8] sm:$0xff] }
 0x6b0   : > { %v3890_v32 = vadd.f32 %v20825_v60, %v3598_v41  ;;  %5435 = vmatpush.bf16.msrb.mxu2 %v13862_v31  ;;  %v20831_v41 = vld [vmem:[#allocation110_spill] sm:$0xff] }
 0x6b1   : > { %5927 = vmatmul.bf16.gmra.mxu0 %v5800_v2 }
 0x6b2   : > { %4603 = vmatmul.bf16.gmra.mxu3 %v4463_v59  ;;  %4331 = vmatmul.bf16.gmra.mxu2 %v20826_v29  ;;  %v17871_v30 = vadd.f32 %v4156_v17, %v3890_v32  ;;  %v20828_v17 = vld [vmem:[#allocation58_spill] sm:$0xff] }
 0x6b3   : > { %v20829_v38 = vshrl.u32 %v20828_v17, 16  ;;  %v20830_v12 = vshll.u32 %v20828_v17, 16  ;;  %v13860_v32 = vld [vmem:[%s20373_s4 + $0x2e8] sm:$0xff] }
 0x6b4   : > { %5436 = vmatpush.bf16.msrb.mxu2 %v13861_v56 }
 0x6b5   : > { %v5061_v55 = vpop.f32.mrf.mxu1  ;;  %v3571_v33 = vpop.f32.mrf.mxu3  ;;  %v5801_v6 = vrot.slane %v20829_v38, 3  ;;  %v5802_v58 = vrot.slane %v20830_v12, 4  ;;  %v13859_v38 = vld [vmem:[%s20373_s4 + $0x2e0] sm:$0xff] }
 0x6b6   : > { %v4292_v39 = vpop.f32.mrf.mxu2  ;;  %v3599_v27 = vadd.f32 %v3571_v33, %v17826_v61  ;;  %v17881_v50 = vpop.f32.mrf.mxu0  ;;  %v4468_v61 = vshll.u32 %v20826_v29, 16  ;;  %v4464_v33 = vshrl.u32 %v20818_v63, 16  ;;  %v20833_v12 = vld [vmem:[#allocation44_spill] sm:$0xff] }
 0x6b7   : > { %v17879_v43 = vadd.f32 %v4292_v39, %v17551_v45  ;;  %20827 = vst [vmem:[#allocation76_spill] sm:$0xff] %v17881_v50  ;;  %v17896_v60 = vor.u32 %v5802_v58, %v5801_v6 }
 0x6b8   : > { %5100 = vmatmul.bf16.gmra.mxu1 %v4984_v21  ;;  %v3891_v26 = vadd.f32 %v20831_v41, %v3599_v27  ;;  %v4470_v39 = vrot.slane %v4468_v61, 1  ;;  %v17902_v21 = vld [vmem:[#allocation2 + $0x5c] sm:$0xff]  ;;  %5437 = vmatpush.bf16.msrb.mxu2 %v13860_v32  ;;  %v4466_v27 = vor.u32 %v4464_v33, %v4462_v15  ;;  %v5737_v33 = vld [vmem:[#allocation2 + $0x70] sm:$0x3] }
 0x6b9   : > { %v5804_v17 = vsel %vm3912_vm5, %v5799_v9, %v17896_v60  ;;  %v20506_v6 = vrot.slane %v17902_v21, 2  ;;  %v13858_v15 = vld [vmem:[%s20373_s4 + $0x2d8] sm:$0xff] }
 0x6ba   : > { %v17892_v45 = vadd.f32 %v4159_v57, %v3891_v26  ;;  %v4471_v63 = vsel %vm2574_vm1, %v4466_v27, %v4470_v39  ;;  %v13921_v9 = vld [vmem:[%s20373_s4 + $0x478] sm:$0xff]  ;;  %v20836_v27 = vld [vmem:[#allocation61_spill] sm:$0xff] }
 0x6bb   : > { %v4986_v26 = vsel %vm3415_vm2, %v4983_v19, %v20506_v6  ;;  %v20834_v61 = vld [vmem:[#allocation60_spill] sm:$0xff]  ;;  %6854 = vmatpush.bf16.msra.mxu0 %v13921_v9  ;;  %v20839_v19 = vld [vmem:[#allocation111_spill] sm:$0xff] }
 0x6bc   : > { %5438 = vmatpush.bf16.msrb.mxu2 %v13859_v38 }
 0x6bd   : > { %v17894_v2 = vpop.f32.mrf.mxu1  ;;  %v3573_v59 = vpop.f32.mrf.mxu3 }
 0x6be   : > { %v4294_v31 = vpop.f32.mrf.mxu2  ;;  %v17907_v57 = vpop.f32.mrf.mxu0 }
 0x6bf   : > { %v17905_v29 = vadd.f32 %v4294_v31, %v17585_v35  ;;  %20832 = vst [vmem:[#allocation38_spill] sm:$0xff] %v17907_v57  ;;  %v17934_v31 = vld [vmem:[#allocation2 + $0x68] sm:$0xff]  }
 0x6c0   : > { %5439 = vmatpush.bf16.msrb.mxu2 %v13858_v15  ;;  %v20507_v9 = vunpack.c.h.b16 %v17934_v31  ;;  %v13920_v15 = vld [vmem:[%s20373_s4 + $0x470] sm:$0xff] }
 0x6c1   : > { %5932 = vmatmul.bf16.gmra.mxu0 %v5804_v17  ;;  %v20837_v17 = vshrl.u32 %v20836_v27, 16 }
 0x6c2   : > { %4608 = vmatmul.bf16.gmra.mxu3 %v4471_v63  ;;  %4336 = vmatmul.bf16.gmra.mxu2 %v20833_v12  ;;  %v20838_v63 = vshll.u32 %v20836_v27, 16 }
 0x6c3   : > { %v5805_v38 = vrot.slane %v20837_v17, 3  ;;  %6855 = vmatpush.bf16.msra.mxu0 %v13920_v15 }
 0x6c4   : > { %v5806_v57 = vrot.slane %v20838_v63, 4  ;;  %v13919_v63 = vld [vmem:[%s20373_s4 + $0x468] sm:$0xff] }
 0x6c5   : > { %v17917_v35 = vpop.f32.mrf.mxu1  ;;  %v4569_v58 = vpop.f32.mrf.mxu3 }
 0x6c6   : > { %v4297_v41 = vpop.f32.mrf.mxu2  ;;  %v4633_v56 = vadd.f32 %v4569_v58, %v17851_v8  ;;  %v17932_v59 = vpop.f32.mrf.mxu0  ;;  %v13886_v8 = vld [vmem:[%s20373_s4 + $0x3b8] sm:$0xff]  ;;  %v13857_v58 = vld [vmem:[%s20373_s4 + $0x2d0] sm:$0xff]  ;;  %v17958_v17 = vor.u32 %v5806_v57, %v5805_v38  ;;  %v17971_v38 = vld [vmem:[#allocation2 + $0x64] sm:$0xff] }
 0x6c7   : > { %v17930_v32 = vadd.f32 %v4297_v41, %v20834_v61  ;;  %20835 = vst [vmem:[#allocation78_spill] sm:$0xff] %v17932_v59  ;;  %v4476_v41 = vshll.u32 %v20833_v12, 16  ;;  %6067 = vmatpush.bf16.msra.mxu1 %v13886_v8  ;;  %5440 = vmatpush.bf16.msrb.mxu2 %v13857_v58  ;;  %v13885_v12 = vld [vmem:[%s20373_s4 + $0x3b0] sm:$0xff] }
 0x6c8   : > { %5105 = vmatmul.bf16.gmra.mxu1 %v4986_v26  ;;  %v4837_v6 = vadd.f32 %v20839_v19, %v4633_v56  ;;  %v17949_v26 = vunpack.c.l.b16 %v5737_v33  ;;  %v13856_v33 = vld [vmem:[%s20373_s4 + $0x2c8] sm:$0xff]  ;;  %v14614_v19 = vld [vmem:[#allocation2 + $0x50] sm:$0xff]   ;;  %6856 = vmatpush.bf16.msra.mxu0 %v13919_v63 }
 0x6c9   : > { %v4472_v8 = vshrl.u32 %v14614_v19, 16  ;;  %v17969_v57 = vrot.slane %v4476_v41, 1  ;;  %v20840_v59 = vld [vmem:[#allocation55_spill] sm:$0xff]  ;;  %v5808_v41 = vsel %vm3912_vm5, %v17896_v60, %v17958_v17  ;;  %v20842_v19 = vld [vmem:[#allocation32_spill] sm:$0xff] }
 0x6ca   : > { %v17954_v56 = vadd.f32 %v5061_v55, %v4837_v6  ;;  %v5756_v58 = vpack.c.b16 %v17949_v26, %v20507_v9 }
 0x6cb   : > { %6068 = vmatpush.bf16.msra.mxu1 %v13885_v12  ;;  %v4474_v10 = vor.u32 %v4472_v8, %v4470_v39  ;;  %5441 = vmatpush.bf16.msrb.mxu2 %v13856_v33  ;;  %v13918_v39 = vld [vmem:[%s20373_s4 + $0x460] sm:$0xff]  ;;  %v4987_v12 = vrot.slane %v17971_v38, 2 }
 0x6cc   : > { %v5810_v33 = vshrl.u32 %v5756_v58, 16  ;;  %v5813_v63 = vshll.u32 %v5756_v58, 16  ;;  %v13883_v58 = vld [vmem:[%s20373_s4 + $0x3a0] sm:$0xff]  ;;  %6857 = vmatpush.bf16.msra.mxu0 %v13918_v39 }
 0x6cd   : > { %v17956_v61 = vpop.f32.mrf.mxu1  ;;  %v4571_v55 = vpop.f32.mrf.mxu3  ;;  %v4479_v60 = vsel %vm2574_vm1, %v4474_v10, %v17969_v57  ;;  %v13870_v10 = vld [vmem:[%s20373_s4 + $0x338] sm:$0xff] }
 0x6ce   : > { %v4299_v6 = vpop.f32.mrf.mxu2  ;;  %v4634_v15 = vadd.f32 %v4571_v55, %v17863_v0  ;;  %v17980_v13 = vpop.f32.mrf.mxu0  ;;  %v13884_v0 = vld [vmem:[%s20373_s4 + $0x3a8] sm:$0xff]  ;;  %v17998_v55 = vld [vmem:[#allocation2 + $0x60] sm:$0xff]   ;;  %5639 = vmatpush.bf16.msrb.mxu3 %v13870_v10 }
 0x6cf   : > { %v17978_v50 = vadd.f32 %v4299_v6, %v20840_v59  ;;  %20841 = vst [vmem:[#allocation39_spill] sm:$0xff] %v17980_v13  ;;  %v13855_v59 = vld [vmem:[%s20373_s4 + $0x2c0] sm:$0xff]  ;;  %6069 = vmatpush.bf16.msra.mxu1 %v13884_v0 }
 0x6d0   : > { %v4838_v62 = vadd.f32 %v20842_v19, %v4634_v15  ;;  %5442 = vmatpush.bf16.msrb.mxu2 %v13855_v59  ;;  %v4886_v15 = vld [vmem:[#allocation2 + $0x6c] sm:$0xf]  ;;  %v20843_v19 = vrot.slane %v17902_v21, 2  ;;  %v5812_v59 = vrot.slane %v5810_v33, 3  ;;  %v13869_v21 = vld [vmem:[%s20373_s4 + $0x330] sm:$0xff]  ;;  %v13882_v33 = vld [vmem:[%s20373_s4 + $0x398] sm:$0xff] }
 0x6d1   : > { %5937 = vmatmul.bf16.gmra.mxu0 %v5808_v41  ;;  %v13917_v41 = vld [vmem:[%s20373_s4 + $0x458] sm:$0xff]  ;;  %v4952_v4 = vunpack.c.l.b16 %v4886_v15  ;;  %v13881_v15 = vld [vmem:[%s20373_s4 + $0x390] sm:$0xff] }
 0x6d2   : > { %4613 = vmatmul.bf16.gmra.mxu3 %v4479_v60  ;;  %4341 = vmatmul.bf16.gmra.mxu2 %v17998_v55  ;;  %v18002_v6 = vadd.f32 %v17894_v2, %v4838_v62  ;;  %v4988_v0 = vsel %vm3415_vm2, %v20843_v19, %v4987_v12  ;;  %v5815_v60 = vrot.slane %v5813_v63, 4 }
 0x6d3   : > { %6070 = vmatpush.bf16.msra.mxu1 %v13883_v58  ;;  %6858 = vmatpush.bf16.msra.mxu0 %v13917_v41  ;;  %v18044_v10 = vpack.c.b16 %v4952_v4, %v4952_v4  ;;  %v13868_v58 = vld [vmem:[%s20373_s4 + $0x328] sm:$0xff] }
 0x6d4   : > { %v18037_v63 = vor.u32 %v5815_v60, %v5812_v59  ;;  %5640 = vmatpush.bf16.msrb.mxu3 %v13869_v21  ;;  %v20846_v21 = vld [vmem:[#allocation56_spill] sm:$0xff] }
 0x6d5   : > { %v18004_v8 = vpop.f32.mrf.mxu1  ;;  %v4574_v62 = vpop.f32.mrf.mxu3 }
 0x6d6   : > { %v4302_v2 = vpop.f32.mrf.mxu2  ;;  %v4635_v9 = vadd.f32 %v4574_v62, %v17879_v43  ;;  %v18024_v39 = vpop.f32.mrf.mxu0  ;;  %v4484_v43 = vshll.u32 %v17998_v55, 16  ;;  %v5817_v4 = vsel %vm3912_vm5, %v17958_v17, %v18037_v63  ;;  %v20847_v17 = vld [vmem:[#allocation33_spill] sm:$0xff] }
 0x6d7   : > { %v18022_v13 = vadd.f32 %v4302_v2, %v17643_v18  ;;  %v13916_v18 = vld [vmem:[%s20373_s4 + $0x450] sm:$0xff]  ;;  %6071 = vmatpush.bf16.msra.mxu1 %v13882_v33  ;;  %v14616_v2 = vld [vmem:[#allocation2 + $0x58] sm:$0xff]   ;;  %v4216_v33 = vpack.c.b16 %v20846_v21, %v20846_v21 }
 0x6d8   : > { %5110 = vmatmul.bf16.gmra.mxu1 %v4988_v0  ;;  %v4839_v20 = vadd.f32 %v20844_v34, %v4635_v9  ;;  %6859 = vmatpush.bf16.msra.mxu0 %v13916_v18  ;;  %v4480_v19 = vshrl.u32 %v14616_v2, 16 }
 0x6d9   : > { %5641 = vmatpush.bf16.msrb.mxu3 %v13868_v58 }
 0x6da   : > { %v18040_v34 = vadd.f32 %v17917_v35, %v4839_v20  ;;  %v4486_v20 = vrot.slane %v4484_v43, 1  ;;  %v13915_v35 = vld [vmem:[%s20373_s4 + $0x448] sm:$0xff]  ;;  %v4482_v18 = vor.u32 %v4480_v19, %v17969_v57  ;;  %v4989_v43 = vrot.slane %v18044_v10, 2  ;;  %v13914_v57 = vld [vmem:[%s20373_s4 + $0x440] sm:$0xff] }
 0x6db   : > { %6072 = vmatpush.bf16.msra.mxu1 %v13881_v15  ;;  %v13879_v19 = vld [vmem:[%s20373_s4 + $0x380] sm:$0xff] }
 0x6dc   : > { %6860 = vmatpush.bf16.msra.mxu0 %v13915_v35  ;;  %v4990_v15 = vsel %vm3415_vm2, %v4987_v12, %v4989_v43  ;;  %v20849_v12 = vld [vmem:[#allocation54_spill] sm:$0xff] }
 0x6dd   : > { %v18042_v9 = vpop.f32.mrf.mxu1  ;;  %v4576_v41 = vpop.f32.mrf.mxu3 }
 0x6de   : > { %v4304_v62 = vpop.f32.mrf.mxu2  ;;  %v4636_v0 = vadd.f32 %v4576_v41, %v17905_v29  ;;  %v18062_v60 = vpop.f32.mrf.mxu0  ;;  %v13867_v29 = vld [vmem:[%s20373_s4 + $0x320] sm:$0xff]  ;;  %v4487_v41 = vsel %vm2574_vm1, %v4482_v18, %v4486_v20  ;;  %v20850_v18 = vld [vmem:[#allocation46_spill] sm:$0xff] }
 0x6df   : > { %v18060_v59 = vadd.f32 %v4304_v62, %v17654_v23  ;;  %20845 = vst [vmem:[#allocation40_spill] sm:$0xff] %v18062_v60  ;;  %v13880_v23 = vld [vmem:[%s20373_s4 + $0x388] sm:$0xff]  ;;  %5642 = vmatpush.bf16.msrb.mxu3 %v13867_v29  ;;  %v13866_v62 = vld [vmem:[%s20373_s4 + $0x318] sm:$0xff] }
 0x6e0   : > { %v4840_v2 = vadd.f32 %v20847_v17, %v4636_v0  ;;  %6073 = vmatpush.bf16.msra.mxu1 %v13880_v23  ;;  %6861 = vmatpush.bf16.msra.mxu0 %v13914_v57  ;;  %v4492_v17 = vshll.u32 %v20850_v18, 16 }
 0x6e1   : > { %5942 = vmatmul.bf16.gmra.mxu0 %v5817_v4 }
 0x6e2   : > { %4618 = vmatmul.bf16.gmra.mxu3 %v4487_v41  ;;  %4346 = vmatmul.bf16.gmra.mxu2 %v4216_v33  ;;  %v18080_v10 = vadd.f32 %v17956_v61, %v4840_v2  ;;  %v13865_v33 = vld [vmem:[%s20373_s4 + $0x310] sm:$0xff] }
 0x6e3   : > { %5643 = vmatpush.bf16.msrb.mxu3 %v13866_v62 }
 0x6e4   : > { %6074 = vmatpush.bf16.msra.mxu1 %v13879_v19 }
 0x6e5   : > { %v5076_v58 = vpop.f32.mrf.mxu1  ;;  %v4579_v4 = vpop.f32.mrf.mxu3 }
 0x6e6   : > { %v4307_v35 = vpop.f32.mrf.mxu2  ;;  %v4637_v61 = vadd.f32 %v4579_v4, %v17930_v32  ;;  %v18093_v38 = vpop.f32.mrf.mxu0  ;;  %v4488_v32 = vshrl.u32 %v17998_v55, 16  ;;  %v13863_v55 = vld [vmem:[%s20373_s4 + $0x300] sm:$0xff] }
 0x6e7   : > { %v4359_v0 = vadd.f32 %v4307_v35, %v17670_v22  ;;  %20848 = vst [vmem:[#allocation23_spill] sm:$0xff] %v18093_v38  ;;  %5644 = vmatpush.bf16.msrb.mxu3 %v13865_v33  ;;  %v13864_v22 = vld [vmem:[%s20373_s4 + $0x308] sm:$0xff] }
 0x6e8   : > { %5115 = vmatmul.bf16.gmra.mxu1 %v4990_v15  ;;  %v4841_v21 = vadd.f32 %v20849_v12, %v4637_v61  ;;  %v4490_v57 = vor.u32 %v4488_v32, %v4486_v20  ;;  %v4494_v15 = vrot.slane %v4492_v17, 1  ;;  %v20853_v20 = vld [vmem:[#allocation37_spill] sm:$0xff]  ;;  %v6748_v12 = vld [vmem:[#allocation2 + $0x14] sm:$0xc] }
 0x6e9   : > { %v20922_v38 = vld [vmem:[#allocation73_spill] sm:$0xff] }
 0x6ea   : > { %v18101_v2 = vadd.f32 %v18004_v8, %v4841_v21  ;;  %v20852_v8 = vld [vmem:[#allocation27_spill] sm:$0xff]  ;;  %v4495_v61 = vsel %vm2574_vm1, %v4490_v57, %v4494_v15  ;;  %v20856_v57 = vld [vmem:[#allocation28_spill] sm:$0xff] }
 0x6eb   : > { %5645 = vmatpush.bf16.msrb.mxu3 %v13864_v22  ;;  %v6766_v22 = vunpack.c.l.b16 %v6748_v12 }
 0x6ed   : > { %v5078_v29 = vpop.f32.mrf.mxu1  ;;  %v4581_v23 = vpop.f32.mrf.mxu3 }
 0x6ee   : > { %v4309_v41 = vpop.f32.mrf.mxu2  ;;  %v4638_v62 = vadd.f32 %v4581_v23, %v17978_v50  ;;  %v18109_v4 = vpop.f32.mrf.mxu0  ;;  %v20855_v23 = vld [vmem:[#allocation52_spill] sm:$0xff] }
 0x6ef   : > { %v4360_v19 = vadd.f32 %v4309_v41, %v17683_v11  ;;  %20851 = vst [vmem:[#allocation29_spill] sm:$0xff] %v18109_v4  ;;  %5646 = vmatpush.bf16.msrb.mxu3 %v13863_v55 }
 0x6f0   : > { %v4842_v35 = vadd.f32 %v20852_v8, %v4638_v62  ;;  %v20857_v62 = vunpack.c.l.b16 %v20856_v57 }
 0x6f1   : > { %5947 = vmatmul.bf16.gmra.mxu0 %v18037_v63 }
 0x6f2   : > { %4623 = vmatmul.bf16.gmra.mxu3 %v4495_v61  ;;  %5443 = vmatmul.bf16.vlgmr.msrb.gmra.mxu2 %v20853_v20  ;;  %v18119_v50 = vadd.f32 %v18042_v9, %v4842_v35  ;;  %v6767_v8 = vpack.c.b16 %v20857_v62, %v6766_v22  ;;  %v4496_v9 = vshrl.u32 %v20850_v18, 16  ;;  %v14617_v61 = vld [vmem:[#allocation2 + $0x1c] sm:$0xff]  ;;  %v20859_v22 = vld [vmem:[#allocation43_spill] sm:$0xff] }
 0x6f3   : > { %v6769_v20 = vrot.slane %v14617_v61, 2 }
 0x6f5   : > { %v5081_v11 = vpop.f32.mrf.mxu1  ;;  %v4584_v21 = vpop.f32.mrf.mxu3 }
 0x6f6   : > { %v4312_v33 = vpop.f32.mrf.mxu2  ;;  %v4639_v17 = vadd.f32 %v4584_v21, %v18022_v13  ;;  %v18123_v32 = vpop.f32.mrf.mxu0  ;;  %v6768_v21 = vrot.slane %v6767_v8, 2 }
 0x6f7   : > { %v4361_v63 = vadd.f32 %v4312_v33, %v17698_v52  ;;  %20854 = vst [vmem:[#allocation100_spill] sm:$0xff] %v18123_v32  ;;  %v4498_v33 = vor.u32 %v4496_v9, %v4494_v15  ;;  %v20862_v15 = vld [vmem:[#allocation50_spill] sm:$0xff]  ;;  %v18494_v32 = vld [vmem:[#allocation2 + $0x1c] sm:$0xff] }
 0x6f8   : > { %5120 = vmatmul.bf16.gmra.mxu1 %v4989_v43  ;;  %v4843_v41 = vadd.f32 %v20855_v23, %v4639_v17  ;;  %v6770_v17 = vsel %vm3415_vm2, %v6768_v21, %v6769_v20  ;;  %v14619_v21 = vld [vmem:[#allocation2 + $0x24] sm:$0xff] }
 0x6fa   : > { %v18129_v35 = vadd.f32 %v5076_v58, %v4843_v41  ;;  %v20860_v58 = vld [vmem:[#allocation14_spill] sm:$0xff] }
 0x6fd   : > { %v5083_v55 = vpop.f32.mrf.mxu1  ;;  %v4586_v4 = vpop.f32.mrf.mxu3 }
 0x6fe   : > { %v4314_v13 = vpop.f32.mrf.mxu2  ;;  %v4640_v52 = vadd.f32 %v4586_v4, %v18060_v59  ;;  %v18133_v12 = vpop.f32.mrf.mxu0 }
 0x6ff   : > { %v4362_v43 = vadd.f32 %v4314_v13, %v17711_v37  ;;  %20858 = vst [vmem:[#allocation30_spill] sm:$0xff] %v18133_v12  ;;  %v14618_v37 = vld [vmem:[#allocation2 + $0x10] sm:$0xff]  }
 0x700   : > { %v4844_v23 = vadd.f32 %v20859_v22, %v4640_v52  ;;  %v6771_v52 = vrot.slane %v14619_v21, 2  ;;  %v20914_v12 = vld [vmem:[#allocation75_spill] sm:$0xff] }
 0x701   : > { %6862 = vmatmul.bf16.vlgmr.msra.gmra.mxu0 %v6770_v17 }
 0x702   : > { %4628 = vmatmul.bf16.gmra.mxu3 %v4498_v33  ;;  %5448 = vmatmul.bf16.gmra.mxu2 %v20860_v58  ;;  %v18138_v18 = vadd.f32 %v5078_v29, %v4844_v23 }
 0x705   : > { %v5086_v41 = vpop.f32.mrf.mxu1  ;;  %v4589_v57 = vpop.f32.mrf.mxu3 }
 0x706   : > { %v4317_v62 = vpop.f32.mrf.mxu2  ;;  %v4641_v8 = vadd.f32 %v4589_v57, %v4359_v0  ;;  %v18141_v4 = vpop.f32.mrf.mxu0  ;;  %v20864_v0 = vld [vmem:[#allocation51_spill] sm:$0xff]  ;;  %v20865_v57 = vld [vmem:[#allocation17_spill] sm:$0xff] }
 0x707   : > { %v4363_v59 = vadd.f32 %v4317_v62, %v17726_v40  ;;  %20861 = vst [vmem:[#allocation31_spill] sm:$0xff] %v18141_v4  ;;  %v6772_v40 = vsel %vm3415_vm2, %v6769_v20, %v6771_v52  ;;  %v20866_v62 = vld [vmem:[#allocation16_spill] sm:$0xff] }
 0x708   : > { %6075 = vmatmul.bf16.vlgmr.msra.gmra.mxu1 %v14618_v37  ;;  %v4845_v9 = vadd.f32 %v20862_v15, %v4641_v8  ;;  %20918 = vst [vmem:[#allocation51_spill] sm:$0xff] %v18494_v32 }
 0x70a   : > { %v18144_v61 = vadd.f32 %v5081_v11, %v4845_v9  ;;  %v14405_v9 = vld [vmem:[#allocation2 + $0x18] sm:$0xff]  }
 0x70d   : > { %v5088_v13 = vpop.f32.mrf.mxu1  ;;  %v4591_v33 = vpop.f32.mrf.mxu3 }
 0x70e   : > { %v4319_v29 = vpop.f32.mrf.mxu2  ;;  %v4642_v17 = vadd.f32 %v4591_v33, %v4360_v19  ;;  %v18147_v23 = vpop.f32.mrf.mxu0 }
 0x70f   : > { %v4364_v22 = vadd.f32 %v4319_v29, %v17739_v3  ;;  %20863 = vst [vmem:[#allocation105_spill] sm:$0xff] %v18147_v23 }
 0x710   : > { %v4846_v58 = vadd.f32 %v20864_v0, %v4642_v17  ;;  %v14620_v17 = vld [vmem:[#allocation2 + $0x2c] sm:$0xff] }
 0x711   : > { %6867 = vmatmul.bf16.gmra.mxu0 %v6772_v40  ;;  %v6773_v40 = vrot.slane %v14620_v17, 2  ;;  %v14406_v17 = vld [vmem:[#allocation2 + $0x20] sm:$0xff]  }
 0x712   : > { %5647 = vmatmul.bf16.vlgmr.msrb.gmra.mxu3 %v20865_v57  ;;  %5453 = vmatmul.bf16.gmra.mxu2 %v20866_v62  ;;  %v18153_v11 = vadd.f32 %v5083_v55, %v4846_v58 }
 0x715   : > { %v5091_v8 = vpop.f32.mrf.mxu1  ;;  %v4594_v37 = vpop.f32.mrf.mxu3 }
 0x716   : > { %v4322_v15 = vpop.f32.mrf.mxu2  ;;  %v4643_v19 = vadd.f32 %v4594_v37, %v4361_v63  ;;  %v18156_v21 = vpop.f32.mrf.mxu0  ;;  %v6774_v63 = vsel %vm3415_vm2, %v6771_v52, %v6773_v40  ;;  %v18173_v52 = vld [vmem:[#allocation2 + $0x34] sm:$0xff] }
 0x717   : > { %v4365_v3 = vadd.f32 %v4322_v15, %v17754_v36  ;;  %20867 = vst [vmem:[#allocation106_spill] sm:$0xff] %v18156_v21  ;;  %v20869_v36 = vld [vmem:[#allocation63_spill] sm:$0xff]  ;;  %v20870_v15 = vld [vmem:[#allocation9_spill] sm:$0xff] }
 0x718   : > { %6080 = vmatmul.bf16.gmra.mxu1 %v14405_v9  ;;  %v4847_v20 = vadd.f32 %v17649_v48, %v4643_v19  ;;  %v20871_v48 = vld [vmem:[#allocation18_spill] sm:$0xff] }
 0x71a   : > { %v18159_v33 = vadd.f32 %v5086_v41, %v4847_v20 }
 0x71d   : > { %v5093_v29 = vpop.f32.mrf.mxu1  ;;  %v4596_v0 = vpop.f32.mrf.mxu3 }
 0x71e   : > { %v4324_v55 = vpop.f32.mrf.mxu2  ;;  %v4644_v58 = vadd.f32 %v4596_v0, %v4362_v43  ;;  %v18162_v62 = vpop.f32.mrf.mxu0 }
 0x71f   : > { %v4366_v57 = vadd.f32 %v4324_v55, %v17767_v28  ;;  %20868 = vst [vmem:[#allocation109_spill] sm:$0xff] %v18162_v62 }
 0x720   : > { %v4848_v37 = vadd.f32 %v20869_v36, %v4644_v58 }
 0x721   : > { %6872 = vmatmul.bf16.gmra.mxu0 %v6774_v63 }
 0x722   : > { %5652 = vmatmul.bf16.gmra.mxu3 %v20870_v15  ;;  %5458 = vmatmul.bf16.gmra.mxu2 %v20871_v48  ;;  %v18168_v41 = vadd.f32 %v5088_v13, %v4848_v37  ;;  %v6775_v13 = vrot.slane %v18173_v52, 2 }
 0x725   : > { %v5096_v9 = vpop.f32.mrf.mxu1  ;;  %v4599_v19 = vpop.f32.mrf.mxu3 }
 0x726   : > { %v4327_v20 = vpop.f32.mrf.mxu2  ;;  %v4645_v43 = vadd.f32 %v4599_v19, %v4363_v59  ;;  %v18171_v0 = vpop.f32.mrf.mxu0 }
 0x727   : > { %v4367_v28 = vadd.f32 %v4327_v20, %v17782_v16  ;;  %20872 = vst [vmem:[#allocation53_spill] sm:$0xff] %v18171_v0  ;;  %v6776_v16 = vsel %vm3415_vm2, %v6773_v40, %v6775_v13  ;;  %v20874_v20 = vld [vmem:[#allocation10_spill] sm:$0xff]  ;;  %v18193_v40 = vld [vmem:[#allocation2 + $0x3c] sm:$0xff] }
 0x728   : > { %6085 = vmatmul.bf16.gmra.mxu1 %v14406_v17  ;;  %v4849_v55 = vadd.f32 %v17677_v49, %v4645_v43  ;;  %v20875_v49 = vld [vmem:[#allocation24_spill] sm:$0xff] }
 0x72a   : > { %v18176_v58 = vadd.f32 %v5091_v8, %v4849_v55  ;;  %v14407_v55 = vld [vmem:[#allocation2 + $0x28] sm:$0xff]  }
 0x72d   : > { %v18178_v63 = vpop.f32.mrf.mxu1  ;;  %v4601_v36 = vpop.f32.mrf.mxu3 }
 0x72e   : > { %v4329_v37 = vpop.f32.mrf.mxu2  ;;  %v4646_v15 = vadd.f32 %v4601_v36, %v4364_v22  ;;  %v18182_v48 = vpop.f32.mrf.mxu0 }
 0x72f   : > { %v4368_v59 = vadd.f32 %v4329_v37, %v17795_v51  ;;  %20873 = vst [vmem:[#allocation57_spill] sm:$0xff] %v18182_v48 }
 0x730   : > { %v4850_v19 = vadd.f32 %v17690_v54, %v4646_v15  ;;  %v6777_v54 = vrot.slane %v18193_v40, 2 }
 0x731   : > { %6877 = vmatmul.bf16.gmra.mxu0 %v6776_v16 }
 0x732   : > { %5657 = vmatmul.bf16.gmra.mxu3 %v20874_v20  ;;  %5463 = vmatmul.bf16.gmra.mxu2 %v20875_v49  ;;  %v18191_v36 = vadd.f32 %v5093_v29, %v4850_v19  ;;  %v20879_v29 = vld [vmem:[#allocation22_spill] sm:$0xff] }
 0x735   : > { %v5101_v8 = vpop.f32.mrf.mxu1  ;;  %v4604_v17 = vpop.f32.mrf.mxu3 }
 0x736   : > { %v4332_v43 = vpop.f32.mrf.mxu2  ;;  %v4647_v0 = vadd.f32 %v4604_v17, %v4365_v3  ;;  %v18189_v51 = vpop.f32.mrf.mxu0  ;;  %v20878_v3 = vld [vmem:[#allocation11_spill] sm:$0xff] }
 0x737   : > { %v4369_v22 = vadd.f32 %v4332_v43, %v17810_v25  ;;  %20876 = vst [vmem:[#allocation107_spill] sm:$0xff] %v18189_v51  ;;  %v6778_v25 = vsel %vm3415_vm2, %v6775_v13, %v6777_v54  ;;  %v14621_v13 = vld [vmem:[#allocation2 + $0x44] sm:$0xff] }
 0x738   : > { %6090 = vmatmul.bf16.gmra.mxu1 %v14407_v55  ;;  %v14408_v55 = vld [vmem:[#allocation2 + $0x30] sm:$0xff]  }
 0x73d   : > { %v18195_v37 = vpop.f32.mrf.mxu1  ;;  %v4606_v15 = vpop.f32.mrf.mxu3 }
 0x73e   : > { %v4334_v16 = vpop.f32.mrf.mxu2  ;;  %v4648_v20 = vadd.f32 %v4606_v15, %v4366_v57  ;;  %v18199_v48 = vpop.f32.mrf.mxu0 }
 0x73f   : > { %v4370_v49 = vadd.f32 %v4334_v16, %v17821_v5  ;;  %20877 = vst [vmem:[#allocation108_spill] sm:$0xff] %v18199_v48  ;;  %v4851_v5 = vadd.f32 %v17705_v46, %v4647_v0  ;;  %v6779_v16 = vrot.slane %v14621_v13, 2  ;;  %v20883_v46 = vld [vmem:[#allocation25_spill] sm:$0xff] }
 0x741   : > { %6882 = vmatmul.bf16.gmra.mxu0 %v6778_v25  ;;  %v18215_v23 = vadd.f32 %v5096_v9, %v4851_v5  ;;  %v14622_v5 = vld [vmem:[#allocation2 + $0x4c] sm:$0xff] }
 0x742   : > { %5662 = vmatmul.bf16.gmra.mxu3 %v20878_v3  ;;  %5468 = vmatmul.bf16.gmra.mxu2 %v20879_v29 }
 0x745   : > { %v18204_v19 = vpop.f32.mrf.mxu1  ;;  %v4609_v17 = vpop.f32.mrf.mxu3 }
 0x746   : > { %v4337_v43 = vpop.f32.mrf.mxu2  ;;  %v4649_v51 = vadd.f32 %v4609_v17, %v4367_v28  ;;  %v18207_v57 = vpop.f32.mrf.mxu0  ;;  %v4852_v28 = vadd.f32 %v17718_v7, %v4648_v20  ;;  %v20882_v17 = vld [vmem:[#allocation20_spill] sm:$0xff] }
 0x747   : > { %v4371_v62 = vadd.f32 %v4337_v43, %v17836_v24  ;;  %20880 = vst [vmem:[#allocation34_spill] sm:$0xff] %v18207_v57  ;;  %v6780_v24 = vsel %vm3415_vm2, %v6777_v54, %v6779_v16 }
 0x748   : > { %6095 = vmatmul.bf16.gmra.mxu1 %v14408_v55  ;;  %v18227_v54 = vadd.f32 %v18178_v63, %v4852_v28  ;;  %v4853_v7 = vadd.f32 %v17733_v47, %v4649_v51  ;;  %v20886_v47 = vld [vmem:[#allocation26_spill] sm:$0xff]  ;;  %v20887_v51 = vld [vmem:[#allocation47_spill] sm:$0xff] }
 0x74d   : > { %v18210_v15 = vpop.f32.mrf.mxu1  ;;  %v4611_v25 = vpop.f32.mrf.mxu3 }
 0x74e   : > { %v4339_v3 = vpop.f32.mrf.mxu2  ;;  %v4650_v29 = vadd.f32 %v4611_v25, %v4368_v59  ;;  %v18213_v21 = vpop.f32.mrf.mxu0  ;;  %v14409_v59 = vld [vmem:[#allocation2 + $0x38] sm:$0xff]   ;;  %v6781_v25 = vrot.slane %v14622_v5, 2 }
 0x74f   : > { %v4372_v48 = vadd.f32 %v4339_v3, %v17846_v42  ;;  %20881 = vst [vmem:[#allocation58_spill] sm:$0xff] %v18213_v21  ;;  %v13900_v21 = vld [vmem:[%s20373_s4 + $0x3d0] sm:$0xff] }
 0x750   : > { %v4854_v63 = vadd.f32 %v17746_v44, %v4650_v29  ;;  %v14623_v29 = vld [vmem:[#allocation2 + $0x54] sm:$0xff] }
 0x751   : > { %6887 = vmatmul.bf16.gmra.mxu0 %v6780_v24 }
 0x752   : > { %5667 = vmatmul.bf16.gmra.mxu3 %v20882_v17  ;;  %5473 = vmatmul.bf16.gmra.mxu2 %v20883_v46 }
 0x755   : > { %v18221_v0 = vpop.f32.mrf.mxu1  ;;  %v4614_v43 = vpop.f32.mrf.mxu3 }
 0x756   : > { %v4342_v55 = vpop.f32.mrf.mxu2  ;;  %v4651_v13 = vadd.f32 %v4614_v43, %v4369_v22  ;;  %v18224_v9 = vpop.f32.mrf.mxu0  ;;  %v6782_v43 = vsel %vm3415_vm2, %v6779_v16, %v6781_v25  ;;  %v18251_v16 = vadd.f32 %v18195_v37, %v4854_v63 }
 0x757   : > { %v4373_v42 = vadd.f32 %v4342_v55, %v17859_v1  ;;  %20884 = vst [vmem:[#allocation110_spill] sm:$0xff] %v18224_v9  ;;  %v18237_v1 = vadd.f32 %v5101_v8, %v4853_v7  ;;  %v6783_v7 = vrot.slane %v14623_v29, 2  ;;  %v13941_v9 = vld [vmem:[%s20373_s4 + $0x4b8] sm:$0xff] }
 0x758   : > { %6100 = vmatmul.bf16.gmra.mxu1 %v14409_v59  ;;  %v14410_v59 = vld [vmem:[#allocation2 + $0x40] sm:$0xff]  }
 0x759   : > { %7236 = vmatpush.bf16.msrb.mxu1 %v13941_v9 }
 0x75d   : > { %v18230_v20 = vpop.f32.mrf.mxu1  ;;  %v4616_v3 = vpop.f32.mrf.mxu3 }
 0x75e   : > { %v4344_v24 = vpop.f32.mrf.mxu2  ;;  %v18232_v17 = vadd.f32 %v4616_v3, %v4370_v49  ;;  %v18235_v46 = vpop.f32.mrf.mxu0 }
 0x75f   : > { %v4374_v22 = vadd.f32 %v4344_v24, %v17871_v30  ;;  %20885 = vst [vmem:[#allocation44_spill] sm:$0xff] %v18235_v46 }
 0x761   : > { %6892 = vmatmul.bf16.gmra.mxu0 %v6782_v43 }
 0x762   : > { %5672 = vmatmul.bf16.gmra.mxu3 %v20886_v47  ;;  %5478 = vmatmul.bf16.gmra.mxu2 %v20887_v51  ;;  %v20891_v51 = vld [vmem:[#allocation65_spill] sm:$0xff] }
 0x765   : > { %v18243_v28 = vpop.f32.mrf.mxu1  ;;  %v4619_v55 = vpop.f32.mrf.mxu3 }
 0x766   : > { %v4347_v49 = vpop.f32.mrf.mxu2  ;;  %v18245_v5 = vadd.f32 %v4619_v55, %v4371_v62  ;;  %v18248_v8 = vpop.f32.mrf.mxu0  ;;  %v6784_v62 = vsel %vm3415_vm2, %v6781_v25, %v6783_v7 }
 0x767   : > { %v4375_v30 = vadd.f32 %v4347_v49, %v17892_v45  ;;  %20888 = vst [vmem:[#allocation60_spill] sm:$0xff] %v18248_v8  ;;  %v20890_v45 = vld [vmem:[#allocation15_spill] sm:$0xff]  ;;  %v14411_v49 = vld [vmem:[#allocation2 + $0x48] sm:$0xff]  }
 0x768   : > { %6105 = vmatmul.bf16.gmra.mxu1 %v14410_v59 }
 0x76d   : > { %v18253_v44 = vpop.f32.mrf.mxu1  ;;  %v4621_v3 = vpop.f32.mrf.mxu3 }
 0x76e   : > { %v4349_v24 = vpop.f32.mrf.mxu2  ;;  %v18255_v43 = vadd.f32 %v4621_v3, %v4372_v48  ;;  %v18257_v47 = vpop.f32.mrf.mxu0 }
 0x76f   : > { %20889 = vst [vmem:[#allocation61_spill] sm:$0xff] %v18257_v47  ;;  %v14624_v24 = vld [vmem:[#allocation2 + $0x5c] sm:$0xff] }
 0x770   : > { %v6785_v47 = vrot.slane %v14624_v24, 2  ;;  %v13904_v24 = vld [vmem:[%s20373_s4 + $0x3f0] sm:$0xff] }
 0x771   : > { %6897 = vmatmul.bf16.gmra.mxu0 %v6784_v62 }
 0x772   : > { %5677 = vmatmul.bf16.gmra.mxu3 %v20890_v45  ;;  %5483 = vmatmul.bf16.gmra.mxu2 %v20891_v51  ;;  %v6786_v46 = vsel %vm3415_vm2, %v6783_v7, %v6785_v47  ;;  %v5175_v7 = vld [vmem:[#allocation2 + $0x70] sm:$0x1] }
 0x775   : > { %v18262_v55 = vpop.f32.mrf.mxu1  ;;  %v4624_v37 = vpop.f32.mrf.mxu3 }
 0x776   : > { %v5444_v63 = vpop.f32.mrf.mxu2  ;;  %v18264_v59 = vadd.f32 %v4624_v37, %v4373_v42  ;;  %v5950_v48 = vpop.f32.mrf.mxu0  ;;  %v4855_v42 = vadd.f32 %v17761_v14, %v4651_v13  ;;  %v20894_v37 = vld [vmem:[#allocation66_spill] sm:$0xff] }
 0x777   : > { %v5508_v29 = vadd.f32 %v5444_v63, %v17954_v56  ;;  %v20893_v56 = vld [vmem:[#allocation48_spill] sm:$0xff]  ;;  %v14412_v48 = vld [vmem:[#allocation2 + $0x50] sm:$0xff]  }
 0x778   : > { %6110 = vmatmul.bf16.gmra.mxu1 %v14411_v49  ;;  %v18291_v13 = vadd.f32 %v18204_v19, %v4855_v42 }
 0x77d   : > { %v5123_v3 = vpop.f32.mrf.mxu1  ;;  %v4626_v25 = vpop.f32.mrf.mxu3 }
 0x77e   : > { %v5446_v62 = vpop.f32.mrf.mxu2  ;;  %v18267_v8 = vadd.f32 %v4626_v25, %v4374_v22  ;;  %v18272_v51 = vpop.f32.mrf.mxu0  ;;  %v13905_v22 = vld [vmem:[%s20373_s4 + $0x3f8] sm:$0xff] }
 0x77f   : > { %v18270_v45 = vadd.f32 %v5446_v62, %v18002_v6  ;;  %20892 = vst [vmem:[#allocation111_spill] sm:$0xff] %v18272_v51  ;;  %6355 = vmatpush.bf16.msra.mxu2 %v13905_v22  ;;  %v14625_v62 = vld [vmem:[#allocation2 + $0x64] sm:$0xff] }
 0x781   : > { %6902 = vmatmul.bf16.gmra.mxu0 %v6786_v46 }
 0x782   : > { %5682 = vmatmul.bf16.gmra.mxu3 %v20893_v56  ;;  %5488 = vmatmul.bf16.gmra.mxu2 %v20894_v37  ;;  %v5243_v56 = vunpack.c.l.b16 %v5175_v7  ;;  %v13902_v7 = vld [vmem:[%s20373_s4 + $0x3e0] sm:$0xff] }
 0x783   : > { %6356 = vmatpush.bf16.msra.mxu2 %v13904_v24  ;;  %v20898_v24 = vld [vmem:[#allocation67_spill] sm:$0xff] }
 0x785   : > { %v18278_v63 = vpop.f32.mrf.mxu1  ;;  %v4629_v49 = vpop.f32.mrf.mxu3 }
 0x786   : > { %v5449_v6 = vpop.f32.mrf.mxu2  ;;  %v18283_v3 = vadd.f32 %v4629_v49, %v4375_v30  ;;  %v18288_v14 = vpop.f32.mrf.mxu0  ;;  %v6787_v30 = vrot.slane %v14625_v62, 2  ;;  %v20899_v62 = vld [vmem:[#allocation70_spill] sm:$0xff] }
 0x787   : > { %v18286_v46 = vadd.f32 %v5449_v6, %v18040_v34  ;;  %20895 = vst [vmem:[#allocation55_spill] sm:$0xff] %v18288_v14  ;;  %v13903_v34 = vld [vmem:[%s20373_s4 + $0x3e8] sm:$0xff]  ;;  %v20897_v6 = vunpack.c.h.b16 %v17934_v31 }
 0x788   : > { %6115 = vmatmul.bf16.gmra.mxu1 %v14412_v48  ;;  %6357 = vmatpush.bf16.msra.mxu2 %v13903_v34  ;;  %v6788_v49 = vsel %vm3415_vm2, %v6785_v47, %v6787_v30  ;;  %v13901_v47 = vld [vmem:[%s20373_s4 + $0x3d8] sm:$0xff] }
 0x789   : > { %v18309_v48 = vpack.c.b16 %v5243_v56, %v20897_v6  ;;  %v13976_v56 = vld [vmem:[%s20373_s4 + $0x578] sm:$0xff] }
 0x78a   : > { %v14413_v6 = vld [vmem:[#allocation2 + $0x58] sm:$0xff]   ;;  %7985 = vmatpush.bf16.msrb.mxu0 %v13976_v56 }
 0x78b   : > { %v5369_v34 = vshll.u32 %v18309_v48, 16 }
 0x78c   : > { %6358 = vmatpush.bf16.msra.mxu2 %v13902_v7 }
 0x78d   : > { %v18296_v25 = vpop.f32.mrf.mxu1  ;;  %v4631_v37 = vpop.f32.mrf.mxu3  ;;  %v5371_v51 = vrot.slane %v5369_v34, 3  ;;  %v13940_v34 = vld [vmem:[%s20373_s4 + $0x4b0] sm:$0xff] }
 0x78e   : > { %v5451_v22 = vpop.f32.mrf.mxu2  ;;  %v18304_v42 = vpop.f32.mrf.mxu0  ;;  %v5366_v37 = vshrl.u32 %v18309_v48, 16  ;;  %7237 = vmatpush.bf16.msrb.mxu1 %v13940_v34 }
 0x78f   : > { %v18302_v19 = vadd.f32 %v5451_v22, %v18080_v10  ;;  %20896 = vst [vmem:[#allocation32_spill] sm:$0xff] %v18304_v42 }
 0x790   : > { %v5368_v14 = vrot.slane %v5366_v37, 2  ;;  %6359 = vmatpush.bf16.msra.mxu2 %v13901_v47  ;;  %v13899_v47 = vld [vmem:[%s20373_s4 + $0x3c8] sm:$0xff] }
 0x791   : > { %6907 = vmatmul.bf16.gmra.mxu0 %v6788_v49 }
 0x792   : > { %5687 = vmatmul.bf16.gmra.mxu3 %v20898_v24  ;;  %5493 = vmatmul.bf16.gmra.mxu2 %v20899_v62  ;;  %v18326_v24 = vld [vmem:[#allocation2 + $0x6c] sm:$0xff]  ;;  %v18347_v37 = vor.u32 %v5371_v51, %v5368_v14 }
 0x794   : > { %6360 = vmatpush.bf16.msra.mxu2 %v13900_v21 }
 0x795   : > { %v18316_v10 = vpop.f32.mrf.mxu1  ;;  %v5648_v22 = vpop.f32.mrf.mxu3 }
 0x796   : > { %v5454_v49 = vpop.f32.mrf.mxu2  ;;  %v18328_v62 = vadd.f32 %v5648_v22, %v5508_v29  ;;  %v18333_v7 = vpop.f32.mrf.mxu0  ;;  %v13975_v29 = vld [vmem:[%s20373_s4 + $0x570] sm:$0xff]  ;;  %v13974_v22 = vld [vmem:[%s20373_s4 + $0x568] sm:$0xff] }
 0x797   : > { %v18331_v42 = vadd.f32 %v5454_v49, %v18101_v2  ;;  %20900 = vst [vmem:[#allocation112_spill] sm:$0xff] %v18333_v7  ;;  %v6789_v2 = vrot.slane %v18326_v24, 2  ;;  %7986 = vmatpush.bf16.msrb.mxu0 %v13975_v29  ;;  %v6453_v29 = vld [vmem:[#allocation2 + $0x74] sm:$0xf]  ;;  %v20902_v7 = vld [vmem:[#allocation68_spill] sm:$0xff] }
 0x798   : > { %6120 = vmatmul.bf16.gmra.mxu1 %v14413_v6  ;;  %v5373_v57 = vsel %vm5257_vm7, %v20902_v7, %v18347_v37  ;;  %6361 = vmatpush.bf16.msra.mxu2 %v13899_v47  ;;  %v6471_v34 = vunpack.c.l.b16 %v6453_v29  ;;  %v13913_v7 = vld [vmem:[%s20373_s4 + $0x438] sm:$0xff]  ;;  %v13938_v47 = vld [vmem:[%s20373_s4 + $0x4a0] sm:$0xff] }
 0x799   : > { %v6790_v6 = vsel %vm3415_vm2, %v6787_v30, %v6789_v2  ;;  %v13939_v30 = vld [vmem:[%s20373_s4 + $0x4a8] sm:$0xff]  ;;  %6650 = vmatpush.bf16.msra.mxu3 %v13913_v7 }
 0x79a   : > { %7238 = vmatpush.bf16.msrb.mxu1 %v13939_v30 }
 0x79b   : > { %7987 = vmatpush.bf16.msrb.mxu0 %v13974_v22  ;;  %v20903_v22 = vld [vmem:[#allocation69_spill] sm:$0xff] }
 0x79d   : > { %v18345_v56 = vpop.f32.mrf.mxu1  ;;  %v5650_v49 = vpop.f32.mrf.mxu3 }
 0x79e   : > { %v5456_v9 = vpop.f32.mrf.mxu2  ;;  %v18360_v51 = vadd.f32 %v5650_v49, %v18270_v45  ;;  %v18365_v14 = vpop.f32.mrf.mxu0  ;;  %v13973_v45 = vld [vmem:[%s20373_s4 + $0x560] sm:$0xff]  ;;  %7239 = vmatpush.bf16.msrb.mxu1 %v13938_v47  ;;  %v13911_v47 = vld [vmem:[%s20373_s4 + $0x428] sm:$0xff] }
 0x79f   : > { %v18363_v21 = vadd.f32 %v5456_v9, %v18119_v50  ;;  %20901 = vst [vmem:[#allocation56_spill] sm:$0xff] %v18365_v14  ;;  %v13898_v50 = vld [vmem:[%s20373_s4 + $0x3c0] sm:$0xff]  ;;  %7988 = vmatpush.bf16.msrb.mxu0 %v13973_v45  ;;  %v13972_v9 = vld [vmem:[%s20373_s4 + $0x558] sm:$0xff]  ;;  %v13912_v45 = vld [vmem:[%s20373_s4 + $0x430] sm:$0xff] }
 0x7a0   : > { %6362 = vmatpush.bf16.msra.mxu2 %v13898_v50  ;;  %6651 = vmatpush.bf16.msra.mxu3 %v13912_v45  ;;  %v13970_v45 = vld [vmem:[%s20373_s4 + $0x548] sm:$0xff] }
 0x7a1   : > { %6912 = vmatmul.bf16.gmra.mxu0 %v6790_v6 }
 0x7a2   : > { %5692 = vmatmul.bf16.gmra.mxu3 %v20903_v22  ;;  %5498 = vmatmul.bf16.gmra.mxu2 %v5373_v57  ;;  %v14414_v57 = vld [vmem:[#allocation2 + $0x60] sm:$0xff]   ;;  %v18391_v22 = vpack.c.b16 %v6471_v34, %v6471_v34  ;;  %v13937_v34 = vld [vmem:[%s20373_s4 + $0x498] sm:$0xff] }
 0x7a3   : > { %7989 = vmatpush.bf16.msrb.mxu0 %v13972_v9  ;;  %7240 = vmatpush.bf16.msrb.mxu1 %v13937_v34  ;;  %v13936_v9 = vld [vmem:[%s20373_s4 + $0x490] sm:$0xff] }
 0x7a4   : > { %20904 = vst [vmem:[#allocation33_spill] sm:$0xff] %v18391_v22  ;;  %6652 = vmatpush.bf16.msra.mxu3 %v13911_v47 }
 0x7a5   : > { %v18380_v49 = vpop.f32.mrf.mxu1  ;;  %v5653_v6 = vpop.f32.mrf.mxu3 }
 0x7a6   : > { %v5459_v29 = vpop.f32.mrf.mxu2  ;;  %v18394_v30 = vadd.f32 %v5653_v6, %v18286_v46  ;;  %v18399_v14 = vpop.f32.mrf.mxu0  ;;  %v13971_v46 = vld [vmem:[%s20373_s4 + $0x550] sm:$0xff] }
 0x7a7   : > { %v18397_v50 = vadd.f32 %v5459_v29, %v18129_v35  ;;  %20905 = vst [vmem:[#allocation54_spill] sm:$0xff] %v18399_v14  ;;  %v6791_v35 = vrot.slane %v18391_v22, 2  ;;  %7990 = vmatpush.bf16.msrb.mxu0 %v13971_v46  ;;  %7241 = vmatpush.bf16.msrb.mxu1 %v13936_v9  ;;  %v13910_v46 = vld [vmem:[%s20373_s4 + $0x420] sm:$0xff]  ;;  %v13909_v9 = vld [vmem:[%s20373_s4 + $0x418] sm:$0xff]  ;;  %v7071_v22 = vshll.u32 %v18494_v32, 16 }
 0x7a8   : > { %6125 = vmatmul.bf16.gmra.mxu1 %v14414_v57  ;;  %6653 = vmatpush.bf16.msra.mxu3 %v13910_v46 }
 0x7a9   : > { %v6792_v57 = vsel %vm3415_vm2, %v6789_v2, %v6791_v35  ;;  %v13935_v2 = vld [vmem:[%s20373_s4 + $0x488] sm:$0xff] }
 0x7ab   : > { %7991 = vmatpush.bf16.msrb.mxu0 %v13970_v45  ;;  %7242 = vmatpush.bf16.msrb.mxu1 %v13935_v2  ;;  %v13908_v2 = vld [vmem:[%s20373_s4 + $0x410] sm:$0xff] }
 0x7ac   : > { %6654 = vmatpush.bf16.msra.mxu3 %v13909_v9 }
 0x7ad   : > { %v18411_v7 = vpop.f32.mrf.mxu1  ;;  %v5655_v6 = vpop.f32.mrf.mxu3 }
 0x7ae   : > { %v5461_v29 = vpop.f32.mrf.mxu2  ;;  %v18424_v14 = vadd.f32 %v5655_v6, %v18302_v19  ;;  %v18429_v4 = vpop.f32.mrf.mxu0  ;;  %v13969_v19 = vld [vmem:[%s20373_s4 + $0x540] sm:$0xff] }
 0x7af   : > { %v18427_v34 = vadd.f32 %v5461_v29, %v18138_v18  ;;  %20906 = vst [vmem:[#allocation46_spill] sm:$0xff] %v18429_v4  ;;  %v20907_v18 = vld [vmem:[#allocation71_spill] sm:$0xff]  ;;  %v13934_v6 = vld [vmem:[%s20373_s4 + $0x480] sm:$0xff]  ;;  %7992 = vmatpush.bf16.msrb.mxu0 %v13969_v19  ;;  %v5576_v19 = vrot.slane %v18309_v48, 3  ;;  %v20912_v4 = vrot.slane %v20836_v27, 3 }
 0x7b0   : > { %7243 = vmatpush.bf16.msrb.mxu1 %v13934_v6  ;;  %6655 = vmatpush.bf16.msra.mxu3 %v13908_v2  ;;  %v18479_v2 = vld [vmem:[#allocation2 + $0x18] sm:$0xf]  ;;  %v6952_v27 = vld [vmem:[#allocation2 + $0x14] sm:$0xc] }
 0x7b1   : > { %6917 = vmatmul.bf16.gmra.mxu0 %v6792_v57  ;;  %v5577_v48 = vsel %vm3707_vm4, %v20912_v4, %v5576_v19  ;;  %20913 = vst [vmem:[#allocation43_spill] sm:$0xff] %v18479_v2  ;;  %v20511_v4 = vunpack.c.l.b16 %v18479_v2  ;;  %v7073_v2 = vrot.slane %v7071_v22, 3  ;;  %v18521_v22 = vld [vmem:[#allocation2 + $0x2c] sm:$0xff] }
 0x7b2   : > { %5697 = vmatmul.bf16.gmra.mxu3 %v20907_v18  ;;  %5503 = vmatmul.bf16.gmra.mxu2 %v18347_v37 }
 0x7b5   : > { %v18442_v47 = vpop.f32.mrf.mxu1  ;;  %v5658_v29 = vpop.f32.mrf.mxu3 }
 0x7b6   : > { %20908 = vst [vmem:[#allocation27_spill] sm:$0xff] %v18442_v47  ;;  %v5464_v57 = vpop.f32.mrf.mxu2  ;;  %v18451_v45 = vadd.f32 %v5658_v29, %v18331_v42  ;;  %v18457_v46 = vpop.f32.mrf.mxu0 }
 0x7b7   : > { %v18454_v37 = vadd.f32 %v5464_v57, %v18144_v61  ;;  %20909 = vst [vmem:[#allocation37_spill] sm:$0xff] %v18457_v46  ;;  %v13907_v61 = vld [vmem:[%s20373_s4 + $0x408] sm:$0xff] }
 0x7b8   : > { %6130 = vmatmul.bf16.gmra.mxu1 %v17934_v31  ;;  %v14626_v31 = vld [vmem:[#allocation2 + $0x1c] sm:$0xff]   ;;  %6656 = vmatpush.bf16.msra.mxu3 %v13907_v61 }
 0x7b9   : > { %v7604_v57 = vunpack.c.l.b16 %v14626_v31  ;;  %v13906_v31 = vld [vmem:[%s20373_s4 + $0x400] sm:$0xff] }
 0x7bc   : > { %6657 = vmatpush.bf16.msra.mxu3 %v13906_v31  ;;  %v7068_v31 = vshrl.u32 %v18494_v32, 16 }
 0x7bd   : > { %v18462_v18 = vpop.f32.mrf.mxu1  ;;  %v5660_v42 = vpop.f32.mrf.mxu3 }
 0x7be   : > { %20910 = vst [vmem:[#allocation52_spill] sm:$0xff] %v18462_v18  ;;  %v5466_v29 = vpop.f32.mrf.mxu2  ;;  %v18469_v9 = vadd.f32 %v5660_v42, %v18363_v21  ;;  %v18474_v46 = vpop.f32.mrf.mxu0  ;;  %v18485_v21 = vpack.c.b16 %v20914_v12, %v7604_v57  ;;  %v6005_v42 = vpack.c.b16 %v17949_v26, %v17949_v26  ;;  %v7020_v57 = vunpack.c.l.b16 %v6952_v27 }
 0x7bf   : > { %v18472_v6 = vadd.f32 %v5466_v29, %v18153_v11  ;;  %20911 = vst [vmem:[#allocation28_spill] sm:$0xff] %v18474_v46  ;;  %v20916_v11 = vld [vmem:[#allocation19_spill] sm:$0xff]  ;;  %v7070_v60 = vrot.slane %v7068_v31, 2 }
 0x7c0   : > { %20915 = vst [vmem:[#allocation14_spill] sm:$0xff] %v18485_v21  ;;  %v7824_v46 = vshll.u32 %v18485_v21, 16  ;;  %v7046_v12 = vpack.c.b16 %v20511_v4, %v7020_v57  ;;  %v7822_v27 = vshrl.u32 %v18485_v21, 16 }
 0x7c1   : > { %6922 = vmatmul.bf16.gmra.mxu0 %v6791_v35 }
 0x7c2   : > { %5702 = vmatmul.bf16.gmra.mxu3 %v5577_v48  ;;  %6363 = vmatmul.bf16.vlgmr.msra.gmra.mxu2 %v20916_v11  ;;  %v7060_v47 = vshrl.u32 %v7046_v12, 16 }
 0x7c4   : > { %v7062_v21 = vrot.slane %v7060_v47, 2  ;;  %v20514_v47 = vshll.u32 %v18521_v22, 16 }
 0x7c5   : > { %v18490_v29 = vpop.f32.mrf.mxu1  ;;  %v5663_v35 = vpop.f32.mrf.mxu3 }
 0x7c6   : > { %20917 = vst [vmem:[#allocation50_spill] sm:$0xff] %v18490_v29  ;;  %v5469_v61 = vpop.f32.mrf.mxu2  ;;  %v18497_v48 = vadd.f32 %v5663_v35, %v18397_v50  ;;  %v18500_v26 = vpop.f32.mrf.mxu0  ;;  %v7826_v29 = vrot.slane %v7824_v46, 1  ;;  %v20923_v50 = vshll.u32 %v20922_v38, 16 }
 0x7c7   : > { %v5518_v11 = vadd.f32 %v5469_v61, %v18159_v33  ;;  %20920 = vst [vmem:[#allocation16_spill] sm:$0xff] %v18500_v26  ;;  %v7063_v33 = vshll.u32 %v7046_v12, 16  ;;  %v20925_v12 = vld [vmem:[#allocation21_spill] sm:$0xff] }
 0x7c8   : > { %20919 = vst [vmem:[#allocation17_spill] sm:$0xff] %v18497_v48  ;;  %6135 = vmatmul.bf16.gmra.mxu1 %v6005_v42  ;;  %v7831_v35 = vrot.slane %v20923_v50, 1  ;;  %v7827_v26 = vor.u32 %v7826_v29, %v7822_v27  ;;  %v7074_v50 = vor.u32 %v7073_v2, %v7070_v60  ;;  %v18524_v27 = vld [vmem:[#allocation2 + $0x24] sm:$0xff] }
 0x7c9   : > { %20927 = vst [vmem:[#allocation10_spill] sm:$0xff] %v18524_v27 }
 0x7ca   : > { %v7832_v32 = vsel %vm2574_vm1, %v7827_v26, %v7831_v35 }
 0x7cd   : > { %v18506_v18 = vpop.f32.mrf.mxu1  ;;  %v5665_v42 = vpop.f32.mrf.mxu3 }
 0x7ce   : > { %20921 = vst [vmem:[#allocation63_spill] sm:$0xff] %v18506_v18  ;;  %v5471_v61 = vpop.f32.mrf.mxu2  ;;  %v18512_v46 = vadd.f32 %v5665_v42, %v18427_v34  ;;  %v18515_v4 = vpop.f32.mrf.mxu0  ;;  %v7065_v18 = vrot.slane %v7063_v33, 3 }
 0x7cf   : > { %v5519_v57 = vadd.f32 %v5471_v61, %v18168_v41  ;;  %20924 = vst [vmem:[#allocation9_spill] sm:$0xff] %v18515_v4  ;;  %v20932_v4 = vld [vmem:[#allocation12_spill] sm:$0xff] }
 0x7d0   : > { %v7066_v29 = vor.u32 %v7065_v18, %v7062_v21  ;;  %v7077_v18 = vshrl.u32 %v18524_v27, 16  ;;  %v7839_v21 = vrot.slane %v20514_v47, 1  ;;  %v20933_v47 = vld [vmem:[#allocation42_spill] sm:$0xff] }
 0x7d1   : > { %7993 = vmatmul.bf16.vlgmr.msrb.gmra.mxu0 %v7832_v32 }
 0x7d2   : > { %5707 = vmatmul.bf16.gmra.mxu3 %v5576_v19  ;;  %6368 = vmatmul.bf16.gmra.mxu2 %v20925_v12  ;;  %v7075_v41 = vsel %vm5257_vm7, %v7066_v29, %v7074_v50  ;;  %v7080_v19 = vshll.u32 %v18524_v27, 16 }
 0x7d4   : > { %v7082_v12 = vrot.slane %v7080_v19, 3  ;;  %v18555_v19 = vld [vmem:[#allocation2 + $0x2c] sm:$0xff] }
 0x7d5   : > { %v18519_v48 = vpop.f32.mrf.mxu1  ;;  %v5668_v34 = vpop.f32.mrf.mxu3  ;;  %20936 = vst [vmem:[#allocation26_spill] sm:$0xff] %v18555_v19 }
 0x7d6   : > { %20926 = vst [vmem:[#allocation18_spill] sm:$0xff] %v18519_v48  ;;  %v5474_v31 = vpop.f32.mrf.mxu2  ;;  %v18527_v26 = vadd.f32 %v5668_v34, %v18454_v37  ;;  %v18530_v60 = vpop.f32.mrf.mxu0  ;;  %v20930_v37 = vshrl.u32 %v20922_v38, 16  ;;  %v18552_v38 = vld [vmem:[#allocation2 + $0x34] sm:$0xff]  ;;  %v20942_v48 = vld [vmem:[#allocation13_spill] sm:$0xff] }
 0x7d7   : > { %v5520_v32 = vadd.f32 %v5474_v31, %v18176_v58  ;;  %20928 = vst [vmem:[#allocation24_spill] sm:$0xff] %v18530_v60  ;;  %v7079_v58 = vrot.slane %v7077_v18, 2 }
 0x7d8   : > { %7244 = vmatmul.bf16.vlgmr.msrb.gmra.mxu1 %v7075_v41  ;;  %v7835_v61 = vor.u32 %v20930_v37, %v7831_v35  ;;  %20935 = vst [vmem:[#allocation25_spill] sm:$0xff] %v18552_v38  ;;  %v7089_v37 = vshll.u32 %v18555_v19, 16 }
 0x7d9   : > { %v7083_v60 = vor.u32 %v7082_v12, %v7079_v58  ;;  %v20518_v58 = vshrl.u32 %v18521_v22, 16 }
 0x7da   : > { %v7840_v41 = vsel %vm2574_vm1, %v7835_v61, %v7839_v21 }
 0x7dd   : > { %v18535_v2 = vpop.f32.mrf.mxu1  ;;  %v5670_v33 = vpop.f32.mrf.mxu3 }
 0x7de   : > { %20929 = vst [vmem:[#allocation11_spill] sm:$0xff] %v18535_v2  ;;  %v5476_v42 = vpop.f32.mrf.mxu2  ;;  %v18542_v29 = vadd.f32 %v5670_v33, %v18472_v6  ;;  %v18545_v31 = vpop.f32.mrf.mxu0  ;;  %v7084_v6 = vsel %vm5257_vm7, %v7074_v50, %v7083_v60 }
 0x7df   : > { %v5521_v34 = vadd.f32 %v5476_v42, %v18191_v36  ;;  %20931 = vst [vmem:[#allocation22_spill] sm:$0xff] %v18545_v31 }
 0x7e1   : > { %7998 = vmatmul.bf16.gmra.mxu0 %v7840_v41  ;;  %v7843_v41 = vor.u32 %v20518_v58, %v7839_v21 }
 0x7e2   : > { %6658 = vmatmul.bf16.vlgmr.msra.gmra.mxu3 %v20932_v4  ;;  %6373 = vmatmul.bf16.gmra.mxu2 %v20933_v47  ;;  %v20517_v4 = vshll.u32 %v18552_v38, 16  ;;  %v7086_v47 = vshrl.u32 %v18555_v19, 16 }
 0x7e4   : > { %v7847_v50 = vrot.slane %v20517_v4, 1 }
 0x7e5   : > { %v18550_v27 = vpop.f32.mrf.mxu1  ;;  %v5673_v35 = vpop.f32.mrf.mxu3 }
 0x7e6   : > { %20934 = vst [vmem:[#allocation20_spill] sm:$0xff] %v18550_v27  ;;  %v5479_v18 = vpop.f32.mrf.mxu2  ;;  %v18557_v36 = vadd.f32 %v5673_v35, %v5518_v11  ;;  %v18560_v42 = vpop.f32.mrf.mxu0  ;;  %v7088_v35 = vrot.slane %v7086_v47, 2  ;;  %v7848_v19 = vsel %vm2574_vm1, %v7843_v41, %v7847_v50  ;;  %v20947_v41 = vld [vmem:[#allocation89_spill] sm:$0xff] }
 0x7e7   : > { %v5522_v33 = vadd.f32 %v5479_v18, %v18215_v23  ;;  %20937 = vst [vmem:[#allocation47_spill] sm:$0xff] %v18560_v42  ;;  %v6276_v23 = vrot.slane %v18173_v52, 1  ;;  %v7091_v18 = vrot.slane %v7089_v37, 3 }
 0x7e8   : > { %7249 = vmatmul.bf16.gmra.mxu1 %v7084_v6 }
 0x7e9   : > { %v7092_v2 = vor.u32 %v7091_v18, %v7088_v35 }
 0x7eb   : > { %v7093_v37 = vsel %vm5257_vm7, %v7083_v60, %v7092_v2  ;;  %v20948_v60 = vshll.u32 %v20947_v41, 16 }
 0x7ed   : > { %v18565_v61 = vpop.f32.mrf.mxu1  ;;  %v5675_v11 = vpop.f32.mrf.mxu3  ;;  %v7855_v35 = vrot.slane %v20948_v60, 1 }
 0x7ee   : > { %20938 = vst [vmem:[#allocation15_spill] sm:$0xff] %v18565_v61  ;;  %v5481_v12 = vpop.f32.mrf.mxu2  ;;  %v18573_v6 = vadd.f32 %v5675_v11, %v5519_v57  ;;  %v18576_v31 = vpop.f32.mrf.mxu0  ;;  %v20940_v61 = vld [vmem:[#allocation41_spill] sm:$0xff] }
 0x7ef   : > { %v5523_v42 = vadd.f32 %v5481_v12, %v18227_v54  ;;  %20939 = vst [vmem:[#allocation65_spill] sm:$0xff] %v18576_v31  ;;  %v20941_v4 = vrot.slane %v20940_v61, 1  ;;  %v18586_v54 = vld [vmem:[#allocation2 + $0x34] sm:$0xff]  ;;  %v20522_v12 = vshrl.u32 %v18552_v38, 16 }
 0x7f0   : > { %20944 = vst [vmem:[#allocation66_spill] sm:$0xff] %v18586_v54 }
 0x7f1   : > { %8003 = vmatmul.bf16.gmra.mxu0 %v7848_v19  ;;  %v6277_v27 = vsel %vm2969_vm6, %v20941_v4, %v6276_v23  ;;  %v7095_v4 = vshrl.u32 %v18586_v54, 16 }
 0x7f2   : > { %6663 = vmatmul.bf16.gmra.mxu3 %v20942_v48  ;;  %6378 = vmatmul.bf16.gmra.mxu2 %v6277_v27  ;;  %v7098_v48 = vshll.u32 %v18586_v54, 16 }
 0x7f5   : > { %v18583_v21 = vpop.f32.mrf.mxu1  ;;  %v5678_v47 = vpop.f32.mrf.mxu3 }
 0x7f6   : > { %20943 = vst [vmem:[#allocation48_spill] sm:$0xff] %v18583_v21  ;;  %v5484_v57 = vpop.f32.mrf.mxu2  ;;  %v18588_v11 = vadd.f32 %v5678_v47, %v5520_v32  ;;  %v18593_v61 = vpop.f32.mrf.mxu0  ;;  %v6278_v47 = vrot.slane %v18193_v40, 1  ;;  %v20950_v21 = vld [vmem:[#allocation49_spill] sm:$0xff] }
 0x7f7   : > { %v18591_v19 = vadd.f32 %v5484_v57, %v18237_v1  ;;  %20945 = vst [vmem:[#allocation67_spill] sm:$0xff] %v18593_v61  ;;  %v7851_v1 = vor.u32 %v20522_v12, %v7847_v50  ;;  %v7097_v57 = vrot.slane %v7095_v4, 2  ;;  %v20954_v12 = vld [vmem:[#allocation95_spill] sm:$0xff] }
 0x7f8   : > { %7254 = vmatmul.bf16.gmra.mxu1 %v7093_v37  ;;  %v7100_v37 = vrot.slane %v7098_v48, 3  ;;  %v6279_v60 = vsel %vm2969_vm6, %v6276_v23, %v6278_v47  ;;  %v6512_v48 = vshll.u32 %v18173_v52, 16 }
 0x7f9   : > { %v7856_v54 = vsel %vm2574_vm1, %v7851_v1, %v7855_v35 }
 0x7fa   : > { %v6514_v1 = vrot.slane %v6512_v48, 2 }
 0x7fd   : > { %v18597_v27 = vpop.f32.mrf.mxu1  ;;  %v5680_v18 = vpop.f32.mrf.mxu3 }
 0x7fe   : > { %20946 = vst [vmem:[#allocation70_spill] sm:$0xff] %v18597_v27  ;;  %v5486_v32 = vpop.f32.mrf.mxu2  ;;  %v18605_v58 = vadd.f32 %v5680_v18, %v5521_v34  ;;  %v18610_v31 = vpop.f32.mrf.mxu0  ;;  %v7101_v27 = vor.u32 %v7100_v37, %v7097_v57  ;;  %v14627_v57 = vld [vmem:[#allocation2 + $0x3c] sm:$0xff] }
 0x7ff   : > { %v18608_v61 = vadd.f32 %v5486_v32, %v18251_v16  ;;  %20949 = vst [vmem:[#allocation68_spill] sm:$0xff] %v18610_v31  ;;  %v6509_v16 = vshrl.u32 %v18173_v52, 16  ;;  %v7104_v37 = vshrl.u32 %v14627_v57, 16  ;;  %v20955_v52 = vshll.u32 %v20954_v12, 16 }
 0x800   : > { %v7102_v34 = vsel %vm5257_vm7, %v7092_v2, %v7101_v27  ;;  %v7107_v2 = vshll.u32 %v14627_v57, 16 }
 0x801   : > { %8008 = vmatmul.bf16.gmra.mxu0 %v7856_v54  ;;  %v6511_v32 = vrot.slane %v6509_v16, 1 }
 0x802   : > { %6668 = vmatmul.bf16.gmra.mxu3 %v20950_v21  ;;  %6383 = vmatmul.bf16.gmra.mxu2 %v6279_v60  ;;  %v4856_v21 = vadd.f32 %v17774_v53, %v18232_v17  ;;  %v7109_v53 = vrot.slane %v7107_v2, 3 }
 0x805   : > { %v18615_v38 = vpop.f32.mrf.mxu1  ;;  %v5683_v50 = vpop.f32.mrf.mxu3 }
 0x806   : > { %20951 = vst [vmem:[#allocation69_spill] sm:$0xff] %v18615_v38  ;;  %v5489_v4 = vpop.f32.mrf.mxu2  ;;  %v18620_v18 = vadd.f32 %v5683_v50, %v5522_v33  ;;  %v18625_v23 = vpop.f32.mrf.mxu0  ;;  %v7863_v33 = vrot.slane %v20955_v52, 1  ;;  %v5144_v50 = vadd.f32 %v18210_v15, %v4856_v21  ;;  %v7106_v38 = vrot.slane %v7104_v37, 2  ;;  %v20958_v52 = vld [vmem:[#allocation59_spill] sm:$0xff]  ;;  %v20959_v15 = vld [vmem:[#allocation45_spill] sm:$0xff] }
 0x807   : > { %v18623_v54 = vadd.f32 %v5489_v4, %v18291_v13  ;;  %20952 = vst [vmem:[#allocation71_spill] sm:$0xff] %v18625_v23  ;;  %v20956_v23 = vshrl.u32 %v20947_v41, 16 }
 0x808   : > { %7259 = vmatmul.bf16.gmra.mxu1 %v7102_v34  ;;  %v6515_v34 = vor.u32 %v6514_v1, %v6511_v32  ;;  %v20960_v32 = vld [vmem:[#allocation74_spill] sm:$0xff] }
 0x809   : > { %v7859_v31 = vor.u32 %v20956_v23, %v7855_v35  ;;  %v20961_v41 = vrot.slane %v20960_v32, 1  ;;  %v7110_v23 = vor.u32 %v7109_v53, %v7106_v38  ;;  %v18652_v1 = vld [vmem:[#allocation2 + $0x4c] sm:$0xff] }
 0x80a   : > { %v6516_v21 = vsel %vm3174_vm3, %v20959_v15, %v6515_v34  ;;  %v20523_v53 = vshll.u32 %v18652_v1, 16 }
 0x80b   : > { %v7864_v57 = vsel %vm2574_vm1, %v7859_v31, %v7863_v33  ;;  %v6281_v35 = vsel %vm2969_vm6, %v6278_v47, %v20961_v41 }
 0x80d   : > { %v18629_v60 = vpop.f32.mrf.mxu1  ;;  %v5685_v13 = vpop.f32.mrf.mxu3 }
 0x80e   : > { %20953 = vst [vmem:[#allocation19_spill] sm:$0xff] %v18629_v60  ;;  %v5491_v4 = vpop.f32.mrf.mxu2  ;;  %v18636_v17 = vadd.f32 %v5685_v13, %v5523_v42  ;;  %v18640_v48 = vpop.f32.mrf.mxu0  ;;  %v4857_v60 = vadd.f32 %v20958_v52, %v18245_v5  ;;  %v7111_v5 = vsel %vm5257_vm7, %v7101_v27, %v7110_v23  ;;  %v6521_v13 = vshll.u32 %v18193_v40, 16  ;;  %v14628_v27 = vld [vmem:[#allocation2 + $0x44] sm:$0xff] }
 0x80f   : > { %v18638_v16 = vadd.f32 %v5491_v4, %v5144_v50  ;;  %20957 = vst [vmem:[#allocation73_spill] sm:$0xff] %v18640_v48  ;;  %v6518_v50 = vshrl.u32 %v18193_v40, 16  ;;  %v7113_v15 = vshrl.u32 %v14628_v27, 16  ;;  %v7871_v40 = vrot.slane %v20523_v53, 1  ;;  %v20966_v53 = vld [vmem:[#allocation36_spill] sm:$0xff] }
 0x810   : > { %v5145_v31 = vadd.f32 %v18221_v0, %v4857_v60  ;;  %v20963_v0 = vld [vmem:[#allocation64_spill] sm:$0xff]  ;;  %v6523_v52 = vrot.slane %v6521_v13, 2  ;;  %v13933_v48 = vld [vmem:[#allocation2 + $0x74] sm:$0x10] }
 0x811   : > { %8013 = vmatmul.bf16.gmra.mxu0 %v7864_v57  ;;  %v4858_v60 = vadd.f32 %v20963_v0, %v18255_v43  ;;  %v6520_v57 = vrot.slane %v6518_v50, 1 }
 0x812   : > { %6673 = vmatmul.bf16.gmra.mxu3 %v6516_v21  ;;  %6388 = vmatmul.bf16.gmra.mxu2 %v6281_v35  ;;  %v7116_v21 = vshll.u32 %v14628_v27, 16 }
 0x814   : > { %v7118_v43 = vrot.slane %v7116_v21, 3 }
 0x815   : > { %v18650_v42 = vpop.f32.mrf.mxu1  ;;  %v5688_v37 = vpop.f32.mrf.mxu3 }
 0x816   : > { %v5494_v2 = vpop.f32.mrf.mxu2  ;;  %v18659_v4 = vadd.f32 %v5688_v37, %v18591_v19  ;;  %v18663_v47 = vpop.f32.mrf.mxu0  ;;  %v5146_v19 = vadd.f32 %v18230_v20, %v4858_v60  ;;  %v20964_v37 = vshrl.u32 %v20954_v12, 16  ;;  %v4859_v20 = vadd.f32 %v20966_v53, %v18264_v59  ;;  %v20967_v12 = vld [vmem:[#allocation79_spill] sm:$0xff] }
 0x817   : > { %v18661_v38 = vadd.f32 %v5494_v2, %v5145_v31  ;;  %20962 = vst [vmem:[#allocation21_spill] sm:$0xff] %v18663_v47  ;;  %v6524_v31 = vor.u32 %v6523_v52, %v6520_v57 }
 0x818   : > { %7264 = vmatmul.bf16.gmra.mxu1 %v7111_v5  ;;  %v7867_v2 = vor.u32 %v20964_v37, %v7863_v33  ;;  %v7115_v5 = vrot.slane %v7113_v15, 2  ;;  %v5147_v52 = vadd.f32 %v18243_v28, %v4859_v20 }
 0x819   : > { %v6525_v60 = vsel %vm3174_vm3, %v6515_v34, %v6524_v31 }
 0x81a   : > { %v7872_v27 = vsel %vm2574_vm1, %v7867_v2, %v7871_v40  ;;  %v7119_v57 = vor.u32 %v7118_v43, %v7115_v5  ;;  %v14629_v2 = vld [vmem:[#allocation2 + $0x4c] sm:$0xff] }
 0x81b   : > { %v7122_v5 = vshrl.u32 %v14629_v2, 16  ;;  %v7125_v28 = vshll.u32 %v14629_v2, 16  ;;  %v20971_v2 = vld [vmem:[#allocation35_spill] sm:$0xff] }
 0x81d   : > { %v18668_v32 = vpop.f32.mrf.mxu1  ;;  %v5690_v41 = vpop.f32.mrf.mxu3 }
 0x81e   : > { %v5496_v35 = vpop.f32.mrf.mxu2  ;;  %v18676_v50 = vadd.f32 %v5690_v41, %v18608_v61  ;;  %v18680_v0 = vpop.f32.mrf.mxu0  ;;  %v18689_v61 = vld [vmem:[#allocation2 + $0x54] sm:$0xff] }
 0x81f   : > { %v18678_v13 = vadd.f32 %v5496_v35, %v5146_v19  ;;  %20965 = vst [vmem:[#allocation12_spill] sm:$0xff] %v18680_v0  ;;  %v7120_v19 = vsel %vm5257_vm7, %v7110_v23, %v7119_v57  ;;  %v20524_v53 = vshll.u32 %v18689_v61, 16  ;;  %v20969_v35 = vld [vmem:[#allocation62_spill] sm:$0xff]  ;;  %v20525_v23 = vshrl.u32 %v18652_v1, 16  ;;  %v13946_v0 = vld [vmem:[%s20373_s4 + $0x4e0] sm:$0xff] }
 0x820   : > { %v4860_v37 = vadd.f32 %v20969_v35, %v18267_v8 }
 0x821   : > { %8018 = vmatmul.bf16.gmra.mxu0 %v7872_v27 }
 0x822   : > { %6678 = vmatmul.bf16.gmra.mxu3 %v6525_v60  ;;  %6393 = vmatmul.bf16.gmra.mxu2 %v20967_v12  ;;  %v5148_v27 = vadd.f32 %v18253_v44, %v4860_v37  ;;  %v7875_v12 = vor.u32 %v20525_v23, %v7871_v40  ;;  %v20972_v44 = vld [vmem:[#allocation80_spill] sm:$0xff] }
 0x823   : > { %v6534_v37 = vsel %vm3174_vm3, %v6524_v31, %v20972_v44  ;;  %v20973_v40 = vld [vmem:[#allocation84_spill] sm:$0xff] }
 0x825   : > { %v18687_v33 = vpop.f32.mrf.mxu1  ;;  %v5693_v15 = vpop.f32.mrf.mxu3 }
 0x826   : > { %v5499_v21 = vpop.f32.mrf.mxu2  ;;  %v18694_v41 = vadd.f32 %v5693_v15, %v18623_v54  ;;  %v18698_v34 = vpop.f32.mrf.mxu0  ;;  %v7879_v54 = vrot.slane %v20524_v53, 1  ;;  %v7127_v15 = vrot.slane %v7125_v28, 3  ;;  %v4861_v53 = vadd.f32 %v20971_v2, %v18283_v3 }
 0x827   : > { %v18696_v59 = vadd.f32 %v5499_v21, %v5147_v52  ;;  %20968 = vst [vmem:[#allocation42_spill] sm:$0xff] %v18698_v34  ;;  %v7124_v52 = vrot.slane %v7122_v5, 2 }
 0x828   : > { %7269 = vmatmul.bf16.gmra.mxu1 %v7120_v19  ;;  %v7880_v35 = vsel %vm2574_vm1, %v7875_v12, %v7879_v54  ;;  %v5149_v28 = vadd.f32 %v18262_v55, %v4861_v53  ;;  %v20527_v55 = vshrl.u32 %v18689_v61, 16 }
 0x829   : > { %v7128_v34 = vor.u32 %v7127_v15, %v7124_v52  ;;  %v14630_v15 = vld [vmem:[#allocation2 + $0x54] sm:$0xff] }
 0x82a   : > { %v7134_v2 = vshll.u32 %v14630_v15, 16 }
 0x82d   : > { %v18703_v43 = vpop.f32.mrf.mxu1  ;;  %v5695_v20 = vpop.f32.mrf.mxu3 }
 0x82e   : > { %v5501_v60 = vpop.f32.mrf.mxu2  ;;  %v18712_v8 = vadd.f32 %v5695_v20, %v18638_v16  ;;  %v18716_v19 = vpop.f32.mrf.mxu0  ;;  %v18726_v16 = vld [vmem:[#allocation2 + $0x5c] sm:$0xff] }
 0x82f   : > { %v18714_v21 = vadd.f32 %v5501_v60, %v5148_v27  ;;  %20970 = vst [vmem:[#allocation41_spill] sm:$0xff] %v18716_v19  ;;  %v7129_v60 = vsel %vm5257_vm7, %v7119_v57, %v7128_v34  ;;  %v20526_v52 = vshll.u32 %v18726_v16, 16 }
 0x831   : > { %8023 = vmatmul.bf16.gmra.mxu0 %v7880_v35  ;;  %v7131_v35 = vshrl.u32 %v14630_v15, 16  ;;  %v7887_v53 = vrot.slane %v20526_v52, 1  ;;  %v20976_v15 = vld [vmem:[#allocation72_spill] sm:$0xff]  ;;  %v20977_v52 = vld [vmem:[#allocation82_spill] sm:$0xff] }
 0x832   : > { %6683 = vmatmul.bf16.gmra.mxu3 %v6534_v37  ;;  %6398 = vmatmul.bf16.gmra.mxu2 %v20973_v40  ;;  %v5952_v23 = vadd.f32 %v20976_v15, %v18328_v62 }
 0x833   : > { %v7133_v40 = vrot.slane %v7131_v35, 2 }
 0x835   : > { %v18724_v5 = vpop.f32.mrf.mxu1  ;;  %v5698_v27 = vpop.f32.mrf.mxu3 }
 0x836   : > { %v5504_v20 = vpop.f32.mrf.mxu2  ;;  %v18731_v3 = vadd.f32 %v5698_v27, %v18661_v38  ;;  %v18733_v31 = vpop.f32.mrf.mxu0  ;;  %v7883_v38 = vor.u32 %v20527_v55, %v7879_v54  ;;  %v6140_v54 = vadd.f32 %v18278_v63, %v5952_v23  ;;  %v14631_v23 = vld [vmem:[#allocation2 + $0x5c] sm:$0xff] }
 0x837   : > { %v5532_v12 = vadd.f32 %v5504_v20, %v5149_v28  ;;  %20974 = vst [vmem:[#allocation13_spill] sm:$0xff] %v18733_v31  ;;  %v7136_v28 = vrot.slane %v7134_v2, 3  ;;  %v7140_v15 = vshrl.u32 %v14631_v23, 16 }
 0x838   : > { %7274 = vmatmul.bf16.gmra.mxu1 %v7129_v60  ;;  %v7888_v60 = vsel %vm2574_vm1, %v7883_v38, %v7887_v53 }
 0x839   : > { %v7137_v31 = vor.u32 %v7136_v28, %v7133_v40 }
 0x83b   : > { %v7138_v2 = vsel %vm5257_vm7, %v7128_v34, %v7137_v31 }
 0x83d   : > { %v18736_v44 = vpop.f32.mrf.mxu1  ;;  %v5700_v57 = vpop.f32.mrf.mxu3 }
 0x83e   : > { %v5506_v37 = vpop.f32.mrf.mxu2  ;;  %v18744_v27 = vadd.f32 %v5700_v57, %v18678_v13  ;;  %v18746_v20 = vpop.f32.mrf.mxu0  ;;  %v18757_v57 = vld [vmem:[#allocation2 + $0x64] sm:$0xff] }
 0x83f   : > { %20975 = vst [vmem:[#allocation89_spill] sm:$0xff] %v18746_v20  ;;  %v20978_v37 = vld [vmem:[#allocation87_spill] sm:$0xff]  ;;  %v20528_v63 = vshll.u32 %v18757_v57, 16 }
 0x840   : > { %v6189_v20 = vld [vmem:[#allocation2 + $0x74] sm:$0x7] }
 0x841   : > { %8028 = vmatmul.bf16.gmra.mxu0 %v7888_v60  ;;  %v20529_v60 = vshrl.u32 %v18726_v16, 16 }
 0x842   : > { %6688 = vmatmul.bf16.gmra.mxu3 %v20977_v52  ;;  %6403 = vmatmul.bf16.gmra.mxu2 %v20978_v37  ;;  %v20979_v52 = vld [vmem:[#allocation76_spill] sm:$0xff]  ;;  %v7143_v37 = vshll.u32 %v14631_v23, 16 }
 0x843   : > { %v5953_v28 = vadd.f32 %v20979_v52, %v18360_v51  ;;  %v7891_v55 = vor.u32 %v20529_v60, %v7887_v53  ;;  %v7142_v51 = vrot.slane %v7140_v15, 2  ;;  %v20980_v53 = vld [vmem:[#allocation38_spill] sm:$0xff] }
 0x844   : > { %v20981_v60 = vld [vmem:[#allocation86_spill] sm:$0xff] }
 0x845   : > { %v18753_v19 = vpop.f32.mrf.mxu1  ;;  %v5703_v35 = vpop.f32.mrf.mxu3 }
 0x846   : > { %v6364_v13 = vpop.f32.mrf.mxu2  ;;  %v18760_v38 = vadd.f32 %v5703_v35, %v18696_v59  ;;  %v6925_v40 = vpop.f32.mrf.mxu0  ;;  %v18772_v59 = vrot.slane %v20528_v63, 1 }
 0x847   : > { %v18762_v62 = vadd.f32 %v6364_v13, %v6140_v54  ;;  %v6141_v54 = vadd.f32 %v18296_v25, %v5953_v28  ;;  %v20982_v25 = vld [vmem:[#allocation88_spill] sm:$0xff] }
 0x848   : > { %7279 = vmatmul.bf16.gmra.mxu1 %v7138_v2  ;;  %v7145_v2 = vrot.slane %v7143_v37, 3  ;;  %v7896_v23 = vsel %vm2574_vm1, %v7891_v55, %v18772_v59 }
 0x84a   : > { %v7146_v63 = vor.u32 %v7145_v2, %v7142_v51  ;;  %v13948_v51 = vld [vmem:[%s20373_s4 + $0x4f0] sm:$0xff]  ;;  %v14632_v2 = vld [vmem:[#allocation2 + $0x64] sm:$0xff] }
 0x84c   : > { %v7147_v55 = vsel %vm5257_vm7, %v7137_v31, %v7146_v63  ;;  %v6290_v31 = vrot.slane %v18326_v24, 1 }
 0x84d   : > { %v6138_v34 = vpop.f32.mrf.mxu1  ;;  %v5705_v35 = vpop.f32.mrf.mxu3 }
 0x84e   : > { %v6366_v13 = vpop.f32.mrf.mxu2  ;;  %v18776_v40 = vadd.f32 %v5705_v35, %v18714_v21  ;;  %v5954_v34 = vadd.f32 %v20980_v53, %v18394_v30  ;;  %v13949_v21 = vld [vmem:[%s20373_s4 + $0x4f8] sm:$0xff] }
 0x84f   : > { %v18778_v52 = vadd.f32 %v6366_v13, %v6141_v54  ;;  %7440 = vmatpush.bf16.msrb.mxu2 %v13949_v21 }
 0x850   : > { %v6142_v15 = vadd.f32 %v18316_v10, %v5954_v34  ;;  %v7152_v10 = vshll.u32 %v14632_v2, 16 }
 0x851   : > { %8033 = vmatmul.bf16.gmra.mxu0 %v7896_v23  ;;  %v7149_v23 = vshrl.u32 %v14632_v2, 16 }
 0x852   : > { %6693 = vmatmul.bf16.gmra.mxu3 %v20981_v60  ;;  %6408 = vmatmul.bf16.gmra.mxu2 %v20982_v25  ;;  %v20983_v60 = vld [vmem:[#allocation78_spill] sm:$0xff] }
 0x853   : > { %v5955_v13 = vadd.f32 %v20983_v60, %v18424_v14  ;;  %7441 = vmatpush.bf16.msrb.mxu2 %v13948_v51  ;;  %v7151_v21 = vrot.slane %v7149_v23, 2  ;;  %v20986_v51 = vld [vmem:[#allocation39_spill] sm:$0xff] }
 0x854   : > { %v5956_v2 = vadd.f32 %v20986_v51, %v18451_v45 }
 0x855   : > { %v18786_v28 = vpop.f32.mrf.mxu1  ;;  %v5708_v37 = vpop.f32.mrf.mxu3  ;;  %v6143_v34 = vadd.f32 %v18345_v56, %v5955_v13  ;;  %v20987_v13 = vld [vmem:[#allocation90_spill] sm:$0xff] }
 0x856   : > { %v6369_v54 = vpop.f32.mrf.mxu2  ;;  %v18793_v30 = vadd.f32 %v5708_v37, %v5532_v12  ;;  %v13947_v12 = vld [vmem:[%s20373_s4 + $0x4e8] sm:$0xff]  ;;  %v6144_v45 = vadd.f32 %v18380_v49, %v5956_v2  ;;  %v5957_v49 = vadd.f32 %v18024_v39, %v18469_v9  ;;  %v13983_v39 = vld [vmem:[%s20373_s4 + $0x5b0] sm:$0xff] }
 0x857   : > { %v18795_v35 = vadd.f32 %v6369_v54, %v6142_v15  ;;  %v7154_v15 = vrot.slane %v7152_v10, 3  ;;  %7442 = vmatpush.bf16.msrb.mxu2 %v13947_v12  ;;  %v20984_v54 = vld [vmem:[#allocation85_spill] sm:$0xff]  ;;  %v6255_v10 = vunpack.c.l.b16 %v6189_v20  ;;  %v18822_v12 = vld [vmem:[#allocation2 + $0x6c] sm:$0xff] }
 0x858   : > { %7284 = vmatmul.bf16.gmra.mxu1 %v7147_v55  ;;  %v20985_v55 = vrot.slane %v20984_v54, 1  ;;  %v13943_v9 = vld [vmem:[%s20373_s4 + $0x4c8] sm:$0xff] }
 0x859   : > { %v7155_v56 = vor.u32 %v7154_v15, %v7151_v21  ;;  %v18834_v20 = vpack.c.b16 %v6255_v10, %v6255_v10  ;;  %v6145_v10 = vadd.f32 %v18411_v7, %v5957_v49  ;;  %v13982_v7 = vld [vmem:[%s20373_s4 + $0x5a8] sm:$0xff]  ;;  %v20990_v49 = vld [vmem:[#allocation92_spill] sm:$0xff] }
 0x85a   : > { %v6291_v60 = vsel %vm2969_vm6, %v20985_v55, %v6290_v31  ;;  %v7161_v55 = vshll.u32 %v18822_v12, 16 }
 0x85b   : > { %7443 = vmatpush.bf16.msrb.mxu2 %v13946_v0  ;;  %v7156_v54 = vsel %vm5257_vm7, %v7146_v63, %v7155_v56  ;;  %v7158_v0 = vshrl.u32 %v18822_v12, 16  ;;  %v13984_v63 = vld [vmem:[%s20373_s4 + $0x5b8] sm:$0xff]  ;;  %v20530_v51 = vrot.slane %v18834_v20, 1 }
 0x85c   : > { %8189 = vmatpush.bf16.msra.mxu1 %v13984_v63  ;;  %v20988_v63 = vld [vmem:[#allocation17_spill] sm:$0xff] }
 0x85d   : > { %v18802_v53 = vpop.f32.mrf.mxu1  ;;  %v5710_v25 = vpop.f32.mrf.mxu3  ;;  %v7160_v2 = vrot.slane %v7158_v0, 2 }
 0x85e   : > { %v6371_v14 = vpop.f32.mrf.mxu2 }
 0x85f   : > { %v18809_v37 = vadd.f32 %v6371_v14, %v6143_v34  ;;  %v13945_v34 = vld [vmem:[%s20373_s4 + $0x4d8] sm:$0xff] }
 0x860   : > { %7444 = vmatpush.bf16.msrb.mxu2 %v13945_v34  ;;  %8190 = vmatpush.bf16.msra.mxu1 %v13983_v39 }
 0x862   : > { %6698 = vmatmul.bf16.gmra.mxu3 %v20987_v13  ;;  %6413 = vmatmul.bf16.gmra.mxu2 %v6291_v60  ;;  %v7163_v13 = vrot.slane %v7161_v55, 3  ;;  %v12449_v55 = vld [vmem:[#allocation2 + $0x74] sm:$0xf] }
 0x864   : > { %v7164_v0 = vor.u32 %v7163_v13, %v7160_v2  ;;  %v6572_v2 = vshrl.u32 %v18326_v24, 16  ;;  %v6575_v13 = vshll.u32 %v18326_v24, 16  ;;  %8191 = vmatpush.bf16.msra.mxu1 %v13982_v7 }
 0x865   : > { %v18820_v23 = vpop.f32.mrf.mxu1  ;;  %v6659_v25 = vpop.f32.mrf.mxu3 }
 0x866   : > { %v6374_v14 = vpop.f32.mrf.mxu2  ;;  %v18830_v21 = vadd.f32 %v6659_v25, %v18762_v62  ;;  %v13944_v62 = vld [vmem:[%s20373_s4 + $0x4d0] sm:$0xff] }
 0x867   : > { %v18832_v15 = vadd.f32 %v6374_v14, %v6144_v45  ;;  %7445 = vmatpush.bf16.msrb.mxu2 %v13944_v62  ;;  %v20989_v62 = vld [vmem:[#allocation40_spill] sm:$0xff] }
 0x868   : > { %7289 = vmatmul.bf16.gmra.mxu1 %v7156_v54  ;;  %v6293_v54 = vsel %vm2969_vm6, %v6290_v31, %v20530_v51  ;;  %v5958_v47 = vadd.f32 %v20989_v62, %v20988_v63  ;;  %v7165_v31 = vsel %vm5257_vm7, %v7155_v56, %v7164_v0 }
 0x86b   : > { %7446 = vmatpush.bf16.msrb.mxu2 %v13943_v9  ;;  %v18878_v9 = vor.u32 %v13933_v48, %v12449_v55  ;;  %v6574_v48 = vrot.slane %v6572_v2, 1  ;;  %v6577_v55 = vrot.slane %v6575_v13, 2 }
 0x86d   : > { %v18846_v60 = vpop.f32.mrf.mxu1  ;;  %v6661_v34 = vpop.f32.mrf.mxu3  ;;  %20991 = vst [vmem:[#allocation49_spill] sm:$0xff] %v18878_v9  ;;  %v7167_v7 = vshrl.u32 %v18878_v9, 16  ;;  %v6578_v2 = vor.u32 %v6577_v55, %v6574_v48  ;;  %v20996_v48 = vld [vmem:[#allocation91_spill] sm:$0xff] }
 0x86e   : > { %v6376_v45 = vpop.f32.mrf.mxu2  ;;  %v18857_v25 = vadd.f32 %v6661_v34, %v18778_v52  ;;  %v13942_v52 = vld [vmem:[%s20373_s4 + $0x4c0] sm:$0xff] }
 0x86f   : > { %v18859_v14 = vadd.f32 %v6376_v45, %v6145_v10  ;;  %7447 = vmatpush.bf16.msrb.mxu2 %v13942_v52  ;;  %v13968_v10 = vld [vmem:[%s20373_s4 + $0x538] sm:$0xff]  ;;  %v13981_v34 = vld [vmem:[%s20373_s4 + $0x5a0] sm:$0xff]  ;;  %v7170_v52 = vshll.u32 %v18878_v9, 16  ;;  %v7169_v13 = vrot.slane %v7167_v7, 2  ;;  %v6579_v55 = vsel %vm3174_vm3, %v20996_v48, %v6578_v2 }
 0x870   : > { %v20992_v45 = vld [vmem:[#allocation27_spill] sm:$0xff]  ;;  %7703 = vmatpush.bf16.msrb.mxu3 %v13968_v10  ;;  %8192 = vmatpush.bf16.msra.mxu1 %v13981_v34  ;;  %v13966_v34 = vld [vmem:[%s20373_s4 + $0x528] sm:$0xff] }
 0x871   : > { %v7172_v10 = vrot.slane %v7170_v52, 3  ;;  %v20997_v52 = vld [vmem:[#allocation29_spill] sm:$0xff] }
 0x872   : > { %6703 = vmatmul.bf16.gmra.mxu3 %v20990_v49  ;;  %6418 = vmatmul.bf16.gmra.mxu2 %v6293_v54  ;;  %v6146_v54 = vadd.f32 %v20992_v45, %v5958_v47  ;;  %v20993_v49 = vld [vmem:[#allocation23_spill] sm:$0xff]  ;;  %v20995_v45 = vld [vmem:[#allocation52_spill] sm:$0xff] }
 0x873   : > { %v5959_v51 = vadd.f32 %v20993_v49, %v18512_v46  ;;  %v13967_v47 = vld [vmem:[%s20373_s4 + $0x530] sm:$0xff]  ;;  %v7173_v7 = vor.u32 %v7172_v10, %v7169_v13  ;;  %v21000_v10 = vld [vmem:[#allocation33_spill] sm:$0xff] }
 0x874   : > { %7704 = vmatpush.bf16.msrb.mxu3 %v13967_v47  ;;  %v13979_v46 = vld [vmem:[%s20373_s4 + $0x590] sm:$0xff] }
 0x875   : > { %v18873_v39 = vpop.f32.mrf.mxu1  ;;  %v6664_v63 = vpop.f32.mrf.mxu3  ;;  %v7174_v13 = vsel %vm5257_vm7, %v7164_v0, %v7173_v7 }
 0x876   : > { %v6379_v56 = vpop.f32.mrf.mxu2  ;;  %v18888_v62 = vadd.f32 %v6664_v63, %v18795_v35  ;;  %v13980_v35 = vld [vmem:[%s20373_s4 + $0x598] sm:$0xff] }
 0x877   : > { %v18890_v24 = vadd.f32 %v6379_v56, %v6146_v54  ;;  %8193 = vmatpush.bf16.msra.mxu1 %v13980_v35  ;;  %v6147_v54 = vadd.f32 %v20995_v45, %v5959_v51  ;;  %v5960_v35 = vadd.f32 %v20997_v52, %v18527_v26  ;;  %v13965_v51 = vld [vmem:[%s20373_s4 + $0x520] sm:$0xff]  ;;  %v20998_v45 = vrot.slane %v18834_v20, 1  ;;  %v21001_v20 = vld [vmem:[#allocation50_spill] sm:$0xff] }
 0x878   : > { %7294 = vmatmul.bf16.gmra.mxu1 %v7165_v31  ;;  %7705 = vmatpush.bf16.msrb.mxu3 %v13966_v34  ;;  %v6584_v26 = vshll.u32 %v21000_v10, 16 }
 0x87b   : > { %8194 = vmatpush.bf16.msra.mxu1 %v13979_v46  ;;  %v6581_v46 = vshrl.u32 %v21000_v10, 16  ;;  %v21002_v10 = vld [vmem:[#allocation100_spill] sm:$0xff] }
 0x87c   : > { %7706 = vmatpush.bf16.msrb.mxu3 %v13965_v51 }
 0x87d   : > { %v18902_v31 = vpop.f32.mrf.mxu1  ;;  %v6666_v63 = vpop.f32.mrf.mxu3  ;;  %v6583_v51 = vrot.slane %v6581_v46, 1  ;;  %v21006_v46 = vld [vmem:[#allocation63_spill] sm:$0xff] }
 0x87e   : > { %20994 = vst [vmem:[#allocation95_spill] sm:$0xff] %v18902_v31  ;;  %v6381_v56 = vpop.f32.mrf.mxu2  ;;  %v18912_v49 = vadd.f32 %v6666_v63, %v18809_v37  ;;  %v13978_v37 = vld [vmem:[%s20373_s4 + $0x588] sm:$0xff]  ;;  %v13977_v63 = vld [vmem:[%s20373_s4 + $0x580] sm:$0xff]  ;;  %v13963_v31 = vld [vmem:[%s20373_s4 + $0x510] sm:$0xff] }
 0x87f   : > { %v18914_v47 = vadd.f32 %v6381_v56, %v6147_v54  ;;  %8195 = vmatpush.bf16.msra.mxu1 %v13978_v37  ;;  %v13964_v54 = vld [vmem:[%s20373_s4 + $0x518] sm:$0xff]  ;;  %v6148_v56 = vadd.f32 %v21001_v20, %v5960_v35  ;;  %v6586_v37 = vrot.slane %v6584_v26, 2 }
 0x880   : > { %7707 = vmatpush.bf16.msrb.mxu3 %v13964_v54 }
 0x881   : > { %v6587_v9 = vor.u32 %v6586_v37, %v6583_v51 }
 0x882   : > { %6708 = vmatmul.bf16.gmra.mxu3 %v6579_v55  ;;  %6423 = vmatmul.bf16.gmra.mxu2 %v20998_v45  ;;  %v7334_v45 = vld [vmem:[#allocation2 + $0x14] sm:$0x8] }
 0x883   : > { %8196 = vmatpush.bf16.msra.mxu1 %v13977_v63  ;;  %v7352_v35 = vunpack.c.l.b16 %v7334_v45  ;;  %v21007_v63 = vld [vmem:[#allocation51_spill] sm:$0xff]  ;;  %v6588_v51 = vsel %vm3174_vm3, %v6578_v2, %v6587_v9 }
 0x884   : > { %7708 = vmatpush.bf16.msrb.mxu3 %v13963_v31  ;;  %v21008_v31 = vld [vmem:[#allocation30_spill] sm:$0xff] }
 0x885   : > { %v18928_v34 = vpop.f32.mrf.mxu1  ;;  %v6669_v48 = vpop.f32.mrf.mxu3 }
 0x886   : > { %20999 = vst [vmem:[#allocation59_spill] sm:$0xff] %v18928_v34  ;;  %v6384_v55 = vpop.f32.mrf.mxu2  ;;  %v18941_v0 = vadd.f32 %v6669_v48, %v18832_v15  ;;  %v5961_v34 = vadd.f32 %v21002_v10, %v18542_v29  ;;  %v21004_v15 = vld [vmem:[#allocation43_spill] sm:$0xff] }
 0x887   : > { %v6436_v52 = vadd.f32 %v6384_v55, %v6148_v56  ;;  %v21005_v48 = vunpack.c.l.b16 %v21004_v15  ;;  %v7355_v55 = vrot.slane %v21007_v63, 3  ;;  %v13961_v15 = vld [vmem:[%s20373_s4 + $0x500] sm:$0xff]  ;;  %v21013_v63 = vld [vmem:[#allocation11_spill] sm:$0xff] }
 0x888   : > { %7299 = vmatmul.bf16.gmra.mxu1 %v7174_v13  ;;  %v13962_v13 = vld [vmem:[%s20373_s4 + $0x508] sm:$0xff]  ;;  %v6149_v26 = vadd.f32 %v21006_v46, %v5961_v34 }
 0x889   : > { %v7353_v56 = vpack.c.b16 %v21005_v48, %v7352_v35  ;;  %7709 = vmatpush.bf16.msrb.mxu3 %v13962_v13  ;;  %v5962_v35 = vadd.f32 %v21008_v31, %v18557_v36  ;;  %v21011_v36 = vld [vmem:[#allocation31_spill] sm:$0xff] }
 0x88b   : > { %v7354_v37 = vrot.slane %v7353_v56, 3 }
 0x88d   : > { %v18948_v20 = vpop.f32.mrf.mxu1  ;;  %v6671_v54 = vpop.f32.mrf.mxu3  ;;  %v7356_v34 = vsel %vm3707_vm4, %v7354_v37, %v7355_v55  ;;  %7710 = vmatpush.bf16.msrb.mxu3 %v13961_v15 }
 0x88e   : > { %21003 = vst [vmem:[#allocation45_spill] sm:$0xff] %v18948_v20  ;;  %v6386_v29 = vpop.f32.mrf.mxu2  ;;  %v18958_v10 = vadd.f32 %v6671_v54, %v18859_v14  ;;  %v21010_v14 = vld [vmem:[#allocation18_spill] sm:$0xff]  ;;  %v5963_v54 = vadd.f32 %v21011_v36, %v18573_v6  ;;  %v21018_v36 = vld [vmem:[#allocation77_spill] sm:$0xff] }
 0x88f   : > { %v6437_v45 = vadd.f32 %v6386_v29, %v6149_v26  ;;  %v6150_v46 = vadd.f32 %v21010_v14, %v5962_v35 }
 0x892   : > { %6713 = vmatmul.bf16.gmra.mxu3 %v6588_v51  ;;  %7448 = vmatmul.bf16.vlgmr.msrb.gmra.mxu2 %v7356_v34  ;;  %v6151_v51 = vadd.f32 %v21013_v63, %v5963_v54  ;;  %v21014_v34 = vld [vmem:[#allocation10_spill] sm:$0xff]  ;;  %v8103_v54 = vrot.slane %v21018_v36, 1  ;;  %v21019_v63 = vld [vmem:[#allocation20_spill] sm:$0xff] }
 0x893   : > { %v7357_v15 = vrot.slane %v21014_v34, 3  ;;  %v21023_v36 = vld [vmem:[#allocation26_spill] sm:$0xff] }
 0x894   : > { %v7359_v20 = vrot.slane %v21023_v36, 3  ;;  %v21030_v36 = vld [vmem:[#allocation70_spill] sm:$0xff] }
 0x895   : > { %v18967_v48 = vpop.f32.mrf.mxu1  ;;  %v6674_v26 = vpop.f32.mrf.mxu3 }
 0x896   : > { %21009 = vst [vmem:[#allocation74_spill] sm:$0xff] %v18967_v48  ;;  %v6389_v2 = vpop.f32.mrf.mxu2  ;;  %v18971_v56 = vadd.f32 %v6674_v26, %v18890_v24  ;;  %v21015_v24 = vld [vmem:[#allocation105_spill] sm:$0xff] }
 0x897   : > { %v6438_v13 = vadd.f32 %v6389_v2, %v6150_v46  ;;  %v5964_v26 = vadd.f32 %v21015_v24, %v18588_v11  ;;  %v18985_v46 = vld [vmem:[#allocation2 + $0x24] sm:$0xff] }
 0x898   : > { %7304 = vmatmul.bf16.gmra.mxu1 %v7173_v7  ;;  %v7358_v7 = vsel %vm3707_vm4, %v7355_v55, %v7357_v15  ;;  %21016 = vst [vmem:[#allocation36_spill] sm:$0xff] %v18985_v46  ;;  %v8104_v6 = vrot.slane %v18985_v46, 1  ;;  %v21020_v55 = vld [vmem:[#allocation106_spill] sm:$0xff] }
 0x899   : > { %v6152_v34 = vadd.f32 %v21019_v63, %v5964_v26  ;;  %v5965_v24 = vadd.f32 %v21020_v55, %v18605_v58 }
 0x89d   : > { %v18975_v29 = vpop.f32.mrf.mxu1  ;;  %v6676_v37 = vpop.f32.mrf.mxu3 }
 0x89e   : > { %21012 = vst [vmem:[#allocation64_spill] sm:$0xff] %v18975_v29  ;;  %v6391_v31 = vpop.f32.mrf.mxu2  ;;  %v18980_v35 = vadd.f32 %v6676_v37, %v18914_v47 }
 0x89f   : > { %v6439_v14 = vadd.f32 %v6391_v31, %v6151_v51  ;;  %v8105_v51 = vsel %vm2969_vm6, %v8103_v54, %v8104_v6  ;;  %v21024_v54 = vld [vmem:[#allocation109_spill] sm:$0xff] }
 0x8a2   : > { %6718 = vmatmul.bf16.gmra.mxu3 %v6587_v9  ;;  %7453 = vmatmul.bf16.gmra.mxu2 %v7358_v7  ;;  %v21022_v9 = vld [vmem:[#allocation15_spill] sm:$0xff] }
 0x8a3   : > { %v6153_v7 = vadd.f32 %v21022_v9, %v5965_v24 }
 0x8a5   : > { %v18988_v2 = vpop.f32.mrf.mxu1  ;;  %v6679_v47 = vpop.f32.mrf.mxu3 }
 0x8a6   : > { %21017 = vst [vmem:[#allocation79_spill] sm:$0xff] %v18988_v2  ;;  %v6394_v37 = vpop.f32.mrf.mxu2  ;;  %v18993_v31 = vadd.f32 %v6679_v47, %v6436_v52  ;;  %v5966_v52 = vadd.f32 %v21024_v54, %v18620_v18  ;;  %v8106_v47 = vrot.slane %v18521_v22, 1  ;;  %v21028_v18 = vld [vmem:[#allocation53_spill] sm:$0xff] }
 0x8a7   : > { %v6440_v11 = vadd.f32 %v6394_v37, %v6152_v34  ;;  %v7360_v34 = vsel %vm3707_vm4, %v7357_v15, %v7359_v20  ;;  %v21025_v37 = vld [vmem:[#allocation14_spill] sm:$0xff]  ;;  %v5967_v15 = vadd.f32 %v21028_v18, %v18636_v17 }
 0x8a8   : > { %8197 = vmatmul.bf16.vlgmr.msra.gmra.mxu1 %v8105_v51  ;;  %v21027_v51 = vld [vmem:[#allocation48_spill] sm:$0xff] }
 0x8a9   : > { %v6154_v55 = vadd.f32 %v21027_v51, %v5966_v52  ;;  %v6155_v54 = vadd.f32 %v21030_v36, %v5967_v15 }
 0x8ad   : > { %v18997_v29 = vpop.f32.mrf.mxu1  ;;  %v6681_v2 = vpop.f32.mrf.mxu3 }
 0x8ae   : > { %21021 = vst [vmem:[#allocation62_spill] sm:$0xff] %v18997_v29  ;;  %v6396_v48 = vpop.f32.mrf.mxu2  ;;  %v19001_v26 = vadd.f32 %v6681_v2, %v6437_v45  ;;  %v8107_v45 = vsel %vm2969_vm6, %v8104_v6, %v8106_v47  ;;  %v21032_v6 = vld [vmem:[#allocation57_spill] sm:$0xff] }
 0x8af   : > { %v6441_v63 = vadd.f32 %v6396_v48, %v6153_v7 }
 0x8b2   : > { %7711 = vmatmul.bf16.vlgmr.msrb.gmra.mxu3 %v21025_v37  ;;  %7458 = vmatmul.bf16.gmra.mxu2 %v7360_v34 }
 0x8b5   : > { %v19008_v58 = vpop.f32.mrf.mxu1  ;;  %v6684_v24 = vpop.f32.mrf.mxu3 }
 0x8b6   : > { %21026 = vst [vmem:[#allocation35_spill] sm:$0xff] %v19008_v58  ;;  %v6399_v9 = vpop.f32.mrf.mxu2  ;;  %v19012_v2 = vadd.f32 %v6684_v24, %v6438_v13  ;;  %v21031_v58 = vld [vmem:[#allocation66_spill] sm:$0xff]  ;;  %v5968_v13 = vadd.f32 %v21032_v6, %v18659_v4  ;;  %v21033_v24 = vld [vmem:[#allocation25_spill] sm:$0xff]  ;;  %v21036_v4 = vld [vmem:[#allocation107_spill] sm:$0xff] }
 0x8b7   : > { %v6442_v48 = vadd.f32 %v6399_v9, %v6154_v55  ;;  %v7361_v29 = vrot.slane %v21031_v58, 3  ;;  %v8108_v9 = vrot.slane %v21033_v24, 1 }
 0x8b8   : > { %8202 = vmatmul.bf16.gmra.mxu1 %v8107_v45  ;;  %v21035_v45 = vld [vmem:[#allocation69_spill] sm:$0xff] }
 0x8b9   : > { %v7362_v55 = vsel %vm3707_vm4, %v7359_v20, %v7361_v29  ;;  %v6156_v18 = vadd.f32 %v21035_v45, %v5968_v13  ;;  %v5969_v20 = vadd.f32 %v21036_v4, %v18676_v50  ;;  %v21038_v45 = vld [vmem:[#allocation108_spill] sm:$0xff] }
 0x8bd   : > { %v19016_v7 = vpop.f32.mrf.mxu1  ;;  %v6686_v34 = vpop.f32.mrf.mxu3 }
 0x8be   : > { %21029 = vst [vmem:[#allocation80_spill] sm:$0xff] %v19016_v7  ;;  %v6401_v37 = vpop.f32.mrf.mxu2  ;;  %v19020_v52 = vadd.f32 %v6686_v34, %v6439_v14  ;;  %v8109_v14 = vsel %vm2969_vm6, %v8106_v47, %v8108_v9  ;;  %v5970_v7 = vadd.f32 %v21038_v45, %v18694_v41  ;;  %v21039_v47 = vld [vmem:[#allocation93_spill] sm:$0xff] }
 0x8bf   : > { %v6443_v51 = vadd.f32 %v6401_v37, %v6155_v54  ;;  %v21037_v37 = vld [vmem:[#allocation19_spill] sm:$0xff] }
 0x8c0   : > { %v6157_v6 = vadd.f32 %v21037_v37, %v5969_v20 }
 0x8c2   : > { %7716 = vmatmul.bf16.gmra.mxu3 %v18985_v46  ;;  %7463 = vmatmul.bf16.gmra.mxu2 %v7362_v55 }
 0x8c5   : > { %v19027_v17 = vpop.f32.mrf.mxu1  ;;  %v6689_v15 = vpop.f32.mrf.mxu3 }
 0x8c6   : > { %21034 = vst [vmem:[#allocation84_spill] sm:$0xff] %v19027_v17  ;;  %v6404_v36 = vpop.f32.mrf.mxu2  ;;  %v19031_v58 = vadd.f32 %v6689_v15, %v6440_v11  ;;  %v21040_v11 = vrot.slane %v21039_v47, 3  ;;  %v19045_v15 = vld [vmem:[#allocation2 + $0x3c] sm:$0xff] }
 0x8c7   : > { %v6444_v54 = vadd.f32 %v6404_v36, %v6156_v18  ;;  %v8110_v50 = vrot.slane %v19045_v15, 1 }
 0x8c8   : > { %8207 = vmatmul.bf16.gmra.mxu1 %v8109_v14  ;;  %v7364_v18 = vsel %vm3707_vm4, %v7361_v29, %v21040_v11  ;;  %v21041_v29 = vld [vmem:[#allocation34_spill] sm:$0xff] }
 0x8c9   : > { %v8111_v4 = vsel %vm2969_vm6, %v8108_v9, %v8110_v50  ;;  %v5971_v37 = vadd.f32 %v21041_v29, %v18712_v8  ;;  %v19064_v9 = vld [vmem:[#allocation2 + $0x44] sm:$0xff] }
 0x8cd   : > { %v19035_v34 = vpop.f32.mrf.mxu1  ;;  %v6691_v55 = vpop.f32.mrf.mxu3 }
 0x8ce   : > { %v6406_v46 = vpop.f32.mrf.mxu2  ;;  %v19038_v17 = vadd.f32 %v6691_v55, %v6441_v63  ;;  %v6158_v63 = vadd.f32 %v18650_v42, %v5970_v7  ;;  %v6159_v55 = vadd.f32 %v18668_v32, %v5971_v37  ;;  %v21042_v7 = vld [vmem:[#allocation58_spill] sm:$0xff] }
 0x8cf   : > { %v6445_v13 = vadd.f32 %v6406_v46, %v6157_v6 }
 0x8d2   : > { %7721 = vmatmul.bf16.gmra.mxu3 %v18521_v22  ;;  %7468 = vmatmul.bf16.gmra.mxu2 %v7364_v18  ;;  %v5972_v18 = vadd.f32 %v21042_v7, %v18731_v3  ;;  %v21045_v3 = vld [vmem:[#allocation110_spill] sm:$0xff] }
 0x8d3   : > { %v5973_v37 = vadd.f32 %v21045_v3, %v18744_v27 }
 0x8d4   : > { %v6160_v32 = vadd.f32 %v18687_v33, %v5972_v18  ;;  %v21046_v18 = vld [vmem:[#allocation44_spill] sm:$0xff] }
 0x8d5   : > { %v19049_v36 = vpop.f32.mrf.mxu1  ;;  %v6694_v14 = vpop.f32.mrf.mxu3 }
 0x8d6   : > { %v6409_v46 = vpop.f32.mrf.mxu2  ;;  %v19053_v41 = vadd.f32 %v6694_v14, %v6442_v48  ;;  %v8112_v48 = vrot.slane %v19064_v9, 1 }
 0x8d7   : > { %v6446_v20 = vadd.f32 %v6409_v46, %v6158_v63  ;;  %v21043_v63 = vld [vmem:[#allocation96_spill] sm:$0xff] }
 0x8d8   : > { %8212 = vmatmul.bf16.gmra.mxu1 %v8111_v4 }
 0x8dd   : > { %v19057_v6 = vpop.f32.mrf.mxu1  ;;  %v6696_v45 = vpop.f32.mrf.mxu3 }
 0x8de   : > { %v6411_v47 = vpop.f32.mrf.mxu2  ;;  %v19060_v11 = vadd.f32 %v6696_v45, %v6443_v51  ;;  %v8113_v51 = vsel %vm2969_vm6, %v8110_v50, %v8112_v48  ;;  %v6161_v45 = vadd.f32 %v18703_v43, %v5973_v37  ;;  %v21047_v50 = vld [vmem:[#allocation99_spill] sm:$0xff]  ;;  %v19095_v37 = vpop.f32.mrf.mxu0 }
 0x8df   : > { %v6447_v42 = vadd.f32 %v6411_v47, %v6159_v55  ;;  %21049 = vst [vmem:[#allocation82_spill] sm:$0xff] %v19095_v37 }
 0x8e2   : > { %7726 = vmatmul.bf16.gmra.mxu3 %v21033_v24  ;;  %7473 = vmatmul.bf16.gmra.mxu2 %v21043_v63 }
 0x8e5   : > { %v19069_v8 = vpop.f32.mrf.mxu1  ;;  %v6699_v14 = vpop.f32.mrf.mxu3 }
 0x8e6   : > { %21044 = vst [vmem:[#allocation72_spill] sm:$0xff] %v19069_v8  ;;  %v6414_v46 = vpop.f32.mrf.mxu2  ;;  %v19073_v4 = vadd.f32 %v6699_v14, %v6444_v54  ;;  %v5974_v8 = vadd.f32 %v21046_v18, %v18760_v38  ;;  %v8114_v54 = vrot.slane %v18652_v1, 1  ;;  %v21048_v38 = vld [vmem:[#allocation60_spill] sm:$0xff] }
 0x8e7   : > { %v6448_v29 = vadd.f32 %v6414_v46, %v6160_v32  ;;  %v5975_v3 = vadd.f32 %v21048_v38, %v18776_v40 }
 0x8e8   : > { %8217 = vmatmul.bf16.gmra.mxu1 %v8113_v51  ;;  %v6162_v27 = vadd.f32 %v18724_v5, %v5974_v8  ;;  %v8115_v46 = vsel %vm2969_vm6, %v8112_v48, %v8114_v54  ;;  %v21050_v48 = vld [vmem:[#allocation61_spill] sm:$0xff] }
 0x8ed   : > { %v19077_v55 = vpop.f32.mrf.mxu1  ;;  %v6701_v47 = vpop.f32.mrf.mxu3 }
 0x8ee   : > { %v6416_v7 = vpop.f32.mrf.mxu2  ;;  %v19080_v63 = vadd.f32 %v6701_v47, %v6445_v13  ;;  %v6163_v47 = vadd.f32 %v18736_v44, %v5975_v3 }
 0x8ef   : > { %v6449_v33 = vadd.f32 %v6416_v7, %v6161_v45 }
 0x8f2   : > { %7731 = vmatmul.bf16.gmra.mxu3 %v19045_v15  ;;  %7478 = vmatmul.bf16.gmra.mxu2 %v21047_v50  ;;  %v8116_v50 = vrot.slane %v18689_v61, 1 }
 0x8f5   : > { %v19087_v32 = vpop.f32.mrf.mxu1  ;;  %v6704_v14 = vpop.f32.mrf.mxu3 }
 0x8f6   : > { %v6419_v43 = vpop.f32.mrf.mxu2  ;;  %v19091_v13 = vadd.f32 %v6704_v14, %v6446_v20  ;;  %v5976_v20 = vadd.f32 %v21050_v48, %v18793_v30  ;;  %v19109_v14 = vpop.f32.mrf.mxu0 }
 0x8f7   : > { %v6450_v51 = vadd.f32 %v6419_v43, %v6162_v27  ;;  %v21051_v27 = vld [vmem:[#allocation101_spill] sm:$0xff]  ;;  %21052 = vst [vmem:[#allocation87_spill] sm:$0xff] %v19109_v14 }
 0x8f8   : > { %8222 = vmatmul.bf16.gmra.mxu1 %v8115_v46  ;;  %v6164_v44 = vadd.f32 %v18753_v19, %v5976_v20  ;;  %v8118_v19 = vrot.slane %v18726_v16, 1 }
 0x8fd   : > { %v19097_v45 = vpop.f32.mrf.mxu1  ;;  %v6706_v7 = vpop.f32.mrf.mxu3 }
 0x8fe   : > { %v6421_v18 = vpop.f32.mrf.mxu2  ;;  %v19100_v5 = vadd.f32 %v6706_v7, %v6447_v42  ;;  %v8117_v42 = vsel %vm2969_vm6, %v8114_v54, %v8116_v50  ;;  %v21055_v54 = vld [vmem:[#allocation103_spill] sm:$0xff] }
 0x8ff   : > { %v6451_v8 = vadd.f32 %v6421_v18, %v6163_v47  ;;  %v19117_v18 = vpop.f32.mrf.mxu0 }
 0x900   : > { %21053 = vst [vmem:[#allocation76_spill] sm:$0xff] %v19117_v18 }
 0x902   : > { %7736 = vmatmul.bf16.gmra.mxu3 %v19064_v9  ;;  %7483 = vmatmul.bf16.gmra.mxu2 %v21051_v27  ;;  %v21054_v27 = vld [vmem:[#allocation111_spill] sm:$0xff] }
 0x903   : > { %v6927_v14 = vadd.f32 %v21054_v27, %v18830_v21  ;;  %v21058_v21 = vld [vmem:[#allocation55_spill] sm:$0xff] }
 0x905   : > { %v19107_v40 = vpop.f32.mrf.mxu1  ;;  %v6709_v43 = vpop.f32.mrf.mxu3  ;;  %v7309_v20 = vadd.f32 %v18786_v28, %v6927_v14  ;;  %v8120_v14 = vrot.slane %v18757_v57, 1 }
 0x906   : > { %v6424_v46 = vpop.f32.mrf.mxu2  ;;  %v19113_v38 = vadd.f32 %v6709_v43, %v6448_v29 }
 0x907   : > { %v6452_v3 = vadd.f32 %v6424_v46, %v6164_v44  ;;  %v8119_v46 = vsel %vm2969_vm6, %v8116_v50, %v8118_v19  ;;  %v21059_v50 = vld [vmem:[#allocation32_spill] sm:$0xff] }
 0x908   : > { %8227 = vmatmul.bf16.gmra.mxu1 %v8117_v42 }
 0x90d   : > { %v19115_v30 = vpop.f32.mrf.mxu1  ;;  %v6711_v47 = vpop.f32.mrf.mxu3 }
 0x90e   : > { %v6426_v7 = vpop.f32.mrf.mxu2  ;;  %v19119_v48 = vadd.f32 %v6711_v47, %v6449_v33  ;;  %v19132_v47 = vpop.f32.mrf.mxu0 }
 0x90f   : > { %21057 = vst [vmem:[#allocation86_spill] sm:$0xff] %v19132_v47  ;;  %v6928_v7 = vadd.f32 %v21058_v21, %v18857_v25  ;;  %v21062_v21 = vld [vmem:[#allocation112_spill] sm:$0xff] }
 0x910   : > { %v21066_v47 = vld [vmem:[#allocation56_spill] sm:$0xff] }
 0x912   : > { %7741 = vmatmul.bf16.gmra.mxu3 %v18652_v1  ;;  %7488 = vmatmul.bf16.gmra.mxu2 %v21055_v54  ;;  %v7310_v54 = vadd.f32 %v18802_v53, %v6928_v7  ;;  %v13992_v53 = vld [vmem:[%s20373_s4 + $0x5f8] sm:$0xff]  ;;  %v6930_v7 = vadd.f32 %v21062_v21, %v18912_v49  ;;  %v13990_v49 = vld [vmem:[%s20373_s4 + $0x5e8] sm:$0xff] }
 0x913   : > { %8429 = vmatpush.bf16.msra.mxu2 %v13992_v53  ;;  %v21064_v21 = vld [vmem:[#allocation102_spill] sm:$0xff] }
 0x914   : > { %v7312_v53 = vadd.f32 %v18846_v60, %v6930_v7  ;;  %v6931_v60 = vadd.f32 %v21066_v47, %v18941_v0  ;;  %v13989_v7 = vld [vmem:[%s20373_s4 + $0x5e0] sm:$0xff] }
 0x915   : > { %v19126_v29 = vpop.f32.mrf.mxu1  ;;  %v6714_v44 = vpop.f32.mrf.mxu3 }
 0x916   : > { %21056 = vst [vmem:[#allocation38_spill] sm:$0xff] %v19126_v29  ;;  %v7449_v43 = vpop.f32.mrf.mxu2  ;;  %v19130_v42 = vadd.f32 %v6714_v44, %v6450_v51  ;;  %v6929_v51 = vadd.f32 %v21059_v50, %v18888_v62  ;;  %v21061_v44 = vld [vmem:[#allocation104_spill] sm:$0xff]  ;;  %v8121_v62 = vsel %vm2969_vm6, %v8118_v19, %v8120_v14 }
 0x917   : > { %v7513_v33 = vadd.f32 %v7449_v43, %v7309_v20  ;;  %v19144_v20 = vpop.f32.mrf.mxu0 }
 0x918   : > { %8232 = vmatmul.bf16.gmra.mxu1 %v8119_v46  ;;  %21060 = vst [vmem:[#allocation88_spill] sm:$0xff] %v19144_v20 }
 0x91d   : > { %v7307_v27 = vpop.f32.mrf.mxu1  ;;  %v6716_v18 = vpop.f32.mrf.mxu3 }
 0x91e   : > { %v7451_v37 = vpop.f32.mrf.mxu2  ;;  %v19137_v29 = vadd.f32 %v6716_v18, %v6451_v8  ;;  %v13991_v27 = vld [vmem:[%s20373_s4 + $0x5f0] sm:$0xff] }
 0x91f   : > { %v19139_v28 = vadd.f32 %v7451_v37, %v7310_v54  ;;  %v7311_v37 = vadd.f32 %v18820_v23, %v6929_v51  ;;  %v19164_v54 = vld [vmem:[#allocation2 + $0x6c] sm:$0xff]  ;;  %v20533_v23 = vshrl.u32 %v18757_v57, 16  ;;  %8430 = vmatpush.bf16.msra.mxu2 %v13991_v27  ;;  %v7375_v51 = vrot.slane %v18822_v12, 3 }
 0x920   : > { %v20534_v19 = vshll.u32 %v19164_v54, 16  ;;  %v21065_v12 = vrot.slane %v21064_v21, 3 }
 0x922   : > { %7746 = vmatmul.bf16.gmra.mxu3 %v18689_v61  ;;  %7493 = vmatmul.bf16.gmra.mxu2 %v21061_v44  ;;  %v19177_v44 = vpop.f32.mrf.mxu0  ;;  %v7376_v27 = vsel %vm3707_vm4, %v21065_v12, %v7375_v51  ;;  %v21068_v12 = vld [vmem:[#allocation54_spill] sm:$0xff] }
 0x923   : > { %21063 = vst [vmem:[#allocation78_spill] sm:$0xff] %v19177_v44  ;;  %8431 = vmatpush.bf16.msra.mxu2 %v13990_v49  ;;  %v13988_v49 = vld [vmem:[%s20373_s4 + $0x5d8] sm:$0xff] }
 0x925   : > { %v19148_v25 = vpop.f32.mrf.mxu1  ;;  %v6719_v8 = vpop.f32.mrf.mxu3 }
 0x926   : > { %v7454_v18 = vpop.f32.mrf.mxu2  ;;  %v19155_v43 = vadd.f32 %v6719_v8, %v6452_v3  ;;  %v7899_v3 = vor.u32 %v20533_v23, %v18772_v59  ;;  %v8122_v23 = vrot.slane %v19164_v54, 1 }
 0x927   : > { %v19157_v46 = vadd.f32 %v7454_v18, %v7311_v37  ;;  %v7903_v37 = vrot.slane %v20534_v19, 1  ;;  %8432 = vmatpush.bf16.msra.mxu2 %v13989_v7  ;;  %v19213_v7 = vld [vmem:[#allocation2 + $0x74] sm:$0xff] }
 0x928   : > { %8237 = vmatmul.bf16.gmra.mxu1 %v8121_v62 }
 0x929   : > { %v7904_v62 = vsel %vm2574_vm1, %v7899_v3, %v7903_v37  ;;  %v8123_v3 = vsel %vm2969_vm6, %v8120_v14, %v8122_v23  ;;  %v6932_v14 = vadd.f32 %v21068_v12, %v18958_v10  ;;  %v13986_v10 = vld [vmem:[%s20373_s4 + $0x5c8] sm:$0xff] }
 0x92a   : > { %8038 = vmatmul.bf16.gmra.mxu0 %v7904_v62  ;;  %v19202_v47 = vpop.f32.mrf.mxu0 }
 0x92b   : > { %21067 = vst [vmem:[#allocation85_spill] sm:$0xff] %v19202_v47  ;;  %8433 = vmatpush.bf16.msra.mxu2 %v13988_v49 }
 0x92d   : > { %v19171_v50 = vpop.f32.mrf.mxu1  ;;  %v6721_v8 = vpop.f32.mrf.mxu3 }
 0x92e   : > { %v7456_v18 = vpop.f32.mrf.mxu2  ;;  %v7313_v8 = vadd.f32 %v18873_v39, %v6931_v60  ;;  %v20535_v39 = vshrl.u32 %v19164_v54, 16 }
 0x92f   : > { %v19182_v59 = vadd.f32 %v7456_v18, %v7312_v53 }
 0x930   : > { %v7907_v60 = vor.u32 %v20535_v39, %v7903_v37 }
 0x932   : > { %7751 = vmatmul.bf16.gmra.mxu3 %v18726_v16  ;;  %7498 = vmatmul.bf16.gmra.mxu2 %v7376_v27  ;;  %v13987_v27 = vld [vmem:[%s20373_s4 + $0x5d0] sm:$0xff]  ;;  %v19236_v47 = vpop.f32.mrf.mxu0 }
 0x933   : > { %8434 = vmatpush.bf16.msra.mxu2 %v13987_v27  ;;  %21072 = vst [vmem:[#allocation90_spill] sm:$0xff] %v19236_v47 }
 0x935   : > { %v19195_v53 = vpop.f32.mrf.mxu1  ;;  %v7712_v18 = vpop.f32.mrf.mxu3 }
 0x936   : > { %v7459_v0 = vpop.f32.mrf.mxu2  ;;  %v19204_v62 = vadd.f32 %v7712_v18, %v7513_v33  ;;  %v20536_v33 = vshll.u32 %v19213_v7, 16  ;;  %v21071_v18 = vld [vmem:[#allocation95_spill] sm:$0xff] }
 0x937   : > { %v19206_v21 = vadd.f32 %v7459_v0, %v7313_v8  ;;  %v7314_v0 = vadd.f32 %v21071_v18, %v6932_v14  ;;  %8435 = vmatpush.bf16.msra.mxu2 %v13986_v10  ;;  %v21073_v14 = vld [vmem:[#allocation46_spill] sm:$0xff] }
 0x938   : > { %8242 = vmatmul.bf16.gmra.mxu1 %v8123_v3  ;;  %v21070_v3 = vld [vmem:[#allocation49_spill] sm:$0xff]  ;;  %v7911_v12 = vrot.slane %v20536_v33, 1  ;;  %v6933_v18 = vadd.f32 %v21073_v14, %v18971_v56 }
 0x939   : > { %v7377_v49 = vrot.slane %v21070_v3, 3  ;;  %v8124_v3 = vrot.slane %v19213_v7, 1 }
 0x93b   : > { %v7378_v27 = vsel %vm3707_vm4, %v7375_v51, %v7377_v49  ;;  %v8125_v51 = vsel %vm2969_vm6, %v8122_v23, %v8124_v3  ;;  %v13999_v23 = vld [vmem:[%s20373_s4 + $0x630] sm:$0xff] }
 0x93d   : > { %v19219_v8 = vpop.f32.mrf.mxu1  ;;  %v7714_v19 = vpop.f32.mrf.mxu3 }
 0x93e   : > { %21069 = vst [vmem:[#allocation39_spill] sm:$0xff] %v19219_v8  ;;  %v7461_v44 = vpop.f32.mrf.mxu2  ;;  %v19229_v37 = vadd.f32 %v7714_v19, %v19139_v28  ;;  %v7912_v8 = vsel %vm2574_vm1, %v7907_v60, %v7911_v12  ;;  %v13985_v28 = vld [vmem:[%s20373_s4 + $0x5c0] sm:$0xff]  ;;  %v21075_v60 = vld [vmem:[#allocation59_spill] sm:$0xff] }
 0x93f   : > { %v19231_v39 = vadd.f32 %v7461_v44, %v7314_v0  ;;  %8043 = vmatmul.bf16.gmra.mxu0 %v7912_v8  ;;  %8436 = vmatpush.bf16.msra.mxu2 %v13985_v28  ;;  %v14000_v44 = vld [vmem:[%s20373_s4 + $0x638] sm:$0xff]  ;;  %v7315_v8 = vadd.f32 %v21075_v60, %v6933_v18  ;;  %v20537_v18 = vshrl.u32 %v19213_v7, 16  ;;  %v19262_v60 = vpop.f32.mrf.mxu0 }
 0x940   : > { %8633 = vmatpush.bf16.msra.mxu3 %v14000_v44  ;;  %v7801_v28 = vld [vmem:[#allocation2 + $0x7c] sm:$0x7]  ;;  %21077 = vst [vmem:[#allocation40_spill] sm:$0xff] %v19262_v60 }
 0x941   : > { %v7819_v47 = vunpack.c.l.b16 %v7801_v28 }
 0x942   : > { %7756 = vmatmul.bf16.gmra.mxu3 %v18757_v57  ;;  %7503 = vmatmul.bf16.gmra.mxu2 %v7378_v27  ;;  %v21076_v27 = vld [vmem:[#allocation37_spill] sm:$0xff] }
 0x943   : > { %v6934_v33 = vadd.f32 %v21076_v27, %v18980_v35  ;;  %v7915_v27 = vor.u32 %v20537_v18, %v7911_v12 }
 0x944   : > { %8634 = vmatpush.bf16.msra.mxu3 %v13999_v23 }
 0x945   : > { %v19244_v19 = vpop.f32.mrf.mxu1  ;;  %v7717_v10 = vpop.f32.mrf.mxu3 }
 0x946   : > { %21074 = vst [vmem:[#allocation17_spill] sm:$0xff] %v19244_v19  ;;  %v7464_v56 = vpop.f32.mrf.mxu2  ;;  %v19252_v0 = vadd.f32 %v7717_v10, %v19157_v46  ;;  %v7820_v46 = vpack.c.b16 %v7819_v47, %v7819_v47  ;;  %v21081_v47 = vld [vmem:[#allocation28_spill] sm:$0xff] }
 0x947   : > { %v19254_v14 = vadd.f32 %v7464_v56, %v7315_v8  ;;  %v21079_v8 = vld [vmem:[#allocation45_spill] sm:$0xff]  ;;  %v6935_v20 = vadd.f32 %v21081_v47, %v18993_v31  ;;  %v19288_v31 = vpop.f32.mrf.mxu0  ;;  %v21084_v47 = vld [vmem:[#allocation16_spill] sm:$0xff] }
 0x948   : > { %8247 = vmatmul.bf16.gmra.mxu1 %v8125_v51  ;;  %v13998_v51 = vld [vmem:[%s20373_s4 + $0x628] sm:$0xff]  ;;  %v7316_v35 = vadd.f32 %v21079_v8, %v6934_v33  ;;  %v7917_v28 = vshll.u32 %v7820_v46, 16  ;;  %v13997_v33 = vld [vmem:[%s20373_s4 + $0x620] sm:$0xff]  ;;  %21082 = vst [vmem:[#allocation23_spill] sm:$0xff] %v19288_v31  ;;  %v7921_v18 = vshrl.u32 %v7820_v46, 16 }
 0x949   : > { %8635 = vmatpush.bf16.msra.mxu3 %v13998_v51  ;;  %v13996_v51 = vld [vmem:[%s20373_s4 + $0x618] sm:$0xff] }
 0x94a   : > { %v7919_v23 = vrot.slane %v7917_v28, 1 }
 0x94c   : > { %v7920_v8 = vsel %vm2574_vm1, %v7915_v27, %v7919_v23 }
 0x94d   : > { %v19264_v44 = vpop.f32.mrf.mxu1  ;;  %v7719_v10 = vpop.f32.mrf.mxu3  ;;  %8636 = vmatpush.bf16.msra.mxu3 %v13997_v33  ;;  %v13995_v33 = vld [vmem:[%s20373_s4 + $0x610] sm:$0xff] }
 0x94e   : > { %21078 = vst [vmem:[#allocation92_spill] sm:$0xff] %v19264_v44  ;;  %v7466_v56 = vpop.f32.mrf.mxu2  ;;  %v19273_v19 = vadd.f32 %v7719_v10, %v19182_v59  ;;  %v8126_v44 = vrot.slane %v7820_v46, 1  ;;  %v13993_v46 = vld [vmem:[%s20373_s4 + $0x600] sm:$0xff] }
 0x94f   : > { %v7520_v60 = vadd.f32 %v7466_v56, %v7316_v35  ;;  %8048 = vmatmul.bf16.gmra.mxu0 %v7920_v8  ;;  %v21083_v35 = vld [vmem:[#allocation74_spill] sm:$0xff] }
 0x950   : > { %21080 = vst [vmem:[#allocation27_spill] sm:$0xff] %v19273_v19  ;;  %v8127_v59 = vsel %vm2969_vm6, %v8124_v3, %v8126_v44  ;;  %v7317_v10 = vadd.f32 %v21083_v35, %v6935_v20  ;;  %v6936_v3 = vadd.f32 %v21084_v47, %v19001_v26  ;;  %v13994_v20 = vld [vmem:[%s20373_s4 + $0x608] sm:$0xff] }
 0x951   : > { %8637 = vmatpush.bf16.msra.mxu3 %v13996_v51  ;;  %v19305_v51 = vpop.f32.mrf.mxu0  ;;  %v21089_v47 = vld [vmem:[#allocation9_spill] sm:$0xff] }
 0x952   : > { %7761 = vmatmul.bf16.gmra.mxu3 %v19164_v54  ;;  %7508 = vmatmul.bf16.gmra.mxu2 %v7377_v49  ;;  %21087 = vst [vmem:[#allocation91_spill] sm:$0xff] %v19305_v51  ;;  %v21100_v51 = vld [vmem:[#allocation81_spill] sm:$0xff] }
 0x955   : > { %v19282_v12 = vpop.f32.mrf.mxu1  ;;  %v7722_v56 = vpop.f32.mrf.mxu3  ;;  %8638 = vmatpush.bf16.msra.mxu3 %v13995_v33  ;;  %v6937_v33 = vadd.f32 %v21089_v47, %v19012_v2  ;;  %v21093_v47 = vld [vmem:[#allocation24_spill] sm:$0xff] }
 0x956   : > { %v7469_v28 = vpop.f32.mrf.mxu2  ;;  %v19292_v27 = vadd.f32 %v7722_v56, %v19206_v21  ;;  %v21086_v21 = vld [vmem:[#allocation64_spill] sm:$0xff]  ;;  %v6938_v19 = vadd.f32 %v21093_v47, %v19020_v52  ;;  %v21099_v52 = vld [vmem:[#allocation22_spill] sm:$0xff] }
 0x957   : > { %v7521_v49 = vadd.f32 %v7469_v28, %v7317_v10  ;;  %v7318_v35 = vadd.f32 %v21086_v21, %v6936_v3  ;;  %v7923_v28 = vor.u32 %v7921_v18, %v7919_v23  ;;  %v21090_v3 = vld [vmem:[#allocation83_spill] sm:$0xff]  ;;  %v6939_v47 = vadd.f32 %v21099_v52, %v19031_v58 }
 0x958   : > { %8252 = vmatmul.bf16.gmra.mxu1 %v8127_v59 }
 0x959   : > { %8639 = vmatpush.bf16.msra.mxu3 %v13994_v20  ;;  %v7562_v20 = vld [vmem:[#allocation2 + $0x7c] sm:$0x3] }
 0x95d   : > { %v19299_v8 = vpop.f32.mrf.mxu1  ;;  %v7724_v10 = vpop.f32.mrf.mxu3  ;;  %8640 = vmatpush.bf16.msra.mxu3 %v13993_v46 }
 0x95e   : > { %21085 = vst [vmem:[#allocation52_spill] sm:$0xff] %v19299_v8  ;;  %v7471_v59 = vpop.f32.mrf.mxu2  ;;  %v19308_v26 = vadd.f32 %v7724_v10, %v19231_v39  ;;  %v21091_v39 = vld [vmem:[#allocation79_spill] sm:$0xff] }
 0x95f   : > { %v7522_v56 = vadd.f32 %v7471_v59, %v7318_v35  ;;  %8053 = vmatmul.bf16.gmra.mxu0 %v7923_v28  ;;  %v7319_v10 = vadd.f32 %v21091_v39, %v6937_v33  ;;  %v19323_v59 = vpop.f32.mrf.mxu0  ;;  %v21095_v28 = vshll.u32 %v18521_v22, 16  ;;  %v7628_v33 = vunpack.c.l.b16 %v7562_v20 }
 0x960   : > { %21088 = vst [vmem:[#allocation29_spill] sm:$0xff] %v19308_v26  ;;  %v21097_v26 = vld [vmem:[#allocation62_spill] sm:$0xff] }
 0x961   : > { %21092 = vst [vmem:[#allocation33_spill] sm:$0xff] %v19323_v59  ;;  %v8320_v46 = vrot.slane %v21095_v28, 2  ;;  %v7641_v31 = vpack.c.b16 %v7628_v33, %v7628_v33  ;;  %v8527_v33 = vld [vmem:[#allocation2 + $0x1c] sm:$0xc] }
 0x962   : > { %7766 = vmatmul.bf16.gmra.mxu3 %v19213_v7  ;;  %8437 = vmatmul.bf16.vlgmr.msra.gmra.mxu2 %v21090_v3  ;;  %v21094_v3 = vshrl.u32 %v18521_v22, 16 }
 0x964   : > { %v8319_v8 = vrot.slane %v21094_v3, 1 }
 0x965   : > { %v19317_v21 = vpop.f32.mrf.mxu1  ;;  %v7727_v35 = vpop.f32.mrf.mxu3 }
 0x966   : > { %v7474_v18 = vpop.f32.mrf.mxu2  ;;  %v19321_v23 = vadd.f32 %v7727_v35, %v19254_v14  ;;  %v7320_v14 = vadd.f32 %v21097_v26, %v6938_v19  ;;  %v21102_v19 = vld [vmem:[#allocation35_spill] sm:$0xff] }
 0x967   : > { %v7523_v2 = vadd.f32 %v7474_v18, %v7319_v10  ;;  %v19340_v22 = vpop.f32.mrf.mxu0  ;;  %v7321_v26 = vadd.f32 %v21102_v19, %v6939_v47 }
 0x968   : > { %8257 = vmatmul.bf16.gmra.mxu1 %v8126_v44  ;;  %v8321_v44 = vor.u32 %v8320_v46, %v8319_v8  ;;  %21101 = vst [vmem:[#allocation43_spill] sm:$0xff] %v19340_v22  ;;  %v21110_v22 = vld [vmem:[#allocation36_spill] sm:$0xff] }
 0x96a   : > { %v8322_v3 = vsel %vm3174_vm3, %v21100_v51, %v8321_v44  ;;  %v21104_v51 = vshrl.u32 %v21033_v24, 16 }
 0x96d   : > { %v19331_v39 = vpop.f32.mrf.mxu1  ;;  %v7729_v35 = vpop.f32.mrf.mxu3 }
 0x96e   : > { %21096 = vst [vmem:[#allocation50_spill] sm:$0xff] %v19331_v39  ;;  %v7476_v10 = vpop.f32.mrf.mxu2  ;;  %v19334_v18 = vadd.f32 %v7729_v35, %v7520_v60  ;;  %v8545_v35 = vunpack.c.l.b16 %v8527_v33  ;;  %v8548_v39 = vrot.slane %v21110_v22, 2 }
 0x96f   : > { %v7524_v59 = vadd.f32 %v7476_v10, %v7320_v14  ;;  %v21103_v14 = vld [vmem:[#allocation47_spill] sm:$0xff]  ;;  %v8323_v10 = vrot.slane %v21104_v51, 1  ;;  %v19356_v19 = vpop.f32.mrf.mxu0 }
 0x970   : > { %21098 = vst [vmem:[#allocation100_spill] sm:$0xff] %v19334_v18  ;;  %v6940_v58 = vadd.f32 %v21103_v14, %v19038_v17  ;;  %v21107_v18 = vld [vmem:[#allocation75_spill] sm:$0xff] }
 0x971   : > { %v8546_v47 = vpack.c.b16 %v21107_v18, %v8545_v35  ;;  %21108 = vst [vmem:[#allocation51_spill] sm:$0xff] %v19356_v19 }
 0x972   : > { %7771 = vmatmul.bf16.gmra.mxu3 %v7641_v31  ;;  %8442 = vmatmul.bf16.gmra.mxu2 %v8322_v3  ;;  %v21105_v31 = vshll.u32 %v21033_v24, 16  ;;  %v21111_v24 = vld [vmem:[#allocation65_spill] sm:$0xff] }
 0x973   : > { %v8547_v51 = vrot.slane %v8546_v47, 2  ;;  %v21114_v47 = vld [vmem:[#allocation67_spill] sm:$0xff] }
 0x974   : > { %v8324_v52 = vrot.slane %v21105_v31, 2  ;;  %v6941_v31 = vadd.f32 %v21111_v24, %v19053_v41  ;;  %v6942_v41 = vadd.f32 %v21114_v47, %v19060_v11 }
 0x975   : > { %v19342_v20 = vpop.f32.mrf.mxu1  ;;  %v7732_v28 = vpop.f32.mrf.mxu3 }
 0x976   : > { %v7479_v8 = vpop.f32.mrf.mxu2  ;;  %v19345_v60 = vadd.f32 %v7732_v28, %v7521_v49  ;;  %v21109_v49 = vld [vmem:[#allocation80_spill] sm:$0xff]  ;;  %v8325_v17 = vor.u32 %v8324_v52, %v8323_v10 }
 0x977   : > { %v7525_v46 = vadd.f32 %v7479_v8, %v7321_v26  ;;  %v7322_v28 = vadd.f32 %v21109_v49, %v6940_v58  ;;  %v21112_v58 = vld [vmem:[#allocation84_spill] sm:$0xff]  ;;  %v19369_v10 = vpop.f32.mrf.mxu0 }
 0x978   : > { %v8326_v18 = vsel %vm3174_vm3, %v8321_v44, %v8325_v17  ;;  %v7323_v49 = vadd.f32 %v21112_v58, %v6941_v31  ;;  %21113 = vst [vmem:[#allocation30_spill] sm:$0xff] %v19369_v10  ;;  %v7324_v44 = vadd.f32 %v19035_v34, %v6942_v41 }
 0x97d   : > { %v19353_v3 = vpop.f32.mrf.mxu1  ;;  %v7734_v26 = vpop.f32.mrf.mxu3 }
 0x97e   : > { %21106 = vst [vmem:[#allocation63_spill] sm:$0xff] %v19353_v3  ;;  %v7481_v8 = vpop.f32.mrf.mxu2  ;;  %v19360_v33 = vadd.f32 %v7734_v26, %v7522_v56  ;;  %v8549_v3 = vsel %vm3415_vm2, %v8547_v51, %v8548_v39 }
 0x97f   : > { %v7526_v14 = vadd.f32 %v7481_v8, %v7322_v28  ;;  %v14636_v8 = vld [vmem:[#allocation2 + $0x2c] sm:$0xff] }
 0x980   : > { %v8550_v51 = vrot.slane %v14636_v8, 2 }
 0x982   : > { %8641 = vmatmul.bf16.vlgmr.msra.gmra.mxu3 %v8549_v3  ;;  %8447 = vmatmul.bf16.gmra.mxu2 %v8326_v18  ;;  %v19380_v18 = vpop.f32.mrf.mxu0  ;;  %v8551_v58 = vsel %vm3415_vm2, %v8548_v39, %v8550_v51 }
 0x983   : > { %21115 = vst [vmem:[#allocation18_spill] sm:$0xff] %v19380_v18 }
 0x985   : > { %v19366_v35 = vpop.f32.mrf.mxu1  ;;  %v7737_v19 = vpop.f32.mrf.mxu3 }
 0x986   : > { %v7484_v22 = vpop.f32.mrf.mxu2  ;;  %v19371_v56 = vadd.f32 %v7737_v19, %v7523_v2  ;;  %v21116_v2 = vld [vmem:[#allocation68_spill] sm:$0xff] }
 0x987   : > { %v7527_v52 = vadd.f32 %v7484_v22, %v7323_v49  ;;  %v6943_v19 = vadd.f32 %v21116_v2, %v19073_v4  ;;  %v21117_v49 = vld [vmem:[#allocation94_spill] sm:$0xff] }
 0x988   : > { %v8330_v11 = vsel %vm3174_vm3, %v8325_v17, %v21117_v49 }
 0x989   : > { %v7325_v22 = vadd.f32 %v19049_v36, %v6943_v19 }
 0x98a   : > { %v19394_v4 = vpop.f32.mrf.mxu0 }
 0x98d   : > { %v19375_v28 = vpop.f32.mrf.mxu1  ;;  %v7739_v3 = vpop.f32.mrf.mxu3 }
 0x98e   : > { %v7486_v26 = vpop.f32.mrf.mxu2  ;;  %v19378_v24 = vadd.f32 %v7739_v3, %v7524_v59  ;;  %v21119_v3 = vld [vmem:[#allocation71_spill] sm:$0xff] }
 0x98f   : > { %v7528_v31 = vadd.f32 %v7486_v26, %v7324_v44  ;;  %v6944_v26 = vadd.f32 %v21119_v3, %v19080_v63  ;;  %v21122_v63 = vld [vmem:[#allocation98_spill] sm:$0xff] }
 0x991   : > { %v7326_v17 = vadd.f32 %v19057_v6, %v6944_v26  ;;  %v21123_v6 = vld [vmem:[#allocation72_spill] sm:$0xff] }
 0x992   : > { %8646 = vmatmul.bf16.gmra.mxu3 %v8551_v58  ;;  %8452 = vmatmul.bf16.gmra.mxu2 %v8330_v11  ;;  %v14637_v58 = vld [vmem:[#allocation2 + $0x34] sm:$0xff] }
 0x993   : > { %v8552_v49 = vrot.slane %v14637_v58, 2 }
 0x995   : > { %v19387_v34 = vpop.f32.mrf.mxu1  ;;  %v7742_v47 = vpop.f32.mrf.mxu3 }
 0x996   : > { %21118 = vst [vmem:[#allocation31_spill] sm:$0xff] %v19387_v34  ;;  %v7489_v59 = vpop.f32.mrf.mxu2  ;;  %v19390_v41 = vadd.f32 %v7742_v47, %v7525_v46  ;;  %v21121_v46 = vld [vmem:[#allocation73_spill] sm:$0xff] }
 0x997   : > { %v7529_v44 = vadd.f32 %v7489_v59, %v7325_v22  ;;  %v6945_v19 = vadd.f32 %v21121_v46, %v19091_v13  ;;  %v8553_v22 = vsel %vm3415_vm2, %v8550_v51, %v8552_v49  ;;  %v19407_v59 = vpop.f32.mrf.mxu0  ;;  %v21125_v13 = vshrl.u32 %v18652_v1, 16 }
 0x999   : > { %v7327_v3 = vadd.f32 %v21123_v6, %v6945_v19  ;;  %v8335_v51 = vrot.slane %v21125_v13, 1 }
 0x99d   : > { %v19396_v39 = vpop.f32.mrf.mxu1  ;;  %v7744_v8 = vpop.f32.mrf.mxu3 }
 0x99e   : > { %21120 = vst [vmem:[#allocation11_spill] sm:$0xff] %v19396_v39  ;;  %v7491_v2 = vpop.f32.mrf.mxu2  ;;  %v19399_v11 = vadd.f32 %v7744_v8, %v7526_v14 }
 0x99f   : > { %v7530_v36 = vadd.f32 %v7491_v2, %v7326_v17  ;;  %v21124_v17 = vld [vmem:[#allocation21_spill] sm:$0xff]  ;;  %v21126_v2 = vshll.u32 %v18652_v1, 16 }
 0x9a0   : > { %v6946_v8 = vadd.f32 %v21124_v17, %v19100_v5  ;;  %v21128_v5 = vld [vmem:[#allocation12_spill] sm:$0xff]  ;;  %v21129_v1 = vld [vmem:[#allocation97_spill] sm:$0xff] }
 0x9a1   : > { %v8336_v46 = vrot.slane %v21126_v2, 2  ;;  %v6947_v17 = vadd.f32 %v21128_v5, %v19113_v38  ;;  %v21131_v38 = vshrl.u32 %v18689_v61, 16 }
 0x9a2   : > { %8651 = vmatmul.bf16.gmra.mxu3 %v8553_v22  ;;  %8457 = vmatmul.bf16.gmra.mxu2 %v21122_v63  ;;  %v7328_v63 = vadd.f32 %v19077_v55, %v6946_v8 }
 0x9a3   : > { %v7329_v8 = vadd.f32 %v19087_v32, %v6947_v17 }
 0x9a5   : > { %v19405_v47 = vpop.f32.mrf.mxu1  ;;  %v7747_v26 = vpop.f32.mrf.mxu3 }
 0x9a6   : > { %v7494_v39 = vpop.f32.mrf.mxu2  ;;  %v19410_v58 = vadd.f32 %v7747_v26, %v7527_v52  ;;  %v8554_v52 = vrot.slane %v19045_v15, 2  ;;  %v8337_v26 = vor.u32 %v8336_v46, %v8335_v51  ;;  %v21130_v46 = vld [vmem:[#allocation42_spill] sm:$0xff] }
 0x9a7   : > { %v7531_v14 = vadd.f32 %v7494_v39, %v7327_v3  ;;  %v8039_v34 = vpop.f32.mrf.mxu0 }
 0x9a8   : > { %v8555_v13 = vsel %vm3415_vm2, %v8552_v49, %v8554_v52  ;;  %v8338_v2 = vsel %vm3174_vm3, %v21129_v1, %v8337_v26  ;;  %v8339_v49 = vrot.slane %v21131_v38, 1 }
 0x9ad   : > { %v19418_v22 = vpop.f32.mrf.mxu1  ;;  %v7749_v19 = vpop.f32.mrf.mxu3 }
 0x9ae   : > { %v7496_v6 = vpop.f32.mrf.mxu2  ;;  %v19422_v39 = vadd.f32 %v7749_v19, %v7528_v31  ;;  %v21132_v19 = vshll.u32 %v18689_v61, 16 }
 0x9af   : > { %v7532_v3 = vadd.f32 %v7496_v6, %v7328_v63  ;;  %v8041_v18 = vpop.f32.mrf.mxu0  ;;  %v6948_v63 = vadd.f32 %v21130_v46, %v19119_v48  ;;  %v21133_v48 = vld [vmem:[#allocation41_spill] sm:$0xff] }
 0x9b0   : > { %21127 = vst [vmem:[#allocation10_spill] sm:$0xff] %v19422_v39  ;;  %v8340_v6 = vrot.slane %v21132_v19, 2 }
 0x9b2   : > { %8656 = vmatmul.bf16.gmra.mxu3 %v8555_v13  ;;  %8462 = vmatmul.bf16.gmra.mxu2 %v8338_v2  ;;  %v7330_v13 = vadd.f32 %v19097_v45, %v6948_v63  ;;  %v8556_v2 = vrot.slane %v19064_v9, 2 }
 0x9b4   : > { %v8557_v46 = vsel %vm3415_vm2, %v8554_v52, %v8556_v2  ;;  %v21136_v52 = vshll.u32 %v18726_v16, 16 }
 0x9b5   : > { %v8243_v55 = vpop.f32.mrf.mxu1  ;;  %v7752_v10 = vpop.f32.mrf.mxu3 }
 0x9b6   : > { %v7499_v15 = vpop.f32.mrf.mxu2  ;;  %v19430_v51 = vadd.f32 %v7752_v10, %v7529_v44  ;;  %v8341_v10 = vor.u32 %v8340_v6, %v8339_v49 }
 0x9b7   : > { %v7533_v31 = vadd.f32 %v7499_v15, %v7329_v8  ;;  %v6949_v15 = vadd.f32 %v21133_v48, %v19130_v42  ;;  %v21135_v42 = vshrl.u32 %v18726_v16, 16 }
 0x9b8   : > { %v8342_v61 = vsel %vm3174_vm3, %v8337_v26, %v8341_v10  ;;  %v8344_v26 = vrot.slane %v21136_v52, 2 }
 0x9b9   : > { %v7331_v45 = vadd.f32 %v19107_v40, %v6949_v15 }
 0x9bc   : > { %v8044_v1 = vpop.f32.mrf.mxu0 }
 0x9bd   : > { %v8245_v5 = vpop.f32.mrf.mxu1  ;;  %v7754_v32 = vpop.f32.mrf.mxu3 }
 0x9be   : > { %v7501_v17 = vpop.f32.mrf.mxu2  ;;  %v19440_v44 = vadd.f32 %v7754_v32, %v7530_v36  ;;  %v21134_v36 = vld [vmem:[#allocation13_spill] sm:$0xff]  ;;  %v8343_v32 = vrot.slane %v21135_v42, 1 }
 0x9bf   : > { %v7534_v8 = vadd.f32 %v7501_v17, %v7330_v13  ;;  %v6950_v6 = vadd.f32 %v21134_v36, %v19137_v29  ;;  %v21137_v29 = vld [vmem:[#allocation89_spill] sm:$0xff] }
 0x9c1   : > { %v7332_v40 = vadd.f32 %v19115_v30, %v6950_v6  ;;  %v21138_v6 = vld [vmem:[#allocation38_spill] sm:$0xff] }
 0x9c2   : > { %8661 = vmatmul.bf16.gmra.mxu3 %v8557_v46  ;;  %8467 = vmatmul.bf16.gmra.mxu2 %v8342_v61 }
 0x9c4   : > { %v8046_v49 = vpop.f32.mrf.mxu0 }
 0x9c5   : > { %v8248_v38 = vpop.f32.mrf.mxu1  ;;  %v7757_v63 = vpop.f32.mrf.mxu3 }
 0x9c6   : > { %v7504_v19 = vpop.f32.mrf.mxu2  ;;  %v7794_v39 = vadd.f32 %v7757_v63, %v7531_v14  ;;  %v14638_v14 = vld [vmem:[#allocation2 + $0x4c] sm:$0xff] }
 0x9c7   : > { %v7535_v9 = vadd.f32 %v7504_v19, %v7331_v45  ;;  %v8558_v61 = vrot.slane %v14638_v14, 2  ;;  %v8345_v45 = vor.u32 %v8344_v26, %v8343_v32 }
 0x9c8   : > { %v8076_v13 = vadd.f32 %v8039_v34, %v7794_v39  ;;  %v6951_v34 = vadd.f32 %v21137_v29, %v19155_v43  ;;  %v21139_v43 = vshrl.u32 %v18757_v57, 16  ;;  %v14639_v29 = vld [vmem:[#allocation2 + $0x54] sm:$0xff] }
 0x9c9   : > { %v8559_v16 = vsel %vm3415_vm2, %v8556_v2, %v8558_v61  ;;  %v21140_v2 = vshll.u32 %v18757_v57, 16 }
 0x9ca   : > { %v19453_v17 = vadd.f32 %v8243_v55, %v8076_v13  ;;  %v8346_v55 = vsel %vm3174_vm3, %v8341_v10, %v8345_v45  ;;  %v7333_v42 = vadd.f32 %v21138_v6, %v6951_v34 }
 0x9cc   : > { %v8049_v36 = vpop.f32.mrf.mxu0 }
 0x9cd   : > { %v8250_v48 = vpop.f32.mrf.mxu1  ;;  %v7759_v15 = vpop.f32.mrf.mxu3 }
 0x9ce   : > { %v7506_v46 = vpop.f32.mrf.mxu2  ;;  %v7795_v63 = vadd.f32 %v7759_v15, %v7532_v3 }
 0x9cf   : > { %v7536_v19 = vadd.f32 %v7506_v46, %v7332_v40  ;;  %v8348_v46 = vrot.slane %v21140_v2, 2 }
 0x9d0   : > { %v8077_v39 = vadd.f32 %v8041_v18, %v7795_v63  ;;  %v8347_v18 = vrot.slane %v21139_v43, 1 }
 0x9d2   : > { %v19460_v13 = vadd.f32 %v8245_v5, %v8077_v39  ;;  %8666 = vmatmul.bf16.gmra.mxu3 %v8559_v16  ;;  %8472 = vmatmul.bf16.gmra.mxu2 %v8346_v55  ;;  %v8560_v39 = vrot.slane %v14639_v29, 2  ;;  %v8349_v34 = vor.u32 %v8348_v46, %v8347_v18  ;;  %v21142_v18 = vshrl.u32 %v19164_v54, 16 }
 0x9d4   : > { %v8051_v15 = vpop.f32.mrf.mxu0 }
 0x9d5   : > { %v8253_v30 = vpop.f32.mrf.mxu1  ;;  %v7762_v52 = vpop.f32.mrf.mxu3 }
 0x9d6   : > { %v7509_v32 = vpop.f32.mrf.mxu2  ;;  %v7796_v3 = vadd.f32 %v7762_v52, %v7533_v31  ;;  %v21141_v31 = vld [vmem:[#allocation82_spill] sm:$0xff]  ;;  %v8350_v52 = vsel %vm3174_vm3, %v8345_v45, %v8349_v34 }
 0x9d7   : > { %v7537_v26 = vadd.f32 %v7509_v32, %v7333_v42  ;;  %v8058_v55 = vadd.f32 %v21141_v31, %v19204_v62  ;;  %v8561_v42 = vsel %vm3415_vm2, %v8558_v61, %v8560_v39  ;;  %v8351_v62 = vrot.slane %v21142_v18, 1  ;;  %v21144_v61 = vld [vmem:[#allocation87_spill] sm:$0xff]  ;;  %v14640_v31 = vld [vmem:[#allocation2 + $0x5c] sm:$0xff] }
 0x9d8   : > { %v8078_v40 = vadd.f32 %v8044_v1, %v7796_v3  ;;  %v8059_v45 = vadd.f32 %v21144_v61, %v19229_v37 }
 0x9d9   : > { %v8262_v32 = vadd.f32 %v19148_v25, %v8058_v55  ;;  %v8562_v55 = vrot.slane %v14640_v31, 2  ;;  %v21149_v31 = vld [vmem:[#allocation17_spill] sm:$0xff] }
 0x9da   : > { %v19467_v10 = vadd.f32 %v8248_v38, %v8078_v40  ;;  %v8263_v25 = vadd.f32 %v19171_v50, %v8059_v45 }
 0x9dc   : > { %v8054_v6 = vpop.f32.mrf.mxu0 }
 0x9dd   : > { %v8255_v5 = vpop.f32.mrf.mxu1  ;;  %v7764_v14 = vpop.f32.mrf.mxu3 }
 0x9de   : > { %v7511_v63 = vpop.f32.mrf.mxu2  ;;  %v7797_v16 = vadd.f32 %v7764_v14, %v7534_v8 }
 0x9e0   : > { %v8079_v1 = vadd.f32 %v8046_v49, %v7797_v16  ;;  %v21143_v49 = vshll.u32 %v19164_v54, 16 }
 0x9e2   : > { %v19473_v57 = vadd.f32 %v8250_v48, %v8079_v1  ;;  %8671 = vmatmul.bf16.gmra.mxu3 %v8561_v42  ;;  %8477 = vmatmul.bf16.gmra.mxu2 %v8350_v52  ;;  %v8352_v2 = vrot.slane %v21143_v49, 2 }
 0x9e4   : > { %v8056_v46 = vpop.f32.mrf.mxu0  ;;  %v8353_v63 = vor.u32 %v8352_v2, %v8351_v62 }
 0x9e5   : > { %v8258_v38 = vpop.f32.mrf.mxu1  ;;  %v7767_v3 = vpop.f32.mrf.mxu3 }
 0x9e6   : > { %v8438_v40 = vpop.f32.mrf.mxu2  ;;  %v7798_v43 = vadd.f32 %v7767_v3, %v7535_v9  ;;  %v8354_v52 = vsel %vm3174_vm3, %v8349_v34, %v8353_v63  ;;  %v21147_v34 = vshll.u32 %v19213_v7, 16 }
 0x9e7   : > { %v8502_v8 = vadd.f32 %v8438_v40, %v8262_v32  ;;  %v21145_v32 = vld [vmem:[#allocation76_spill] sm:$0xff] }
 0x9e8   : > { %v8080_v48 = vadd.f32 %v8049_v36, %v7798_v43  ;;  %v8060_v3 = vadd.f32 %v21145_v32, %v19252_v0  ;;  %v8563_v36 = vsel %vm3415_vm2, %v8560_v39, %v8562_v55  ;;  %v8356_v2 = vrot.slane %v21147_v34, 2 }
 0x9ea   : > { %v19482_v14 = vadd.f32 %v8253_v30, %v8080_v48  ;;  %v8264_v50 = vadd.f32 %v19195_v53, %v8060_v3  ;;  %v14641_v53 = vld [vmem:[#allocation2 + $0x64] sm:$0xff] }
 0x9eb   : > { %v8564_v46 = vrot.slane %v14641_v53, 2 }
 0x9ed   : > { %v8260_v29 = vpop.f32.mrf.mxu1  ;;  %v7769_v16 = vpop.f32.mrf.mxu3 }
 0x9ee   : > { %v8440_v9 = vpop.f32.mrf.mxu2  ;;  %v7799_v1 = vadd.f32 %v7769_v16, %v7536_v19  ;;  %v21146_v19 = vshrl.u32 %v19213_v7, 16 }
 0x9ef   : > { %v8503_v42 = vadd.f32 %v8440_v9, %v8263_v25  ;;  %v21148_v25 = vld [vmem:[#allocation88_spill] sm:$0xff]  ;;  %v8565_v9 = vsel %vm3415_vm2, %v8562_v55, %v8564_v46 }
 0x9f0   : > { %v8081_v37 = vadd.f32 %v8051_v15, %v7799_v1  ;;  %v8355_v49 = vrot.slane %v21146_v19, 1  ;;  %v8287_v15 = vld [vmem:[#allocation2 + $0x7c] sm:$0xf]  ;;  %v8062_v16 = vadd.f32 %v21148_v25, %v19292_v27 }
 0x9f1   : > { %v8305_v39 = vunpack.c.l.b16 %v8287_v15 }
 0x9f2   : > { %v19489_v30 = vadd.f32 %v8255_v5, %v8081_v37  ;;  %8676 = vmatmul.bf16.gmra.mxu3 %v8563_v36  ;;  %8482 = vmatmul.bf16.gmra.mxu2 %v8354_v52  ;;  %v8357_v5 = vor.u32 %v8356_v2, %v8355_v49  ;;  %v8266_v1 = vadd.f32 %v21149_v31, %v8062_v16  ;;  %v21150_v49 = vld [vmem:[#allocation85_spill] sm:$0xff] }
 0x9f3   : > { %v8306_v29 = vpack.c.b16 %v8305_v39, %v8305_v39  ;;  %v8064_v34 = vadd.f32 %v21150_v49, %v19321_v23  ;;  %v8568_v39 = vrot.slane %v19213_v7, 2 }
 0x9f5   : > { %v7772_v40 = vpop.f32.mrf.mxu3  ;;  %v8570_v16 = vrot.slane %v8306_v29, 2 }
 0x9f6   : > { %v8443_v43 = vpop.f32.mrf.mxu2  ;;  %v7800_v18 = vadd.f32 %v7772_v40, %v7537_v26  ;;  %v8358_v26 = vsel %vm3174_vm3, %v8353_v63, %v8357_v5  ;;  %v8566_v63 = vrot.slane %v19164_v54, 2 }
 0x9f7   : > { %v8504_v62 = vadd.f32 %v8443_v43, %v8264_v50 }
 0x9f8   : > { %v8082_v0 = vadd.f32 %v8054_v6, %v7800_v18  ;;  %v8360_v6 = vshrl.u32 %v8306_v29, 16  ;;  %v8567_v18 = vsel %vm3415_vm2, %v8564_v46, %v8566_v63  ;;  %v8569_v53 = vsel %vm3415_vm2, %v8566_v63, %v8568_v39 }
 0x9fa   : > { %v19496_v61 = vadd.f32 %v8258_v38, %v8082_v0  ;;  %v8363_v38 = vshll.u32 %v8306_v29, 16  ;;  %v8362_v36 = vrot.slane %v8360_v6, 1  ;;  %v8571_v6 = vsel %vm3415_vm2, %v8568_v39, %v8570_v16 }
 0x9fc   : > { %v8365_v50 = vrot.slane %v8363_v38, 2  ;;  %v21152_v38 = vld [vmem:[#allocation91_spill] sm:$0xff] }
 0x9fd   : > { %v7774_v45 = vpop.f32.mrf.mxu3  ;;  %v8068_v31 = vadd.f32 %v21152_v38, %v19371_v56  ;;  %v21153_v56 = vld [vmem:[#allocation23_spill] sm:$0xff]  ;;  %v21160_v38 = vld [vmem:[#allocation100_spill] sm:$0xff] }
 0x9fe   : > { %v19498_v48 = vpop.f32.mrf.mxu2  ;;  %v8366_v40 = vor.u32 %v8365_v50, %v8362_v36  ;;  %v8067_v49 = vadd.f32 %v21153_v56, %v19360_v33 }
 0xa00   : > { %v8367_v19 = vsel %vm3174_vm3, %v8357_v5, %v8366_v40  ;;  %v21151_v5 = vld [vmem:[#allocation40_spill] sm:$0xff] }
 0xa01   : > { %v8066_v46 = vadd.f32 %v21151_v5, %v19345_v60  ;;  %v8272_v60 = vadd.f32 %v19342_v20, %v8068_v31  ;;  %v21161_v31 = vld [vmem:[#allocation90_spill] sm:$0xff] }
 0xa02   : > { %8681 = vmatmul.bf16.gmra.mxu3 %v8565_v9  ;;  %8487 = vmatmul.bf16.gmra.mxu2 %v8358_v26 }
 0xa03   : > { %v8270_v23 = vadd.f32 %v19317_v21, %v8066_v46  ;;  %v21157_v46 = vld [vmem:[#allocation63_spill] sm:$0xff] }
 0xa05   : > { %v8642_v52 = vpop.f32.mrf.mxu3 }
 0xa06   : > { %v8448_v32 = vpop.f32.mrf.mxu2  ;;  %v19505_v3 = vadd.f32 %v8642_v52, %v8502_v8  ;;  %v8268_v8 = vadd.f32 %v19282_v12, %v8064_v34 }
 0xa07   : > { %v8506_v37 = vadd.f32 %v8448_v32, %v8266_v1 }
 0xa0d   : > { %v8644_v43 = vpop.f32.mrf.mxu3 }
 0xa0e   : > { %v19508_v27 = vpop.f32.mrf.mxu2  ;;  %v19510_v55 = vadd.f32 %v8644_v43, %v8503_v42 }
 0xa12   : > { %8686 = vmatmul.bf16.gmra.mxu3 %v8567_v18  ;;  %8492 = vmatmul.bf16.gmra.mxu2 %v8367_v19 }
 0xa15   : > { %v8647_v2 = vpop.f32.mrf.mxu3 }
 0xa16   : > { %v8453_v0 = vpop.f32.mrf.mxu2  ;;  %v19517_v54 = vadd.f32 %v8647_v2, %v8504_v62 }
 0xa17   : > { %v8508_v15 = vadd.f32 %v8453_v0, %v8268_v8  ;;  %v21154_v8 = vld [vmem:[#allocation33_spill] sm:$0xff]  ;;  %v8074_v0 = vadd.f32 %v19394_v4, %v19430_v51  ;;  %v21162_v51 = vld [vmem:[#allocation51_spill] sm:$0xff] }
 0xa18   : > { %v8069_v2 = vadd.f32 %v21154_v8, %v19378_v24  ;;  %v8065_v24 = vadd.f32 %v21161_v31, %v21160_v38  ;;  %v21167_v38 = vld [vmem:[#allocation30_spill] sm:$0xff]  ;;  %v21168_v31 = vld [vmem:[#allocation39_spill] sm:$0xff] }
 0xa19   : > { %v8278_v33 = vadd.f32 %v19405_v47, %v8074_v0  ;;  %v19561_v47 = vld [vmem:[%s20374_s5] ss:$0 sm:$0xff] }
 0xa1d   : > { %v19520_v42 = vpop.f32.mrf.mxu3 }
 0xa1e   : > { %v8455_v45 = vpop.f32.mrf.mxu2 }
 0xa22   : > { %8691 = vmatmul.bf16.gmra.mxu3 %v8569_v53  ;;  %8497 = vmatmul.bf16.gmra.mxu2 %v8366_v40  ;;  %v21156_v53 = vld [vmem:[#allocation43_spill] sm:$0xff] }
 0xa23   : > { %v8070_v5 = vadd.f32 %v21156_v53, %v19390_v41 }
 0xa25   : > { %v8652_v12 = vpop.f32.mrf.mxu3  ;;  %v8274_v41 = vadd.f32 %v19366_v35, %v8070_v5 }
 0xa26   : > { %v8458_v26 = vpop.f32.mrf.mxu2  ;;  %v19526_v25 = vadd.f32 %v8652_v12, %v8506_v37 }
 0xa27   : > { %v8510_v62 = vadd.f32 %v8458_v26, %v8270_v23  ;;  %v8273_v23 = vadd.f32 %v21157_v46, %v8069_v2  ;;  %v21164_v2 = vld [vmem:[#allocation52_spill] sm:$0xff] }
 0xa28   : > { %v8269_v0 = vadd.f32 %v21164_v2, %v8065_v24 }
 0xa2a   : > { %v8509_v53 = vadd.f32 %v8455_v45, %v8269_v0 }
 0xa2d   : > { %v8654_v9 = vpop.f32.mrf.mxu3 }
 0xa2e   : > { %v8460_v7 = vpop.f32.mrf.mxu2 }
 0xa32   : > { %8696 = vmatmul.bf16.gmra.mxu3 %v8571_v6 }
 0xa35   : > { %v8657_v1 = vpop.f32.mrf.mxu3 }
 0xa36   : > { %v8463_v52 = vpop.f32.mrf.mxu2  ;;  %v19532_v32 = vadd.f32 %v8657_v1, %v8508_v15  ;;  %v21155_v15 = vld [vmem:[#allocation50_spill] sm:$0xff] }
 0xa37   : > { %v8512_v21 = vadd.f32 %v8463_v52, %v8272_v60  ;;  %v8271_v39 = vadd.f32 %v21155_v15, %v8067_v49  ;;  %v8071_v52 = vadd.f32 %v21162_v51, %v19399_v11  ;;  %v21163_v49 = vld [vmem:[#allocation92_spill] sm:$0xff] }
 0xa39   : > { %v8511_v12 = vadd.f32 %v8460_v7, %v8271_v39  ;;  %v8075_v7 = vadd.f32 %v19407_v59, %v19440_v44  ;;  %v8275_v35 = vadd.f32 %v19375_v28, %v8071_v52 }
 0xa3b   : > { %v8279_v44 = vadd.f32 %v19418_v22, %v8075_v7  ;;  %v8072_v22 = vadd.f32 %v21167_v38, %v19410_v58  ;;  %v21169_v58 = vld [vmem:[#allocation10_spill] sm:$0xff] }
 0xa3d   : > { %v8659_v36 = vpop.f32.mrf.mxu3 }
 0xa3e   : > { %v8465_v37 = vpop.f32.mrf.mxu2 }
 0xa3f   : > { %v8513_v26 = vadd.f32 %v8465_v37, %v8273_v23 }
 0xa42   : > { %8701 = vmatmul.bf16.gmra.mxu3 %v8570_v16  ;;  %v21159_v16 = vld [vmem:[#allocation78_spill] sm:$0xff] }
 0xa45   : > { %v8662_v50 = vpop.f32.mrf.mxu3 }
 0xa46   : > { %v8468_v29 = vpop.f32.mrf.mxu2  ;;  %v8714_v63 = vadd.f32 %v8662_v50, %v8510_v62  ;;  %v21158_v62 = vld [vmem:[#allocation29_spill] sm:$0xff] }
 0xa47   : > { %v8063_v6 = vadd.f32 %v21159_v16, %v21158_v62  ;;  %v8514_v37 = vadd.f32 %v8468_v29, %v8274_v41  ;;  %v21166_v29 = vld [vmem:[#allocation86_spill] sm:$0xff]  ;;  %v8739_v41 = vadd.f32 %v19561_v47, %v19526_v25 }
 0xa48   : > { %v8743_v5 = vadd.f32 %v19561_v47, %v8714_v63 }
 0xa49   : > { %v8267_v8 = vadd.f32 %v21163_v49, %v8063_v6 }
 0xa4a   : > { %v8768_v6 = vmax.f32 %v8743_v5, 0.0  ;;  %v21172_v5 = vld [vmem:[#allocation11_spill] sm:$0xff] }
 0xa4b   : > { %v8507_v39 = vadd.f32 %v19508_v27, %v8267_v8 }
 0xa4d   : > { %v8664_v40 = vpop.f32.mrf.mxu3  ;;  %v8711_v23 = vadd.f32 %v8654_v9, %v8507_v39 }
 0xa4e   : > { %v8470_v43 = vpop.f32.mrf.mxu2  ;;  %v8715_v60 = vadd.f32 %v8664_v40, %v8511_v12  ;;  %v8713_v12 = vadd.f32 %v8659_v36, %v8509_v53 }
 0xa4f   : > { %v8515_v46 = vadd.f32 %v8470_v43, %v8275_v35  ;;  %v8740_v9 = vadd.f32 %v19561_v47, %v8711_v23  ;;  %v21171_v35 = vld [vmem:[#allocation31_spill] sm:$0xff] }
 0xa50   : > { %v8744_v11 = vadd.f32 %v19561_v47, %v8715_v60  ;;  %v8742_v36 = vadd.f32 %v19561_v47, %v8713_v12 }
 0xa51   : > { %v8765_v0 = vmax.f32 %v8740_v9, 0.0 }
 0xa55   : > { %v8667_v18 = vpop.f32.mrf.mxu3 }
 0xa56   : > { %v19534_v19 = vpop.f32.mrf.mxu2  ;;  %v8716_v40 = vadd.f32 %v8667_v18, %v8512_v21  ;;  %v21165_v21 = vld [vmem:[#allocation27_spill] sm:$0xff] }
 0xa57   : > { %v8061_v18 = vadd.f32 %v21166_v29, %v21165_v21  ;;  %v8735_v21 = vadd.f32 %v19561_v47, %v19505_v3 }
 0xa58   : > { %v8745_v59 = vadd.f32 %v19561_v47, %v8716_v40 }
 0xa59   : > { %v8265_v24 = vadd.f32 %v21168_v31, %v8061_v18 }
 0xa5a   : > { %v8770_v63 = vmax.f32 %v8745_v59, 0.0 }
 0xa5b   : > { %v8505_v52 = vadd.f32 %v19498_v48, %v8265_v24 }
 0xa5d   : > { %v8669_v20 = vpop.f32.mrf.mxu3  ;;  %v8709_v49 = vadd.f32 %v19520_v42, %v8505_v52 }
 0xa5e   : > { %v19538_v34 = vpop.f32.mrf.mxu2  ;;  %v8717_v50 = vadd.f32 %v8669_v20, %v8513_v26  ;;  %v8769_v26 = vmax.f32 %v8744_v11, 0.0  ;;  %v8767_v11 = vmax.f32 %v8742_v36, 0.0 }
 0xa5f   : > { %v8738_v53 = vadd.f32 %v19561_v47, %v8709_v49 }
 0xa60   : > { %v8746_v20 = vadd.f32 %v19561_v47, %v8717_v50  ;;  %v8793_v51 = vpack.c.bf16 %v8769_v26, %v8768_v6  ;;  %v8741_v50 = vadd.f32 %v19561_v47, %v19532_v32  ;;  %v8736_v32 = vadd.f32 %v19561_v47, %v19510_v55 }
 0xa61   : > { %v8763_v12 = vmax.f32 %v8738_v53, 0.0 }
 0xa62   : > { %v8771_v62 = vmax.f32 %v8746_v20, 0.0  ;;  %v8276_v20 = vadd.f32 %v21171_v35, %v8072_v22  ;;  %v8766_v39 = vmax.f32 %v8741_v50, 0.0  ;;  %v8761_v18 = vmax.f32 %v8736_v32, 0.0 }
 0xa64   : > { %v8516_v25 = vadd.f32 %v19534_v19, %v8276_v20  ;;  %v8792_v59 = vpack.c.bf16 %v8767_v11, %v8766_v39 }
 0xa65   : > { %v8672_v1 = vpop.f32.mrf.mxu3 }
 0xa66   : > { %v8478_v4 = vpop.f32.mrf.mxu2  ;;  %v8718_v15 = vadd.f32 %v8672_v1, %v8514_v37  ;;  %v21170_v37 = vld [vmem:[#allocation18_spill] sm:$0xff] }
 0xa67   : > { %v19556_v56 = vadd.f32 %v8478_v4, %v8278_v33  ;;  %v8794_v4 = vpack.c.bf16 %v8771_v62, %v8770_v63  ;;  %v8073_v40 = vadd.f32 %v21170_v37, %v21169_v58 }
 0xa68   : > { %v8747_v16 = vadd.f32 %v19561_v47, %v8718_v15  ;;  %v8764_v15 = vmax.f32 %v8739_v41, 0.0 }
 0xa6a   : > { %v8772_v60 = vmax.f32 %v8747_v16, 0.0 }
 0xa6d   : > { %v8674_v28 = vpop.f32.mrf.mxu3 }
 0xa6e   : > { %v8480_v33 = vpop.f32.mrf.mxu2  ;;  %v8719_v27 = vadd.f32 %v8674_v28, %v8515_v46  ;;  %v8277_v46 = vadd.f32 %v21172_v5, %v8073_v40 }
 0xa6f   : > { %v8519_v45 = vadd.f32 %v8480_v33, %v8279_v44  ;;  %v8791_v44 = vpack.c.bf16 %v8765_v0, %v8764_v15  ;;  %v8760_v33 = vmax.f32 %v8735_v21, 0.0  ;;  %v14004_v0 = vld [vmem:[%s20375_s6 + $0x14] sm:$0x10] }
 0xa70   : > { %v8748_v43 = vadd.f32 %v19561_v47, %v8719_v27  ;;  %v8517_v29 = vadd.f32 %v19538_v34, %v8277_v46 }
 0xa71   : > { %v8789_v63 = vpack.c.bf16 %v8761_v18, %v8760_v33 }
 0xa72   : > { %v8773_v1 = vmax.f32 %v8748_v43, 0.0 }
 0xa74   : > { %v8795_v7 = vpack.c.bf16 %v8773_v1, %v8772_v60 }
 0xa75   : > { %v8677_v8 = vpop.f32.mrf.mxu3 }
 0xa76   : > { %v8483_v2 = vpop.f32.mrf.mxu2  ;;  %v8720_v42 = vadd.f32 %v8677_v8, %v8516_v25 }
 0xa77   : > { %v8520_v48 = vadd.f32 %v8483_v2, %v19453_v17  ;;  %v8737_v17 = vadd.f32 %v19561_v47, %v19517_v54  ;;  %v12729_v2 = vld [vmem:[%s20375_s6 + $0x10] sm:$0xf] }
 0xa78   : > { %v8749_v55 = vadd.f32 %v19561_v47, %v8720_v42  ;;  %v12730_v35 = vor.u32 %v14004_v0, %v12729_v2  ;;  %v14023_v2 = vld [vmem:[%s20376_s7 + $0x90] sm:$0xff]  ;;  %v14005_v0 = vld [vmem:[%s20376_s7] sm:$0xff] }
 0xa79   : > { %v8762_v62 = vmax.f32 %v8737_v17, 0.0 }
 0xa7a   : > { %v8774_v27 = vmax.f32 %v8749_v55, 0.0 }
 0xa7b   : > { %v8790_v6 = vpack.c.bf16 %v8763_v12, %v8762_v62 }
 0xa7d   : > { %v8679_v19 = vpop.f32.mrf.mxu3 }
 0xa7e   : > { %v8485_v23 = vpop.f32.mrf.mxu2  ;;  %v8721_v26 = vadd.f32 %v8679_v19, %v8517_v29 }
 0xa7f   : > { %v8521_v28 = vadd.f32 %v8485_v23, %v19460_v13 }
 0xa80   : > { %v8750_v16 = vadd.f32 %v19561_v47, %v8721_v26 }
 0xa82   : > { %v8775_v3 = vmax.f32 %v8750_v16, 0.0  ;;  %v14011_v16 = vld [vmem:[%s20376_s7 + $0x30] sm:$0xff] }
 0xa84   : > { %v8796_v54 = vpack.c.bf16 %v8775_v3, %v8774_v27  ;;  %v14019_v27 = vld [vmem:[%s20376_s7 + $0x70] sm:$0xff] }
 0xa85   : > { %v8682_v43 = vpop.f32.mrf.mxu3 }
 0xa86   : > { %v8488_v34 = vpop.f32.mrf.mxu2  ;;  %v8722_v38 = vadd.f32 %v8682_v43, %v19556_v56  ;;  %8831 = vmatpush.bf16.msra.mxu0 %v8796_v54  ;;  %v12721_v56 = vld [vmem:[%s20375_s6] sm:$0xf]  ;;  %v14010_v54 = vld [vmem:[%s20376_s7 + $0x28] sm:$0xff] }
 0xa87   : > { %v8522_v22 = vadd.f32 %v8488_v34, %v19467_v10  ;;  %v14002_v10 = vld [vmem:[%s20375_s6 + $0x4] sm:$0xf0] }
 0xa88   : > { %v12722_v52 = vor.u32 %v14002_v10, %v12721_v56  ;;  %v8751_v32 = vadd.f32 %v19561_v47, %v8722_v38  ;;  %v14018_v43 = vld [vmem:[%s20376_s7 + $0x68] sm:$0xff]  ;;  %v14036_v10 = vld [vmem:[%s20376_s7 + $0xf8] sm:$0xff] }
 0xa89   : > { %v14026_v34 = vld [vmem:[%s20376_s7 + $0xa8] sm:$0xff] }
 0xa8a   : > { %8832 = vmatpush.bf16.msra.mxu0 %v8795_v7  ;;  %v12723_v56 = vld [vmem:[%s20375_s6 + $0x8] sm:$0xf0] }
 0xa8d   : > { %v8684_v31 = vpop.f32.mrf.mxu3 }
 0xa8e   : > { %v8490_v24 = vpop.f32.mrf.mxu2  ;;  %v8723_v13 = vadd.f32 %v8684_v31, %v8519_v45  ;;  %8833 = vmatpush.bf16.msra.mxu0 %v8794_v4  ;;  %v14017_v31 = vld [vmem:[%s20376_s7 + $0x60] sm:$0xff] }
 0xa8f   : > { %v8523_v50 = vadd.f32 %v8490_v24, %v19473_v57  ;;  %v14025_v24 = vld [vmem:[%s20376_s7 + $0xa0] sm:$0xff] }
 0xa90   : > { %v8752_v15 = vadd.f32 %v19561_v47, %v8723_v13 }
 0xa92   : > { %8834 = vmatpush.bf16.msra.mxu0 %v8793_v51  ;;  %v8777_v46 = vmax.f32 %v8752_v15, 0.0  ;;  %v14051_v15 = vld [vmem:[%s20376_s7 + $0x170] sm:$0xff] }
 0xa95   : > { %v8687_v9 = vpop.f32.mrf.mxu3 }
 0xa96   : > { %v8493_v36 = vpop.f32.mrf.mxu2  ;;  %8835 = vmatpush.bf16.msra.mxu0 %v8792_v59  ;;  %v8724_v7 = vadd.f32 %v8687_v9, %v8520_v48 }
 0xa97   : > { %v8524_v59 = vadd.f32 %v8493_v36, %v19482_v14  ;;  %v14020_v14 = vld [vmem:[%s20376_s7 + $0x78] sm:$0xff] }
 0xa98   : > { %v8753_v57 = vadd.f32 %v19561_v47, %v8724_v7  ;;  %8960 = vmatpush.bf16.msrb.mxu1 %v14020_v14  ;;  %v14008_v36 = vld [vmem:[%s20376_s7 + $0x18] sm:$0xff] }
 0xa99   : > { %v14016_v7 = vld [vmem:[%s20376_s7 + $0x58] sm:$0xff] }
 0xa9a   : > { %8836 = vmatpush.bf16.msra.mxu0 %v8791_v44  ;;  %v8778_v53 = vmax.f32 %v8753_v57, 0.0  ;;  %v8776_v44 = vmax.f32 %v8751_v32, 0.0  ;;  %v14052_v57 = vld [vmem:[%s20376_s7 + $0x178] sm:$0xff] }
 0xa9b   : > { %v14044_v32 = vld [vmem:[%s20376_s7 + $0x138] sm:$0xff] }
 0xa9c   : > { %v8797_v17 = vpack.c.bf16 %v8777_v46, %v8776_v44  ;;  %8961 = vmatpush.bf16.msrb.mxu1 %v14019_v27  ;;  %v14050_v46 = vld [vmem:[%s20376_s7 + $0x168] sm:$0xff]  ;;  %v14059_v44 = vld [vmem:[%s20376_s7 + $0x1b0] sm:$0xff]  ;;  %v14040_v14 = vld [vmem:[%s20376_s7 + $0x118] sm:$0xff] }
 0xa9d   : > { %v8689_v60 = vpop.f32.mrf.mxu3  ;;  %v14064_v27 = vld [vmem:[%s20376_s7 + $0x1d8] sm:$0xff] }
 0xa9e   : > { %v8495_v1 = vpop.f32.mrf.mxu2  ;;  %8837 = vmatpush.bf16.msra.mxu0 %v8790_v6  ;;  %v8725_v41 = vadd.f32 %v8689_v60, %v8521_v28  ;;  %v14012_v28 = vld [vmem:[%s20376_s7 + $0x38] sm:$0xff]  ;;  %v14027_v6 = vld [vmem:[%s20376_s7 + $0xb0] sm:$0xff] }
 0xa9f   : > { %v8525_v29 = vadd.f32 %v8495_v1, %v19489_v30  ;;  %v14028_v30 = vld [vmem:[%s20376_s7 + $0xb8] sm:$0xff]  ;;  %9021 = vmatpush.bf16.msrb.mxu2 %v14012_v28  ;;  %v14007_v60 = vld [vmem:[%s20376_s7 + $0x10] sm:$0xff]  ;;  %v14001_v1 = vld [vmem:[%s20375_s6 + $0x4] sm:$0xf] }
 0xaa0   : > { %v8754_v8 = vadd.f32 %v19561_v47, %v8725_v41  ;;  %9100 = vmatpush.bf16.msrb.mxu3 %v14028_v30  ;;  %8962 = vmatpush.bf16.msrb.mxu1 %v14018_v43  ;;  %v14003_v41 = vld [vmem:[%s20375_s6 + $0x14] sm:$0xf]  ;;  %v14065_v28 = vld [vmem:[%s20376_s7 + $0x1e0] sm:$0xff]  ;;  %v14056_v30 = vld [vmem:[%s20376_s7 + $0x198] sm:$0xff] }
 0xaa1   : > { %v14054_v43 = vld [vmem:[%s20376_s7 + $0x188] sm:$0xff] }
 0xaa2   : > { %8838 = vmatpush.bf16.msra.mxu0 %v8789_v63  ;;  %v8779_v39 = vmax.f32 %v8754_v8, 0.0  ;;  %v14015_v8 = vld [vmem:[%s20376_s7 + $0x50] sm:$0xff] }
 0xaa3   : > { %9022 = vmatpush.bf16.msrb.mxu2 %v14011_v16  ;;  %v14046_v16 = vld [vmem:[%s20376_s7 + $0x148] sm:$0xff] }
 0xaa4   : > { %v8798_v42 = vpack.c.bf16 %v8779_v39, %v8778_v53  ;;  %9101 = vmatpush.bf16.msrb.mxu3 %v14027_v6  ;;  %8963 = vmatpush.bf16.msrb.mxu1 %v14017_v31  ;;  %v14013_v39 = vld [vmem:[%s20376_s7 + $0x40] sm:$0xff]  ;;  %v14060_v53 = vld [vmem:[%s20376_s7 + $0x1b8] sm:$0xff]  ;;  %v14055_v6 = vld [vmem:[%s20376_s7 + $0x190] sm:$0xff] }
 0xaa5   : > { %v8692_v45 = vpop.f32.mrf.mxu3  ;;  %8839 = vmatmul.bf16.vlgmr.msra.gmra.mxu0 %v12722_v52  ;;  %v12726_v52 = vor.u32 %v14001_v1, %v12723_v56  ;;  %v14061_v31 = vld [vmem:[%s20376_s7 + $0x1c0] sm:$0xff]  ;;  %v14083_v56 = vld [vmem:[%s20376_s7 + $0x270] sm:$0xff] }
 0xaa6   : > { %v8498_v4 = vpop.f32.mrf.mxu2  ;;  %v8726_v51 = vadd.f32 %v8692_v45, %v8522_v22  ;;  %v14035_v45 = vld [vmem:[%s20376_s7 + $0xf0] sm:$0xff] }
 0xaa7   : > { %v8526_v33 = vadd.f32 %v8498_v4, %v19496_v61  ;;  %9023 = vmatpush.bf16.msrb.mxu2 %v14010_v54  ;;  %v14034_v4 = vld [vmem:[%s20376_s7 + $0xe8] sm:$0xff] }
 0xaa8   : > { %v8755_v40 = vadd.f32 %v19561_v47, %v8726_v51  ;;  %9102 = vmatpush.bf16.msrb.mxu3 %v14026_v34  ;;  %v14033_v51 = vld [vmem:[%s20376_s7 + $0xe0] sm:$0xff]  ;;  %8964 = vmatpush.bf16.msrb.mxu1 %v14016_v7  ;;  %v14038_v54 = vld [vmem:[%s20376_s7 + $0x108] sm:$0xff] }
 0xaaa   : > { %v8780_v20 = vmax.f32 %v8755_v40, 0.0  ;;  %v14006_v40 = vld [vmem:[%s20376_s7 + $0x8] sm:$0xff] }
 0xaac   : > { %9103 = vmatpush.bf16.msrb.mxu3 %v14025_v24  ;;  %8965 = vmatpush.bf16.msrb.mxu1 %v14015_v8  ;;  %v14074_v8 = vld [vmem:[%s20376_s7 + $0x228] sm:$0xff] }
 0xaad   : > { %v8694_v58 = vpop.f32.mrf.mxu3 }
 0xaae   : > { %v8500_v37 = vpop.f32.mrf.mxu2  ;;  %v8727_v49 = vadd.f32 %v8694_v58, %v8523_v50  ;;  %v12731_v50 = vld [vmem:[%s20375_s6 + $0x18] sm:$0x10] }
 0xaaf   : > { %v12734_v58 = vor.u32 %v14003_v41, %v12731_v50  ;;  %v14024_v37 = vld [vmem:[%s20376_s7 + $0x98] sm:$0xff]  ;;  %v14082_v41 = vld [vmem:[%s20376_s7 + $0x268] sm:$0xff] }
 0xab0   : > { %v8756_v11 = vadd.f32 %v19561_v47, %v8727_v49  ;;  %v14032_v49 = vld [vmem:[%s20376_s7 + $0xd8] sm:$0xff]  ;;  %9104 = vmatpush.bf16.msrb.mxu3 %v14024_v37  ;;  %v14091_v37 = vld [vmem:[%s20376_s7 + $0x2b0] sm:$0xff] }
 0xab1   : > { %v14100_v50 = vld [vmem:[%s20376_s7 + $0x2f8] sm:$0xff] }
 0xab2   : > { %v8781_v48 = vmax.f32 %v8756_v11, 0.0  ;;  %v14031_v11 = vld [vmem:[%s20376_s7 + $0xd0] sm:$0xff] }
 0xab4   : > { %v8799_v25 = vpack.c.bf16 %v8781_v48, %v8780_v20  ;;  %9105 = vmatpush.bf16.msrb.mxu3 %v14023_v2  ;;  %v14022_v20 = vld [vmem:[%s20376_s7 + $0x88] sm:$0xff] }
 0xab5   : > { %v8697_v5 = vpop.f32.mrf.mxu3  ;;  %8844 = vmatmul.bf16.gmra.mxu0 %v12730_v35  ;;  %v14014_v35 = vld [vmem:[%s20376_s7 + $0x48] sm:$0xff] }
 0xab6   : > { %v8728_v21 = vadd.f32 %v8697_v5, %v8524_v59  ;;  %v14030_v48 = vld [vmem:[%s20376_s7 + $0xc8] sm:$0xff]  ;;  %8966 = vmatpush.bf16.msrb.mxu1 %v14014_v35  ;;  %v14029_v5 = vld [vmem:[%s20376_s7 + $0xc0] sm:$0xff]  ;;  %v14043_v59 = vld [vmem:[%s20376_s7 + $0x130] sm:$0xff] }
 0xab7   : > { %v14090_v2 = vld [vmem:[%s20376_s7 + $0x2a8] sm:$0xff] }
 0xab8   : > { %v8757_v19 = vadd.f32 %v19561_v47, %v8728_v21  ;;  %9106 = vmatpush.bf16.msrb.mxu3 %v14022_v20  ;;  %v14049_v21 = vld [vmem:[%s20376_s7 + $0x160] sm:$0xff] }
 0xab9   : > { %v14073_v20 = vld [vmem:[%s20376_s7 + $0x220] sm:$0xff] }
 0xaba   : > { %v8782_v55 = vmax.f32 %v8757_v19, 0.0  ;;  %8967 = vmatpush.bf16.msrb.mxu1 %v14013_v39  ;;  %v14048_v19 = vld [vmem:[%s20376_s7 + $0x158] sm:$0xff]  ;;  %v14079_v39 = vld [vmem:[%s20376_s7 + $0x250] sm:$0xff] }
 0xabd   : > { %v8699_v18 = vpop.f32.mrf.mxu3 }
 0xabe   : > { %v8729_v23 = vadd.f32 %v8699_v18, %v8525_v29  ;;  %9260 = vmatpush.bf16.msra.mxu1 %v14044_v32  ;;  %v14042_v29 = vld [vmem:[%s20376_s7 + $0x128] sm:$0xff] }
 0xabf   : > { %v14058_v18 = vld [vmem:[%s20376_s7 + $0x1a8] sm:$0xff] }
 0xac0   : > { %v8758_v12 = vadd.f32 %v19561_v47, %v8729_v23  ;;  %v14066_v23 = vld [vmem:[%s20376_s7 + $0x1e8] sm:$0xff] }
 0xac2   : > { %v8783_v26 = vmax.f32 %v8758_v12, 0.0  ;;  %9261 = vmatpush.bf16.msra.mxu1 %v14043_v59  ;;  %v14041_v12 = vld [vmem:[%s20376_s7 + $0x120] sm:$0xff]  ;;  %v14078_v59 = vld [vmem:[%s20376_s7 + $0x248] sm:$0xff] }
 0xac4   : > { %v8800_v62 = vpack.c.bf16 %v8783_v26, %v8782_v55  ;;  %v14057_v55 = vld [vmem:[%s20376_s7 + $0x1a0] sm:$0xff]  ;;  %v14047_v26 = vld [vmem:[%s20376_s7 + $0x150] sm:$0xff] }
 0xac5   : > { %v8702_v3 = vpop.f32.mrf.mxu3 }
 0xac6   : > { %v8730_v63 = vadd.f32 %v8702_v3, %v8526_v33  ;;  %9262 = vmatpush.bf16.msra.mxu1 %v14042_v29  ;;  %v14039_v3 = vld [vmem:[%s20376_s7 + $0x110] sm:$0xff] }
 0xac7   : > { %v14071_v29 = vld [vmem:[%s20376_s7 + $0x210] sm:$0xff] }
 0xac8   : > { %v8759_v61 = vadd.f32 %v19561_v47, %v8730_v63  ;;  %v14009_v47 = vld [vmem:[%s20376_s7 + $0x20] sm:$0xff] }
 0xac9   : > { %9024 = vmatpush.bf16.msrb.mxu2 %v14009_v47  ;;  %v14045_v63 = vld [vmem:[%s20376_s7 + $0x140] sm:$0xff] }
 0xaca   : > { %v8784_v38 = vmax.f32 %v8759_v61, 0.0  ;;  %9263 = vmatpush.bf16.msra.mxu1 %v14041_v12  ;;  %v14063_v61 = vld [vmem:[%s20376_s7 + $0x1d0] sm:$0xff]  ;;  %v14053_v47 = vld [vmem:[%s20376_s7 + $0x180] sm:$0xff]  ;;  %v14116_v12 = vld [vmem:[%s20376_s7 + $0x378] sm:$0xff] }
 0xacc   : > { %v8801_v22 = vpack.c.bf16 %v8784_v38, %v8784_v38  ;;  %v14062_v38 = vld [vmem:[%s20376_s7 + $0x1c8] sm:$0xff] }
 0xacd   : > { %v8704_v13 = vpop.f32.mrf.mxu3  ;;  %9025 = vmatpush.bf16.msrb.mxu2 %v14008_v36  ;;  %v14084_v36 = vld [vmem:[%s20376_s7 + $0x278] sm:$0xff] }
 0xace   : > { %v8829_v9 = vsel %vm8827_vm8, %v8801_v22, 0  ;;  %9264 = vmatpush.bf16.msra.mxu1 %v14040_v14  ;;  %v14037_v22 = vld [vmem:[%s20376_s7 + $0x100] sm:$0xff]  ;;  %v14094_v14 = vld [vmem:[%s20376_s7 + $0x2c8] sm:$0xff] }
 0xacf   : > { %8853 = vmatpush.bf16.msrb.mxu0 %v8829_v9 }
 0xad1   : > { %9026 = vmatpush.bf16.msrb.mxu2 %v14007_v60 }
 0xad2   : > { %9265 = vmatpush.bf16.msra.mxu1 %v14039_v3  ;;  %v14124_v3 = vld [vmem:[%s20376_s7 + $0x3b8] sm:$0xff] }
 0xad3   : > { %8854 = vmatpush.bf16.msrb.mxu0 %v8800_v62 }
 0xad5   : > { %9027 = vmatpush.bf16.msrb.mxu2 %v14006_v40  ;;  %v14081_v40 = vld [vmem:[%s20376_s7 + $0x260] sm:$0xff] }
 0xad6   : > { %9266 = vmatpush.bf16.msra.mxu1 %v14038_v54  ;;  %v14107_v54 = vld [vmem:[%s20376_s7 + $0x330] sm:$0xff] }
 0xad7   : > { %8855 = vmatpush.bf16.msrb.mxu0 %v8799_v25  ;;  %v14021_v25 = vld [vmem:[%s20376_s7 + $0x80] sm:$0xff] }
 0xad8   : > { %9107 = vmatpush.bf16.msrb.mxu3 %v14021_v25  ;;  %v14097_v25 = vld [vmem:[%s20376_s7 + $0x2e0] sm:$0xff] }
 0xad9   : > { %9028 = vmatpush.bf16.msrb.mxu2 %v14005_v0  ;;  %v14080_v0 = vld [vmem:[%s20376_s7 + $0x258] sm:$0xff] }
 0xada   : > { %9267 = vmatpush.bf16.msra.mxu1 %v14037_v22  ;;  %v14113_v22 = vld [vmem:[%s20376_s7 + $0x360] sm:$0xff] }
 0xadb   : > { %8856 = vmatpush.bf16.msrb.mxu0 %v8798_v42  ;;  %v14068_v42 = vld [vmem:[%s20376_s7 + $0x1f8] sm:$0xff] }
 0xadc   : > { %9420 = vmatpush.bf16.msra.mxu3 %v14060_v53  ;;  %v14072_v53 = vld [vmem:[%s20376_s7 + $0x218] sm:$0xff] }
 0xadd   : > { %9340 = vmatpush.bf16.msra.mxu2 %v14052_v57 }
 0xadf   : > { %8857 = vmatpush.bf16.msrb.mxu0 %v8797_v17  ;;  %v14067_v17 = vld [vmem:[%s20376_s7 + $0x1f0] sm:$0xff] }
 0xae0   : > { %9421 = vmatpush.bf16.msra.mxu3 %v14059_v44  ;;  %v14096_v44 = vld [vmem:[%s20376_s7 + $0x2d8] sm:$0xff] }
 0xae1   : > { %9341 = vmatpush.bf16.msra.mxu2 %v14051_v15 }
 0xae2   : > { %12735 = vmatmul.msk.bf16.vlgmr.msrb.gmra.mxu0 %vm8820_vm9, %v12726_v52  ;;  %v14076_v52 = vld [vmem:[%s20376_s7 + $0x238] sm:$0xff] }
 0xae3   : > { %9180 = vmatpush.bf16.msra.mxu0 %v14036_v10 }
 0xae4   : > { %9422 = vmatpush.bf16.msra.mxu3 %v14058_v18  ;;  %v14087_v18 = vld [vmem:[%s20376_s7 + $0x290] sm:$0xff] }
 0xae5   : > { %9342 = vmatpush.bf16.msra.mxu2 %v14050_v46 }
 0xae7   : > { %9181 = vmatpush.bf16.msra.mxu0 %v14035_v45  ;;  %v14092_v45 = vld [vmem:[%s20376_s7 + $0x2b8] sm:$0xff] }
 0xae8   : > { %9423 = vmatpush.bf16.msra.mxu3 %v14057_v55 }
 0xae9   : > { %9343 = vmatpush.bf16.msra.mxu2 %v14049_v21 }
 0xaeb   : > { %9182 = vmatpush.bf16.msra.mxu0 %v14034_v4 }
 0xaec   : > { %9424 = vmatpush.bf16.msra.mxu3 %v14056_v30  ;;  %v14115_v30 = vld [vmem:[%s20376_s7 + $0x370] sm:$0xff] }
 0xaed   : > { %9344 = vmatpush.bf16.msra.mxu2 %v14048_v19  ;;  %v14077_v19 = vld [vmem:[%s20376_s7 + $0x240] sm:$0xff] }
 0xaef   : > { %9183 = vmatpush.bf16.msra.mxu0 %v14033_v51 }
 0xaf0   : > { %9425 = vmatpush.bf16.msra.mxu3 %v14055_v6  ;;  %v14093_v6 = vld [vmem:[%s20376_s7 + $0x2c0] sm:$0xff] }
 0xaf1   : > { %9345 = vmatpush.bf16.msra.mxu2 %v14047_v26  ;;  %v14070_v26 = vld [vmem:[%s20376_s7 + $0x208] sm:$0xff] }
 0xaf2   : > { %12736 = vmatmul.msk.bf16.gmra.mxu0 %vm8820_vm9, %v12734_v58  ;;  %v14075_v58 = vld [vmem:[%s20376_s7 + $0x230] sm:$0xff] }
 0xaf3   : > { %9184 = vmatpush.bf16.msra.mxu0 %v14032_v49  ;;  %v14099_v49 = vld [vmem:[%s20376_s7 + $0x2f0] sm:$0xff] }
 0xaf4   : > { %9426 = vmatpush.bf16.msra.mxu3 %v14054_v43  ;;  %v14123_v43 = vld [vmem:[%s20376_s7 + $0x3b0] sm:$0xff] }
 0xaf5   : > { %9346 = vmatpush.bf16.msra.mxu2 %v14046_v16  ;;  %v14085_v16 = vld [vmem:[%s20376_s7 + $0x280] sm:$0xff] }
 0xaf7   : > { %9185 = vmatpush.bf16.msra.mxu0 %v14031_v11  ;;  %v14098_v11 = vld [vmem:[%s20376_s7 + $0x2e8] sm:$0xff] }
 0xaf8   : > { %9427 = vmatpush.bf16.msra.mxu3 %v14053_v47  ;;  %v14131_v47 = vld [vmem:[%s20376_s7 + $0x3f0] sm:$0xff] }
 0xaf9   : > { %9347 = vmatpush.bf16.msra.mxu2 %v14045_v63  ;;  %v14114_v63 = vld [vmem:[%s20376_s7 + $0x368] sm:$0xff] }
 0xafb   : > { %9186 = vmatpush.bf16.msra.mxu0 %v14030_v48  ;;  %v14089_v48 = vld [vmem:[%s20376_s7 + $0x2a0] sm:$0xff] }
 0xaff   : > { %9187 = vmatpush.bf16.msra.mxu0 %v14029_v5  ;;  %v14088_v5 = vld [vmem:[%s20376_s7 + $0x298] sm:$0xff] }
 0xb03   : > { %9500 = vmatpush.bf16.msrb.mxu0 %v14068_v42 }
 0xb07   : > { %9501 = vmatpush.bf16.msrb.mxu0 %v14067_v17 }
 0xb0b   : > { %9502 = vmatpush.bf16.msrb.mxu0 %v14066_v23  ;;  %v14095_v23 = vld [vmem:[%s20376_s7 + $0x2d0] sm:$0xff] }
 0xb0f   : > { %9503 = vmatpush.bf16.msrb.mxu0 %v14065_v28  ;;  %v14086_v28 = vld [vmem:[%s20376_s7 + $0x288] sm:$0xff] }
 0xb13   : > { %9504 = vmatpush.bf16.msrb.mxu0 %v14064_v27  ;;  %v14108_v27 = vld [vmem:[%s20376_s7 + $0x338] sm:$0xff] }
 0xb17   : > { %9505 = vmatpush.bf16.msrb.mxu0 %v14063_v61  ;;  %v14132_v61 = vld [vmem:[%s20376_s7 + $0x3f8] sm:$0xff] }
 0xb1b   : > { %9506 = vmatpush.bf16.msrb.mxu0 %v14062_v38 }
 0xb1f   : > { %9507 = vmatpush.bf16.msrb.mxu0 %v14061_v31 }
 0xb22   : > { %v8840_v33 = vpop.f32.mrf.mxu0 }
 0xb2a   : > { %v19803_v62 = vpop.f32.mrf.mxu0 }
 0xb32   : > { %v19829_v34 = vpop.f32.mrf.mxu0 }
 0xb3a   : > { %v19843_v24 = vpop.f32.mrf.mxu0 }
 0xb5f   : > { %v8859_v13 = vpop.f32.mrf.mxu0 }
 0xb60   : > { %v8860_v9 = vadd.f32 %v8859_v13, %v8840_v33  ;;  %v14106_v13 = vld [vmem:[%s20376_s7 + $0x328] sm:$0xff] }
 0xb62   : > { %v8869_v60 = vpack.c.bf16 %v8860_v9, %v8860_v9  ;;  %v14122_v9 = vld [vmem:[%s20376_s7 + $0x3a8] sm:$0xff] }
 0xb64   : > { %v8906_v1 = vunpack.c.l.b16 %v8869_v60  ;;  %9029 = vmatmul.bf16.vlgmr.msrb.gmra.mxu2 %v8869_v60  ;;  %v14130_v60 = vld [vmem:[%s20376_s7 + $0x3e8] sm:$0xff] }
 0xb65   : > { %9663 = vmatpush.bf16.msrb.mxu2 %v14084_v36  ;;  %v14112_v36 = vld [vmem:[%s20376_s7 + $0x358] sm:$0xff] }
 0xb66   : > { %v8907_v10 = vpack.c.b16 %v8906_v1, %v8906_v1  ;;  %v14105_v1 = vld [vmem:[%s20376_s7 + $0x320] sm:$0xff] }
 0xb67   : > { %v8861_v35 = vpop.f32.mrf.mxu0 }
 0xb68   : > { %v8909_v4 = vshrl.u32 %v8907_v10, 16  ;;  %v9050_v51 = vrot.slane %v8907_v10, 1  ;;  %v8862_v15 = vadd.f32 %v8861_v35, %v19803_v62  ;;  %v9210_v46 = vrot.slane %v8907_v10, 2  ;;  %v14069_v62 = vld [vmem:[%s20376_s7 + $0x200] sm:$0xff] }
 0xb69   : > { %9664 = vmatpush.bf16.msrb.mxu2 %v14083_v56  ;;  %v9370_v42 = vrot.slane %v8907_v10, 3  ;;  %v14121_v56 = vld [vmem:[%s20376_s7 + $0x3a0] sm:$0xff]  ;;  %v14111_v10 = vld [vmem:[%s20376_s7 + $0x350] sm:$0xff] }
 0xb6a   : > { %8968 = vmatmul.bf16.vlgmr.msrb.gmra.mxu1 %v8909_v4  ;;  %9108 = vmatmul.bf16.vlgmr.msrb.gmra.mxu3 %v9050_v51  ;;  %v9130_v7 = vrot.slane %v8909_v4, 1  ;;  %v9290_v57 = vrot.slane %v8909_v4, 2  ;;  %v8870_v32 = vpack.c.bf16 %v8862_v15, %v8862_v15  ;;  %v9450_v21 = vrot.slane %v8909_v4, 3  ;;  %v14120_v4 = vld [vmem:[%s20376_s7 + $0x398] sm:$0xff]  ;;  %v14110_v51 = vld [vmem:[%s20376_s7 + $0x348] sm:$0xff]  ;;  %v14117_v35 = vld [vmem:[%s20376_s7 + $0x380] sm:$0xff] }
 0xb6b   : > { %9578 = vmatpush.bf16.msrb.mxu1 %v14076_v52  ;;  %9743 = vmatpush.bf16.msrb.mxu3 %v14092_v45  ;;  %v14129_v52 = vld [vmem:[%s20376_s7 + $0x3e0] sm:$0xff]  ;;  %v14104_v45 = vld [vmem:[%s20376_s7 + $0x318] sm:$0xff] }
 0xb6c   : > { %9188 = vmatmul.bf16.vlgmr.msra.gmra.mxu0 %v9130_v7  ;;  %v9609_v17 = vunpack.c.l.b16 %v8870_v32  ;;  %v14119_v7 = vld [vmem:[%s20376_s7 + $0x390] sm:$0xff]  ;;  %v14125_v15 = vld [vmem:[%s20376_s7 + $0x3c0] sm:$0xff] }
 0xb6d   : > { %9665 = vmatpush.bf16.msrb.mxu2 %v14082_v41  ;;  %9823 = vmatpush.bf16.msra.mxu0 %v14100_v50  ;;  %v14128_v41 = vld [vmem:[%s20376_s7 + $0x3d8] sm:$0xff]  ;;  %v14103_v50 = vld [vmem:[%s20376_s7 + $0x310] sm:$0xff] }
 0xb6e   : > { %v19927_v55 = vpack.c.b16 %v9609_v17, %v9609_v17  ;;  %v14154_v17 = vld [vmem:[%s20376_s7 + $0x4a8] sm:$0xff] }
 0xb6f   : > { %9579 = vmatpush.bf16.msrb.mxu1 %v14075_v58  ;;  %9744 = vmatpush.bf16.msrb.mxu3 %v14091_v37  ;;  %v14109_v58 = vld [vmem:[%s20376_s7 + $0x340] sm:$0xff]  ;;  %v14127_v37 = vld [vmem:[%s20376_s7 + $0x3d0] sm:$0xff] }
 0xb70   : > { %v19942_v33 = vshrl.u32 %v19927_v55, 16  ;;  %v9693_v38 = vrot.slane %v19927_v55, 1 }
 0xb71   : > { %9666 = vmatpush.bf16.msrb.mxu2 %v14081_v40  ;;  %9824 = vmatpush.bf16.msra.mxu0 %v14099_v49  ;;  %v14148_v40 = vld [vmem:[%s20376_s7 + $0x478] sm:$0xff]  ;;  %v14102_v49 = vld [vmem:[%s20376_s7 + $0x308] sm:$0xff] }
 0xb72   : > { %v9773_v31 = vrot.slane %v19942_v33, 1 }
 0xb73   : > { %9580 = vmatpush.bf16.msrb.mxu1 %v14074_v8  ;;  %9745 = vmatpush.bf16.msrb.mxu3 %v14090_v2  ;;  %v14118_v8 = vld [vmem:[%s20376_s7 + $0x388] sm:$0xff] }
 0xb74   : > { %9348 = vmatmul.bf16.vlgmr.msra.gmra.mxu2 %v9290_v57  ;;  %v14126_v2 = vld [vmem:[%s20376_s7 + $0x3c8] sm:$0xff]  ;;  %v14101_v57 = vld [vmem:[%s20376_s7 + $0x300] sm:$0xff] }
 0xb75   : > { %9667 = vmatpush.bf16.msrb.mxu2 %v14080_v0  ;;  %9825 = vmatpush.bf16.msra.mxu0 %v14098_v11  ;;  %v14147_v0 = vld [vmem:[%s20376_s7 + $0x470] sm:$0xff]  ;;  %v9933_v11 = vrot.slane %v19942_v33, 2 }
 0xb77   : > { %9581 = vmatpush.bf16.msrb.mxu1 %v14073_v20  ;;  %9746 = vmatpush.bf16.msrb.mxu3 %v14089_v48  ;;  %v14140_v20 = vld [vmem:[%s20376_s7 + $0x438] sm:$0xff] }
 0xb78   : > { %v14156_v48 = vld [vmem:[%s20376_s7 + $0x4b8] sm:$0xff] }
 0xb79   : > { %9668 = vmatpush.bf16.msrb.mxu2 %v14079_v39  ;;  %9826 = vmatpush.bf16.msra.mxu0 %v14097_v25  ;;  %v14146_v39 = vld [vmem:[%s20376_s7 + $0x468] sm:$0xff]  ;;  %v14164_v25 = vld [vmem:[%s20376_s7 + $0x4f8] sm:$0xff] }
 0xb7a   : > { %9268 = vmatmul.bf16.vlgmr.msra.gmra.mxu1 %v9210_v46  ;;  %9428 = vmatmul.bf16.vlgmr.msra.gmra.mxu3 %v9370_v42  ;;  %v10013_v46 = vrot.slane %v19927_v55, 3  ;;  %v14145_v42 = vld [vmem:[%s20376_s7 + $0x460] sm:$0xff] }
 0xb7b   : > { %9582 = vmatpush.bf16.msrb.mxu1 %v14072_v53  ;;  %9747 = vmatpush.bf16.msrb.mxu3 %v14088_v5  ;;  %v14155_v53 = vld [vmem:[%s20376_s7 + $0x4b0] sm:$0xff]  ;;  %v9853_v5 = vrot.slane %v19927_v55, 2  ;;  %v14153_v55 = vld [vmem:[%s20376_s7 + $0x4a0] sm:$0xff] }
 0xb7c   : > { %9508 = vmatmul.bf16.vlgmr.msrb.gmra.mxu0 %v9450_v21  ;;  %v14138_v21 = vld [vmem:[%s20376_s7 + $0x428] sm:$0xff] }
 0xb7d   : > { %9669 = vmatpush.bf16.msrb.mxu2 %v14078_v59  ;;  %9827 = vmatpush.bf16.msra.mxu0 %v14096_v44  ;;  %v14163_v59 = vld [vmem:[%s20376_s7 + $0x4f0] sm:$0xff]  ;;  %v10093_v44 = vrot.slane %v19942_v33, 3 }
 0xb7f   : > { %9583 = vmatpush.bf16.msrb.mxu1 %v14071_v29  ;;  %9748 = vmatpush.bf16.msrb.mxu3 %v14087_v18  ;;  %v8864_v29 = vpop.f32.mrf.mxu0  ;;  %v14144_v18 = vld [vmem:[%s20376_s7 + $0x458] sm:$0xff] }
 0xb81   : > { %9670 = vmatpush.bf16.msrb.mxu2 %v14077_v19  ;;  %9828 = vmatpush.bf16.msra.mxu0 %v14095_v23  ;;  %v14162_v19 = vld [vmem:[%s20376_s7 + $0x4e8] sm:$0xff]  ;;  %v8865_v23 = vadd.f32 %v8864_v29, %v19829_v34  ;;  %v14161_v34 = vld [vmem:[%s20376_s7 + $0x4e0] sm:$0xff] }
 0xb83   : > { %9584 = vmatpush.bf16.msrb.mxu1 %v14070_v26  ;;  %9749 = vmatpush.bf16.msrb.mxu3 %v14086_v28  ;;  %v14143_v26 = vld [vmem:[%s20376_s7 + $0x450] sm:$0xff]  ;;  %v8871_v28 = vpack.c.bf16 %v8865_v23, %v8865_v23 }
 0xb84   : > { %9671 = vmatmul.bf16.vlgmr.msrb.gmra.mxu2 %v19942_v33  ;;  %v14142_v33 = vld [vmem:[%s20376_s7 + $0x448] sm:$0xff] }
 0xb85   : > { %9983 = vmatpush.bf16.msra.mxu2 %v14116_v12  ;;  %9829 = vmatpush.bf16.msra.mxu0 %v14094_v14  ;;  %v14137_v12 = vld [vmem:[%s20376_s7 + $0x420] sm:$0xff]  ;;  %v14136_v14 = vld [vmem:[%s20376_s7 + $0x418] sm:$0xff] }
 0xb87   : > { %9585 = vmatpush.bf16.msrb.mxu1 %v14069_v62  ;;  %9750 = vmatpush.bf16.msrb.mxu3 %v14085_v16  ;;  %v14160_v62 = vld [vmem:[%s20376_s7 + $0x4d8] sm:$0xff]  ;;  %v10252_v16 = vunpack.c.l.b16 %v8871_v28 }
 0xb89   : > { %9984 = vmatpush.bf16.msra.mxu2 %v14115_v30  ;;  %9830 = vmatpush.bf16.msra.mxu0 %v14093_v6  ;;  %v14152_v30 = vld [vmem:[%s20376_s7 + $0x498] sm:$0xff]  ;;  %v14141_v6 = vld [vmem:[%s20376_s7 + $0x440] sm:$0xff] }
 0xb8a   : > { %9586 = vmatmul.bf16.vlgmr.msrb.gmra.mxu1 %v8870_v32  ;;  %9751 = vmatmul.bf16.vlgmr.msrb.gmra.mxu3 %v9693_v38  ;;  %v14139_v32 = vld [vmem:[%s20376_s7 + $0x430] sm:$0xff]  ;;  %v14150_v38 = vld [vmem:[%s20376_s7 + $0x488] sm:$0xff] }
 0xb8b   : > { %9903 = vmatpush.bf16.msra.mxu1 %v14108_v27  ;;  %10063 = vmatpush.bf16.msra.mxu3 %v14124_v3  ;;  %v14135_v27 = vld [vmem:[%s20376_s7 + $0x410] sm:$0xff] }
 0xb8c   : > { %9831 = vmatmul.bf16.vlgmr.msra.gmra.mxu0 %v9773_v31  ;;  %v14151_v3 = vld [vmem:[%s20376_s7 + $0x490] sm:$0xff] }
 0xb8d   : > { %9985 = vmatpush.bf16.msra.mxu2 %v14114_v63  ;;  %10143 = vmatpush.bf16.msrb.mxu0 %v14132_v61  ;;  %v14159_v63 = vld [vmem:[%s20376_s7 + $0x4d0] sm:$0xff]  ;;  %v14180_v61 = vld [vmem:[%s20376_s7 + $0x578] sm:$0xff] }
 0xb8e   : > { %v14179_v31 = vld [vmem:[%s20376_s7 + $0x570] sm:$0xff] }
 0xb8f   : > { %9904 = vmatpush.bf16.msra.mxu1 %v14107_v54  ;;  %10064 = vmatpush.bf16.msra.mxu3 %v14123_v43  ;;  %v20132_v54 = vpack.c.b16 %v10252_v16, %v10252_v16  ;;  %v14134_v43 = vld [vmem:[%s20376_s7 + $0x408] sm:$0xff]  ;;  %v14199_v16 = vld [vmem:[%s20376_s7 + $0x610] sm:$0xff] }
 0xb91   : > { %9986 = vmatpush.bf16.msra.mxu2 %v14113_v22  ;;  %10144 = vmatpush.bf16.msrb.mxu0 %v14131_v47  ;;  %v14158_v22 = vld [vmem:[%s20376_s7 + $0x4c8] sm:$0xff]  ;;  %v20144_v47 = vshrl.u32 %v20132_v54, 16  ;;  %v10656_v29 = vrot.slane %v20132_v54, 3 }
 0xb93   : > { %9905 = vmatpush.bf16.msra.mxu1 %v14106_v13  ;;  %10065 = vmatpush.bf16.msra.mxu3 %v14122_v9  ;;  %v14133_v13 = vld [vmem:[%s20376_s7 + $0x400] sm:$0xff]  ;;  %v10736_v23 = vrot.slane %v20144_v47, 3 }
 0xb94   : > { %v14149_v9 = vld [vmem:[%s20376_s7 + $0x480] sm:$0xff] }
 0xb95   : > { %9987 = vmatpush.bf16.msra.mxu2 %v14112_v36  ;;  %10145 = vmatpush.bf16.msrb.mxu0 %v14130_v60  ;;  %v14172_v36 = vld [vmem:[%s20376_s7 + $0x538] sm:$0xff] }
 0xb96   : > { %v14188_v60 = vld [vmem:[%s20376_s7 + $0x5b8] sm:$0xff] }
 0xb97   : > { %9906 = vmatpush.bf16.msra.mxu1 %v14105_v1  ;;  %10066 = vmatpush.bf16.msra.mxu3 %v14121_v56  ;;  %v14157_v1 = vld [vmem:[%s20376_s7 + $0x4c0] sm:$0xff]  ;;  %v14178_v56 = vld [vmem:[%s20376_s7 + $0x568] sm:$0xff] }
 0xb99   : > { %9988 = vmatpush.bf16.msra.mxu2 %v14111_v10  ;;  %10146 = vmatpush.bf16.msrb.mxu0 %v14129_v52  ;;  %v14196_v10 = vld [vmem:[%s20376_s7 + $0x5f8] sm:$0xff]  ;;  %v14171_v52 = vld [vmem:[%s20376_s7 + $0x530] sm:$0xff] }
 0xb9b   : > { %9907 = vmatpush.bf16.msra.mxu1 %v14104_v45  ;;  %10067 = vmatpush.bf16.msra.mxu3 %v14120_v4  ;;  %v14187_v45 = vld [vmem:[%s20376_s7 + $0x5b0] sm:$0xff]  ;;  %v10336_v4 = vrot.slane %v20132_v54, 1 }
 0xb9d   : > { %9989 = vmatpush.bf16.msra.mxu2 %v14110_v51  ;;  %10147 = vmatpush.bf16.msrb.mxu0 %v14128_v41  ;;  %v14177_v51 = vld [vmem:[%s20376_s7 + $0x560] sm:$0xff]  ;;  %v14195_v41 = vld [vmem:[%s20376_s7 + $0x5f0] sm:$0xff] }
 0xb9f   : > { %9908 = vmatpush.bf16.msra.mxu1 %v14103_v50  ;;  %10068 = vmatpush.bf16.msra.mxu3 %v14119_v7  ;;  %v10416_v50 = vrot.slane %v20144_v47, 1  ;;  %v14170_v7 = vld [vmem:[%s20376_s7 + $0x528] sm:$0xff] }
 0xba1   : > { %9990 = vmatpush.bf16.msra.mxu2 %v14109_v58  ;;  %10148 = vmatpush.bf16.msrb.mxu0 %v14127_v37  ;;  %v14186_v58 = vld [vmem:[%s20376_s7 + $0x5a8] sm:$0xff]  ;;  %v14176_v37 = vld [vmem:[%s20376_s7 + $0x558] sm:$0xff] }
 0xba3   : > { %9909 = vmatpush.bf16.msra.mxu1 %v14102_v49  ;;  %10069 = vmatpush.bf16.msra.mxu3 %v14118_v8  ;;  %v14169_v49 = vld [vmem:[%s20376_s7 + $0x520] sm:$0xff] }
 0xba4   : > { %9991 = vmatmul.bf16.vlgmr.msra.gmra.mxu2 %v9933_v11  ;;  %v14185_v8 = vld [vmem:[%s20376_s7 + $0x5a0] sm:$0xff]  ;;  %v14168_v11 = vld [vmem:[%s20376_s7 + $0x518] sm:$0xff] }
 0xba5   : > { %10306 = vmatpush.bf16.msrb.mxu2 %v14148_v40  ;;  %10149 = vmatpush.bf16.msrb.mxu0 %v14126_v2  ;;  %v14194_v40 = vld [vmem:[%s20376_s7 + $0x5e8] sm:$0xff]  ;;  %v14175_v2 = vld [vmem:[%s20376_s7 + $0x550] sm:$0xff] }
 0xba7   : > { %9910 = vmatpush.bf16.msra.mxu1 %v14101_v57  ;;  %10070 = vmatpush.bf16.msra.mxu3 %v14117_v35  ;;  %v14184_v57 = vld [vmem:[%s20376_s7 + $0x598] sm:$0xff]  ;;  %v14174_v35 = vld [vmem:[%s20376_s7 + $0x548] sm:$0xff] }
 0xba9   : > { %10307 = vmatpush.bf16.msrb.mxu2 %v14147_v0  ;;  %10150 = vmatpush.bf16.msrb.mxu0 %v14125_v15  ;;  %v14193_v0 = vld [vmem:[%s20376_s7 + $0x5e0] sm:$0xff]  ;;  %v14183_v15 = vld [vmem:[%s20376_s7 + $0x590] sm:$0xff] }
 0xbaa   : > { %9911 = vmatmul.bf16.vlgmr.msra.gmra.mxu1 %v9853_v5  ;;  %10071 = vmatmul.bf16.vlgmr.msra.gmra.mxu3 %v10013_v46  ;;  %v14190_v5 = vld [vmem:[%s20376_s7 + $0x5c8] sm:$0xff]  ;;  %v10576_v46 = vrot.slane %v20144_v47, 2 }
 0xbab   : > { %10221 = vmatpush.bf16.msrb.mxu1 %v14140_v20  ;;  %10386 = vmatpush.bf16.msrb.mxu3 %v14156_v48  ;;  %v14192_v20 = vld [vmem:[%s20376_s7 + $0x5d8] sm:$0xff]  ;;  %v14167_v48 = vld [vmem:[%s20376_s7 + $0x510] sm:$0xff] }
 0xbac   : > { %10151 = vmatmul.bf16.vlgmr.msrb.gmra.mxu0 %v10093_v44  ;;  %v14204_v44 = vld [vmem:[%s20376_s7 + $0x638] sm:$0xff] }
 0xbad   : > { %10308 = vmatpush.bf16.msrb.mxu2 %v14146_v39  ;;  %10466 = vmatpush.bf16.msra.mxu0 %v14164_v25  ;;  %v14173_v39 = vld [vmem:[%s20376_s7 + $0x540] sm:$0xff]  ;;  %v14191_v25 = vld [vmem:[%s20376_s7 + $0x5d0] sm:$0xff] }
 0xbaf   : > { %10222 = vmatpush.bf16.msrb.mxu1 %v14139_v32  ;;  %10387 = vmatpush.bf16.msrb.mxu3 %v14155_v53  ;;  %v14166_v32 = vld [vmem:[%s20376_s7 + $0x508] sm:$0xff] }
 0xbb0   : > { %v14182_v53 = vld [vmem:[%s20376_s7 + $0x588] sm:$0xff] }
 0xbb1   : > { %10309 = vmatpush.bf16.msrb.mxu2 %v14145_v42  ;;  %10467 = vmatpush.bf16.msra.mxu0 %v14163_v59  ;;  %v14165_v42 = vld [vmem:[%s20376_s7 + $0x500] sm:$0xff] }
 0xbb2   : > { %v14181_v59 = vld [vmem:[%s20376_s7 + $0x580] sm:$0xff] }
 0xbb3   : > { %10223 = vmatpush.bf16.msrb.mxu1 %v14138_v21  ;;  %10388 = vmatpush.bf16.msrb.mxu3 %v14154_v17  ;;  %v14189_v21 = vld [vmem:[%s20376_s7 + $0x5c0] sm:$0xff]  ;;  %v10496_v17 = vrot.slane %v20132_v54, 2 }
 0xbb5   : > { %10310 = vmatpush.bf16.msrb.mxu2 %v14144_v18  ;;  %10468 = vmatpush.bf16.msra.mxu0 %v14162_v19  ;;  %v14203_v18 = vld [vmem:[%s20376_s7 + $0x630] sm:$0xff]  ;;  %v8866_v19 = vpop.f32.mrf.mxu0 }
 0xbb7   : > { %10224 = vmatpush.bf16.msrb.mxu1 %v14137_v12  ;;  %10389 = vmatpush.bf16.msrb.mxu3 %v14153_v55  ;;  %v14202_v12 = vld [vmem:[%s20376_s7 + $0x628] sm:$0xff]  ;;  %v14201_v55 = vld [vmem:[%s20376_s7 + $0x620] sm:$0xff] }
 0xbb9   : > { %10311 = vmatpush.bf16.msrb.mxu2 %v14143_v26  ;;  %10469 = vmatpush.bf16.msra.mxu0 %v14161_v34 }
 0xbbb   : > { %10225 = vmatpush.bf16.msrb.mxu1 %v14136_v14  ;;  %10390 = vmatpush.bf16.msrb.mxu3 %v14152_v30  ;;  %v14200_v30 = vld [vmem:[%s20376_s7 + $0x618] sm:$0xff] }
 0xbbd   : > { %10312 = vmatpush.bf16.msrb.mxu2 %v14142_v33  ;;  %10470 = vmatpush.bf16.msra.mxu0 %v14160_v62 }
 0xbbf   : > { %10226 = vmatpush.bf16.msrb.mxu1 %v14135_v27  ;;  %10391 = vmatpush.bf16.msrb.mxu3 %v14151_v3 }
 0xbc1   : > { %10313 = vmatpush.bf16.msrb.mxu2 %v14141_v6  ;;  %10471 = vmatpush.bf16.msra.mxu0 %v14159_v63 }
 0xbc3   : > { %10227 = vmatpush.bf16.msrb.mxu1 %v14134_v43  ;;  %10392 = vmatpush.bf16.msrb.mxu3 %v14150_v38  ;;  %v14197_v43 = vld [vmem:[%s20376_s7 + $0x600] sm:$0xff] }
 0xbc4   : > { %10314 = vmatmul.bf16.vlgmr.msrb.gmra.mxu2 %v20144_v47  ;;  %v8867_v47 = vadd.f32 %v8866_v19, %v19843_v24 }
 0xbc5   : > { %10626 = vmatpush.bf16.msra.mxu2 %v14180_v61  ;;  %10472 = vmatpush.bf16.msra.mxu0 %v14158_v22  ;;  %v14198_v61 = vld [vmem:[%s20376_s7 + $0x608] sm:$0xff] }
 0xbc7   : > { %10228 = vmatpush.bf16.msrb.mxu1 %v14133_v13  ;;  %10393 = vmatpush.bf16.msrb.mxu3 %v14149_v9 }
 0xbc9   : > { %10627 = vmatpush.bf16.msra.mxu2 %v14179_v31  ;;  %10473 = vmatpush.bf16.msra.mxu0 %v14157_v1 }
 0xbca   : > { %10229 = vmatmul.bf16.vlgmr.msrb.gmra.mxu1 %v8871_v28  ;;  %10394 = vmatmul.bf16.vlgmr.msrb.gmra.mxu3 %v10336_v4 }
 0xbcb   : > { %10546 = vmatpush.bf16.msra.mxu1 %v14172_v36  ;;  %10706 = vmatpush.bf16.msra.mxu3 %v14188_v60  ;;  %v8872_v36 = vpack.c.bf16 %v8867_v47, %v8867_v47  ;;  %v14218_v47 = vld [vmem:[%s20380_s11 + $0x28] sm:$0xff] }
 0xbcc   : > { %10474 = vmatmul.bf16.vlgmr.msra.gmra.mxu0 %v10416_v50 }
 0xbcd   : > { %10628 = vmatpush.bf16.msra.mxu2 %v14178_v56  ;;  %10786 = vmatpush.bf16.msrb.mxu0 %v14196_v10 }
 0xbcf   : > { %10547 = vmatpush.bf16.msra.mxu1 %v14171_v52  ;;  %10707 = vmatpush.bf16.msra.mxu3 %v14187_v45 }
 0xbd1   : > { %10629 = vmatpush.bf16.msra.mxu2 %v14177_v51  ;;  %10787 = vmatpush.bf16.msrb.mxu0 %v14195_v41 }
 0xbd3   : > { %10548 = vmatpush.bf16.msra.mxu1 %v14170_v7  ;;  %10708 = vmatpush.bf16.msra.mxu3 %v14186_v58 }
 0xbd5   : > { %10630 = vmatpush.bf16.msra.mxu2 %v14176_v37  ;;  %10788 = vmatpush.bf16.msrb.mxu0 %v14194_v40 }
 0xbd7   : > { %10549 = vmatpush.bf16.msra.mxu1 %v14169_v49  ;;  %10709 = vmatpush.bf16.msra.mxu3 %v14185_v8 }
 0xbd9   : > { %10631 = vmatpush.bf16.msra.mxu2 %v14175_v2  ;;  %10789 = vmatpush.bf16.msrb.mxu0 %v14193_v0 }
 0xbdb   : > { %10550 = vmatpush.bf16.msra.mxu1 %v14168_v11  ;;  %10710 = vmatpush.bf16.msra.mxu3 %v14184_v57 }
 0xbdd   : > { %10632 = vmatpush.bf16.msra.mxu2 %v14174_v35  ;;  %10790 = vmatpush.bf16.msrb.mxu0 %v14192_v20 }
 0xbdf   : > { %10551 = vmatpush.bf16.msra.mxu1 %v14167_v48  ;;  %10711 = vmatpush.bf16.msra.mxu3 %v14183_v15 }
 0xbe1   : > { %10633 = vmatpush.bf16.msra.mxu2 %v14173_v39  ;;  %10791 = vmatpush.bf16.msrb.mxu0 %v14191_v25 }
 0xbe3   : > { %10552 = vmatpush.bf16.msra.mxu1 %v14166_v32  ;;  %10712 = vmatpush.bf16.msra.mxu3 %v14182_v53 }
 0xbe4   : > { %10634 = vmatmul.bf16.vlgmr.msra.gmra.mxu2 %v10576_v46 }
 0xbe5   : > { %10792 = vmatpush.bf16.msrb.mxu0 %v14190_v5 }
 0xbe7   : > { %10553 = vmatpush.bf16.msra.mxu1 %v14165_v42  ;;  %10713 = vmatpush.bf16.msra.mxu3 %v14181_v59  ;;  %v8969_v26 = vpop.f32.mrf.mxu1  ;;  %v9030_v34 = vpop.f32.mrf.mxu2 }
 0xbe8   : > { %v9031_v28 = vadd.f32 %v9030_v34, %v8969_v26  ;;  %v14208_v34 = vld [vmem:[%s20378_s9 + $0x18] sm:$0xff] }
 0xbe9   : > { %10793 = vmatpush.bf16.msrb.mxu0 %v14189_v21  ;;  %v9189_v14 = vpop.f32.mrf.mxu0  ;;  %v14212_v21 = vld [vmem:[%s20378_s9 + $0x38] sm:$0xff] }
 0xbea   : > { %10554 = vmatmul.bf16.vlgmr.msra.gmra.mxu1 %v10496_v17  ;;  %10714 = vmatmul.bf16.vlgmr.msra.gmra.mxu3 %v10656_v29  ;;  %v14211_v29 = vld [vmem:[%s20378_s9 + $0x30] sm:$0xff] }
 0xbeb   : > { %10864 = vmatpush.bf16.msrb.mxu1 %v14204_v44  ;;  %10947 = vmatpush.bf16.msrb.mxu2 %v14212_v21 }
 0xbec   : > { %10794 = vmatmul.bf16.vlgmr.msrb.gmra.mxu0 %v10736_v23 }
 0xbed   : > { %v9109_v33 = vpop.f32.mrf.mxu3 }
 0xbee   : > { %v9113_v62 = vadd.f32 %v9109_v33, %v9031_v28  ;;  %v14207_v28 = vld [vmem:[%s20378_s9 + $0x10] sm:$0xff] }
 0xbef   : > { %10865 = vmatpush.bf16.msrb.mxu1 %v14203_v18  ;;  %v8971_v27 = vpop.f32.mrf.mxu1  ;;  %v9032_v3 = vpop.f32.mrf.mxu2  ;;  %10948 = vmatpush.bf16.msrb.mxu2 %v14211_v29 }
 0xbf0   : > { %v9193_v6 = vadd.f32 %v9189_v14, %v9113_v62  ;;  %v14206_v62 = vld [vmem:[%s20378_s9 + $0x8] sm:$0xff]  ;;  %v14205_v3 = vld [vmem:[%s20378_s9] sm:$0xff] }
 0xbf1   : > { %v9191_v63 = vpop.f32.mrf.mxu0 }
 0xbf3   : > { %10866 = vmatpush.bf16.msrb.mxu1 %v14202_v12  ;;  %v14210_v12 = vld [vmem:[%s20378_s9 + $0x28] sm:$0xff] }
 0xbf4   : > { %10949 = vmatpush.bf16.msrb.mxu2 %v14210_v12 }
 0xbf5   : > { %v9111_v54 = vpop.f32.mrf.mxu3 }
 0xbf6   : > { %v14219_v54 = vld [vmem:[%s20380_s11 + $0x30] sm:$0xff] }
 0xbf7   : > { %10867 = vmatpush.bf16.msrb.mxu1 %v14201_v55  ;;  %v9269_v38 = vpop.f32.mrf.mxu1  ;;  %v9349_v22 = vpop.f32.mrf.mxu2  ;;  %v14209_v55 = vld [vmem:[%s20378_s9 + $0x20] sm:$0xff] }
 0xbf8   : > { %v9273_v31 = vadd.f32 %v9269_v38, %v9193_v6  ;;  %10950 = vmatpush.bf16.msrb.mxu2 %v14209_v55  ;;  %v14220_v6 = vld [vmem:[%s20380_s11 + $0x38] sm:$0xff] }
 0xbf9   : > { %v9509_v13 = vpop.f32.mrf.mxu0  ;;  %11027 = vmatpush.bf16.msrb.mxu3 %v14220_v6 }
 0xbfa   : > { %v9353_v9 = vadd.f32 %v9349_v22, %v9273_v31 }
 0xbfb   : > { %10868 = vmatpush.bf16.msrb.mxu1 %v14200_v30 }
 0xbfc   : > { %10951 = vmatpush.bf16.msrb.mxu2 %v14208_v34 }
 0xbfd   : > { %v9429_v60 = vpop.f32.mrf.mxu3  ;;  %11028 = vmatpush.bf16.msrb.mxu3 %v14219_v54 }
 0xbfe   : > { %v9433_v1 = vadd.f32 %v9429_v60, %v9353_v9  ;;  %v14217_v9 = vld [vmem:[%s20380_s11 + $0x20] sm:$0xff]  ;;  %v14216_v60 = vld [vmem:[%s20380_s11 + $0x18] sm:$0xff] }
 0xbff   : > { %10869 = vmatpush.bf16.msrb.mxu1 %v14199_v16  ;;  %v9271_v56 = vpop.f32.mrf.mxu1  ;;  %v9351_v10 = vpop.f32.mrf.mxu2 }
 0xc00   : > { %v9513_v52 = vadd.f32 %v9509_v13, %v9433_v1  ;;  %10952 = vmatpush.bf16.msrb.mxu2 %v14207_v28  ;;  %v14215_v10 = vld [vmem:[%s20380_s11 + $0x10] sm:$0xff] }
 0xc01   : > { %v9511_v45 = vpop.f32.mrf.mxu0  ;;  %11029 = vmatpush.bf16.msrb.mxu3 %v14218_v47 }
 0xc03   : > { %10870 = vmatpush.bf16.msrb.mxu1 %v14198_v61 }
 0xc04   : > { %10953 = vmatpush.bf16.msrb.mxu2 %v14206_v62 }
 0xc05   : > { %v9431_v4 = vpop.f32.mrf.mxu3  ;;  %11030 = vmatpush.bf16.msrb.mxu3 %v14217_v9 }
 0xc06   : > { %v10878_v4 = vld [vmem:[%s20377_s8] sm:$0x1] }
 0xc07   : > { %10871 = vmatpush.bf16.msrb.mxu1 %v14197_v43  ;;  %v9672_v51 = vpop.f32.mrf.mxu2  ;;  %v9587_v41 = vpop.f32.mrf.mxu1 }
 0xc08   : > { %v9591_v50 = vadd.f32 %v9587_v41, %v9513_v52  ;;  %10954 = vmatpush.bf16.msrb.mxu2 %v14205_v3 }
 0xc09   : > { %v9832_v7 = vpop.f32.mrf.mxu0  ;;  %11031 = vmatpush.bf16.msrb.mxu3 %v14216_v60 }
 0xc0a   : > { %10872 = vmatmul.bf16.vlgmr.msrb.gmra.mxu1 %v8872_v36  ;;  %v9676_v58 = vadd.f32 %v9672_v51, %v9591_v50 }
 0xc0d   : > { %v9752_v37 = vpop.f32.mrf.mxu3  ;;  %11032 = vmatpush.bf16.msrb.mxu3 %v14215_v10 }
 0xc0e   : > { %v9756_v24 = vadd.f32 %v9752_v37, %v9676_v58  ;;  %v14214_v37 = vld [vmem:[%s20380_s11 + $0x8] sm:$0xff] }
 0xc0f   : > { %v9674_v40 = vpop.f32.mrf.mxu2  ;;  %v9589_v49 = vpop.f32.mrf.mxu1 }
 0xc10   : > { %v9836_v8 = vadd.f32 %v9832_v7, %v9756_v24  ;;  %v14213_v24 = vld [vmem:[%s20380_s11] sm:$0xff] }
 0xc11   : > { %v9834_v2 = vpop.f32.mrf.mxu0  ;;  %11033 = vmatpush.bf16.msrb.mxu3 %v14214_v37  ;;  %v10898_v40 = vld [vmem:[%s20379_s10] sm:$0x1] }
 0xc15   : > { %v9754_v0 = vpop.f32.mrf.mxu3  ;;  %11034 = vmatpush.bf16.msrb.mxu3 %v14213_v24 }
 0xc27   : > { %v9992_v11 = vpop.f32.mrf.mxu2  ;;  %v9912_v57 = vpop.f32.mrf.mxu1 }
 0xc28   : > { %v9916_v35 = vadd.f32 %v9912_v57, %v9836_v8  ;;  %v10978_v57 = vld [vmem:[%s20381_s12] sm:$0x1] }
 0xc29   : > { %v10152_v20 = vpop.f32.mrf.mxu0 }
 0xc2a   : > { %v9996_v48 = vadd.f32 %v9992_v11, %v9916_v35 }
 0xc2d   : > { %v10072_v15 = vpop.f32.mrf.mxu3 }
 0xc2e   : > { %v10076_v39 = vadd.f32 %v10072_v15, %v9996_v48 }
 0xc2f   : > { %v9994_v25 = vpop.f32.mrf.mxu2  ;;  %v9914_v32 = vpop.f32.mrf.mxu1 }
 0xc30   : > { %v10156_v53 = vadd.f32 %v10152_v20, %v10076_v39 }
 0xc31   : > { %v10154_v5 = vpop.f32.mrf.mxu0 }
 0xc35   : > { %v10074_v46 = vpop.f32.mrf.mxu3 }
 0xc47   : > { %v10315_v42 = vpop.f32.mrf.mxu2  ;;  %v10230_v59 = vpop.f32.mrf.mxu1 }
 0xc48   : > { %v10234_v16 = vadd.f32 %v10230_v59, %v10156_v53 }
 0xc49   : > { %v10475_v44 = vpop.f32.mrf.mxu0 }
 0xc4a   : > { %v10319_v43 = vadd.f32 %v10315_v42, %v10234_v16 }
 0xc4d   : > { %v10395_v17 = vpop.f32.mrf.mxu3 }
 0xc4e   : > { %v10399_v22 = vadd.f32 %v10395_v17, %v10319_v43 }
 0xc4f   : > { %v10317_v18 = vpop.f32.mrf.mxu2  ;;  %v10232_v19 = vpop.f32.mrf.mxu1 }
 0xc50   : > { %v10479_v13 = vadd.f32 %v10475_v44, %v10399_v22 }
 0xc51   : > { %v10477_v23 = vpop.f32.mrf.mxu0 }
 0xc55   : > { %v10397_v26 = vpop.f32.mrf.mxu3 }
 0xc67   : > { %v10555_v14 = vpop.f32.mrf.mxu1  ;;  %v10635_v30 = vpop.f32.mrf.mxu2 }
 0xc68   : > { %v10559_v36 = vadd.f32 %v10555_v14, %v10479_v13 }
 0xc69   : > { %v10795_v33 = vpop.f32.mrf.mxu0 }
 0xc6a   : > { %v10639_v1 = vadd.f32 %v10635_v30, %v10559_v36 }
 0xc6d   : > { %v10715_v27 = vpop.f32.mrf.mxu3 }
 0xc6e   : > { %v10719_v56 = vadd.f32 %v10715_v27, %v10639_v1 }
 0xc6f   : > { %v10557_v63 = vpop.f32.mrf.mxu1  ;;  %v10637_v61 = vpop.f32.mrf.mxu2 }
 0xc70   : > { %v10799_v52 = vadd.f32 %v10795_v33, %v10719_v56 }
 0xc71   : > { %v10797_v38 = vpop.f32.mrf.mxu0 }
 0xc75   : > { %v10717_v31 = vpop.f32.mrf.mxu3 }
 0xc87   : > { %v10873_v45 = vpop.f32.mrf.mxu1 }
 0xc88   : > { %v10877_v51 = vadd.f32 %v10873_v45, %v10799_v52 }
 0xc8a   : > { %v10879_v41 = vadd.f32 %v10878_v4, %v10877_v51 }
 0xc8c   : > { %v10880_v50 = vmax.f32 %v10879_v41, 0.0 }
 0xc8e   : > { %v10881_v7 = vpack.c.bf16 %v10880_v50, %v10880_v50 }
 0xc8f   : > { %v10875_v58 = vpop.f32.mrf.mxu1 }
 0xc90   : > { %10955 = vmatmul.bf16.vlgmr.msrb.gmra.mxu2 %v10881_v7 }
 0xd13   : > { %v10956_v49 = vpop.f32.mrf.mxu2 }
 0xd14   : > { %v10957_v8 = vadd.f32 %v10956_v49, %v10898_v40 }
 0xd16   : > { %v10960_v2 = vmax.f32 %v10957_v8, 0.0 }
 0xd18   : > { %v10961_v0 = vpack.c.bf16 %v10960_v2, %v10960_v2 }
 0xd1a   : > { %11035 = vmatmul.bf16.vlgmr.msrb.gmra.mxu3 %v10961_v0 }
 0xd1b   : > { %v10958_v11 = vpop.f32.mrf.mxu2 }
 0xd9d   : > { %v11036_v35 = vpop.f32.mrf.mxu3 }
 0xd9e   : > { %v11037_v20 = vadd.f32 %v11036_v35, %v10978_v57 }
 0xda0   : > { %11040 = vst [vmem:[%s432_s24] sm:$0x1] %v11037_v20 }
 0xda1   : > { %14669 = shalt.err (!%p14666_p3)
}
 0xda2   : > { %14569 = dma.vmem_to_hbm [thread:$0]  (%p14815_p5), %s11053_s30, 16, %s11055_s15, %s11042_s16  }
 0xda5   : > { %v11038_v48 = vpop.f32.mrf.mxu3 }
 0xda6 PF: > { %p14575_p4 = scmp.ge.s32.totalorder %s14704_s28, 2  ;;  %s11066_s21 = sand.u32 1, %s14692_s25  }
 0xda7   : > { %s11067_s17 = scalar_lea.sflag [#allocation4], %s11066_s21 }
 0xda8   : > { %p14572_p7 = pnand %p14575_p4, %p14819_p6 }
 0xdaa   : > { %p14573_p8 = pneg %p14572_p7 }
 0xdac   : > { %14687 = dma.done.wait (%p14573_p8), %s11067_s17, 16  }
 0xdad   : > { %14689 = vsyncadd (%p14573_p8), %s11067_s17, 4294967280  ;;  %s21173_s28 = sld [smem:[#allocation7_spill]]  ;;  %s21176_s25 = smov %s14696_s26 }
 0xdae   : > { %s21174_s0 = sld [smem:[#allocation6_spill]] }
 0xdaf   : > { %s21175_s27 = sld [smem:[#allocation8_spill]] }
 0xdb3   : > { %p23_p9 = scmp.ge.s32.totalorder %s21173_s28, 4  }
 0xdb4   : > { %s21177_s26 = smov %s21174_s0 }
 0xdb5   :  { %25 = sbr.rel (!%p23_p9) target bundleno = 5 (0x5), region = 107 }
 0xdba   :  { %11072 = vsyncpa [#allocation4], 1 }
 0xdbb   :  { %11074 = vsyncpa [#allocation4 + $0x1], 1 }

</bundles_post_ra>
